<compile_context>
chip_gen: v7x
topology: tpu7x:2x2x1
jax: 0.10.0
libtpu: 0.0.40
codegen_flags: <defaults>
</compile_context>

<pallas_src>
import functools

import jax
import jax.numpy as jnp
import numpy as np
from jax.experimental import pallas as pl
from jax.experimental.pallas import tpu as pltpu

EPS = 1e-5  # nn.BatchNorm2d default eps


# --------------------------------------------------------------------------
# ConvTranspose2d(kernel=1, stride=2, padding=p) geometry (static ints).
# out[2*i - p] = value[i]  for lo <= i <= hi; every other position is zero.
# --------------------------------------------------------------------------
def _up_len(length, p):
    return 2 * length - 1 - 2 * p


def _valid_range(length, p):
    lo = (p + 1) // 2
    hi = (2 * length - 2 - p) // 2
    return lo, hi


def _pick_tile(hw, cap=2048):
    """Largest multiple of 128 that divides hw (capped); else the full hw."""
    if hw % 128 != 0:
        return hw
    best = 128
    for k in range(1, cap // 128 + 1):
        cand = 128 * k
        if hw % cand == 0:
            best = cand
    return best


def _smem_spec():
    return pl.BlockSpec(memory_space=pltpu.MemorySpace.SMEM)


# --------------------------------------------------------------------------
# Pallas call 1: phased reduction producing the BN1 / BN2 batch-stat sums.
#   phase 0: sums / sum-of-squares of the layer-1 channel mix (masked to the
#            positions that survive the first stride-2 scatter).
#   phase 1: sums / sum-of-squares of BN1+ReLU+layer-2 mix (masked to the
#            positions that survive both scatters).
# Channel mixes are unrolled scalar(SMEM) x vector broadcast-FMAs on the VPU.
# --------------------------------------------------------------------------
def _stats_kernel(mask1_ref, maskA_ref, x_ref,
                  w1a_ref, w1b_ref, w2a_ref, w2b_ref,
                  g1a_ref, b1a_ref, g1b_ref, b1b_ref,
                  sums1_ref, sums2_ref,
                  s1a, q1a, s1b, q1b, s2a, q2a, s2b, q2b,
                  *, cin, cout, inv_count1):
    phase = pl.program_id(0)
    n = pl.program_id(1)
    t = pl.program_id(2)

    x = x_ref[...]                                      # (cin, T)
    xr = [x[c:c + 1, :] for c in range(cin)]

    def mix(w_ref, rows, n_in, n_out):
        return [sum(w_ref[c, d] * rows[c] for c in range(n_in))
                for d in range(n_out)]

    # ---- phase 0: layer-1 (pre-BN1) masked sums --------------------------
    @pl.when(phase == 0)
    def _():
        @pl.when((n == 0) & (t == 0))
        def _():
            for r in (s1a, q1a, s1b, q1b, s2a, q2a, s2b, q2b):
                r[...] = jnp.zeros_like(r)

        m1 = mask1_ref[...]                             # (1, T) of {0,1}
        ma = mix(w1a_ref, xr, cin, cin)
        mb = mix(w1b_ref, xr, cin, cin)
        for c in range(cin):
            va = ma[c] * m1
            vb = mb[c] * m1
            s1a[c:c + 1, :] += jnp.sum(va, axis=1, keepdims=True)
            q1a[c:c + 1, :] += jnp.sum(va * ma[c], axis=1, keepdims=True)
            s1b[c:c + 1, :] += jnp.sum(vb, axis=1, keepdims=True)
            q1b[c:c + 1, :] += jnp.sum(vb * mb[c], axis=1, keepdims=True)

    # ---- phase 1: layer-2 (pre-BN2) masked sums --------------------------
    @pl.when(phase == 1)
    def _():
        mA = maskA_ref[...]

        def branch(w1_ref, w2_ref, g1_ref, b1_ref, s1, q1, s2, q2):
            m = mix(w1_ref, xr, cin, cin)
            act = []
            for c in range(cin):
                mean_c = s1[c:c + 1, :] * inv_count1
                var_c = q1[c:c + 1, :] * inv_count1 - mean_c * mean_c
                k_c = g1_ref[c] * jax.lax.rsqrt(var_c + EPS)
                t_c = b1_ref[c] - mean_c * k_c
                act.append(jnp.maximum(m[c] * k_c + t_c, 0.0))
            z = mix(w2_ref, act, cin, cout)
            for d in range(cout):
                zm = z[d] * mA
                s2[d:d + 1, :] += jnp.sum(zm, axis=1, keepdims=True)
                q2[d:d + 1, :] += jnp.sum(zm * z[d], axis=1, keepdims=True)

        branch(w1a_ref, w2a_ref, g1a_ref, b1a_ref, s1a, q1a, s2a, q2a)
        branch(w1b_ref, w2b_ref, g1b_ref, b1b_ref, s1b, q1b, s2b, q2b)

    # Keep a running copy in the (block-resident) outputs; the last grid step
    # leaves the complete sums, and the single final writeback lands in HBM.
    sums1_ref[:, 0:1] = s1a[...]
    sums1_ref[:, 1:2] = q1a[...]
    sums1_ref[:, 2:3] = s1b[...]
    sums1_ref[:, 3:4] = q1b[...]
    sums2_ref[:, 0:1] = s2a[...]
    sums2_ref[:, 1:2] = q2a[...]
    sums2_ref[:, 2:3] = s2b[...]
    sums2_ref[:, 3:4] = q2b[...]


def _collect_stats(x, mask1, maskA, w1a_s, w1b_s, w2a, w2b,
                   g1a, b1a, g1b, b1b, inv_count1, tile):
    n_imgs, cin, hw = x.shape
    cout = w2a.shape[1]
    n_tiles = hw // tile
    kern = functools.partial(_stats_kernel, cin=cin, cout=cout,
                             inv_count1=inv_count1)
    return pl.pallas_call(
        kern,
        grid=(2, n_imgs, n_tiles),
        in_specs=[
            pl.BlockSpec((1, tile), lambda p, n, t: (0, t)),          # mask1
            pl.BlockSpec((1, tile), lambda p, n, t: (0, t)),          # maskA
            pl.BlockSpec((None, cin, tile), lambda p, n, t: (n, 0, t)),  # x
        ] + [_smem_spec() for _ in range(8)],
        out_specs=[
            pl.BlockSpec((cin, 4), lambda p, n, t: (0, 0)),
            pl.BlockSpec((cout, 4), lambda p, n, t: (0, 0)),
        ],
        out_shape=[
            jax.ShapeDtypeStruct((cin, 4), jnp.float32),
            jax.ShapeDtypeStruct((cout, 4), jnp.float32),
        ],
        scratch_shapes=(
            [pltpu.VMEM((cin, 1), jnp.float32) for _ in range(4)]
            + [pltpu.VMEM((cout, 1), jnp.float32) for _ in range(4)]),
        compiler_params=pltpu.CompilerParams(
            dimension_semantics=("arbitrary", "arbitrary", "arbitrary")),
    )(mask1, maskA, x, w1a_s, w1b_s, w2a, w2b, g1a, b1a, g1b, b1b)


# --------------------------------------------------------------------------
# Pallas call 2: per-pixel fused  mix1 -> BN1+ReLU -> mix2 -> BN2+ReLU  for
# both branches, plus the branch add.  All BN affines are pre-folded into the
# weights/biases, so each pixel is just 2x(16+32) VPU FMAs + 2 ReLUs.
# --------------------------------------------------------------------------
def _apply_kernel(x_ref,
                  w1a_ref, w1b_ref, w2a_ref, w2b_ref,
                  t1a_ref, t1b_ref, t2a_ref, t2b_ref,
                  o_ref, *, cin, cout):
    x = x_ref[...]                                      # (cin, T)
    xr = [x[c:c + 1, :] for c in range(cin)]

    def branch(w1_ref, w2_ref, t1_ref, t2_ref):
        act = [jnp.maximum(
            sum(w1_ref[c, d] * xr[c] for c in range(cin)) + t1_ref[d], 0.0)
            for d in range(cin)]
        return [jnp.maximum(
            sum(w2_ref[c, d] * act[c] for c in range(cin)) + t2_ref[d], 0.0)
            for d in range(cout)]

    oa = branch(w1a_ref, w2a_ref, t1a_ref, t2a_ref)
    ob = branch(w1b_ref, w2b_ref, t1b_ref, t2b_ref)
    for d in range(cout):
        o_ref[d:d + 1, :] = oa[d] + ob[d]


def _apply_block(x, w1a_eff, w1b_eff, w2a_eff, w2b_eff,
                 t1a, t1b, t2a, t2b, tile):
    n_imgs, cin, hw = x.shape
    cout = w2a_eff.shape[1]
    n_tiles = hw // tile
    kern = functools.partial(_apply_kernel, cin=cin, cout=cout)
    return pl.pallas_call(
        kern,
        grid=(n_imgs, n_tiles),
        in_specs=[pl.BlockSpec((None, cin, tile), lambda n, t: (n, 0, t))]
                 + [_smem_spec() for _ in range(8)],
        out_specs=pl.BlockSpec((None, cout, tile), lambda n, t: (n, 0, t)),
        out_shape=jax.ShapeDtypeStruct((n_imgs, cout, hw), jnp.float32),
        compiler_params=pltpu.CompilerParams(
            dimension_semantics=("parallel", "parallel")),
    )(x, w1a_eff, w1b_eff, w2a_eff, w2b_eff, t1a, t1b, t2a, t2b)


# --------------------------------------------------------------------------
# trans_combi_block forward (Pallas path)
# --------------------------------------------------------------------------
def _forward_impl(x_nchw, alpha, beta, params_a, params_b, pool1, pool2):
    w1a, g1a, b1a, w2a, g2a, b2a = params_a
    w1b, g1b, b1b, w2b, g2b, b2b = params_b
    n_imgs, cin, h, w = x_nchw.shape
    cout = w2a.shape[1]
    hw = h * w

    # ---- static geometry of the two k=1 / s=2 transposed convolutions ----
    h1, w1_ = _up_len(h, pool1), _up_len(w, pool1)
    h2, w2_ = _up_len(h1, pool2), _up_len(w1_, pool2)
    i1lo, i1hi = _valid_range(h, pool1)
    j1lo, j1hi = _valid_range(w, pool1)
    u2lo, u2hi = _valid_range(h1, pool2)
    v2lo, v2hi = _valid_range(w1_, pool2)
    # input rows/cols whose value survives BOTH scatters ("type A")
    iAlo = max(i1lo, (u2lo + pool1 + 1) // 2)
    iAhi = min(i1hi, (u2hi + pool1) // 2)
    jAlo = max(j1lo, (v2lo + pool1 + 1) // 2)
    jAhi = min(j1hi, (v2hi + pool1) // 2)
    nIA, nJA = iAhi - iAlo + 1, jAhi - jAlo + 1
    nu2, nv2 = u2hi - u2lo + 1, v2hi - v2lo + 1
    assert nIA > 0 and nJA > 0 and nu2 > 0 and nv2 > 0
    count1 = n_imgs * h1 * w1_                 # BN1 element count (with zeros)
    count2 = n_imgs * h2 * w2_                 # BN2 element count (with zeros)
    countB = n_imgs * (nu2 * nv2 - nIA * nJA)  # layer-2 grid cells fed by zeros

    # ---- masks over the compact input grid (static, built once) ----------
    ii = np.arange(h)[:, None]
    jj = np.arange(w)[None, :]
    m1 = (ii >= i1lo) & (ii <= i1hi) & (jj >= j1lo) & (jj <= j1hi)
    mA = (ii >= iAlo) & (ii <= iAhi) & (jj >= jAlo) & (jj <= jAhi)
    mask1 = jnp.asarray(m1.reshape(1, hw), jnp.float32)
    maskA = jnp.asarray(mA.reshape(1, hw), jnp.float32)

    x = x_nchw.reshape(n_imgs, cin, hw).astype(jnp.float32)
    tile = _pick_tile(hw)

    # fold 1/alpha, 1/beta into the (tiny) layer-1 weights on the wrapper side
    w1a_s = (w1a / alpha[0]).astype(jnp.float32)
    w1b_s = (w1b / beta[0]).astype(jnp.float32)

    # ---- pallas call 1: masked BN1 / BN2 sums -----------------------------
    sums1, sums2 = _collect_stats(
        x, mask1, maskA, w1a_s, w1b_s, w2a, w2b, g1a, b1a, g1b, b1b,
        1.0 / count1, tile)

    def bn_affine(s, q, count, g, b):
        mean = s * (1.0 / count)
        var = q * (1.0 / count) - mean * mean
        k = g * jax.lax.rsqrt(var + EPS)
        return k, b - mean * k

    k1a, t1a = bn_affine(sums1[:, 0], sums1[:, 1], count1, g1a, b1a)
    k1b, t1b = bn_affine(sums1[:, 2], sums1[:, 3], count1, g1b, b1b)
    # layer-2 mix value at positions fed by the layer-1 zero interleave
    d1a = jnp.maximum(t1a, 0.0) @ w2a                   # (cout,)
    d1b = jnp.maximum(t1b, 0.0) @ w2b
    k2a, t2a = bn_affine(sums2[:, 0] + countB * d1a,
                         sums2[:, 1] + countB * d1a * d1a, count2, g2a, b2a)
    k2b, t2b = bn_affine(sums2[:, 2] + countB * d1b,
                         sums2[:, 3] + countB * d1b * d1b, count2, g2b, b2b)

    # fold BatchNorm scales into the channel-mix weights
    w1a_eff = w1a_s * k1a[None, :]
    w1b_eff = w1b_s * k1b[None, :]
    w2a_eff = (w2a * k2a[None, :]).astype(jnp.float32)
    w2b_eff = (w2b * k2b[None, :]).astype(jnp.float32)

    # ---- pallas call 2: fused per-pixel forward for both branches ---------
    pix = _apply_block(x, w1a_eff, w1b_eff, w2a_eff, w2b_eff,
                       t1a, t1b, t2a, t2b, tile)        # (N, cout, hw)
    valsA = pix.reshape(n_imgs, cout, h, w)[:, :, iAlo:iAhi + 1,
                                            jAlo:jAhi + 1]

    # per-channel constants at the two kinds of zero-interleave positions
    cB = (jnp.maximum(d1a * k2a + t2a, 0.0)
          + jnp.maximum(d1b * k2b + t2b, 0.0))   # on layer-2 grid, zero source
    cC = jnp.maximum(t2a, 0.0) + jnp.maximum(t2b, 0.0)  # off the layer-2 grid

    # ---- assemble the NCHW output with strided placements -----------------
    # TODO(synk): this zero-interleave placement is pure data movement; it is
    # left to XLA strided updates (BlockSpec cannot express stride-4 scatter).
    out = jnp.broadcast_to(cC[None, :, None, None], (n_imgs, cout, h2, w2_))
    oy0, ox0 = 2 * u2lo - pool2, 2 * v2lo - pool2
    out = out.at[:, :, oy0:oy0 + 2 * nu2:2, ox0:ox0 + 2 * nv2:2].set(
        jnp.broadcast_to(cB[None, :, None, None], (n_imgs, cout, nu2, nv2)))
    oyA, oxA = 4 * iAlo - 2 * pool1 - pool2, 4 * jAlo - 2 * pool1 - pool2
    out = out.at[:, :, oyA:oyA + 4 * nIA:4, oxA:oxA + 4 * nJA:4].set(valsA)
    return out


trans_combi_block_forward = jax.jit(_forward_impl, static_argnums=(5, 6))


# --------------------------------------------------------------------------
# Pure-JAX reference (mirrors the PyTorch module math) for validation.
# --------------------------------------------------------------------------
def _upsample_ref(m, pad):
    n, h, w, c = m.shape
    ho, wo = 2 * h - 1 - 2 * pad, 2 * w - 1 - 2 * pad
    z = jnp.zeros((n, 2 * h, 2 * w, c), m.dtype)
    z = z.at[:, ::2, ::2, :].set(m)
    return z[:, pad:pad + ho, pad:pad + wo, :]


def reference_forward(x_nchw, alpha, beta, params_a, params_b, pool1, pool2):
    def bn_train(y, g, b):
        mean = y.mean(axis=(0, 1, 2), keepdims=True)
        var = jnp.square(y - mean).mean(axis=(0, 1, 2), keepdims=True)
        return (y - mean) / jnp.sqrt(var + EPS) * g.reshape(1, 1, 1, -1) \
            + b.reshape(1, 1, 1, -1)

    def branch(h, params):
        w1, g1, b1, w2, g2, b2 = params
        y = jnp.einsum('nhwc,cd->nhwd', h, w1)
        y = _upsample_ref(y, pool1)
        y = jnp.maximum(bn_train(y, g1, b1), 0.0)
        y = jnp.einsum('nhwc,cd->nhwd', y, w2)
        y = _upsample_ref(y, pool2)
        return jnp.maximum(bn_train(y, g2, b2), 0.0)

    x = jnp.transpose(x_nchw, (0, 2, 3, 1)).astype(jnp.float32)
    out = branch(x / alpha[0], params_a) + branch(x / beta[0], params_b)
    return jnp.transpose(out, (0, 3, 1, 2))


# --------------------------------------------------------------------------
def init_branch_params(key, cin, cout):
    k1, k2, k3, k4, k5, k6 = jax.random.split(key, 6)
    bound = 1.0 / (cin ** 0.5)
    # nn.ConvTranspose2d weight (cin, cout, 1, 1) squeezed to (cin, cout)
    w1 = jax.random.uniform(k1, (cin, cin), jnp.float32, -bound, bound)
    w2 = jax.random.uniform(k2, (cin, cout), jnp.float32, -bound, bound)
    # BatchNorm2d affine params (randomised to exercise the full math path)
    g1 = jax.random.uniform(k3, (cin,), jnp.float32, 0.5, 1.5)
    b1 = jax.random.uniform(k4, (cin,), jnp.float32, -0.5, 0.5)
    g2 = jax.random.uniform(k5, (cout,), jnp.float32, 0.5, 1.5)
    b2 = jax.random.uniform(k6, (cout,), jnp.float32, -0.5, 0.5)
    return (w1, g1, b1, w2, g2, b2)


if __name__ == "__main__":
    N, C_IN, H, W = 2, 4, 16, 16
    C_OUT = 8
    POOL1, POOL2 = 1, 0

    key = jax.random.PRNGKey(0)
    kx, ka, kb, kp1, kp2 = jax.random.split(key, 5)

    x = jax.random.normal(kx, (N, C_IN, H, W), jnp.float32)
    alpha = jax.random.uniform(ka, (1,), jnp.float32, 0.25, 1.0)  # torch.rand(1)
    beta = jax.random.uniform(kb, (1,), jnp.float32, 0.25, 1.0)   # torch.rand(1)
    params_a = init_branch_params(kp1, C_IN, C_OUT)
    params_b = init_branch_params(kp2, C_IN, C_OUT)

    out = trans_combi_block_forward(x, alpha, beta, params_a, params_b,
                                    POOL1, POOL2)
    out = jax.block_until_ready(out)

    ref = jax.block_until_ready(
        reference_forward(x, alpha, beta, params_a, params_b, POOL1, POOL2))

    assert out.shape == ref.shape, (out.shape, ref.shape)
    max_err = float(jnp.max(jnp.abs(out - ref)))
    assert jnp.allclose(out, ref, rtol=1e-4, atol=1e-4), max_err

    print("KERNEL_OK")
</pallas_src>

<mosaic_0001>
module attributes {stable_mosaic.version = 11 : i64} {
  func.func @_stats_kernel(%arg0: i32, %arg1: i32, %arg2: i32, %arg3: memref<1x256xf32, #tpu.memory_space<vmem>>, %arg4: memref<1x256xf32, #tpu.memory_space<vmem>>, %arg5: memref<1x4x256xf32, #tpu.memory_space<vmem>>, %arg6: memref<4x4xf32, #tpu.memory_space<smem>>, %arg7: memref<4x4xf32, #tpu.memory_space<smem>>, %arg8: memref<4x8xf32, #tpu.memory_space<smem>>, %arg9: memref<4x8xf32, #tpu.memory_space<smem>>, %arg10: memref<4xf32, #tpu.memory_space<smem>>, %arg11: memref<4xf32, #tpu.memory_space<smem>>, %arg12: memref<4xf32, #tpu.memory_space<smem>>, %arg13: memref<4xf32, #tpu.memory_space<smem>>, %arg14: memref<4x4xf32, #tpu.memory_space<vmem>>, %arg15: memref<8x4xf32, #tpu.memory_space<vmem>>, %arg16: memref<4x1xf32, #tpu.memory_space<vmem>>, %arg17: memref<4x1xf32, #tpu.memory_space<vmem>>, %arg18: memref<4x1xf32, #tpu.memory_space<vmem>>, %arg19: memref<4x1xf32, #tpu.memory_space<vmem>>, %arg20: memref<8x1xf32, #tpu.memory_space<vmem>>, %arg21: memref<8x1xf32, #tpu.memory_space<vmem>>, %arg22: memref<8x1xf32, #tpu.memory_space<vmem>>, %arg23: memref<8x1xf32, #tpu.memory_space<vmem>>) attributes {dimension_semantics = [#tpu.dimension_semantics<arbitrary>, #tpu.dimension_semantics<arbitrary>, #tpu.dimension_semantics<arbitrary>], iteration_bounds = array<i64: 2, 2, 1>, scalar_prefetch = 0 : i64, scratch_operands = 8 : i64, tpu.core_type = #tpu.core_type<tc>, window_params = [{transform_indices = @transform_0, window_bounds = array<i64: 1, 256>}, {transform_indices = @transform_1, window_bounds = array<i64: 1, 256>}, {transform_indices = @transform_2, window_bounds = array<i64: 1, 4, 256>}, {transform_indices = @transform_3, window_bounds = array<i64: 4, 4>}, {transform_indices = @transform_4, window_bounds = array<i64: 4, 4>}, {transform_indices = @transform_5, window_bounds = array<i64: 4, 8>}, {transform_indices = @transform_6, window_bounds = array<i64: 4, 8>}, {transform_indices = @transform_7, window_bounds = array<i64: 4>}, {transform_indices = @transform_8, window_bounds = array<i64: 4>}, {transform_indices = @transform_9, window_bounds = array<i64: 4>}, {transform_indices = @transform_10, window_bounds = array<i64: 4>}, {pipeline_mode = #tpu.pipeline_mode<synchronous>, transform_indices = @transform_11, window_bounds = array<i64: 4, 4>}, {pipeline_mode = #tpu.pipeline_mode<synchronous>, transform_indices = @transform_12, window_bounds = array<i64: 8, 4>}]} {
    %c0 = arith.constant 0 : index
    %c0_0 = arith.constant 0 : index
    %c0_1 = arith.constant 0 : index
    %0 = vector.load %arg5[%c0, %c0_0, %c0_1] : memref<1x4x256xf32, #tpu.memory_space<vmem>>, vector<1x4x256xf32>
    %1 = vector.shape_cast %0 : vector<1x4x256xf32> to vector<4x256xf32>
    %2 = vector.extract_strided_slice %1 {offsets = [0, 0], sizes = [1, 256], strides = [1, 1]} : vector<4x256xf32> to vector<1x256xf32>
    %3 = vector.extract_strided_slice %1 {offsets = [1, 0], sizes = [1, 256], strides = [1, 1]} : vector<4x256xf32> to vector<1x256xf32>
    %4 = vector.extract_strided_slice %1 {offsets = [2, 0], sizes = [1, 256], strides = [1, 1]} : vector<4x256xf32> to vector<1x256xf32>
    %5 = vector.extract_strided_slice %1 {offsets = [3, 0], sizes = [1, 256], strides = [1, 1]} : vector<4x256xf32> to vector<1x256xf32>
    %c0_i32 = arith.constant 0 : i32
    %6 = arith.cmpi eq, %arg0, %c0_i32 : i32
    %7 = arith.extui %6 : i1 to i32
    %c0_i32_2 = arith.constant 0 : i32
    %8 = arith.cmpi ne, %7, %c0_i32_2 : i32
    scf.if %8 {
      %c0_i32_33 = arith.constant 0 : i32
      %28 = arith.cmpi eq, %arg1, %c0_i32_33 : i32
      %c0_i32_34 = arith.constant 0 : i32
      %29 = arith.cmpi eq, %arg2, %c0_i32_34 : i32
      %30 = arith.andi %28, %29 : i1
      %31 = arith.extui %30 : i1 to i32
      %c0_i32_35 = arith.constant 0 : i32
      %32 = arith.cmpi ne, %31, %c0_i32_35 : i32
      scf.if %32 {
        %cst_189 = arith.constant 0.000000e+00 : f32
        %266 = vector.broadcast %cst_189 : f32 to vector<4x1xf32>
        %c0_190 = arith.constant 0 : index
        %c0_191 = arith.constant 0 : index
        %267 = vector.load %arg16[%c0_190, %c0_191] : memref<4x1xf32, #tpu.memory_space<vmem>>, vector<4x1xf32>
        tpu.vector_store %arg16[%c0_190, %c0_191], %266 {strides = array<i32>} : memref<4x1xf32, #tpu.memory_space<vmem>>, vector<4x1xf32>,
        %cst_192 = arith.constant 0.000000e+00 : f32
        %268 = vector.broadcast %cst_192 : f32 to vector<4x1xf32>
        %c0_193 = arith.constant 0 : index
        %c0_194 = arith.constant 0 : index
        %269 = vector.load %arg17[%c0_193, %c0_194] : memref<4x1xf32, #tpu.memory_space<vmem>>, vector<4x1xf32>
        tpu.vector_store %arg17[%c0_193, %c0_194], %268 {strides = array<i32>} : memref<4x1xf32, #tpu.memory_space<vmem>>, vector<4x1xf32>,
        %cst_195 = arith.constant 0.000000e+00 : f32
        %270 = vector.broadcast %cst_195 : f32 to vector<4x1xf32>
        %c0_196 = arith.constant 0 : index
        %c0_197 = arith.constant 0 : index
        %271 = vector.load %arg18[%c0_196, %c0_197] : memref<4x1xf32, #tpu.memory_space<vmem>>, vector<4x1xf32>
        tpu.vector_store %arg18[%c0_196, %c0_197], %270 {strides = array<i32>} : memref<4x1xf32, #tpu.memory_space<vmem>>, vector<4x1xf32>,
        %cst_198 = arith.constant 0.000000e+00 : f32
        %272 = vector.broadcast %cst_198 : f32 to vector<4x1xf32>
        %c0_199 = arith.constant 0 : index
        %c0_200 = arith.constant 0 : index
        %273 = vector.load %arg19[%c0_199, %c0_200] : memref<4x1xf32, #tpu.memory_space<vmem>>, vector<4x1xf32>
        tpu.vector_store %arg19[%c0_199, %c0_200], %272 {strides = array<i32>} : memref<4x1xf32, #tpu.memory_space<vmem>>, vector<4x1xf32>,
        %cst_201 = arith.constant 0.000000e+00 : f32
        %274 = vector.broadcast %cst_201 : f32 to vector<8x1xf32>
        %c0_202 = arith.constant 0 : index
        %c0_203 = arith.constant 0 : index
        %275 = vector.load %arg20[%c0_202, %c0_203] : memref<8x1xf32, #tpu.memory_space<vmem>>, vector<8x1xf32>
        tpu.vector_store %arg20[%c0_202, %c0_203], %274 {strides = array<i32>} : memref<8x1xf32, #tpu.memory_space<vmem>>, vector<8x1xf32>,
        %cst_204 = arith.constant 0.000000e+00 : f32
        %276 = vector.broadcast %cst_204 : f32 to vector<8x1xf32>
        %c0_205 = arith.constant 0 : index
        %c0_206 = arith.constant 0 : index
        %277 = vector.load %arg21[%c0_205, %c0_206] : memref<8x1xf32, #tpu.memory_space<vmem>>, vector<8x1xf32>
        tpu.vector_store %arg21[%c0_205, %c0_206], %276 {strides = array<i32>} : memref<8x1xf32, #tpu.memory_space<vmem>>, vector<8x1xf32>,
        %cst_207 = arith.constant 0.000000e+00 : f32
        %278 = vector.broadcast %cst_207 : f32 to vector<8x1xf32>
        %c0_208 = arith.constant 0 : index
        %c0_209 = arith.constant 0 : index
        %279 = vector.load %arg22[%c0_208, %c0_209] : memref<8x1xf32, #tpu.memory_space<vmem>>, vector<8x1xf32>
        tpu.vector_store %arg22[%c0_208, %c0_209], %278 {strides = array<i32>} : memref<8x1xf32, #tpu.memory_space<vmem>>, vector<8x1xf32>,
        %cst_210 = arith.constant 0.000000e+00 : f32
        %280 = vector.broadcast %cst_210 : f32 to vector<8x1xf32>
        %c0_211 = arith.constant 0 : index
        %c0_212 = arith.constant 0 : index
        %281 = vector.load %arg23[%c0_211, %c0_212] : memref<8x1xf32, #tpu.memory_space<vmem>>, vector<8x1xf32>
        tpu.vector_store %arg23[%c0_211, %c0_212], %280 {strides = array<i32>} : memref<8x1xf32, #tpu.memory_space<vmem>>, vector<8x1xf32>,
      } else {
      }
      %c0_36 = arith.constant 0 : index
      %c0_37 = arith.constant 0 : index
      %33 = vector.load %arg3[%c0_36, %c0_37] : memref<1x256xf32, #tpu.memory_space<vmem>>, vector<1x256xf32>
      %c0_38 = arith.constant 0 : index
      %c0_39 = arith.constant 0 : index
      %34 = memref.load %arg6[%c0_38, %c0_39] : memref<4x4xf32, #tpu.memory_space<smem>>
      %35 = vector.broadcast %34 : f32 to vector<1x256xf32>
      %36 = arith.mulf %35, %2 : vector<1x256xf32>
      %cst = arith.constant 0.000000e+00 : f32
      %37 = vector.broadcast %cst : f32 to vector<1x256xf32>
      %38 = arith.addf %37, %36 : vector<1x256xf32>
      %c1_40 = arith.constant 1 : index
      %c0_41 = arith.constant 0 : index
      %39 = memref.load %arg6[%c1_40, %c0_41] : memref<4x4xf32, #tpu.memory_space<smem>>
      %40 = vector.broadcast %39 : f32 to vector<1x256xf32>
      %41 = arith.mulf %40, %3 : vector<1x256xf32>
      %42 = arith.addf %38, %41 : vector<1x256xf32>
      %c2_42 = arith.constant 2 : index
      %c0_43 = arith.constant 0 : index
      %43 = memref.load %arg6[%c2_42, %c0_43] : memref<4x4xf32, #tpu.memory_space<smem>>
      %44 = vector.broadcast %43 : f32 to vector<1x256xf32>
      %45 = arith.mulf %44, %4 : vector<1x256xf32>
      %46 = arith.addf %42, %45 : vector<1x256xf32>
      %c3_44 = arith.constant 3 : index
      %c0_45 = arith.constant 0 : index
      %47 = memref.load %arg6[%c3_44, %c0_45] : memref<4x4xf32, #tpu.memory_space<smem>>
      %48 = vector.broadcast %47 : f32 to vector<1x256xf32>
      %49 = arith.mulf %48, %5 : vector<1x256xf32>
      %50 = arith.addf %46, %49 : vector<1x256xf32>
      %c0_46 = arith.constant 0 : index
      %c1_47 = arith.constant 1 : index
      %51 = memref.load %arg6[%c0_46, %c1_47] : memref<4x4xf32, #tpu.memory_space<smem>>
      %52 = vector.broadcast %51 : f32 to vector<1x256xf32>
      %53 = arith.mulf %52, %2 : vector<1x256xf32>
      %cst_48 = arith.constant 0.000000e+00 : f32
      %54 = vector.broadcast %cst_48 : f32 to vector<1x256xf32>
      %55 = arith.addf %54, %53 : vector<1x256xf32>
      %c1_49 = arith.constant 1 : index
      %c1_50 = arith.constant 1 : index
      %56 = memref.load %arg6[%c1_49, %c1_50] : memref<4x4xf32, #tpu.memory_space<smem>>
      %57 = vector.broadcast %56 : f32 to vector<1x256xf32>
      %58 = arith.mulf %57, %3 : vector<1x256xf32>
      %59 = arith.addf %55, %58 : vector<1x256xf32>
      %c2_51 = arith.constant 2 : index
      %c1_52 = arith.constant 1 : index
      %60 = memref.load %arg6[%c2_51, %c1_52] : memref<4x4xf32, #tpu.memory_space<smem>>
      %61 = vector.broadcast %60 : f32 to vector<1x256xf32>
      %62 = arith.mulf %61, %4 : vector<1x256xf32>
      %63 = arith.addf %59, %62 : vector<1x256xf32>
      %c3_53 = arith.constant 3 : index
      %c1_54 = arith.constant 1 : index
      %64 = memref.load %arg6[%c3_53, %c1_54] : memref<4x4xf32, #tpu.memory_space<smem>>
      %65 = vector.broadcast %64 : f32 to vector<1x256xf32>
      %66 = arith.mulf %65, %5 : vector<1x256xf32>
      %67 = arith.addf %63, %66 : vector<1x256xf32>
      %c0_55 = arith.constant 0 : index
      %c2_56 = arith.constant 2 : index
      %68 = memref.load %arg6[%c0_55, %c2_56] : memref<4x4xf32, #tpu.memory_space<smem>>
      %69 = vector.broadcast %68 : f32 to vector<1x256xf32>
      %70 = arith.mulf %69, %2 : vector<1x256xf32>
      %cst_57 = arith.constant 0.000000e+00 : f32
      %71 = vector.broadcast %cst_57 : f32 to vector<1x256xf32>
      %72 = arith.addf %71, %70 : vector<1x256xf32>
      %c1_58 = arith.constant 1 : index
      %c2_59 = arith.constant 2 : index
      %73 = memref.load %arg6[%c1_58, %c2_59] : memref<4x4xf32, #tpu.memory_space<smem>>
      %74 = vector.broadcast %73 : f32 to vector<1x256xf32>
      %75 = arith.mulf %74, %3 : vector<1x256xf32>
      %76 = arith.addf %72, %75 : vector<1x256xf32>
      %c2_60 = arith.constant 2 : index
      %c2_61 = arith.constant 2 : index
      %77 = memref.load %arg6[%c2_60, %c2_61] : memref<4x4xf32, #tpu.memory_space<smem>>
      %78 = vector.broadcast %77 : f32 to vector<1x256xf32>
      %79 = arith.mulf %78, %4 : vector<1x256xf32>
      %80 = arith.addf %76, %79 : vector<1x256xf32>
      %c3_62 = arith.constant 3 : index
      %c2_63 = arith.constant 2 : index
      %81 = memref.load %arg6[%c3_62, %c2_63] : memref<4x4xf32, #tpu.memory_space<smem>>
      %82 = vector.broadcast %81 : f32 to vector<1x256xf32>
      %83 = arith.mulf %82, %5 : vector<1x256xf32>
      %84 = arith.addf %80, %83 : vector<1x256xf32>
      %c0_64 = arith.constant 0 : index
      %c3_65 = arith.constant 3 : index
      %85 = memref.load %arg6[%c0_64, %c3_65] : memref<4x4xf32, #tpu.memory_space<smem>>
      %86 = vector.broadcast %85 : f32 to vector<1x256xf32>
      %87 = arith.mulf %86, %2 : vector<1x256xf32>
      %cst_66 = arith.constant 0.000000e+00 : f32
      %88 = vector.broadcast %cst_66 : f32 to vector<1x256xf32>
      %89 = arith.addf %88, %87 : vector<1x256xf32>
      %c1_67 = arith.constant 1 : index
      %c3_68 = arith.constant 3 : index
      %90 = memref.load %arg6[%c1_67, %c3_68] : memref<4x4xf32, #tpu.memory_space<smem>>
      %91 = vector.broadcast %90 : f32 to vector<1x256xf32>
      %92 = arith.mulf %91, %3 : vector<1x256xf32>
      %93 = arith.addf %89, %92 : vector<1x256xf32>
      %c2_69 = arith.constant 2 : index
      %c3_70 = arith.constant 3 : index
      %94 = memref.load %arg6[%c2_69, %c3_70] : memref<4x4xf32, #tpu.memory_space<smem>>
      %95 = vector.broadcast %94 : f32 to vector<1x256xf32>
      %96 = arith.mulf %95, %4 : vector<1x256xf32>
      %97 = arith.addf %93, %96 : vector<1x256xf32>
      %c3_71 = arith.constant 3 : index
      %c3_72 = arith.constant 3 : index
      %98 = memref.load %arg6[%c3_71, %c3_72] : memref<4x4xf32, #tpu.memory_space<smem>>
      %99 = vector.broadcast %98 : f32 to vector<1x256xf32>
      %100 = arith.mulf %99, %5 : vector<1x256xf32>
      %101 = arith.addf %97, %100 : vector<1x256xf32>
      %c0_73 = arith.constant 0 : index
      %c0_74 = arith.constant 0 : index
      %102 = memref.load %arg7[%c0_73, %c0_74] : memref<4x4xf32, #tpu.memory_space<smem>>
      %103 = vector.broadcast %102 : f32 to vector<1x256xf32>
      %104 = arith.mulf %103, %2 : vector<1x256xf32>
      %cst_75 = arith.constant 0.000000e+00 : f32
      %105 = vector.broadcast %cst_75 : f32 to vector<1x256xf32>
      %106 = arith.addf %105, %104 : vector<1x256xf32>
      %c1_76 = arith.constant 1 : index
      %c0_77 = arith.constant 0 : index
      %107 = memref.load %arg7[%c1_76, %c0_77] : memref<4x4xf32, #tpu.memory_space<smem>>
      %108 = vector.broadcast %107 : f32 to vector<1x256xf32>
      %109 = arith.mulf %108, %3 : vector<1x256xf32>
      %110 = arith.addf %106, %109 : vector<1x256xf32>
      %c2_78 = arith.constant 2 : index
      %c0_79 = arith.constant 0 : index
      %111 = memref.load %arg7[%c2_78, %c0_79] : memref<4x4xf32, #tpu.memory_space<smem>>
      %112 = vector.broadcast %111 : f32 to vector<1x256xf32>
      %113 = arith.mulf %112, %4 : vector<1x256xf32>
      %114 = arith.addf %110, %113 : vector<1x256xf32>
      %c3_80 = arith.constant 3 : index
      %c0_81 = arith.constant 0 : index
      %115 = memref.load %arg7[%c3_80, %c0_81] : memref<4x4xf32, #tpu.memory_space<smem>>
      %116 = vector.broadcast %115 : f32 to vector<1x256xf32>
      %117 = arith.mulf %116, %5 : vector<1x256xf32>
      %118 = arith.addf %114, %117 : vector<1x256xf32>
      %c0_82 = arith.constant 0 : index
      %c1_83 = arith.constant 1 : index
      %119 = memref.load %arg7[%c0_82, %c1_83] : memref<4x4xf32, #tpu.memory_space<smem>>
      %120 = vector.broadcast %119 : f32 to vector<1x256xf32>
      %121 = arith.mulf %120, %2 : vector<1x256xf32>
      %cst_84 = arith.constant 0.000000e+00 : f32
      %122 = vector.broadcast %cst_84 : f32 to vector<1x256xf32>
      %123 = arith.addf %122, %121 : vector<1x256xf32>
      %c1_85 = arith.constant 1 : index
      %c1_86 = arith.constant 1 : index
      %124 = memref.load %arg7[%c1_85, %c1_86] : memref<4x4xf32, #tpu.memory_space<smem>>
      %125 = vector.broadcast %124 : f32 to vector<1x256xf32>
      %126 = arith.mulf %125, %3 : vector<1x256xf32>
      %127 = arith.addf %123, %126 : vector<1x256xf32>
      %c2_87 = arith.constant 2 : index
      %c1_88 = arith.constant 1 : index
      %128 = memref.load %arg7[%c2_87, %c1_88] : memref<4x4xf32, #tpu.memory_space<smem>>
      %129 = vector.broadcast %128 : f32 to vector<1x256xf32>
      %130 = arith.mulf %129, %4 : vector<1x256xf32>
      %131 = arith.addf %127, %130 : vector<1x256xf32>
      %c3_89 = arith.constant 3 : index
      %c1_90 = arith.constant 1 : index
      %132 = memref.load %arg7[%c3_89, %c1_90] : memref<4x4xf32, #tpu.memory_space<smem>>
      %133 = vector.broadcast %132 : f32 to vector<1x256xf32>
      %134 = arith.mulf %133, %5 : vector<1x256xf32>
      %135 = arith.addf %131, %134 : vector<1x256xf32>
      %c0_91 = arith.constant 0 : index
      %c2_92 = arith.constant 2 : index
      %136 = memref.load %arg7[%c0_91, %c2_92] : memref<4x4xf32, #tpu.memory_space<smem>>
      %137 = vector.broadcast %136 : f32 to vector<1x256xf32>
      %138 = arith.mulf %137, %2 : vector<1x256xf32>
      %cst_93 = arith.constant 0.000000e+00 : f32
      %139 = vector.broadcast %cst_93 : f32 to vector<1x256xf32>
      %140 = arith.addf %139, %138 : vector<1x256xf32>
      %c1_94 = arith.constant 1 : index
      %c2_95 = arith.constant 2 : index
      %141 = memref.load %arg7[%c1_94, %c2_95] : memref<4x4xf32, #tpu.memory_space<smem>>
      %142 = vector.broadcast %141 : f32 to vector<1x256xf32>
      %143 = arith.mulf %142, %3 : vector<1x256xf32>
      %144 = arith.addf %140, %143 : vector<1x256xf32>
      %c2_96 = arith.constant 2 : index
      %c2_97 = arith.constant 2 : index
      %145 = memref.load %arg7[%c2_96, %c2_97] : memref<4x4xf32, #tpu.memory_space<smem>>
      %146 = vector.broadcast %145 : f32 to vector<1x256xf32>
      %147 = arith.mulf %146, %4 : vector<1x256xf32>
      %148 = arith.addf %144, %147 : vector<1x256xf32>
      %c3_98 = arith.constant 3 : index
      %c2_99 = arith.constant 2 : index
      %149 = memref.load %arg7[%c3_98, %c2_99] : memref<4x4xf32, #tpu.memory_space<smem>>
      %150 = vector.broadcast %149 : f32 to vector<1x256xf32>
      %151 = arith.mulf %150, %5 : vector<1x256xf32>
      %152 = arith.addf %148, %151 : vector<1x256xf32>
      %c0_100 = arith.constant 0 : index
      %c3_101 = arith.constant 3 : index
      %153 = memref.load %arg7[%c0_100, %c3_101] : memref<4x4xf32, #tpu.memory_space<smem>>
      %154 = vector.broadcast %153 : f32 to vector<1x256xf32>
      %155 = arith.mulf %154, %2 : vector<1x256xf32>
      %cst_102 = arith.constant 0.000000e+00 : f32
      %156 = vector.broadcast %cst_102 : f32 to vector<1x256xf32>
      %157 = arith.addf %156, %155 : vector<1x256xf32>
      %c1_103 = arith.constant 1 : index
      %c3_104 = arith.constant 3 : index
      %158 = memref.load %arg7[%c1_103, %c3_104] : memref<4x4xf32, #tpu.memory_space<smem>>
      %159 = vector.broadcast %158 : f32 to vector<1x256xf32>
      %160 = arith.mulf %159, %3 : vector<1x256xf32>
      %161 = arith.addf %157, %160 : vector<1x256xf32>
      %c2_105 = arith.constant 2 : index
      %c3_106 = arith.constant 3 : index
      %162 = memref.load %arg7[%c2_105, %c3_106] : memref<4x4xf32, #tpu.memory_space<smem>>
      %163 = vector.broadcast %162 : f32 to vector<1x256xf32>
      %164 = arith.mulf %163, %4 : vector<1x256xf32>
      %165 = arith.addf %161, %164 : vector<1x256xf32>
      %c3_107 = arith.constant 3 : index
      %c3_108 = arith.constant 3 : index
      %166 = memref.load %arg7[%c3_107, %c3_108] : memref<4x4xf32, #tpu.memory_space<smem>>
      %167 = vector.broadcast %166 : f32 to vector<1x256xf32>
      %168 = arith.mulf %167, %5 : vector<1x256xf32>
      %169 = arith.addf %165, %168 : vector<1x256xf32>
      %170 = arith.mulf %50, %33 : vector<1x256xf32>
      %171 = arith.mulf %118, %33 : vector<1x256xf32>
      %c0_109 = arith.constant 0 : index
      %c0_110 = arith.constant 0 : index
      %172 = vector.load %arg16[%c0_109, %c0_110] : memref<4x1xf32, #tpu.memory_space<vmem>>, vector<1x1xf32>
      %cst_111 = arith.constant dense<0.000000e+00> : vector<1xf32>
      %173 = vector.multi_reduction <add>, %170, %cst_111 [1] : vector<1x256xf32> to vector<1xf32>
      %174 = vector.shape_cast %173 : vector<1xf32> to vector<1x1xf32>
      %175 = arith.addf %172, %174 : vector<1x1xf32>
      %c0_112 = arith.constant 0 : index
      %c0_113 = arith.constant 0 : index
      %176 = vector.load %arg16[%c0_112, %c0_113] : memref<4x1xf32, #tpu.memory_space<vmem>>, vector<1x1xf32>
      tpu.vector_store %arg16[%c0_112, %c0_113], %175 {strides = array<i32>} : memref<4x1xf32, #tpu.memory_space<vmem>>, vector<1x1xf32>,
      %c0_114 = arith.constant 0 : index
      %c0_115 = arith.constant 0 : index
      %177 = vector.load %arg17[%c0_114, %c0_115] : memref<4x1xf32, #tpu.memory_space<vmem>>, vector<1x1xf32>
      %178 = arith.mulf %170, %50 : vector<1x256xf32>
      %cst_116 = arith.constant dense<0.000000e+00> : vector<1xf32>
      %179 = vector.multi_reduction <add>, %178, %cst_116 [1] : vector<1x256xf32> to vector<1xf32>
      %180 = vector.shape_cast %179 : vector<1xf32> to vector<1x1xf32>
      %181 = arith.addf %177, %180 : vector<1x1xf32>
      %c0_117 = arith.constant 0 : index
      %c0_118 = arith.constant 0 : index
      %182 = vector.load %arg17[%c0_117, %c0_118] : memref<4x1xf32, #tpu.memory_space<vmem>>, vector<1x1xf32>
      tpu.vector_store %arg17[%c0_117, %c0_118], %181 {strides = array<i32>} : memref<4x1xf32, #tpu.memory_space<vmem>>, vector<1x1xf32>,
      %c0_119 = arith.constant 0 : index
      %c0_120 = arith.constant 0 : index
      %183 = vector.load %arg18[%c0_119, %c0_120] : memref<4x1xf32, #tpu.memory_space<vmem>>, vector<1x1xf32>
      %cst_121 = arith.constant dense<0.000000e+00> : vector<1xf32>
      %184 = vector.multi_reduction <add>, %171, %cst_121 [1] : vector<1x256xf32> to vector<1xf32>
      %185 = vector.shape_cast %184 : vector<1xf32> to vector<1x1xf32>
      %186 = arith.addf %183, %185 : vector<1x1xf32>
      %c0_122 = arith.constant 0 : index
      %c0_123 = arith.constant 0 : index
      %187 = vector.load %arg18[%c0_122, %c0_123] : memref<4x1xf32, #tpu.memory_space<vmem>>, vector<1x1xf32>
      tpu.vector_store %arg18[%c0_122, %c0_123], %186 {strides = array<i32>} : memref<4x1xf32, #tpu.memory_space<vmem>>, vector<1x1xf32>,
      %c0_124 = arith.constant 0 : index
      %c0_125 = arith.constant 0 : index
      %188 = vector.load %arg19[%c0_124, %c0_125] : memref<4x1xf32, #tpu.memory_space<vmem>>, vector<1x1xf32>
      %189 = arith.mulf %171, %118 : vector<1x256xf32>
      %cst_126 = arith.constant dense<0.000000e+00> : vector<1xf32>
      %190 = vector.multi_reduction <add>, %189, %cst_126 [1] : vector<1x256xf32> to vector<1xf32>
      %191 = vector.shape_cast %190 : vector<1xf32> to vector<1x1xf32>
      %192 = arith.addf %188, %191 : vector<1x1xf32>
      %c0_127 = arith.constant 0 : index
      %c0_128 = arith.constant 0 : index
      %193 = vector.load %arg19[%c0_127, %c0_128] : memref<4x1xf32, #tpu.memory_space<vmem>>, vector<1x1xf32>
      tpu.vector_store %arg19[%c0_127, %c0_128], %192 {strides = array<i32>} : memref<4x1xf32, #tpu.memory_space<vmem>>, vector<1x1xf32>,
      %194 = arith.mulf %67, %33 : vector<1x256xf32>
      %195 = arith.mulf %135, %33 : vector<1x256xf32>
      %c1_129 = arith.constant 1 : index
      %c0_130 = arith.constant 0 : index
      %196 = vector.load %arg16[%c1_129, %c0_130] : memref<4x1xf32, #tpu.memory_space<vmem>>, vector<1x1xf32>
      %cst_131 = arith.constant dense<0.000000e+00> : vector<1xf32>
      %197 = vector.multi_reduction <add>, %194, %cst_131 [1] : vector<1x256xf32> to vector<1xf32>
      %198 = vector.shape_cast %197 : vector<1xf32> to vector<1x1xf32>
      %199 = arith.addf %196, %198 : vector<1x1xf32>
      %c1_132 = arith.constant 1 : index
      %c0_133 = arith.constant 0 : index
      %200 = vector.load %arg16[%c1_132, %c0_133] : memref<4x1xf32, #tpu.memory_space<vmem>>, vector<1x1xf32>
      tpu.vector_store %arg16[%c1_132, %c0_133], %199 {strides = array<i32>} : memref<4x1xf32, #tpu.memory_space<vmem>>, vector<1x1xf32>,
      %c1_134 = arith.constant 1 : index
      %c0_135 = arith.constant 0 : index
      %201 = vector.load %arg17[%c1_134, %c0_135] : memref<4x1xf32, #tpu.memory_space<vmem>>, vector<1x1xf32>
      %202 = arith.mulf %194, %67 : vector<1x256xf32>
      %cst_136 = arith.constant dense<0.000000e+00> : vector<1xf32>
      %203 = vector.multi_reduction <add>, %202, %cst_136 [1] : vector<1x256xf32> to vector<1xf32>
      %204 = vector.shape_cast %203 : vector<1xf32> to vector<1x1xf32>
      %205 = arith.addf %201, %204 : vector<1x1xf32>
      %c1_137 = arith.constant 1 : index
      %c0_138 = arith.constant 0 : index
      %206 = vector.load %arg17[%c1_137, %c0_138] : memref<4x1xf32, #tpu.memory_space<vmem>>, vector<1x1xf32>
      tpu.vector_store %arg17[%c1_137, %c0_138], %205 {strides = array<i32>} : memref<4x1xf32, #tpu.memory_space<vmem>>, vector<1x1xf32>,
      %c1_139 = arith.constant 1 : index
      %c0_140 = arith.constant 0 : index
      %207 = vector.load %arg18[%c1_139, %c0_140] : memref<4x1xf32, #tpu.memory_space<vmem>>, vector<1x1xf32>
      %cst_141 = arith.constant dense<0.000000e+00> : vector<1xf32>
      %208 = vector.multi_reduction <add>, %195, %cst_141 [1] : vector<1x256xf32> to vector<1xf32>
      %209 = vector.shape_cast %208 : vector<1xf32> to vector<1x1xf32>
      %210 = arith.addf %207, %209 : vector<1x1xf32>
      %c1_142 = arith.constant 1 : index
      %c0_143 = arith.constant 0 : index
      %211 = vector.load %arg18[%c1_142, %c0_143] : memref<4x1xf32, #tpu.memory_space<vmem>>, vector<1x1xf32>
      tpu.vector_store %arg18[%c1_142, %c0_143], %210 {strides = array<i32>} : memref<4x1xf32, #tpu.memory_space<vmem>>, vector<1x1xf32>,
      %c1_144 = arith.constant 1 : index
      %c0_145 = arith.constant 0 : index
      %212 = vector.load %arg19[%c1_144, %c0_145] : memref<4x1xf32, #tpu.memory_space<vmem>>, vector<1x1xf32>
      %213 = arith.mulf %195, %135 : vector<1x256xf32>
      %cst_146 = arith.constant dense<0.000000e+00> : vector<1xf32>
      %214 = vector.multi_reduction <add>, %213, %cst_146 [1] : vector<1x256xf32> to vector<1xf32>
      %215 = vector.shape_cast %214 : vector<1xf32> to vector<1x1xf32>
      %216 = arith.addf %212, %215 : vector<1x1xf32>
      %c1_147 = arith.constant 1 : index
      %c0_148 = arith.constant 0 : index
      %217 = vector.load %arg19[%c1_147, %c0_148] : memref<4x1xf32, #tpu.memory_space<vmem>>, vector<1x1xf32>
      tpu.vector_store %arg19[%c1_147, %c0_148], %216 {strides = array<i32>} : memref<4x1xf32, #tpu.memory_space<vmem>>, vector<1x1xf32>,
      %218 = arith.mulf %84, %33 : vector<1x256xf32>
      %219 = arith.mulf %152, %33 : vector<1x256xf32>
      %c2_149 = arith.constant 2 : index
      %c0_150 = arith.constant 0 : index
      %220 = vector.load %arg16[%c2_149, %c0_150] : memref<4x1xf32, #tpu.memory_space<vmem>>, vector<1x1xf32>
      %cst_151 = arith.constant dense<0.000000e+00> : vector<1xf32>
      %221 = vector.multi_reduction <add>, %218, %cst_151 [1] : vector<1x256xf32> to vector<1xf32>
      %222 = vector.shape_cast %221 : vector<1xf32> to vector<1x1xf32>
      %223 = arith.addf %220, %222 : vector<1x1xf32>
      %c2_152 = arith.constant 2 : index
      %c0_153 = arith.constant 0 : index
      %224 = vector.load %arg16[%c2_152, %c0_153] : memref<4x1xf32, #tpu.memory_space<vmem>>, vector<1x1xf32>
      tpu.vector_store %arg16[%c2_152, %c0_153], %223 {strides = array<i32>} : memref<4x1xf32, #tpu.memory_space<vmem>>, vector<1x1xf32>,
      %c2_154 = arith.constant 2 : index
      %c0_155 = arith.constant 0 : index
      %225 = vector.load %arg17[%c2_154, %c0_155] : memref<4x1xf32, #tpu.memory_space<vmem>>, vector<1x1xf32>
      %226 = arith.mulf %218, %84 : vector<1x256xf32>
      %cst_156 = arith.constant dense<0.000000e+00> : vector<1xf32>
      %227 = vector.multi_reduction <add>, %226, %cst_156 [1] : vector<1x256xf32> to vector<1xf32>
      %228 = vector.shape_cast %227 : vector<1xf32> to vector<1x1xf32>
      %229 = arith.addf %225, %228 : vector<1x1xf32>
      %c2_157 = arith.constant 2 : index
      %c0_158 = arith.constant 0 : index
      %230 = vector.load %arg17[%c2_157, %c0_158] : memref<4x1xf32, #tpu.memory_space<vmem>>, vector<1x1xf32>
      tpu.vector_store %arg17[%c2_157, %c0_158], %229 {strides = array<i32>} : memref<4x1xf32, #tpu.memory_space<vmem>>, vector<1x1xf32>,
      %c2_159 = arith.constant 2 : index
      %c0_160 = arith.constant 0 : index
      %231 = vector.load %arg18[%c2_159, %c0_160] : memref<4x1xf32, #tpu.memory_space<vmem>>, vector<1x1xf32>
      %cst_161 = arith.constant dense<0.000000e+00> : vector<1xf32>
      %232 = vector.multi_reduction <add>, %219, %cst_161 [1] : vector<1x256xf32> to vector<1xf32>
      %233 = vector.shape_cast %232 : vector<1xf32> to vector<1x1xf32>
      %234 = arith.addf %231, %233 : vector<1x1xf32>
      %c2_162 = arith.constant 2 : index
      %c0_163 = arith.constant 0 : index
      %235 = vector.load %arg18[%c2_162, %c0_163] : memref<4x1xf32, #tpu.memory_space<vmem>>, vector<1x1xf32>
      tpu.vector_store %arg18[%c2_162, %c0_163], %234 {strides = array<i32>} : memref<4x1xf32, #tpu.memory_space<vmem>>, vector<1x1xf32>,
      %c2_164 = arith.constant 2 : index
      %c0_165 = arith.constant 0 : index
      %236 = vector.load %arg19[%c2_164, %c0_165] : memref<4x1xf32, #tpu.memory_space<vmem>>, vector<1x1xf32>
      %237 = arith.mulf %219, %152 : vector<1x256xf32>
      %cst_166 = arith.constant dense<0.000000e+00> : vector<1xf32>
      %238 = vector.multi_reduction <add>, %237, %cst_166 [1] : vector<1x256xf32> to vector<1xf32>
      %239 = vector.shape_cast %238 : vector<1xf32> to vector<1x1xf32>
      %240 = arith.addf %236, %239 : vector<1x1xf32>
      %c2_167 = arith.constant 2 : index
      %c0_168 = arith.constant 0 : index
      %241 = vector.load %arg19[%c2_167, %c0_168] : memref<4x1xf32, #tpu.memory_space<vmem>>, vector<1x1xf32>
      tpu.vector_store %arg19[%c2_167, %c0_168], %240 {strides = array<i32>} : memref<4x1xf32, #tpu.memory_space<vmem>>, vector<1x1xf32>,
      %242 = arith.mulf %101, %33 : vector<1x256xf32>
      %243 = arith.mulf %169, %33 : vector<1x256xf32>
      %c3_169 = arith.constant 3 : index
      %c0_170 = arith.constant 0 : index
      %244 = vector.load %arg16[%c3_169, %c0_170] : memref<4x1xf32, #tpu.memory_space<vmem>>, vector<1x1xf32>
      %cst_171 = arith.constant dense<0.000000e+00> : vector<1xf32>
      %245 = vector.multi_reduction <add>, %242, %cst_171 [1] : vector<1x256xf32> to vector<1xf32>
      %246 = vector.shape_cast %245 : vector<1xf32> to vector<1x1xf32>
      %247 = arith.addf %244, %246 : vector<1x1xf32>
      %c3_172 = arith.constant 3 : index
      %c0_173 = arith.constant 0 : index
      %248 = vector.load %arg16[%c3_172, %c0_173] : memref<4x1xf32, #tpu.memory_space<vmem>>, vector<1x1xf32>
      tpu.vector_store %arg16[%c3_172, %c0_173], %247 {strides = array<i32>} : memref<4x1xf32, #tpu.memory_space<vmem>>, vector<1x1xf32>,
      %c3_174 = arith.constant 3 : index
      %c0_175 = arith.constant 0 : index
      %249 = vector.load %arg17[%c3_174, %c0_175] : memref<4x1xf32, #tpu.memory_space<vmem>>, vector<1x1xf32>
      %250 = arith.mulf %242, %101 : vector<1x256xf32>
      %cst_176 = arith.constant dense<0.000000e+00> : vector<1xf32>
      %251 = vector.multi_reduction <add>, %250, %cst_176 [1] : vector<1x256xf32> to vector<1xf32>
      %252 = vector.shape_cast %251 : vector<1xf32> to vector<1x1xf32>
      %253 = arith.addf %249, %252 : vector<1x1xf32>
      %c3_177 = arith.constant 3 : index
      %c0_178 = arith.constant 0 : index
      %254 = vector.load %arg17[%c3_177, %c0_178] : memref<4x1xf32, #tpu.memory_space<vmem>>, vector<1x1xf32>
      tpu.vector_store %arg17[%c3_177, %c0_178], %253 {strides = array<i32>} : memref<4x1xf32, #tpu.memory_space<vmem>>, vector<1x1xf32>,
      %c3_179 = arith.constant 3 : index
      %c0_180 = arith.constant 0 : index
      %255 = vector.load %arg18[%c3_179, %c0_180] : memref<4x1xf32, #tpu.memory_space<vmem>>, vector<1x1xf32>
      %cst_181 = arith.constant dense<0.000000e+00> : vector<1xf32>
      %256 = vector.multi_reduction <add>, %243, %cst_181 [1] : vector<1x256xf32> to vector<1xf32>
      %257 = vector.shape_cast %256 : vector<1xf32> to vector<1x1xf32>
      %258 = arith.addf %255, %257 : vector<1x1xf32>
      %c3_182 = arith.constant 3 : index
      %c0_183 = arith.constant 0 : index
      %259 = vector.load %arg18[%c3_182, %c0_183] : memref<4x1xf32, #tpu.memory_space<vmem>>, vector<1x1xf32>
      tpu.vector_store %arg18[%c3_182, %c0_183], %258 {strides = array<i32>} : memref<4x1xf32, #tpu.memory_space<vmem>>, vector<1x1xf32>,
      %c3_184 = arith.constant 3 : index
      %c0_185 = arith.constant 0 : index
      %260 = vector.load %arg19[%c3_184, %c0_185] : memref<4x1xf32, #tpu.memory_space<vmem>>, vector<1x1xf32>
      %261 = arith.mulf %243, %169 : vector<1x256xf32>
      %cst_186 = arith.constant dense<0.000000e+00> : vector<1xf32>
      %262 = vector.multi_reduction <add>, %261, %cst_186 [1] : vector<1x256xf32> to vector<1xf32>
      %263 = vector.shape_cast %262 : vector<1xf32> to vector<1x1xf32>
      %264 = arith.addf %260, %263 : vector<1x1xf32>
      %c3_187 = arith.constant 3 : index
      %c0_188 = arith.constant 0 : index
      %265 = vector.load %arg19[%c3_187, %c0_188] : memref<4x1xf32, #tpu.memory_space<vmem>>, vector<1x1xf32>
      tpu.vector_store %arg19[%c3_187, %c0_188], %264 {strides = array<i32>} : memref<4x1xf32, #tpu.memory_space<vmem>>, vector<1x1xf32>,
    } else {
    }
    %c1_i32 = arith.constant 1 : i32
    %9 = arith.cmpi eq, %arg0, %c1_i32 : i32
    %10 = arith.extui %9 : i1 to i32
    %c0_i32_3 = arith.constant 0 : i32
    %11 = arith.cmpi ne, %10, %c0_i32_3 : i32
    scf.if %11 {
      %c0_33 = arith.constant 0 : index
      %c0_34 = arith.constant 0 : index
      %28 = vector.load %arg4[%c0_33, %c0_34] : memref<1x256xf32, #tpu.memory_space<vmem>>, vector<1x256xf32>
      %c0_35 = arith.constant 0 : index
      %c0_36 = arith.constant 0 : index
      %29 = memref.load %arg6[%c0_35, %c0_36] : memref<4x4xf32, #tpu.memory_space<smem>>
      %30 = vector.broadcast %29 : f32 to vector<1x256xf32>
      %31 = arith.mulf %30, %2 : vector<1x256xf32>
      %cst = arith.constant 0.000000e+00 : f32
      %32 = vector.broadcast %cst : f32 to vector<1x256xf32>
      %33 = arith.addf %32, %31 : vector<1x256xf32>
      %c1_37 = arith.constant 1 : index
      %c0_38 = arith.constant 0 : index
      %34 = memref.load %arg6[%c1_37, %c0_38] : memref<4x4xf32, #tpu.memory_space<smem>>
      %35 = vector.broadcast %34 : f32 to vector<1x256xf32>
      %36 = arith.mulf %35, %3 : vector<1x256xf32>
      %37 = arith.addf %33, %36 : vector<1x256xf32>
      %c2_39 = arith.constant 2 : index
      %c0_40 = arith.constant 0 : index
      %38 = memref.load %arg6[%c2_39, %c0_40] : memref<4x4xf32, #tpu.memory_space<smem>>
      %39 = vector.broadcast %38 : f32 to vector<1x256xf32>
      %40 = arith.mulf %39, %4 : vector<1x256xf32>
      %41 = arith.addf %37, %40 : vector<1x256xf32>
      %c3_41 = arith.constant 3 : index
      %c0_42 = arith.constant 0 : index
      %42 = memref.load %arg6[%c3_41, %c0_42] : memref<4x4xf32, #tpu.memory_space<smem>>
      %43 = vector.broadcast %42 : f32 to vector<1x256xf32>
      %44 = arith.mulf %43, %5 : vector<1x256xf32>
      %45 = arith.addf %41, %44 : vector<1x256xf32>
      %c0_43 = arith.constant 0 : index
      %c1_44 = arith.constant 1 : index
      %46 = memref.load %arg6[%c0_43, %c1_44] : memref<4x4xf32, #tpu.memory_space<smem>>
      %47 = vector.broadcast %46 : f32 to vector<1x256xf32>
      %48 = arith.mulf %47, %2 : vector<1x256xf32>
      %cst_45 = arith.constant 0.000000e+00 : f32
      %49 = vector.broadcast %cst_45 : f32 to vector<1x256xf32>
      %50 = arith.addf %49, %48 : vector<1x256xf32>
      %c1_46 = arith.constant 1 : index
      %c1_47 = arith.constant 1 : index
      %51 = memref.load %arg6[%c1_46, %c1_47] : memref<4x4xf32, #tpu.memory_space<smem>>
      %52 = vector.broadcast %51 : f32 to vector<1x256xf32>
      %53 = arith.mulf %52, %3 : vector<1x256xf32>
      %54 = arith.addf %50, %53 : vector<1x256xf32>
      %c2_48 = arith.constant 2 : index
      %c1_49 = arith.constant 1 : index
      %55 = memref.load %arg6[%c2_48, %c1_49] : memref<4x4xf32, #tpu.memory_space<smem>>
      %56 = vector.broadcast %55 : f32 to vector<1x256xf32>
      %57 = arith.mulf %56, %4 : vector<1x256xf32>
      %58 = arith.addf %54, %57 : vector<1x256xf32>
      %c3_50 = arith.constant 3 : index
      %c1_51 = arith.constant 1 : index
      %59 = memref.load %arg6[%c3_50, %c1_51] : memref<4x4xf32, #tpu.memory_space<smem>>
      %60 = vector.broadcast %59 : f32 to vector<1x256xf32>
      %61 = arith.mulf %60, %5 : vector<1x256xf32>
      %62 = arith.addf %58, %61 : vector<1x256xf32>
      %c0_52 = arith.constant 0 : index
      %c2_53 = arith.constant 2 : index
      %63 = memref.load %arg6[%c0_52, %c2_53] : memref<4x4xf32, #tpu.memory_space<smem>>
      %64 = vector.broadcast %63 : f32 to vector<1x256xf32>
      %65 = arith.mulf %64, %2 : vector<1x256xf32>
      %cst_54 = arith.constant 0.000000e+00 : f32
      %66 = vector.broadcast %cst_54 : f32 to vector<1x256xf32>
      %67 = arith.addf %66, %65 : vector<1x256xf32>
      %c1_55 = arith.constant 1 : index
      %c2_56 = arith.constant 2 : index
      %68 = memref.load %arg6[%c1_55, %c2_56] : memref<4x4xf32, #tpu.memory_space<smem>>
      %69 = vector.broadcast %68 : f32 to vector<1x256xf32>
      %70 = arith.mulf %69, %3 : vector<1x256xf32>
      %71 = arith.addf %67, %70 : vector<1x256xf32>
      %c2_57 = arith.constant 2 : index
      %c2_58 = arith.constant 2 : index
      %72 = memref.load %arg6[%c2_57, %c2_58] : memref<4x4xf32, #tpu.memory_space<smem>>
      %73 = vector.broadcast %72 : f32 to vector<1x256xf32>
      %74 = arith.mulf %73, %4 : vector<1x256xf32>
      %75 = arith.addf %71, %74 : vector<1x256xf32>
      %c3_59 = arith.constant 3 : index
      %c2_60 = arith.constant 2 : index
      %76 = memref.load %arg6[%c3_59, %c2_60] : memref<4x4xf32, #tpu.memory_space<smem>>
      %77 = vector.broadcast %76 : f32 to vector<1x256xf32>
      %78 = arith.mulf %77, %5 : vector<1x256xf32>
      %79 = arith.addf %75, %78 : vector<1x256xf32>
      %c0_61 = arith.constant 0 : index
      %c3_62 = arith.constant 3 : index
      %80 = memref.load %arg6[%c0_61, %c3_62] : memref<4x4xf32, #tpu.memory_space<smem>>
      %81 = vector.broadcast %80 : f32 to vector<1x256xf32>
      %82 = arith.mulf %81, %2 : vector<1x256xf32>
      %cst_63 = arith.constant 0.000000e+00 : f32
      %83 = vector.broadcast %cst_63 : f32 to vector<1x256xf32>
      %84 = arith.addf %83, %82 : vector<1x256xf32>
      %c1_64 = arith.constant 1 : index
      %c3_65 = arith.constant 3 : index
      %85 = memref.load %arg6[%c1_64, %c3_65] : memref<4x4xf32, #tpu.memory_space<smem>>
      %86 = vector.broadcast %85 : f32 to vector<1x256xf32>
      %87 = arith.mulf %86, %3 : vector<1x256xf32>
      %88 = arith.addf %84, %87 : vector<1x256xf32>
      %c2_66 = arith.constant 2 : index
      %c3_67 = arith.constant 3 : index
      %89 = memref.load %arg6[%c2_66, %c3_67] : memref<4x4xf32, #tpu.memory_space<smem>>
      %90 = vector.broadcast %89 : f32 to vector<1x256xf32>
      %91 = arith.mulf %90, %4 : vector<1x256xf32>
      %92 = arith.addf %88, %91 : vector<1x256xf32>
      %c3_68 = arith.constant 3 : index
      %c3_69 = arith.constant 3 : index
      %93 = memref.load %arg6[%c3_68, %c3_69] : memref<4x4xf32, #tpu.memory_space<smem>>
      %94 = vector.broadcast %93 : f32 to vector<1x256xf32>
      %95 = arith.mulf %94, %5 : vector<1x256xf32>
      %96 = arith.addf %92, %95 : vector<1x256xf32>
      %c0_70 = arith.constant 0 : index
      %c0_71 = arith.constant 0 : index
      %97 = vector.load %arg16[%c0_70, %c0_71] : memref<4x1xf32, #tpu.memory_space<vmem>>, vector<1x1xf32>
      %cst_72 = arith.constant 5.94530313E-4 : f32
      %98 = vector.broadcast %cst_72 : f32 to vector<1x1xf32>
      %99 = arith.mulf %97, %98 : vector<1x1xf32>
      %c0_73 = arith.constant 0 : index
      %c0_74 = arith.constant 0 : index
      %100 = vector.load %arg17[%c0_73, %c0_74] : memref<4x1xf32, #tpu.memory_space<vmem>>, vector<1x1xf32>
      %cst_75 = arith.constant 5.94530313E-4 : f32
      %101 = vector.broadcast %cst_75 : f32 to vector<1x1xf32>
      %102 = arith.mulf %100, %101 : vector<1x1xf32>
      %103 = arith.mulf %99, %99 : vector<1x1xf32>
      %104 = arith.subf %102, %103 : vector<1x1xf32>
      %c0_76 = arith.constant 0 : index
      %105 = memref.load %arg10[%c0_76] : memref<4xf32, #tpu.memory_space<smem>>
      %cst_77 = arith.constant 9.99999974E-6 : f32
      %106 = vector.broadcast %cst_77 : f32 to vector<1x1xf32>
      %107 = arith.addf %104, %106 : vector<1x1xf32>
      %108 = math.rsqrt %107 : vector<1x1xf32>
      %109 = vector.broadcast %105 : f32 to vector<1x1xf32>
      %110 = arith.mulf %109, %108 : vector<1x1xf32>
      %c0_78 = arith.constant 0 : index
      %111 = memref.load %arg11[%c0_78] : memref<4xf32, #tpu.memory_space<smem>>
      %112 = arith.mulf %99, %110 : vector<1x1xf32>
      %113 = vector.broadcast %111 : f32 to vector<1x1xf32>
      %114 = arith.subf %113, %112 : vector<1x1xf32>
      %115 = vector.broadcast %110 : vector<1x1xf32> to vector<1x256xf32>
      %116 = arith.mulf %45, %115 : vector<1x256xf32>
      %117 = vector.broadcast %114 : vector<1x1xf32> to vector<1x256xf32>
      %118 = arith.addf %116, %117 : vector<1x256xf32>
      %cst_79 = arith.constant 0.000000e+00 : f32
      %119 = vector.broadcast %cst_79 : f32 to vector<1x256xf32>
      %120 = arith.maximumf %118, %119 : vector<1x256xf32>
      %c1_80 = arith.constant 1 : index
      %c0_81 = arith.constant 0 : index
      %121 = vector.load %arg16[%c1_80, %c0_81] : memref<4x1xf32, #tpu.memory_space<vmem>>, vector<1x1xf32>
      %cst_82 = arith.constant 5.94530313E-4 : f32
      %122 = vector.broadcast %cst_82 : f32 to vector<1x1xf32>
      %123 = arith.mulf %121, %122 : vector<1x1xf32>
      %c1_83 = arith.constant 1 : index
      %c0_84 = arith.constant 0 : index
      %124 = vector.load %arg17[%c1_83, %c0_84] : memref<4x1xf32, #tpu.memory_space<vmem>>, vector<1x1xf32>
      %cst_85 = arith.constant 5.94530313E-4 : f32
      %125 = vector.broadcast %cst_85 : f32 to vector<1x1xf32>
      %126 = arith.mulf %124, %125 : vector<1x1xf32>
      %127 = arith.mulf %123, %123 : vector<1x1xf32>
      %128 = arith.subf %126, %127 : vector<1x1xf32>
      %c1_86 = arith.constant 1 : index
      %129 = memref.load %arg10[%c1_86] : memref<4xf32, #tpu.memory_space<smem>>
      %cst_87 = arith.constant 9.99999974E-6 : f32
      %130 = vector.broadcast %cst_87 : f32 to vector<1x1xf32>
      %131 = arith.addf %128, %130 : vector<1x1xf32>
      %132 = math.rsqrt %131 : vector<1x1xf32>
      %133 = vector.broadcast %129 : f32 to vector<1x1xf32>
      %134 = arith.mulf %133, %132 : vector<1x1xf32>
      %c1_88 = arith.constant 1 : index
      %135 = memref.load %arg11[%c1_88] : memref<4xf32, #tpu.memory_space<smem>>
      %136 = arith.mulf %123, %134 : vector<1x1xf32>
      %137 = vector.broadcast %135 : f32 to vector<1x1xf32>
      %138 = arith.subf %137, %136 : vector<1x1xf32>
      %139 = vector.broadcast %134 : vector<1x1xf32> to vector<1x256xf32>
      %140 = arith.mulf %62, %139 : vector<1x256xf32>
      %141 = vector.broadcast %138 : vector<1x1xf32> to vector<1x256xf32>
      %142 = arith.addf %140, %141 : vector<1x256xf32>
      %cst_89 = arith.constant 0.000000e+00 : f32
      %143 = vector.broadcast %cst_89 : f32 to vector<1x256xf32>
      %144 = arith.maximumf %142, %143 : vector<1x256xf32>
      %c2_90 = arith.constant 2 : index
      %c0_91 = arith.constant 0 : index
      %145 = vector.load %arg16[%c2_90, %c0_91] : memref<4x1xf32, #tpu.memory_space<vmem>>, vector<1x1xf32>
      %cst_92 = arith.constant 5.94530313E-4 : f32
      %146 = vector.broadcast %cst_92 : f32 to vector<1x1xf32>
      %147 = arith.mulf %145, %146 : vector<1x1xf32>
      %c2_93 = arith.constant 2 : index
      %c0_94 = arith.constant 0 : index
      %148 = vector.load %arg17[%c2_93, %c0_94] : memref<4x1xf32, #tpu.memory_space<vmem>>, vector<1x1xf32>
      %cst_95 = arith.constant 5.94530313E-4 : f32
      %149 = vector.broadcast %cst_95 : f32 to vector<1x1xf32>
      %150 = arith.mulf %148, %149 : vector<1x1xf32>
      %151 = arith.mulf %147, %147 : vector<1x1xf32>
      %152 = arith.subf %150, %151 : vector<1x1xf32>
      %c2_96 = arith.constant 2 : index
      %153 = memref.load %arg10[%c2_96] : memref<4xf32, #tpu.memory_space<smem>>
      %cst_97 = arith.constant 9.99999974E-6 : f32
      %154 = vector.broadcast %cst_97 : f32 to vector<1x1xf32>
      %155 = arith.addf %152, %154 : vector<1x1xf32>
      %156 = math.rsqrt %155 : vector<1x1xf32>
      %157 = vector.broadcast %153 : f32 to vector<1x1xf32>
      %158 = arith.mulf %157, %156 : vector<1x1xf32>
      %c2_98 = arith.constant 2 : index
      %159 = memref.load %arg11[%c2_98] : memref<4xf32, #tpu.memory_space<smem>>
      %160 = arith.mulf %147, %158 : vector<1x1xf32>
      %161 = vector.broadcast %159 : f32 to vector<1x1xf32>
      %162 = arith.subf %161, %160 : vector<1x1xf32>
      %163 = vector.broadcast %158 : vector<1x1xf32> to vector<1x256xf32>
      %164 = arith.mulf %79, %163 : vector<1x256xf32>
      %165 = vector.broadcast %162 : vector<1x1xf32> to vector<1x256xf32>
      %166 = arith.addf %164, %165 : vector<1x256xf32>
      %cst_99 = arith.constant 0.000000e+00 : f32
      %167 = vector.broadcast %cst_99 : f32 to vector<1x256xf32>
      %168 = arith.maximumf %166, %167 : vector<1x256xf32>
      %c3_100 = arith.constant 3 : index
      %c0_101 = arith.constant 0 : index
      %169 = vector.load %arg16[%c3_100, %c0_101] : memref<4x1xf32, #tpu.memory_space<vmem>>, vector<1x1xf32>
      %cst_102 = arith.constant 5.94530313E-4 : f32
      %170 = vector.broadcast %cst_102 : f32 to vector<1x1xf32>
      %171 = arith.mulf %169, %170 : vector<1x1xf32>
      %c3_103 = arith.constant 3 : index
      %c0_104 = arith.constant 0 : index
      %172 = vector.load %arg17[%c3_103, %c0_104] : memref<4x1xf32, #tpu.memory_space<vmem>>, vector<1x1xf32>
      %cst_105 = arith.constant 5.94530313E-4 : f32
      %173 = vector.broadcast %cst_105 : f32 to vector<1x1xf32>
      %174 = arith.mulf %172, %173 : vector<1x1xf32>
      %175 = arith.mulf %171, %171 : vector<1x1xf32>
      %176 = arith.subf %174, %175 : vector<1x1xf32>
      %c3_106 = arith.constant 3 : index
      %177 = memref.load %arg10[%c3_106] : memref<4xf32, #tpu.memory_space<smem>>
      %cst_107 = arith.constant 9.99999974E-6 : f32
      %178 = vector.broadcast %cst_107 : f32 to vector<1x1xf32>
      %179 = arith.addf %176, %178 : vector<1x1xf32>
      %180 = math.rsqrt %179 : vector<1x1xf32>
      %181 = vector.broadcast %177 : f32 to vector<1x1xf32>
      %182 = arith.mulf %181, %180 : vector<1x1xf32>
      %c3_108 = arith.constant 3 : index
      %183 = memref.load %arg11[%c3_108] : memref<4xf32, #tpu.memory_space<smem>>
      %184 = arith.mulf %171, %182 : vector<1x1xf32>
      %185 = vector.broadcast %183 : f32 to vector<1x1xf32>
      %186 = arith.subf %185, %184 : vector<1x1xf32>
      %187 = vector.broadcast %182 : vector<1x1xf32> to vector<1x256xf32>
      %188 = arith.mulf %96, %187 : vector<1x256xf32>
      %189 = vector.broadcast %186 : vector<1x1xf32> to vector<1x256xf32>
      %190 = arith.addf %188, %189 : vector<1x256xf32>
      %cst_109 = arith.constant 0.000000e+00 : f32
      %191 = vector.broadcast %cst_109 : f32 to vector<1x256xf32>
      %192 = arith.maximumf %190, %191 : vector<1x256xf32>
      %c0_110 = arith.constant 0 : index
      %c0_111 = arith.constant 0 : index
      %193 = memref.load %arg8[%c0_110, %c0_111] : memref<4x8xf32, #tpu.memory_space<smem>>
      %194 = vector.broadcast %193 : f32 to vector<1x256xf32>
      %195 = arith.mulf %194, %120 : vector<1x256xf32>
      %cst_112 = arith.constant 0.000000e+00 : f32
      %196 = vector.broadcast %cst_112 : f32 to vector<1x256xf32>
      %197 = arith.addf %196, %195 : vector<1x256xf32>
      %c1_113 = arith.constant 1 : index
      %c0_114 = arith.constant 0 : index
      %198 = memref.load %arg8[%c1_113, %c0_114] : memref<4x8xf32, #tpu.memory_space<smem>>
      %199 = vector.broadcast %198 : f32 to vector<1x256xf32>
      %200 = arith.mulf %199, %144 : vector<1x256xf32>
      %201 = arith.addf %197, %200 : vector<1x256xf32>
      %c2_115 = arith.constant 2 : index
      %c0_116 = arith.constant 0 : index
      %202 = memref.load %arg8[%c2_115, %c0_116] : memref<4x8xf32, #tpu.memory_space<smem>>
      %203 = vector.broadcast %202 : f32 to vector<1x256xf32>
      %204 = arith.mulf %203, %168 : vector<1x256xf32>
      %205 = arith.addf %201, %204 : vector<1x256xf32>
      %c3_117 = arith.constant 3 : index
      %c0_118 = arith.constant 0 : index
      %206 = memref.load %arg8[%c3_117, %c0_118] : memref<4x8xf32, #tpu.memory_space<smem>>
      %207 = vector.broadcast %206 : f32 to vector<1x256xf32>
      %208 = arith.mulf %207, %192 : vector<1x256xf32>
      %209 = arith.addf %205, %208 : vector<1x256xf32>
      %c0_119 = arith.constant 0 : index
      %c1_120 = arith.constant 1 : index
      %210 = memref.load %arg8[%c0_119, %c1_120] : memref<4x8xf32, #tpu.memory_space<smem>>
      %211 = vector.broadcast %210 : f32 to vector<1x256xf32>
      %212 = arith.mulf %211, %120 : vector<1x256xf32>
      %cst_121 = arith.constant 0.000000e+00 : f32
      %213 = vector.broadcast %cst_121 : f32 to vector<1x256xf32>
      %214 = arith.addf %213, %212 : vector<1x256xf32>
      %c1_122 = arith.constant 1 : index
      %c1_123 = arith.constant 1 : index
      %215 = memref.load %arg8[%c1_122, %c1_123] : memref<4x8xf32, #tpu.memory_space<smem>>
      %216 = vector.broadcast %215 : f32 to vector<1x256xf32>
      %217 = arith.mulf %216, %144 : vector<1x256xf32>
      %218 = arith.addf %214, %217 : vector<1x256xf32>
      %c2_124 = arith.constant 2 : index
      %c1_125 = arith.constant 1 : index
      %219 = memref.load %arg8[%c2_124, %c1_125] : memref<4x8xf32, #tpu.memory_space<smem>>
      %220 = vector.broadcast %219 : f32 to vector<1x256xf32>
      %221 = arith.mulf %220, %168 : vector<1x256xf32>
      %222 = arith.addf %218, %221 : vector<1x256xf32>
      %c3_126 = arith.constant 3 : index
      %c1_127 = arith.constant 1 : index
      %223 = memref.load %arg8[%c3_126, %c1_127] : memref<4x8xf32, #tpu.memory_space<smem>>
      %224 = vector.broadcast %223 : f32 to vector<1x256xf32>
      %225 = arith.mulf %224, %192 : vector<1x256xf32>
      %226 = arith.addf %222, %225 : vector<1x256xf32>
      %c0_128 = arith.constant 0 : index
      %c2_129 = arith.constant 2 : index
      %227 = memref.load %arg8[%c0_128, %c2_129] : memref<4x8xf32, #tpu.memory_space<smem>>
      %228 = vector.broadcast %227 : f32 to vector<1x256xf32>
      %229 = arith.mulf %228, %120 : vector<1x256xf32>
      %cst_130 = arith.constant 0.000000e+00 : f32
      %230 = vector.broadcast %cst_130 : f32 to vector<1x256xf32>
      %231 = arith.addf %230, %229 : vector<1x256xf32>
      %c1_131 = arith.constant 1 : index
      %c2_132 = arith.constant 2 : index
      %232 = memref.load %arg8[%c1_131, %c2_132] : memref<4x8xf32, #tpu.memory_space<smem>>
      %233 = vector.broadcast %232 : f32 to vector<1x256xf32>
      %234 = arith.mulf %233, %144 : vector<1x256xf32>
      %235 = arith.addf %231, %234 : vector<1x256xf32>
      %c2_133 = arith.constant 2 : index
      %c2_134 = arith.constant 2 : index
      %236 = memref.load %arg8[%c2_133, %c2_134] : memref<4x8xf32, #tpu.memory_space<smem>>
      %237 = vector.broadcast %236 : f32 to vector<1x256xf32>
      %238 = arith.mulf %237, %168 : vector<1x256xf32>
      %239 = arith.addf %235, %238 : vector<1x256xf32>
      %c3_135 = arith.constant 3 : index
      %c2_136 = arith.constant 2 : index
      %240 = memref.load %arg8[%c3_135, %c2_136] : memref<4x8xf32, #tpu.memory_space<smem>>
      %241 = vector.broadcast %240 : f32 to vector<1x256xf32>
      %242 = arith.mulf %241, %192 : vector<1x256xf32>
      %243 = arith.addf %239, %242 : vector<1x256xf32>
      %c0_137 = arith.constant 0 : index
      %c3_138 = arith.constant 3 : index
      %244 = memref.load %arg8[%c0_137, %c3_138] : memref<4x8xf32, #tpu.memory_space<smem>>
      %245 = vector.broadcast %244 : f32 to vector<1x256xf32>
      %246 = arith.mulf %245, %120 : vector<1x256xf32>
      %cst_139 = arith.constant 0.000000e+00 : f32
      %247 = vector.broadcast %cst_139 : f32 to vector<1x256xf32>
      %248 = arith.addf %247, %246 : vector<1x256xf32>
      %c1_140 = arith.constant 1 : index
      %c3_141 = arith.constant 3 : index
      %249 = memref.load %arg8[%c1_140, %c3_141] : memref<4x8xf32, #tpu.memory_space<smem>>
      %250 = vector.broadcast %249 : f32 to vector<1x256xf32>
      %251 = arith.mulf %250, %144 : vector<1x256xf32>
      %252 = arith.addf %248, %251 : vector<1x256xf32>
      %c2_142 = arith.constant 2 : index
      %c3_143 = arith.constant 3 : index
      %253 = memref.load %arg8[%c2_142, %c3_143] : memref<4x8xf32, #tpu.memory_space<smem>>
      %254 = vector.broadcast %253 : f32 to vector<1x256xf32>
      %255 = arith.mulf %254, %168 : vector<1x256xf32>
      %256 = arith.addf %252, %255 : vector<1x256xf32>
      %c3_144 = arith.constant 3 : index
      %c3_145 = arith.constant 3 : index
      %257 = memref.load %arg8[%c3_144, %c3_145] : memref<4x8xf32, #tpu.memory_space<smem>>
      %258 = vector.broadcast %257 : f32 to vector<1x256xf32>
      %259 = arith.mulf %258, %192 : vector<1x256xf32>
      %260 = arith.addf %256, %259 : vector<1x256xf32>
      %c0_146 = arith.constant 0 : index
      %c4 = arith.constant 4 : index
      %261 = memref.load %arg8[%c0_146, %c4] : memref<4x8xf32, #tpu.memory_space<smem>>
      %262 = vector.broadcast %261 : f32 to vector<1x256xf32>
      %263 = arith.mulf %262, %120 : vector<1x256xf32>
      %cst_147 = arith.constant 0.000000e+00 : f32
      %264 = vector.broadcast %cst_147 : f32 to vector<1x256xf32>
      %265 = arith.addf %264, %263 : vector<1x256xf32>
      %c1_148 = arith.constant 1 : index
      %c4_149 = arith.constant 4 : index
      %266 = memref.load %arg8[%c1_148, %c4_149] : memref<4x8xf32, #tpu.memory_space<smem>>
      %267 = vector.broadcast %266 : f32 to vector<1x256xf32>
      %268 = arith.mulf %267, %144 : vector<1x256xf32>
      %269 = arith.addf %265, %268 : vector<1x256xf32>
      %c2_150 = arith.constant 2 : index
      %c4_151 = arith.constant 4 : index
      %270 = memref.load %arg8[%c2_150, %c4_151] : memref<4x8xf32, #tpu.memory_space<smem>>
      %271 = vector.broadcast %270 : f32 to vector<1x256xf32>
      %272 = arith.mulf %271, %168 : vector<1x256xf32>
      %273 = arith.addf %269, %272 : vector<1x256xf32>
      %c3_152 = arith.constant 3 : index
      %c4_153 = arith.constant 4 : index
      %274 = memref.load %arg8[%c3_152, %c4_153] : memref<4x8xf32, #tpu.memory_space<smem>>
      %275 = vector.broadcast %274 : f32 to vector<1x256xf32>
      %276 = arith.mulf %275, %192 : vector<1x256xf32>
      %277 = arith.addf %273, %276 : vector<1x256xf32>
      %c0_154 = arith.constant 0 : index
      %c5 = arith.constant 5 : index
      %278 = memref.load %arg8[%c0_154, %c5] : memref<4x8xf32, #tpu.memory_space<smem>>
      %279 = vector.broadcast %278 : f32 to vector<1x256xf32>
      %280 = arith.mulf %279, %120 : vector<1x256xf32>
      %cst_155 = arith.constant 0.000000e+00 : f32
      %281 = vector.broadcast %cst_155 : f32 to vector<1x256xf32>
      %282 = arith.addf %281, %280 : vector<1x256xf32>
      %c1_156 = arith.constant 1 : index
      %c5_157 = arith.constant 5 : index
      %283 = memref.load %arg8[%c1_156, %c5_157] : memref<4x8xf32, #tpu.memory_space<smem>>
      %284 = vector.broadcast %283 : f32 to vector<1x256xf32>
      %285 = arith.mulf %284, %144 : vector<1x256xf32>
      %286 = arith.addf %282, %285 : vector<1x256xf32>
      %c2_158 = arith.constant 2 : index
      %c5_159 = arith.constant 5 : index
      %287 = memref.load %arg8[%c2_158, %c5_159] : memref<4x8xf32, #tpu.memory_space<smem>>
      %288 = vector.broadcast %287 : f32 to vector<1x256xf32>
      %289 = arith.mulf %288, %168 : vector<1x256xf32>
      %290 = arith.addf %286, %289 : vector<1x256xf32>
      %c3_160 = arith.constant 3 : index
      %c5_161 = arith.constant 5 : index
      %291 = memref.load %arg8[%c3_160, %c5_161] : memref<4x8xf32, #tpu.memory_space<smem>>
      %292 = vector.broadcast %291 : f32 to vector<1x256xf32>
      %293 = arith.mulf %292, %192 : vector<1x256xf32>
      %294 = arith.addf %290, %293 : vector<1x256xf32>
      %c0_162 = arith.constant 0 : index
      %c6 = arith.constant 6 : index
      %295 = memref.load %arg8[%c0_162, %c6] : memref<4x8xf32, #tpu.memory_space<smem>>
      %296 = vector.broadcast %295 : f32 to vector<1x256xf32>
      %297 = arith.mulf %296, %120 : vector<1x256xf32>
      %cst_163 = arith.constant 0.000000e+00 : f32
      %298 = vector.broadcast %cst_163 : f32 to vector<1x256xf32>
      %299 = arith.addf %298, %297 : vector<1x256xf32>
      %c1_164 = arith.constant 1 : index
      %c6_165 = arith.constant 6 : index
      %300 = memref.load %arg8[%c1_164, %c6_165] : memref<4x8xf32, #tpu.memory_space<smem>>
      %301 = vector.broadcast %300 : f32 to vector<1x256xf32>
      %302 = arith.mulf %301, %144 : vector<1x256xf32>
      %303 = arith.addf %299, %302 : vector<1x256xf32>
      %c2_166 = arith.constant 2 : index
      %c6_167 = arith.constant 6 : index
      %304 = memref.load %arg8[%c2_166, %c6_167] : memref<4x8xf32, #tpu.memory_space<smem>>
      %305 = vector.broadcast %304 : f32 to vector<1x256xf32>
      %306 = arith.mulf %305, %168 : vector<1x256xf32>
      %307 = arith.addf %303, %306 : vector<1x256xf32>
      %c3_168 = arith.constant 3 : index
      %c6_169 = arith.constant 6 : index
      %308 = memref.load %arg8[%c3_168, %c6_169] : memref<4x8xf32, #tpu.memory_space<smem>>
      %309 = vector.broadcast %308 : f32 to vector<1x256xf32>
      %310 = arith.mulf %309, %192 : vector<1x256xf32>
      %311 = arith.addf %307, %310 : vector<1x256xf32>
      %c0_170 = arith.constant 0 : index
      %c7 = arith.constant 7 : index
      %312 = memref.load %arg8[%c0_170, %c7] : memref<4x8xf32, #tpu.memory_space<smem>>
      %313 = vector.broadcast %312 : f32 to vector<1x256xf32>
      %314 = arith.mulf %313, %120 : vector<1x256xf32>
      %cst_171 = arith.constant 0.000000e+00 : f32
      %315 = vector.broadcast %cst_171 : f32 to vector<1x256xf32>
      %316 = arith.addf %315, %314 : vector<1x256xf32>
      %c1_172 = arith.constant 1 : index
      %c7_173 = arith.constant 7 : index
      %317 = memref.load %arg8[%c1_172, %c7_173] : memref<4x8xf32, #tpu.memory_space<smem>>
      %318 = vector.broadcast %317 : f32 to vector<1x256xf32>
      %319 = arith.mulf %318, %144 : vector<1x256xf32>
      %320 = arith.addf %316, %319 : vector<1x256xf32>
      %c2_174 = arith.constant 2 : index
      %c7_175 = arith.constant 7 : index
      %321 = memref.load %arg8[%c2_174, %c7_175] : memref<4x8xf32, #tpu.memory_space<smem>>
      %322 = vector.broadcast %321 : f32 to vector<1x256xf32>
      %323 = arith.mulf %322, %168 : vector<1x256xf32>
      %324 = arith.addf %320, %323 : vector<1x256xf32>
      %c3_176 = arith.constant 3 : index
      %c7_177 = arith.constant 7 : index
      %325 = memref.load %arg8[%c3_176, %c7_177] : memref<4x8xf32, #tpu.memory_space<smem>>
      %326 = vector.broadcast %325 : f32 to vector<1x256xf32>
      %327 = arith.mulf %326, %192 : vector<1x256xf32>
      %328 = arith.addf %324, %327 : vector<1x256xf32>
      %329 = arith.mulf %209, %28 : vector<1x256xf32>
      %c0_178 = arith.constant 0 : index
      %c0_179 = arith.constant 0 : index
      %330 = vector.load %arg20[%c0_178, %c0_179] : memref<8x1xf32, #tpu.memory_space<vmem>>, vector<1x1xf32>
      %cst_180 = arith.constant dense<0.000000e+00> : vector<1xf32>
      %331 = vector.multi_reduction <add>, %329, %cst_180 [1] : vector<1x256xf32> to vector<1xf32>
      %332 = vector.shape_cast %331 : vector<1xf32> to vector<1x1xf32>
      %333 = arith.addf %330, %332 : vector<1x1xf32>
      %c0_181 = arith.constant 0 : index
      %c0_182 = arith.constant 0 : index
      %334 = vector.load %arg20[%c0_181, %c0_182] : memref<8x1xf32, #tpu.memory_space<vmem>>, vector<1x1xf32>
      tpu.vector_store %arg20[%c0_181, %c0_182], %333 {strides = array<i32>} : memref<8x1xf32, #tpu.memory_space<vmem>>, vector<1x1xf32>,
      %c0_183 = arith.constant 0 : index
      %c0_184 = arith.constant 0 : index
      %335 = vector.load %arg21[%c0_183, %c0_184] : memref<8x1xf32, #tpu.memory_space<vmem>>, vector<1x1xf32>
      %336 = arith.mulf %329, %209 : vector<1x256xf32>
      %cst_185 = arith.constant dense<0.000000e+00> : vector<1xf32>
      %337 = vector.multi_reduction <add>, %336, %cst_185 [1] : vector<1x256xf32> to vector<1xf32>
      %338 = vector.shape_cast %337 : vector<1xf32> to vector<1x1xf32>
      %339 = arith.addf %335, %338 : vector<1x1xf32>
      %c0_186 = arith.constant 0 : index
      %c0_187 = arith.constant 0 : index
      %340 = vector.load %arg21[%c0_186, %c0_187] : memref<8x1xf32, #tpu.memory_space<vmem>>, vector<1x1xf32>
      tpu.vector_store %arg21[%c0_186, %c0_187], %339 {strides = array<i32>} : memref<8x1xf32, #tpu.memory_space<vmem>>, vector<1x1xf32>,
      %341 = arith.mulf %226, %28 : vector<1x256xf32>
      %c1_188 = arith.constant 1 : index
      %c0_189 = arith.constant 0 : index
      %342 = vector.load %arg20[%c1_188, %c0_189] : memref<8x1xf32, #tpu.memory_space<vmem>>, vector<1x1xf32>
      %cst_190 = arith.constant dense<0.000000e+00> : vector<1xf32>
      %343 = vector.multi_reduction <add>, %341, %cst_190 [1] : vector<1x256xf32> to vector<1xf32>
      %344 = vector.shape_cast %343 : vector<1xf32> to vector<1x1xf32>
      %345 = arith.addf %342, %344 : vector<1x1xf32>
      %c1_191 = arith.constant 1 : index
      %c0_192 = arith.constant 0 : index
      %346 = vector.load %arg20[%c1_191, %c0_192] : memref<8x1xf32, #tpu.memory_space<vmem>>, vector<1x1xf32>
      tpu.vector_store %arg20[%c1_191, %c0_192], %345 {strides = array<i32>} : memref<8x1xf32, #tpu.memory_space<vmem>>, vector<1x1xf32>,
      %c1_193 = arith.constant 1 : index
      %c0_194 = arith.constant 0 : index
      %347 = vector.load %arg21[%c1_193, %c0_194] : memref<8x1xf32, #tpu.memory_space<vmem>>, vector<1x1xf32>
      %348 = arith.mulf %341, %226 : vector<1x256xf32>
      %cst_195 = arith.constant dense<0.000000e+00> : vector<1xf32>
      %349 = vector.multi_reduction <add>, %348, %cst_195 [1] : vector<1x256xf32> to vector<1xf32>
      %350 = vector.shape_cast %349 : vector<1xf32> to vector<1x1xf32>
      %351 = arith.addf %347, %350 : vector<1x1xf32>
      %c1_196 = arith.constant 1 : index
      %c0_197 = arith.constant 0 : index
      %352 = vector.load %arg21[%c1_196, %c0_197] : memref<8x1xf32, #tpu.memory_space<vmem>>, vector<1x1xf32>
      tpu.vector_store %arg21[%c1_196, %c0_197], %351 {strides = array<i32>} : memref<8x1xf32, #tpu.memory_space<vmem>>, vector<1x1xf32>,
      %353 = arith.mulf %243, %28 : vector<1x256xf32>
      %c2_198 = arith.constant 2 : index
      %c0_199 = arith.constant 0 : index
      %354 = vector.load %arg20[%c2_198, %c0_199] : memref<8x1xf32, #tpu.memory_space<vmem>>, vector<1x1xf32>
      %cst_200 = arith.constant dense<0.000000e+00> : vector<1xf32>
      %355 = vector.multi_reduction <add>, %353, %cst_200 [1] : vector<1x256xf32> to vector<1xf32>
      %356 = vector.shape_cast %355 : vector<1xf32> to vector<1x1xf32>
      %357 = arith.addf %354, %356 : vector<1x1xf32>
      %c2_201 = arith.constant 2 : index
      %c0_202 = arith.constant 0 : index
      %358 = vector.load %arg20[%c2_201, %c0_202] : memref<8x1xf32, #tpu.memory_space<vmem>>, vector<1x1xf32>
      tpu.vector_store %arg20[%c2_201, %c0_202], %357 {strides = array<i32>} : memref<8x1xf32, #tpu.memory_space<vmem>>, vector<1x1xf32>,
      %c2_203 = arith.constant 2 : index
      %c0_204 = arith.constant 0 : index
      %359 = vector.load %arg21[%c2_203, %c0_204] : memref<8x1xf32, #tpu.memory_space<vmem>>, vector<1x1xf32>
      %360 = arith.mulf %353, %243 : vector<1x256xf32>
      %cst_205 = arith.constant dense<0.000000e+00> : vector<1xf32>
      %361 = vector.multi_reduction <add>, %360, %cst_205 [1] : vector<1x256xf32> to vector<1xf32>
      %362 = vector.shape_cast %361 : vector<1xf32> to vector<1x1xf32>
      %363 = arith.addf %359, %362 : vector<1x1xf32>
      %c2_206 = arith.constant 2 : index
      %c0_207 = arith.constant 0 : index
      %364 = vector.load %arg21[%c2_206, %c0_207] : memref<8x1xf32, #tpu.memory_space<vmem>>, vector<1x1xf32>
      tpu.vector_store %arg21[%c2_206, %c0_207], %363 {strides = array<i32>} : memref<8x1xf32, #tpu.memory_space<vmem>>, vector<1x1xf32>,
      %365 = arith.mulf %260, %28 : vector<1x256xf32>
      %c3_208 = arith.constant 3 : index
      %c0_209 = arith.constant 0 : index
      %366 = vector.load %arg20[%c3_208, %c0_209] : memref<8x1xf32, #tpu.memory_space<vmem>>, vector<1x1xf32>
      %cst_210 = arith.constant dense<0.000000e+00> : vector<1xf32>
      %367 = vector.multi_reduction <add>, %365, %cst_210 [1] : vector<1x256xf32> to vector<1xf32>
      %368 = vector.shape_cast %367 : vector<1xf32> to vector<1x1xf32>
      %369 = arith.addf %366, %368 : vector<1x1xf32>
      %c3_211 = arith.constant 3 : index
      %c0_212 = arith.constant 0 : index
      %370 = vector.load %arg20[%c3_211, %c0_212] : memref<8x1xf32, #tpu.memory_space<vmem>>, vector<1x1xf32>
      tpu.vector_store %arg20[%c3_211, %c0_212], %369 {strides = array<i32>} : memref<8x1xf32, #tpu.memory_space<vmem>>, vector<1x1xf32>,
      %c3_213 = arith.constant 3 : index
      %c0_214 = arith.constant 0 : index
      %371 = vector.load %arg21[%c3_213, %c0_214] : memref<8x1xf32, #tpu.memory_space<vmem>>, vector<1x1xf32>
      %372 = arith.mulf %365, %260 : vector<1x256xf32>
      %cst_215 = arith.constant dense<0.000000e+00> : vector<1xf32>
      %373 = vector.multi_reduction <add>, %372, %cst_215 [1] : vector<1x256xf32> to vector<1xf32>
      %374 = vector.shape_cast %373 : vector<1xf32> to vector<1x1xf32>
      %375 = arith.addf %371, %374 : vector<1x1xf32>
      %c3_216 = arith.constant 3 : index
      %c0_217 = arith.constant 0 : index
      %376 = vector.load %arg21[%c3_216, %c0_217] : memref<8x1xf32, #tpu.memory_space<vmem>>, vector<1x1xf32>
      tpu.vector_store %arg21[%c3_216, %c0_217], %375 {strides = array<i32>} : memref<8x1xf32, #tpu.memory_space<vmem>>, vector<1x1xf32>,
      %377 = arith.mulf %277, %28 : vector<1x256xf32>
      %c4_218 = arith.constant 4 : index
      %c0_219 = arith.constant 0 : index
      %378 = vector.load %arg20[%c4_218, %c0_219] : memref<8x1xf32, #tpu.memory_space<vmem>>, vector<1x1xf32>
      %cst_220 = arith.constant dense<0.000000e+00> : vector<1xf32>
      %379 = vector.multi_reduction <add>, %377, %cst_220 [1] : vector<1x256xf32> to vector<1xf32>
      %380 = vector.shape_cast %379 : vector<1xf32> to vector<1x1xf32>
      %381 = arith.addf %378, %380 : vector<1x1xf32>
      %c4_221 = arith.constant 4 : index
      %c0_222 = arith.constant 0 : index
      %382 = vector.load %arg20[%c4_221, %c0_222] : memref<8x1xf32, #tpu.memory_space<vmem>>, vector<1x1xf32>
      tpu.vector_store %arg20[%c4_221, %c0_222], %381 {strides = array<i32>} : memref<8x1xf32, #tpu.memory_space<vmem>>, vector<1x1xf32>,
      %c4_223 = arith.constant 4 : index
      %c0_224 = arith.constant 0 : index
      %383 = vector.load %arg21[%c4_223, %c0_224] : memref<8x1xf32, #tpu.memory_space<vmem>>, vector<1x1xf32>
      %384 = arith.mulf %377, %277 : vector<1x256xf32>
      %cst_225 = arith.constant dense<0.000000e+00> : vector<1xf32>
      %385 = vector.multi_reduction <add>, %384, %cst_225 [1] : vector<1x256xf32> to vector<1xf32>
      %386 = vector.shape_cast %385 : vector<1xf32> to vector<1x1xf32>
      %387 = arith.addf %383, %386 : vector<1x1xf32>
      %c4_226 = arith.constant 4 : index
      %c0_227 = arith.constant 0 : index
      %388 = vector.load %arg21[%c4_226, %c0_227] : memref<8x1xf32, #tpu.memory_space<vmem>>, vector<1x1xf32>
      tpu.vector_store %arg21[%c4_226, %c0_227], %387 {strides = array<i32>} : memref<8x1xf32, #tpu.memory_space<vmem>>, vector<1x1xf32>,
      %389 = arith.mulf %294, %28 : vector<1x256xf32>
      %c5_228 = arith.constant 5 : index
      %c0_229 = arith.constant 0 : index
      %390 = vector.load %arg20[%c5_228, %c0_229] : memref<8x1xf32, #tpu.memory_space<vmem>>, vector<1x1xf32>
      %cst_230 = arith.constant dense<0.000000e+00> : vector<1xf32>
      %391 = vector.multi_reduction <add>, %389, %cst_230 [1] : vector<1x256xf32> to vector<1xf32>
      %392 = vector.shape_cast %391 : vector<1xf32> to vector<1x1xf32>
      %393 = arith.addf %390, %392 : vector<1x1xf32>
      %c5_231 = arith.constant 5 : index
      %c0_232 = arith.constant 0 : index
      %394 = vector.load %arg20[%c5_231, %c0_232] : memref<8x1xf32, #tpu.memory_space<vmem>>, vector<1x1xf32>
      tpu.vector_store %arg20[%c5_231, %c0_232], %393 {strides = array<i32>} : memref<8x1xf32, #tpu.memory_space<vmem>>, vector<1x1xf32>,
      %c5_233 = arith.constant 5 : index
      %c0_234 = arith.constant 0 : index
      %395 = vector.load %arg21[%c5_233, %c0_234] : memref<8x1xf32, #tpu.memory_space<vmem>>, vector<1x1xf32>
      %396 = arith.mulf %389, %294 : vector<1x256xf32>
      %cst_235 = arith.constant dense<0.000000e+00> : vector<1xf32>
      %397 = vector.multi_reduction <add>, %396, %cst_235 [1] : vector<1x256xf32> to vector<1xf32>
      %398 = vector.shape_cast %397 : vector<1xf32> to vector<1x1xf32>
      %399 = arith.addf %395, %398 : vector<1x1xf32>
      %c5_236 = arith.constant 5 : index
      %c0_237 = arith.constant 0 : index
      %400 = vector.load %arg21[%c5_236, %c0_237] : memref<8x1xf32, #tpu.memory_space<vmem>>, vector<1x1xf32>
      tpu.vector_store %arg21[%c5_236, %c0_237], %399 {strides = array<i32>} : memref<8x1xf32, #tpu.memory_space<vmem>>, vector<1x1xf32>,
      %401 = arith.mulf %311, %28 : vector<1x256xf32>
      %c6_238 = arith.constant 6 : index
      %c0_239 = arith.constant 0 : index
      %402 = vector.load %arg20[%c6_238, %c0_239] : memref<8x1xf32, #tpu.memory_space<vmem>>, vector<1x1xf32>
      %cst_240 = arith.constant dense<0.000000e+00> : vector<1xf32>
      %403 = vector.multi_reduction <add>, %401, %cst_240 [1] : vector<1x256xf32> to vector<1xf32>
      %404 = vector.shape_cast %403 : vector<1xf32> to vector<1x1xf32>
      %405 = arith.addf %402, %404 : vector<1x1xf32>
      %c6_241 = arith.constant 6 : index
      %c0_242 = arith.constant 0 : index
      %406 = vector.load %arg20[%c6_241, %c0_242] : memref<8x1xf32, #tpu.memory_space<vmem>>, vector<1x1xf32>
      tpu.vector_store %arg20[%c6_241, %c0_242], %405 {strides = array<i32>} : memref<8x1xf32, #tpu.memory_space<vmem>>, vector<1x1xf32>,
      %c6_243 = arith.constant 6 : index
      %c0_244 = arith.constant 0 : index
      %407 = vector.load %arg21[%c6_243, %c0_244] : memref<8x1xf32, #tpu.memory_space<vmem>>, vector<1x1xf32>
      %408 = arith.mulf %401, %311 : vector<1x256xf32>
      %cst_245 = arith.constant dense<0.000000e+00> : vector<1xf32>
      %409 = vector.multi_reduction <add>, %408, %cst_245 [1] : vector<1x256xf32> to vector<1xf32>
      %410 = vector.shape_cast %409 : vector<1xf32> to vector<1x1xf32>
      %411 = arith.addf %407, %410 : vector<1x1xf32>
      %c6_246 = arith.constant 6 : index
      %c0_247 = arith.constant 0 : index
      %412 = vector.load %arg21[%c6_246, %c0_247] : memref<8x1xf32, #tpu.memory_space<vmem>>, vector<1x1xf32>
      tpu.vector_store %arg21[%c6_246, %c0_247], %411 {strides = array<i32>} : memref<8x1xf32, #tpu.memory_space<vmem>>, vector<1x1xf32>,
      %413 = arith.mulf %328, %28 : vector<1x256xf32>
      %c7_248 = arith.constant 7 : index
      %c0_249 = arith.constant 0 : index
      %414 = vector.load %arg20[%c7_248, %c0_249] : memref<8x1xf32, #tpu.memory_space<vmem>>, vector<1x1xf32>
      %cst_250 = arith.constant dense<0.000000e+00> : vector<1xf32>
      %415 = vector.multi_reduction <add>, %413, %cst_250 [1] : vector<1x256xf32> to vector<1xf32>
      %416 = vector.shape_cast %415 : vector<1xf32> to vector<1x1xf32>
      %417 = arith.addf %414, %416 : vector<1x1xf32>
      %c7_251 = arith.constant 7 : index
      %c0_252 = arith.constant 0 : index
      %418 = vector.load %arg20[%c7_251, %c0_252] : memref<8x1xf32, #tpu.memory_space<vmem>>, vector<1x1xf32>
      tpu.vector_store %arg20[%c7_251, %c0_252], %417 {strides = array<i32>} : memref<8x1xf32, #tpu.memory_space<vmem>>, vector<1x1xf32>,
      %c7_253 = arith.constant 7 : index
      %c0_254 = arith.constant 0 : index
      %419 = vector.load %arg21[%c7_253, %c0_254] : memref<8x1xf32, #tpu.memory_space<vmem>>, vector<1x1xf32>
      %420 = arith.mulf %413, %328 : vector<1x256xf32>
      %cst_255 = arith.constant dense<0.000000e+00> : vector<1xf32>
      %421 = vector.multi_reduction <add>, %420, %cst_255 [1] : vector<1x256xf32> to vector<1xf32>
      %422 = vector.shape_cast %421 : vector<1xf32> to vector<1x1xf32>
      %423 = arith.addf %419, %422 : vector<1x1xf32>
      %c7_256 = arith.constant 7 : index
      %c0_257 = arith.constant 0 : index
      %424 = vector.load %arg21[%c7_256, %c0_257] : memref<8x1xf32, #tpu.memory_space<vmem>>, vector<1x1xf32>
      tpu.vector_store %arg21[%c7_256, %c0_257], %423 {strides = array<i32>} : memref<8x1xf32, #tpu.memory_space<vmem>>, vector<1x1xf32>,
      %c0_258 = arith.constant 0 : index
      %c0_259 = arith.constant 0 : index
      %425 = memref.load %arg7[%c0_258, %c0_259] : memref<4x4xf32, #tpu.memory_space<smem>>
      %426 = vector.broadcast %425 : f32 to vector<1x256xf32>
      %427 = arith.mulf %426, %2 : vector<1x256xf32>
      %cst_260 = arith.constant 0.000000e+00 : f32
      %428 = vector.broadcast %cst_260 : f32 to vector<1x256xf32>
      %429 = arith.addf %428, %427 : vector<1x256xf32>
      %c1_261 = arith.constant 1 : index
      %c0_262 = arith.constant 0 : index
      %430 = memref.load %arg7[%c1_261, %c0_262] : memref<4x4xf32, #tpu.memory_space<smem>>
      %431 = vector.broadcast %430 : f32 to vector<1x256xf32>
      %432 = arith.mulf %431, %3 : vector<1x256xf32>
      %433 = arith.addf %429, %432 : vector<1x256xf32>
      %c2_263 = arith.constant 2 : index
      %c0_264 = arith.constant 0 : index
      %434 = memref.load %arg7[%c2_263, %c0_264] : memref<4x4xf32, #tpu.memory_space<smem>>
      %435 = vector.broadcast %434 : f32 to vector<1x256xf32>
      %436 = arith.mulf %435, %4 : vector<1x256xf32>
      %437 = arith.addf %433, %436 : vector<1x256xf32>
      %c3_265 = arith.constant 3 : index
      %c0_266 = arith.constant 0 : index
      %438 = memref.load %arg7[%c3_265, %c0_266] : memref<4x4xf32, #tpu.memory_space<smem>>
      %439 = vector.broadcast %438 : f32 to vector<1x256xf32>
      %440 = arith.mulf %439, %5 : vector<1x256xf32>
      %441 = arith.addf %437, %440 : vector<1x256xf32>
      %c0_267 = arith.constant 0 : index
      %c1_268 = arith.constant 1 : index
      %442 = memref.load %arg7[%c0_267, %c1_268] : memref<4x4xf32, #tpu.memory_space<smem>>
      %443 = vector.broadcast %442 : f32 to vector<1x256xf32>
      %444 = arith.mulf %443, %2 : vector<1x256xf32>
      %cst_269 = arith.constant 0.000000e+00 : f32
      %445 = vector.broadcast %cst_269 : f32 to vector<1x256xf32>
      %446 = arith.addf %445, %444 : vector<1x256xf32>
      %c1_270 = arith.constant 1 : index
      %c1_271 = arith.constant 1 : index
      %447 = memref.load %arg7[%c1_270, %c1_271] : memref<4x4xf32, #tpu.memory_space<smem>>
      %448 = vector.broadcast %447 : f32 to vector<1x256xf32>
      %449 = arith.mulf %448, %3 : vector<1x256xf32>
      %450 = arith.addf %446, %449 : vector<1x256xf32>
      %c2_272 = arith.constant 2 : index
      %c1_273 = arith.constant 1 : index
      %451 = memref.load %arg7[%c2_272, %c1_273] : memref<4x4xf32, #tpu.memory_space<smem>>
      %452 = vector.broadcast %451 : f32 to vector<1x256xf32>
      %453 = arith.mulf %452, %4 : vector<1x256xf32>
      %454 = arith.addf %450, %453 : vector<1x256xf32>
      %c3_274 = arith.constant 3 : index
      %c1_275 = arith.constant 1 : index
      %455 = memref.load %arg7[%c3_274, %c1_275] : memref<4x4xf32, #tpu.memory_space<smem>>
      %456 = vector.broadcast %455 : f32 to vector<1x256xf32>
      %457 = arith.mulf %456, %5 : vector<1x256xf32>
      %458 = arith.addf %454, %457 : vector<1x256xf32>
      %c0_276 = arith.constant 0 : index
      %c2_277 = arith.constant 2 : index
      %459 = memref.load %arg7[%c0_276, %c2_277] : memref<4x4xf32, #tpu.memory_space<smem>>
      %460 = vector.broadcast %459 : f32 to vector<1x256xf32>
      %461 = arith.mulf %460, %2 : vector<1x256xf32>
      %cst_278 = arith.constant 0.000000e+00 : f32
      %462 = vector.broadcast %cst_278 : f32 to vector<1x256xf32>
      %463 = arith.addf %462, %461 : vector<1x256xf32>
      %c1_279 = arith.constant 1 : index
      %c2_280 = arith.constant 2 : index
      %464 = memref.load %arg7[%c1_279, %c2_280] : memref<4x4xf32, #tpu.memory_space<smem>>
      %465 = vector.broadcast %464 : f32 to vector<1x256xf32>
      %466 = arith.mulf %465, %3 : vector<1x256xf32>
      %467 = arith.addf %463, %466 : vector<1x256xf32>
      %c2_281 = arith.constant 2 : index
      %c2_282 = arith.constant 2 : index
      %468 = memref.load %arg7[%c2_281, %c2_282] : memref<4x4xf32, #tpu.memory_space<smem>>
      %469 = vector.broadcast %468 : f32 to vector<1x256xf32>
      %470 = arith.mulf %469, %4 : vector<1x256xf32>
      %471 = arith.addf %467, %470 : vector<1x256xf32>
      %c3_283 = arith.constant 3 : index
      %c2_284 = arith.constant 2 : index
      %472 = memref.load %arg7[%c3_283, %c2_284] : memref<4x4xf32, #tpu.memory_space<smem>>
      %473 = vector.broadcast %472 : f32 to vector<1x256xf32>
      %474 = arith.mulf %473, %5 : vector<1x256xf32>
      %475 = arith.addf %471, %474 : vector<1x256xf32>
      %c0_285 = arith.constant 0 : index
      %c3_286 = arith.constant 3 : index
      %476 = memref.load %arg7[%c0_285, %c3_286] : memref<4x4xf32, #tpu.memory_space<smem>>
      %477 = vector.broadcast %476 : f32 to vector<1x256xf32>
      %478 = arith.mulf %477, %2 : vector<1x256xf32>
      %cst_287 = arith.constant 0.000000e+00 : f32
      %479 = vector.broadcast %cst_287 : f32 to vector<1x256xf32>
      %480 = arith.addf %479, %478 : vector<1x256xf32>
      %c1_288 = arith.constant 1 : index
      %c3_289 = arith.constant 3 : index
      %481 = memref.load %arg7[%c1_288, %c3_289] : memref<4x4xf32, #tpu.memory_space<smem>>
      %482 = vector.broadcast %481 : f32 to vector<1x256xf32>
      %483 = arith.mulf %482, %3 : vector<1x256xf32>
      %484 = arith.addf %480, %483 : vector<1x256xf32>
      %c2_290 = arith.constant 2 : index
      %c3_291 = arith.constant 3 : index
      %485 = memref.load %arg7[%c2_290, %c3_291] : memref<4x4xf32, #tpu.memory_space<smem>>
      %486 = vector.broadcast %485 : f32 to vector<1x256xf32>
      %487 = arith.mulf %486, %4 : vector<1x256xf32>
      %488 = arith.addf %484, %487 : vector<1x256xf32>
      %c3_292 = arith.constant 3 : index
      %c3_293 = arith.constant 3 : index
      %489 = memref.load %arg7[%c3_292, %c3_293] : memref<4x4xf32, #tpu.memory_space<smem>>
      %490 = vector.broadcast %489 : f32 to vector<1x256xf32>
      %491 = arith.mulf %490, %5 : vector<1x256xf32>
      %492 = arith.addf %488, %491 : vector<1x256xf32>
      %c0_294 = arith.constant 0 : index
      %c0_295 = arith.constant 0 : index
      %493 = vector.load %arg18[%c0_294, %c0_295] : memref<4x1xf32, #tpu.memory_space<vmem>>, vector<1x1xf32>
      %cst_296 = arith.constant 5.94530313E-4 : f32
      %494 = vector.broadcast %cst_296 : f32 to vector<1x1xf32>
      %495 = arith.mulf %493, %494 : vector<1x1xf32>
      %c0_297 = arith.constant 0 : index
      %c0_298 = arith.constant 0 : index
      %496 = vector.load %arg19[%c0_297, %c0_298] : memref<4x1xf32, #tpu.memory_space<vmem>>, vector<1x1xf32>
      %cst_299 = arith.constant 5.94530313E-4 : f32
      %497 = vector.broadcast %cst_299 : f32 to vector<1x1xf32>
      %498 = arith.mulf %496, %497 : vector<1x1xf32>
      %499 = arith.mulf %495, %495 : vector<1x1xf32>
      %500 = arith.subf %498, %499 : vector<1x1xf32>
      %c0_300 = arith.constant 0 : index
      %501 = memref.load %arg12[%c0_300] : memref<4xf32, #tpu.memory_space<smem>>
      %cst_301 = arith.constant 9.99999974E-6 : f32
      %502 = vector.broadcast %cst_301 : f32 to vector<1x1xf32>
      %503 = arith.addf %500, %502 : vector<1x1xf32>
      %504 = math.rsqrt %503 : vector<1x1xf32>
      %505 = vector.broadcast %501 : f32 to vector<1x1xf32>
      %506 = arith.mulf %505, %504 : vector<1x1xf32>
      %c0_302 = arith.constant 0 : index
      %507 = memref.load %arg13[%c0_302] : memref<4xf32, #tpu.memory_space<smem>>
      %508 = arith.mulf %495, %506 : vector<1x1xf32>
      %509 = vector.broadcast %507 : f32 to vector<1x1xf32>
      %510 = arith.subf %509, %508 : vector<1x1xf32>
      %511 = vector.broadcast %506 : vector<1x1xf32> to vector<1x256xf32>
      %512 = arith.mulf %441, %511 : vector<1x256xf32>
      %513 = vector.broadcast %510 : vector<1x1xf32> to vector<1x256xf32>
      %514 = arith.addf %512, %513 : vector<1x256xf32>
      %cst_303 = arith.constant 0.000000e+00 : f32
      %515 = vector.broadcast %cst_303 : f32 to vector<1x256xf32>
      %516 = arith.maximumf %514, %515 : vector<1x256xf32>
      %c1_304 = arith.constant 1 : index
      %c0_305 = arith.constant 0 : index
      %517 = vector.load %arg18[%c1_304, %c0_305] : memref<4x1xf32, #tpu.memory_space<vmem>>, vector<1x1xf32>
      %cst_306 = arith.constant 5.94530313E-4 : f32
      %518 = vector.broadcast %cst_306 : f32 to vector<1x1xf32>
      %519 = arith.mulf %517, %518 : vector<1x1xf32>
      %c1_307 = arith.constant 1 : index
      %c0_308 = arith.constant 0 : index
      %520 = vector.load %arg19[%c1_307, %c0_308] : memref<4x1xf32, #tpu.memory_space<vmem>>, vector<1x1xf32>
      %cst_309 = arith.constant 5.94530313E-4 : f32
      %521 = vector.broadcast %cst_309 : f32 to vector<1x1xf32>
      %522 = arith.mulf %520, %521 : vector<1x1xf32>
      %523 = arith.mulf %519, %519 : vector<1x1xf32>
      %524 = arith.subf %522, %523 : vector<1x1xf32>
      %c1_310 = arith.constant 1 : index
      %525 = memref.load %arg12[%c1_310] : memref<4xf32, #tpu.memory_space<smem>>
      %cst_311 = arith.constant 9.99999974E-6 : f32
      %526 = vector.broadcast %cst_311 : f32 to vector<1x1xf32>
      %527 = arith.addf %524, %526 : vector<1x1xf32>
      %528 = math.rsqrt %527 : vector<1x1xf32>
      %529 = vector.broadcast %525 : f32 to vector<1x1xf32>
      %530 = arith.mulf %529, %528 : vector<1x1xf32>
      %c1_312 = arith.constant 1 : index
      %531 = memref.load %arg13[%c1_312] : memref<4xf32, #tpu.memory_space<smem>>
      %532 = arith.mulf %519, %530 : vector<1x1xf32>
      %533 = vector.broadcast %531 : f32 to vector<1x1xf32>
      %534 = arith.subf %533, %532 : vector<1x1xf32>
      %535 = vector.broadcast %530 : vector<1x1xf32> to vector<1x256xf32>
      %536 = arith.mulf %458, %535 : vector<1x256xf32>
      %537 = vector.broadcast %534 : vector<1x1xf32> to vector<1x256xf32>
      %538 = arith.addf %536, %537 : vector<1x256xf32>
      %cst_313 = arith.constant 0.000000e+00 : f32
      %539 = vector.broadcast %cst_313 : f32 to vector<1x256xf32>
      %540 = arith.maximumf %538, %539 : vector<1x256xf32>
      %c2_314 = arith.constant 2 : index
      %c0_315 = arith.constant 0 : index
      %541 = vector.load %arg18[%c2_314, %c0_315] : memref<4x1xf32, #tpu.memory_space<vmem>>, vector<1x1xf32>
      %cst_316 = arith.constant 5.94530313E-4 : f32
      %542 = vector.broadcast %cst_316 : f32 to vector<1x1xf32>
      %543 = arith.mulf %541, %542 : vector<1x1xf32>
      %c2_317 = arith.constant 2 : index
      %c0_318 = arith.constant 0 : index
      %544 = vector.load %arg19[%c2_317, %c0_318] : memref<4x1xf32, #tpu.memory_space<vmem>>, vector<1x1xf32>
      %cst_319 = arith.constant 5.94530313E-4 : f32
      %545 = vector.broadcast %cst_319 : f32 to vector<1x1xf32>
      %546 = arith.mulf %544, %545 : vector<1x1xf32>
      %547 = arith.mulf %543, %543 : vector<1x1xf32>
      %548 = arith.subf %546, %547 : vector<1x1xf32>
      %c2_320 = arith.constant 2 : index
      %549 = memref.load %arg12[%c2_320] : memref<4xf32, #tpu.memory_space<smem>>
      %cst_321 = arith.constant 9.99999974E-6 : f32
      %550 = vector.broadcast %cst_321 : f32 to vector<1x1xf32>
      %551 = arith.addf %548, %550 : vector<1x1xf32>
      %552 = math.rsqrt %551 : vector<1x1xf32>
      %553 = vector.broadcast %549 : f32 to vector<1x1xf32>
      %554 = arith.mulf %553, %552 : vector<1x1xf32>
      %c2_322 = arith.constant 2 : index
      %555 = memref.load %arg13[%c2_322] : memref<4xf32, #tpu.memory_space<smem>>
      %556 = arith.mulf %543, %554 : vector<1x1xf32>
      %557 = vector.broadcast %555 : f32 to vector<1x1xf32>
      %558 = arith.subf %557, %556 : vector<1x1xf32>
      %559 = vector.broadcast %554 : vector<1x1xf32> to vector<1x256xf32>
      %560 = arith.mulf %475, %559 : vector<1x256xf32>
      %561 = vector.broadcast %558 : vector<1x1xf32> to vector<1x256xf32>
      %562 = arith.addf %560, %561 : vector<1x256xf32>
      %cst_323 = arith.constant 0.000000e+00 : f32
      %563 = vector.broadcast %cst_323 : f32 to vector<1x256xf32>
      %564 = arith.maximumf %562, %563 : vector<1x256xf32>
      %c3_324 = arith.constant 3 : index
      %c0_325 = arith.constant 0 : index
      %565 = vector.load %arg18[%c3_324, %c0_325] : memref<4x1xf32, #tpu.memory_space<vmem>>, vector<1x1xf32>
      %cst_326 = arith.constant 5.94530313E-4 : f32
      %566 = vector.broadcast %cst_326 : f32 to vector<1x1xf32>
      %567 = arith.mulf %565, %566 : vector<1x1xf32>
      %c3_327 = arith.constant 3 : index
      %c0_328 = arith.constant 0 : index
      %568 = vector.load %arg19[%c3_327, %c0_328] : memref<4x1xf32, #tpu.memory_space<vmem>>, vector<1x1xf32>
      %cst_329 = arith.constant 5.94530313E-4 : f32
      %569 = vector.broadcast %cst_329 : f32 to vector<1x1xf32>
      %570 = arith.mulf %568, %569 : vector<1x1xf32>
      %571 = arith.mulf %567, %567 : vector<1x1xf32>
      %572 = arith.subf %570, %571 : vector<1x1xf32>
      %c3_330 = arith.constant 3 : index
      %573 = memref.load %arg12[%c3_330] : memref<4xf32, #tpu.memory_space<smem>>
      %cst_331 = arith.constant 9.99999974E-6 : f32
      %574 = vector.broadcast %cst_331 : f32 to vector<1x1xf32>
      %575 = arith.addf %572, %574 : vector<1x1xf32>
      %576 = math.rsqrt %575 : vector<1x1xf32>
      %577 = vector.broadcast %573 : f32 to vector<1x1xf32>
      %578 = arith.mulf %577, %576 : vector<1x1xf32>
      %c3_332 = arith.constant 3 : index
      %579 = memref.load %arg13[%c3_332] : memref<4xf32, #tpu.memory_space<smem>>
      %580 = arith.mulf %567, %578 : vector<1x1xf32>
      %581 = vector.broadcast %579 : f32 to vector<1x1xf32>
      %582 = arith.subf %581, %580 : vector<1x1xf32>
      %583 = vector.broadcast %578 : vector<1x1xf32> to vector<1x256xf32>
      %584 = arith.mulf %492, %583 : vector<1x256xf32>
      %585 = vector.broadcast %582 : vector<1x1xf32> to vector<1x256xf32>
      %586 = arith.addf %584, %585 : vector<1x256xf32>
      %cst_333 = arith.constant 0.000000e+00 : f32
      %587 = vector.broadcast %cst_333 : f32 to vector<1x256xf32>
      %588 = arith.maximumf %586, %587 : vector<1x256xf32>
      %c0_334 = arith.constant 0 : index
      %c0_335 = arith.constant 0 : index
      %589 = memref.load %arg9[%c0_334, %c0_335] : memref<4x8xf32, #tpu.memory_space<smem>>
      %590 = vector.broadcast %589 : f32 to vector<1x256xf32>
      %591 = arith.mulf %590, %516 : vector<1x256xf32>
      %cst_336 = arith.constant 0.000000e+00 : f32
      %592 = vector.broadcast %cst_336 : f32 to vector<1x256xf32>
      %593 = arith.addf %592, %591 : vector<1x256xf32>
      %c1_337 = arith.constant 1 : index
      %c0_338 = arith.constant 0 : index
      %594 = memref.load %arg9[%c1_337, %c0_338] : memref<4x8xf32, #tpu.memory_space<smem>>
      %595 = vector.broadcast %594 : f32 to vector<1x256xf32>
      %596 = arith.mulf %595, %540 : vector<1x256xf32>
      %597 = arith.addf %593, %596 : vector<1x256xf32>
      %c2_339 = arith.constant 2 : index
      %c0_340 = arith.constant 0 : index
      %598 = memref.load %arg9[%c2_339, %c0_340] : memref<4x8xf32, #tpu.memory_space<smem>>
      %599 = vector.broadcast %598 : f32 to vector<1x256xf32>
      %600 = arith.mulf %599, %564 : vector<1x256xf32>
      %601 = arith.addf %597, %600 : vector<1x256xf32>
      %c3_341 = arith.constant 3 : index
      %c0_342 = arith.constant 0 : index
      %602 = memref.load %arg9[%c3_341, %c0_342] : memref<4x8xf32, #tpu.memory_space<smem>>
      %603 = vector.broadcast %602 : f32 to vector<1x256xf32>
      %604 = arith.mulf %603, %588 : vector<1x256xf32>
      %605 = arith.addf %601, %604 : vector<1x256xf32>
      %c0_343 = arith.constant 0 : index
      %c1_344 = arith.constant 1 : index
      %606 = memref.load %arg9[%c0_343, %c1_344] : memref<4x8xf32, #tpu.memory_space<smem>>
      %607 = vector.broadcast %606 : f32 to vector<1x256xf32>
      %608 = arith.mulf %607, %516 : vector<1x256xf32>
      %cst_345 = arith.constant 0.000000e+00 : f32
      %609 = vector.broadcast %cst_345 : f32 to vector<1x256xf32>
      %610 = arith.addf %609, %608 : vector<1x256xf32>
      %c1_346 = arith.constant 1 : index
      %c1_347 = arith.constant 1 : index
      %611 = memref.load %arg9[%c1_346, %c1_347] : memref<4x8xf32, #tpu.memory_space<smem>>
      %612 = vector.broadcast %611 : f32 to vector<1x256xf32>
      %613 = arith.mulf %612, %540 : vector<1x256xf32>
      %614 = arith.addf %610, %613 : vector<1x256xf32>
      %c2_348 = arith.constant 2 : index
      %c1_349 = arith.constant 1 : index
      %615 = memref.load %arg9[%c2_348, %c1_349] : memref<4x8xf32, #tpu.memory_space<smem>>
      %616 = vector.broadcast %615 : f32 to vector<1x256xf32>
      %617 = arith.mulf %616, %564 : vector<1x256xf32>
      %618 = arith.addf %614, %617 : vector<1x256xf32>
      %c3_350 = arith.constant 3 : index
      %c1_351 = arith.constant 1 : index
      %619 = memref.load %arg9[%c3_350, %c1_351] : memref<4x8xf32, #tpu.memory_space<smem>>
      %620 = vector.broadcast %619 : f32 to vector<1x256xf32>
      %621 = arith.mulf %620, %588 : vector<1x256xf32>
      %622 = arith.addf %618, %621 : vector<1x256xf32>
      %c0_352 = arith.constant 0 : index
      %c2_353 = arith.constant 2 : index
      %623 = memref.load %arg9[%c0_352, %c2_353] : memref<4x8xf32, #tpu.memory_space<smem>>
      %624 = vector.broadcast %623 : f32 to vector<1x256xf32>
      %625 = arith.mulf %624, %516 : vector<1x256xf32>
      %cst_354 = arith.constant 0.000000e+00 : f32
      %626 = vector.broadcast %cst_354 : f32 to vector<1x256xf32>
      %627 = arith.addf %626, %625 : vector<1x256xf32>
      %c1_355 = arith.constant 1 : index
      %c2_356 = arith.constant 2 : index
      %628 = memref.load %arg9[%c1_355, %c2_356] : memref<4x8xf32, #tpu.memory_space<smem>>
      %629 = vector.broadcast %628 : f32 to vector<1x256xf32>
      %630 = arith.mulf %629, %540 : vector<1x256xf32>
      %631 = arith.addf %627, %630 : vector<1x256xf32>
      %c2_357 = arith.constant 2 : index
      %c2_358 = arith.constant 2 : index
      %632 = memref.load %arg9[%c2_357, %c2_358] : memref<4x8xf32, #tpu.memory_space<smem>>
      %633 = vector.broadcast %632 : f32 to vector<1x256xf32>
      %634 = arith.mulf %633, %564 : vector<1x256xf32>
      %635 = arith.addf %631, %634 : vector<1x256xf32>
      %c3_359 = arith.constant 3 : index
      %c2_360 = arith.constant 2 : index
      %636 = memref.load %arg9[%c3_359, %c2_360] : memref<4x8xf32, #tpu.memory_space<smem>>
      %637 = vector.broadcast %636 : f32 to vector<1x256xf32>
      %638 = arith.mulf %637, %588 : vector<1x256xf32>
      %639 = arith.addf %635, %638 : vector<1x256xf32>
      %c0_361 = arith.constant 0 : index
      %c3_362 = arith.constant 3 : index
      %640 = memref.load %arg9[%c0_361, %c3_362] : memref<4x8xf32, #tpu.memory_space<smem>>
      %641 = vector.broadcast %640 : f32 to vector<1x256xf32>
      %642 = arith.mulf %641, %516 : vector<1x256xf32>
      %cst_363 = arith.constant 0.000000e+00 : f32
      %643 = vector.broadcast %cst_363 : f32 to vector<1x256xf32>
      %644 = arith.addf %643, %642 : vector<1x256xf32>
      %c1_364 = arith.constant 1 : index
      %c3_365 = arith.constant 3 : index
      %645 = memref.load %arg9[%c1_364, %c3_365] : memref<4x8xf32, #tpu.memory_space<smem>>
      %646 = vector.broadcast %645 : f32 to vector<1x256xf32>
      %647 = arith.mulf %646, %540 : vector<1x256xf32>
      %648 = arith.addf %644, %647 : vector<1x256xf32>
      %c2_366 = arith.constant 2 : index
      %c3_367 = arith.constant 3 : index
      %649 = memref.load %arg9[%c2_366, %c3_367] : memref<4x8xf32, #tpu.memory_space<smem>>
      %650 = vector.broadcast %649 : f32 to vector<1x256xf32>
      %651 = arith.mulf %650, %564 : vector<1x256xf32>
      %652 = arith.addf %648, %651 : vector<1x256xf32>
      %c3_368 = arith.constant 3 : index
      %c3_369 = arith.constant 3 : index
      %653 = memref.load %arg9[%c3_368, %c3_369] : memref<4x8xf32, #tpu.memory_space<smem>>
      %654 = vector.broadcast %653 : f32 to vector<1x256xf32>
      %655 = arith.mulf %654, %588 : vector<1x256xf32>
      %656 = arith.addf %652, %655 : vector<1x256xf32>
      %c0_370 = arith.constant 0 : index
      %c4_371 = arith.constant 4 : index
      %657 = memref.load %arg9[%c0_370, %c4_371] : memref<4x8xf32, #tpu.memory_space<smem>>
      %658 = vector.broadcast %657 : f32 to vector<1x256xf32>
      %659 = arith.mulf %658, %516 : vector<1x256xf32>
      %cst_372 = arith.constant 0.000000e+00 : f32
      %660 = vector.broadcast %cst_372 : f32 to vector<1x256xf32>
      %661 = arith.addf %660, %659 : vector<1x256xf32>
      %c1_373 = arith.constant 1 : index
      %c4_374 = arith.constant 4 : index
      %662 = memref.load %arg9[%c1_373, %c4_374] : memref<4x8xf32, #tpu.memory_space<smem>>
      %663 = vector.broadcast %662 : f32 to vector<1x256xf32>
      %664 = arith.mulf %663, %540 : vector<1x256xf32>
      %665 = arith.addf %661, %664 : vector<1x256xf32>
      %c2_375 = arith.constant 2 : index
      %c4_376 = arith.constant 4 : index
      %666 = memref.load %arg9[%c2_375, %c4_376] : memref<4x8xf32, #tpu.memory_space<smem>>
      %667 = vector.broadcast %666 : f32 to vector<1x256xf32>
      %668 = arith.mulf %667, %564 : vector<1x256xf32>
      %669 = arith.addf %665, %668 : vector<1x256xf32>
      %c3_377 = arith.constant 3 : index
      %c4_378 = arith.constant 4 : index
      %670 = memref.load %arg9[%c3_377, %c4_378] : memref<4x8xf32, #tpu.memory_space<smem>>
      %671 = vector.broadcast %670 : f32 to vector<1x256xf32>
      %672 = arith.mulf %671, %588 : vector<1x256xf32>
      %673 = arith.addf %669, %672 : vector<1x256xf32>
      %c0_379 = arith.constant 0 : index
      %c5_380 = arith.constant 5 : index
      %674 = memref.load %arg9[%c0_379, %c5_380] : memref<4x8xf32, #tpu.memory_space<smem>>
      %675 = vector.broadcast %674 : f32 to vector<1x256xf32>
      %676 = arith.mulf %675, %516 : vector<1x256xf32>
      %cst_381 = arith.constant 0.000000e+00 : f32
      %677 = vector.broadcast %cst_381 : f32 to vector<1x256xf32>
      %678 = arith.addf %677, %676 : vector<1x256xf32>
      %c1_382 = arith.constant 1 : index
      %c5_383 = arith.constant 5 : index
      %679 = memref.load %arg9[%c1_382, %c5_383] : memref<4x8xf32, #tpu.memory_space<smem>>
      %680 = vector.broadcast %679 : f32 to vector<1x256xf32>
      %681 = arith.mulf %680, %540 : vector<1x256xf32>
      %682 = arith.addf %678, %681 : vector<1x256xf32>
      %c2_384 = arith.constant 2 : index
      %c5_385 = arith.constant 5 : index
      %683 = memref.load %arg9[%c2_384, %c5_385] : memref<4x8xf32, #tpu.memory_space<smem>>
      %684 = vector.broadcast %683 : f32 to vector<1x256xf32>
      %685 = arith.mulf %684, %564 : vector<1x256xf32>
      %686 = arith.addf %682, %685 : vector<1x256xf32>
      %c3_386 = arith.constant 3 : index
      %c5_387 = arith.constant 5 : index
      %687 = memref.load %arg9[%c3_386, %c5_387] : memref<4x8xf32, #tpu.memory_space<smem>>
      %688 = vector.broadcast %687 : f32 to vector<1x256xf32>
      %689 = arith.mulf %688, %588 : vector<1x256xf32>
      %690 = arith.addf %686, %689 : vector<1x256xf32>
      %c0_388 = arith.constant 0 : index
      %c6_389 = arith.constant 6 : index
      %691 = memref.load %arg9[%c0_388, %c6_389] : memref<4x8xf32, #tpu.memory_space<smem>>
      %692 = vector.broadcast %691 : f32 to vector<1x256xf32>
      %693 = arith.mulf %692, %516 : vector<1x256xf32>
      %cst_390 = arith.constant 0.000000e+00 : f32
      %694 = vector.broadcast %cst_390 : f32 to vector<1x256xf32>
      %695 = arith.addf %694, %693 : vector<1x256xf32>
      %c1_391 = arith.constant 1 : index
      %c6_392 = arith.constant 6 : index
      %696 = memref.load %arg9[%c1_391, %c6_392] : memref<4x8xf32, #tpu.memory_space<smem>>
      %697 = vector.broadcast %696 : f32 to vector<1x256xf32>
      %698 = arith.mulf %697, %540 : vector<1x256xf32>
      %699 = arith.addf %695, %698 : vector<1x256xf32>
      %c2_393 = arith.constant 2 : index
      %c6_394 = arith.constant 6 : index
      %700 = memref.load %arg9[%c2_393, %c6_394] : memref<4x8xf32, #tpu.memory_space<smem>>
      %701 = vector.broadcast %700 : f32 to vector<1x256xf32>
      %702 = arith.mulf %701, %564 : vector<1x256xf32>
      %703 = arith.addf %699, %702 : vector<1x256xf32>
      %c3_395 = arith.constant 3 : index
      %c6_396 = arith.constant 6 : index
      %704 = memref.load %arg9[%c3_395, %c6_396] : memref<4x8xf32, #tpu.memory_space<smem>>
      %705 = vector.broadcast %704 : f32 to vector<1x256xf32>
      %706 = arith.mulf %705, %588 : vector<1x256xf32>
      %707 = arith.addf %703, %706 : vector<1x256xf32>
      %c0_397 = arith.constant 0 : index
      %c7_398 = arith.constant 7 : index
      %708 = memref.load %arg9[%c0_397, %c7_398] : memref<4x8xf32, #tpu.memory_space<smem>>
      %709 = vector.broadcast %708 : f32 to vector<1x256xf32>
      %710 = arith.mulf %709, %516 : vector<1x256xf32>
      %cst_399 = arith.constant 0.000000e+00 : f32
      %711 = vector.broadcast %cst_399 : f32 to vector<1x256xf32>
      %712 = arith.addf %711, %710 : vector<1x256xf32>
      %c1_400 = arith.constant 1 : index
      %c7_401 = arith.constant 7 : index
      %713 = memref.load %arg9[%c1_400, %c7_401] : memref<4x8xf32, #tpu.memory_space<smem>>
      %714 = vector.broadcast %713 : f32 to vector<1x256xf32>
      %715 = arith.mulf %714, %540 : vector<1x256xf32>
      %716 = arith.addf %712, %715 : vector<1x256xf32>
      %c2_402 = arith.constant 2 : index
      %c7_403 = arith.constant 7 : index
      %717 = memref.load %arg9[%c2_402, %c7_403] : memref<4x8xf32, #tpu.memory_space<smem>>
      %718 = vector.broadcast %717 : f32 to vector<1x256xf32>
      %719 = arith.mulf %718, %564 : vector<1x256xf32>
      %720 = arith.addf %716, %719 : vector<1x256xf32>
      %c3_404 = arith.constant 3 : index
      %c7_405 = arith.constant 7 : index
      %721 = memref.load %arg9[%c3_404, %c7_405] : memref<4x8xf32, #tpu.memory_space<smem>>
      %722 = vector.broadcast %721 : f32 to vector<1x256xf32>
      %723 = arith.mulf %722, %588 : vector<1x256xf32>
      %724 = arith.addf %720, %723 : vector<1x256xf32>
      %725 = arith.mulf %605, %28 : vector<1x256xf32>
      %c0_406 = arith.constant 0 : index
      %c0_407 = arith.constant 0 : index
      %726 = vector.load %arg22[%c0_406, %c0_407] : memref<8x1xf32, #tpu.memory_space<vmem>>, vector<1x1xf32>
      %cst_408 = arith.constant dense<0.000000e+00> : vector<1xf32>
      %727 = vector.multi_reduction <add>, %725, %cst_408 [1] : vector<1x256xf32> to vector<1xf32>
      %728 = vector.shape_cast %727 : vector<1xf32> to vector<1x1xf32>
      %729 = arith.addf %726, %728 : vector<1x1xf32>
      %c0_409 = arith.constant 0 : index
      %c0_410 = arith.constant 0 : index
      %730 = vector.load %arg22[%c0_409, %c0_410] : memref<8x1xf32, #tpu.memory_space<vmem>>, vector<1x1xf32>
      tpu.vector_store %arg22[%c0_409, %c0_410], %729 {strides = array<i32>} : memref<8x1xf32, #tpu.memory_space<vmem>>, vector<1x1xf32>,
      %c0_411 = arith.constant 0 : index
      %c0_412 = arith.constant 0 : index
      %731 = vector.load %arg23[%c0_411, %c0_412] : memref<8x1xf32, #tpu.memory_space<vmem>>, vector<1x1xf32>
      %732 = arith.mulf %725, %605 : vector<1x256xf32>
      %cst_413 = arith.constant dense<0.000000e+00> : vector<1xf32>
      %733 = vector.multi_reduction <add>, %732, %cst_413 [1] : vector<1x256xf32> to vector<1xf32>
      %734 = vector.shape_cast %733 : vector<1xf32> to vector<1x1xf32>
      %735 = arith.addf %731, %734 : vector<1x1xf32>
      %c0_414 = arith.constant 0 : index
      %c0_415 = arith.constant 0 : index
      %736 = vector.load %arg23[%c0_414, %c0_415] : memref<8x1xf32, #tpu.memory_space<vmem>>, vector<1x1xf32>
      tpu.vector_store %arg23[%c0_414, %c0_415], %735 {strides = array<i32>} : memref<8x1xf32, #tpu.memory_space<vmem>>, vector<1x1xf32>,
      %737 = arith.mulf %622, %28 : vector<1x256xf32>
      %c1_416 = arith.constant 1 : index
      %c0_417 = arith.constant 0 : index
      %738 = vector.load %arg22[%c1_416, %c0_417] : memref<8x1xf32, #tpu.memory_space<vmem>>, vector<1x1xf32>
      %cst_418 = arith.constant dense<0.000000e+00> : vector<1xf32>
      %739 = vector.multi_reduction <add>, %737, %cst_418 [1] : vector<1x256xf32> to vector<1xf32>
      %740 = vector.shape_cast %739 : vector<1xf32> to vector<1x1xf32>
      %741 = arith.addf %738, %740 : vector<1x1xf32>
      %c1_419 = arith.constant 1 : index
      %c0_420 = arith.constant 0 : index
      %742 = vector.load %arg22[%c1_419, %c0_420] : memref<8x1xf32, #tpu.memory_space<vmem>>, vector<1x1xf32>
      tpu.vector_store %arg22[%c1_419, %c0_420], %741 {strides = array<i32>} : memref<8x1xf32, #tpu.memory_space<vmem>>, vector<1x1xf32>,
      %c1_421 = arith.constant 1 : index
      %c0_422 = arith.constant 0 : index
      %743 = vector.load %arg23[%c1_421, %c0_422] : memref<8x1xf32, #tpu.memory_space<vmem>>, vector<1x1xf32>
      %744 = arith.mulf %737, %622 : vector<1x256xf32>
      %cst_423 = arith.constant dense<0.000000e+00> : vector<1xf32>
      %745 = vector.multi_reduction <add>, %744, %cst_423 [1] : vector<1x256xf32> to vector<1xf32>
      %746 = vector.shape_cast %745 : vector<1xf32> to vector<1x1xf32>
      %747 = arith.addf %743, %746 : vector<1x1xf32>
      %c1_424 = arith.constant 1 : index
      %c0_425 = arith.constant 0 : index
      %748 = vector.load %arg23[%c1_424, %c0_425] : memref<8x1xf32, #tpu.memory_space<vmem>>, vector<1x1xf32>
      tpu.vector_store %arg23[%c1_424, %c0_425], %747 {strides = array<i32>} : memref<8x1xf32, #tpu.memory_space<vmem>>, vector<1x1xf32>,
      %749 = arith.mulf %639, %28 : vector<1x256xf32>
      %c2_426 = arith.constant 2 : index
      %c0_427 = arith.constant 0 : index
      %750 = vector.load %arg22[%c2_426, %c0_427] : memref<8x1xf32, #tpu.memory_space<vmem>>, vector<1x1xf32>
      %cst_428 = arith.constant dense<0.000000e+00> : vector<1xf32>
      %751 = vector.multi_reduction <add>, %749, %cst_428 [1] : vector<1x256xf32> to vector<1xf32>
      %752 = vector.shape_cast %751 : vector<1xf32> to vector<1x1xf32>
      %753 = arith.addf %750, %752 : vector<1x1xf32>
      %c2_429 = arith.constant 2 : index
      %c0_430 = arith.constant 0 : index
      %754 = vector.load %arg22[%c2_429, %c0_430] : memref<8x1xf32, #tpu.memory_space<vmem>>, vector<1x1xf32>
      tpu.vector_store %arg22[%c2_429, %c0_430], %753 {strides = array<i32>} : memref<8x1xf32, #tpu.memory_space<vmem>>, vector<1x1xf32>,
      %c2_431 = arith.constant 2 : index
      %c0_432 = arith.constant 0 : index
      %755 = vector.load %arg23[%c2_431, %c0_432] : memref<8x1xf32, #tpu.memory_space<vmem>>, vector<1x1xf32>
      %756 = arith.mulf %749, %639 : vector<1x256xf32>
      %cst_433 = arith.constant dense<0.000000e+00> : vector<1xf32>
      %757 = vector.multi_reduction <add>, %756, %cst_433 [1] : vector<1x256xf32> to vector<1xf32>
      %758 = vector.shape_cast %757 : vector<1xf32> to vector<1x1xf32>
      %759 = arith.addf %755, %758 : vector<1x1xf32>
      %c2_434 = arith.constant 2 : index
      %c0_435 = arith.constant 0 : index
      %760 = vector.load %arg23[%c2_434, %c0_435] : memref<8x1xf32, #tpu.memory_space<vmem>>, vector<1x1xf32>
      tpu.vector_store %arg23[%c2_434, %c0_435], %759 {strides = array<i32>} : memref<8x1xf32, #tpu.memory_space<vmem>>, vector<1x1xf32>,
      %761 = arith.mulf %656, %28 : vector<1x256xf32>
      %c3_436 = arith.constant 3 : index
      %c0_437 = arith.constant 0 : index
      %762 = vector.load %arg22[%c3_436, %c0_437] : memref<8x1xf32, #tpu.memory_space<vmem>>, vector<1x1xf32>
      %cst_438 = arith.constant dense<0.000000e+00> : vector<1xf32>
      %763 = vector.multi_reduction <add>, %761, %cst_438 [1] : vector<1x256xf32> to vector<1xf32>
      %764 = vector.shape_cast %763 : vector<1xf32> to vector<1x1xf32>
      %765 = arith.addf %762, %764 : vector<1x1xf32>
      %c3_439 = arith.constant 3 : index
      %c0_440 = arith.constant 0 : index
      %766 = vector.load %arg22[%c3_439, %c0_440] : memref<8x1xf32, #tpu.memory_space<vmem>>, vector<1x1xf32>
      tpu.vector_store %arg22[%c3_439, %c0_440], %765 {strides = array<i32>} : memref<8x1xf32, #tpu.memory_space<vmem>>, vector<1x1xf32>,
      %c3_441 = arith.constant 3 : index
      %c0_442 = arith.constant 0 : index
      %767 = vector.load %arg23[%c3_441, %c0_442] : memref<8x1xf32, #tpu.memory_space<vmem>>, vector<1x1xf32>
      %768 = arith.mulf %761, %656 : vector<1x256xf32>
      %cst_443 = arith.constant dense<0.000000e+00> : vector<1xf32>
      %769 = vector.multi_reduction <add>, %768, %cst_443 [1] : vector<1x256xf32> to vector<1xf32>
      %770 = vector.shape_cast %769 : vector<1xf32> to vector<1x1xf32>
      %771 = arith.addf %767, %770 : vector<1x1xf32>
      %c3_444 = arith.constant 3 : index
      %c0_445 = arith.constant 0 : index
      %772 = vector.load %arg23[%c3_444, %c0_445] : memref<8x1xf32, #tpu.memory_space<vmem>>, vector<1x1xf32>
      tpu.vector_store %arg23[%c3_444, %c0_445], %771 {strides = array<i32>} : memref<8x1xf32, #tpu.memory_space<vmem>>, vector<1x1xf32>,
      %773 = arith.mulf %673, %28 : vector<1x256xf32>
      %c4_446 = arith.constant 4 : index
      %c0_447 = arith.constant 0 : index
      %774 = vector.load %arg22[%c4_446, %c0_447] : memref<8x1xf32, #tpu.memory_space<vmem>>, vector<1x1xf32>
      %cst_448 = arith.constant dense<0.000000e+00> : vector<1xf32>
      %775 = vector.multi_reduction <add>, %773, %cst_448 [1] : vector<1x256xf32> to vector<1xf32>
      %776 = vector.shape_cast %775 : vector<1xf32> to vector<1x1xf32>
      %777 = arith.addf %774, %776 : vector<1x1xf32>
      %c4_449 = arith.constant 4 : index
      %c0_450 = arith.constant 0 : index
      %778 = vector.load %arg22[%c4_449, %c0_450] : memref<8x1xf32, #tpu.memory_space<vmem>>, vector<1x1xf32>
      tpu.vector_store %arg22[%c4_449, %c0_450], %777 {strides = array<i32>} : memref<8x1xf32, #tpu.memory_space<vmem>>, vector<1x1xf32>,
      %c4_451 = arith.constant 4 : index
      %c0_452 = arith.constant 0 : index
      %779 = vector.load %arg23[%c4_451, %c0_452] : memref<8x1xf32, #tpu.memory_space<vmem>>, vector<1x1xf32>
      %780 = arith.mulf %773, %673 : vector<1x256xf32>
      %cst_453 = arith.constant dense<0.000000e+00> : vector<1xf32>
      %781 = vector.multi_reduction <add>, %780, %cst_453 [1] : vector<1x256xf32> to vector<1xf32>
      %782 = vector.shape_cast %781 : vector<1xf32> to vector<1x1xf32>
      %783 = arith.addf %779, %782 : vector<1x1xf32>
      %c4_454 = arith.constant 4 : index
      %c0_455 = arith.constant 0 : index
      %784 = vector.load %arg23[%c4_454, %c0_455] : memref<8x1xf32, #tpu.memory_space<vmem>>, vector<1x1xf32>
      tpu.vector_store %arg23[%c4_454, %c0_455], %783 {strides = array<i32>} : memref<8x1xf32, #tpu.memory_space<vmem>>, vector<1x1xf32>,
      %785 = arith.mulf %690, %28 : vector<1x256xf32>
      %c5_456 = arith.constant 5 : index
      %c0_457 = arith.constant 0 : index
      %786 = vector.load %arg22[%c5_456, %c0_457] : memref<8x1xf32, #tpu.memory_space<vmem>>, vector<1x1xf32>
      %cst_458 = arith.constant dense<0.000000e+00> : vector<1xf32>
      %787 = vector.multi_reduction <add>, %785, %cst_458 [1] : vector<1x256xf32> to vector<1xf32>
      %788 = vector.shape_cast %787 : vector<1xf32> to vector<1x1xf32>
      %789 = arith.addf %786, %788 : vector<1x1xf32>
      %c5_459 = arith.constant 5 : index
      %c0_460 = arith.constant 0 : index
      %790 = vector.load %arg22[%c5_459, %c0_460] : memref<8x1xf32, #tpu.memory_space<vmem>>, vector<1x1xf32>
      tpu.vector_store %arg22[%c5_459, %c0_460], %789 {strides = array<i32>} : memref<8x1xf32, #tpu.memory_space<vmem>>, vector<1x1xf32>,
      %c5_461 = arith.constant 5 : index
      %c0_462 = arith.constant 0 : index
      %791 = vector.load %arg23[%c5_461, %c0_462] : memref<8x1xf32, #tpu.memory_space<vmem>>, vector<1x1xf32>
      %792 = arith.mulf %785, %690 : vector<1x256xf32>
      %cst_463 = arith.constant dense<0.000000e+00> : vector<1xf32>
      %793 = vector.multi_reduction <add>, %792, %cst_463 [1] : vector<1x256xf32> to vector<1xf32>
      %794 = vector.shape_cast %793 : vector<1xf32> to vector<1x1xf32>
      %795 = arith.addf %791, %794 : vector<1x1xf32>
      %c5_464 = arith.constant 5 : index
      %c0_465 = arith.constant 0 : index
      %796 = vector.load %arg23[%c5_464, %c0_465] : memref<8x1xf32, #tpu.memory_space<vmem>>, vector<1x1xf32>
      tpu.vector_store %arg23[%c5_464, %c0_465], %795 {strides = array<i32>} : memref<8x1xf32, #tpu.memory_space<vmem>>, vector<1x1xf32>,
      %797 = arith.mulf %707, %28 : vector<1x256xf32>
      %c6_466 = arith.constant 6 : index
      %c0_467 = arith.constant 0 : index
      %798 = vector.load %arg22[%c6_466, %c0_467] : memref<8x1xf32, #tpu.memory_space<vmem>>, vector<1x1xf32>
      %cst_468 = arith.constant dense<0.000000e+00> : vector<1xf32>
      %799 = vector.multi_reduction <add>, %797, %cst_468 [1] : vector<1x256xf32> to vector<1xf32>
      %800 = vector.shape_cast %799 : vector<1xf32> to vector<1x1xf32>
      %801 = arith.addf %798, %800 : vector<1x1xf32>
      %c6_469 = arith.constant 6 : index
      %c0_470 = arith.constant 0 : index
      %802 = vector.load %arg22[%c6_469, %c0_470] : memref<8x1xf32, #tpu.memory_space<vmem>>, vector<1x1xf32>
      tpu.vector_store %arg22[%c6_469, %c0_470], %801 {strides = array<i32>} : memref<8x1xf32, #tpu.memory_space<vmem>>, vector<1x1xf32>,
      %c6_471 = arith.constant 6 : index
      %c0_472 = arith.constant 0 : index
      %803 = vector.load %arg23[%c6_471, %c0_472] : memref<8x1xf32, #tpu.memory_space<vmem>>, vector<1x1xf32>
      %804 = arith.mulf %797, %707 : vector<1x256xf32>
      %cst_473 = arith.constant dense<0.000000e+00> : vector<1xf32>
      %805 = vector.multi_reduction <add>, %804, %cst_473 [1] : vector<1x256xf32> to vector<1xf32>
      %806 = vector.shape_cast %805 : vector<1xf32> to vector<1x1xf32>
      %807 = arith.addf %803, %806 : vector<1x1xf32>
      %c6_474 = arith.constant 6 : index
      %c0_475 = arith.constant 0 : index
      %808 = vector.load %arg23[%c6_474, %c0_475] : memref<8x1xf32, #tpu.memory_space<vmem>>, vector<1x1xf32>
      tpu.vector_store %arg23[%c6_474, %c0_475], %807 {strides = array<i32>} : memref<8x1xf32, #tpu.memory_space<vmem>>, vector<1x1xf32>,
      %809 = arith.mulf %724, %28 : vector<1x256xf32>
      %c7_476 = arith.constant 7 : index
      %c0_477 = arith.constant 0 : index
      %810 = vector.load %arg22[%c7_476, %c0_477] : memref<8x1xf32, #tpu.memory_space<vmem>>, vector<1x1xf32>
      %cst_478 = arith.constant dense<0.000000e+00> : vector<1xf32>
      %811 = vector.multi_reduction <add>, %809, %cst_478 [1] : vector<1x256xf32> to vector<1xf32>
      %812 = vector.shape_cast %811 : vector<1xf32> to vector<1x1xf32>
      %813 = arith.addf %810, %812 : vector<1x1xf32>
      %c7_479 = arith.constant 7 : index
      %c0_480 = arith.constant 0 : index
      %814 = vector.load %arg22[%c7_479, %c0_480] : memref<8x1xf32, #tpu.memory_space<vmem>>, vector<1x1xf32>
      tpu.vector_store %arg22[%c7_479, %c0_480], %813 {strides = array<i32>} : memref<8x1xf32, #tpu.memory_space<vmem>>, vector<1x1xf32>,
      %c7_481 = arith.constant 7 : index
      %c0_482 = arith.constant 0 : index
      %815 = vector.load %arg23[%c7_481, %c0_482] : memref<8x1xf32, #tpu.memory_space<vmem>>, vector<1x1xf32>
      %816 = arith.mulf %809, %724 : vector<1x256xf32>
      %cst_483 = arith.constant dense<0.000000e+00> : vector<1xf32>
      %817 = vector.multi_reduction <add>, %816, %cst_483 [1] : vector<1x256xf32> to vector<1xf32>
      %818 = vector.shape_cast %817 : vector<1xf32> to vector<1x1xf32>
      %819 = arith.addf %815, %818 : vector<1x1xf32>
      %c7_484 = arith.constant 7 : index
      %c0_485 = arith.constant 0 : index
      %820 = vector.load %arg23[%c7_484, %c0_485] : memref<8x1xf32, #tpu.memory_space<vmem>>, vector<1x1xf32>
      tpu.vector_store %arg23[%c7_484, %c0_485], %819 {strides = array<i32>} : memref<8x1xf32, #tpu.memory_space<vmem>>, vector<1x1xf32>,
    } else {
    }
    %c0_4 = arith.constant 0 : index
    %c0_5 = arith.constant 0 : index
    %12 = vector.load %arg16[%c0_4, %c0_5] : memref<4x1xf32, #tpu.memory_space<vmem>>, vector<4x1xf32>
    %c0_6 = arith.constant 0 : index
    %c0_7 = arith.constant 0 : index
    %13 = vector.load %arg14[%c0_6, %c0_7] : memref<4x4xf32, #tpu.memory_space<vmem>>, vector<4x1xf32>
    tpu.vector_store %arg14[%c0_6, %c0_7], %12 {strides = array<i32>} : memref<4x4xf32, #tpu.memory_space<vmem>>, vector<4x1xf32>,
    %c0_8 = arith.constant 0 : index
    %c0_9 = arith.constant 0 : index
    %14 = vector.load %arg17[%c0_8, %c0_9] : memref<4x1xf32, #tpu.memory_space<vmem>>, vector<4x1xf32>
    %c0_10 = arith.constant 0 : index
    %c1 = arith.constant 1 : index
    %15 = vector.load %arg14[%c0_10, %c1] : memref<4x4xf32, #tpu.memory_space<vmem>>, vector<4x1xf32>
    tpu.vector_store %arg14[%c0_10, %c1], %14 {strides = array<i32>} : memref<4x4xf32, #tpu.memory_space<vmem>>, vector<4x1xf32>,
    %c0_11 = arith.constant 0 : index
    %c0_12 = arith.constant 0 : index
    %16 = vector.load %arg18[%c0_11, %c0_12] : memref<4x1xf32, #tpu.memory_space<vmem>>, vector<4x1xf32>
    %c0_13 = arith.constant 0 : index
    %c2 = arith.constant 2 : index
    %17 = vector.load %arg14[%c0_13, %c2] : memref<4x4xf32, #tpu.memory_space<vmem>>, vector<4x1xf32>
    tpu.vector_store %arg14[%c0_13, %c2], %16 {strides = array<i32>} : memref<4x4xf32, #tpu.memory_space<vmem>>, vector<4x1xf32>,
    %c0_14 = arith.constant 0 : index
    %c0_15 = arith.constant 0 : index
    %18 = vector.load %arg19[%c0_14, %c0_15] : memref<4x1xf32, #tpu.memory_space<vmem>>, vector<4x1xf32>
    %c0_16 = arith.constant 0 : index
    %c3 = arith.constant 3 : index
    %19 = vector.load %arg14[%c0_16, %c3] : memref<4x4xf32, #tpu.memory_space<vmem>>, vector<4x1xf32>
    tpu.vector_store %arg14[%c0_16, %c3], %18 {strides = array<i32>} : memref<4x4xf32, #tpu.memory_space<vmem>>, vector<4x1xf32>,
    %c0_17 = arith.constant 0 : index
    %c0_18 = arith.constant 0 : index
    %20 = vector.load %arg20[%c0_17, %c0_18] : memref<8x1xf32, #tpu.memory_space<vmem>>, vector<8x1xf32>
    %c0_19 = arith.constant 0 : index
    %c0_20 = arith.constant 0 : index
    %21 = vector.load %arg15[%c0_19, %c0_20] : memref<8x4xf32, #tpu.memory_space<vmem>>, vector<8x1xf32>
    tpu.vector_store %arg15[%c0_19, %c0_20], %20 {strides = array<i32>} : memref<8x4xf32, #tpu.memory_space<vmem>>, vector<8x1xf32>,
    %c0_21 = arith.constant 0 : index
    %c0_22 = arith.constant 0 : index
    %22 = vector.load %arg21[%c0_21, %c0_22] : memref<8x1xf32, #tpu.memory_space<vmem>>, vector<8x1xf32>
    %c0_23 = arith.constant 0 : index
    %c1_24 = arith.constant 1 : index
    %23 = vector.load %arg15[%c0_23, %c1_24] : memref<8x4xf32, #tpu.memory_space<vmem>>, vector<8x1xf32>
    tpu.vector_store %arg15[%c0_23, %c1_24], %22 {strides = array<i32>} : memref<8x4xf32, #tpu.memory_space<vmem>>, vector<8x1xf32>,
    %c0_25 = arith.constant 0 : index
    %c0_26 = arith.constant 0 : index
    %24 = vector.load %arg22[%c0_25, %c0_26] : memref<8x1xf32, #tpu.memory_space<vmem>>, vector<8x1xf32>
    %c0_27 = arith.constant 0 : index
    %c2_28 = arith.constant 2 : index
    %25 = vector.load %arg15[%c0_27, %c2_28] : memref<8x4xf32, #tpu.memory_space<vmem>>, vector<8x1xf32>
    tpu.vector_store %arg15[%c0_27, %c2_28], %24 {strides = array<i32>} : memref<8x4xf32, #tpu.memory_space<vmem>>, vector<8x1xf32>,
    %c0_29 = arith.constant 0 : index
    %c0_30 = arith.constant 0 : index
    %26 = vector.load %arg23[%c0_29, %c0_30] : memref<8x1xf32, #tpu.memory_space<vmem>>, vector<8x1xf32>
    %c0_31 = arith.constant 0 : index
    %c3_32 = arith.constant 3 : index
    %27 = vector.load %arg15[%c0_31, %c3_32] : memref<8x4xf32, #tpu.memory_space<vmem>>, vector<8x1xf32>
    tpu.vector_store %arg15[%c0_31, %c3_32], %26 {strides = array<i32>} : memref<8x4xf32, #tpu.memory_space<vmem>>, vector<8x1xf32>,
    return
  }
  func.func @transform_0(%arg0: i32, %arg1: i32, %arg2: i32) -> (i32, i32) {
    %c0_i32 = arith.constant 0 : i32
    %c0_i32_0 = arith.constant 0 : i32
    return %c0_i32, %arg2 : i32, i32
  }
  func.func @transform_1(%arg0: i32, %arg1: i32, %arg2: i32) -> (i32, i32) {
    %c0_i32 = arith.constant 0 : i32
    %c0_i32_0 = arith.constant 0 : i32
    return %c0_i32, %arg2 : i32, i32
  }
  func.func @transform_2(%arg0: i32, %arg1: i32, %arg2: i32) -> (i32, i32, i32) {
    %c0_i32 = arith.constant 0 : i32
    %c0_i32_0 = arith.constant 0 : i32
    return %arg1, %c0_i32, %arg2 : i32, i32, i32
  }
  func.func @transform_3(%arg0: i32, %arg1: i32, %arg2: i32) -> (i32, i32) {
    %c0_i32 = arith.constant 0 : i32
    %c0_i32_0 = arith.constant 0 : i32
    %c0_i32_1 = arith.constant 0 : i32
    return %c0_i32, %c0_i32_0 : i32, i32
  }
  func.func @transform_4(%arg0: i32, %arg1: i32, %arg2: i32) -> (i32, i32) {
    %c0_i32 = arith.constant 0 : i32
    %c0_i32_0 = arith.constant 0 : i32
    %c0_i32_1 = arith.constant 0 : i32
    return %c0_i32, %c0_i32_0 : i32, i32
  }
  func.func @transform_5(%arg0: i32, %arg1: i32, %arg2: i32) -> (i32, i32) {
    %c0_i32 = arith.constant 0 : i32
    %c0_i32_0 = arith.constant 0 : i32
    %c0_i32_1 = arith.constant 0 : i32
    return %c0_i32, %c0_i32_0 : i32, i32
  }
  func.func @transform_6(%arg0: i32, %arg1: i32, %arg2: i32) -> (i32, i32) {
    %c0_i32 = arith.constant 0 : i32
    %c0_i32_0 = arith.constant 0 : i32
    %c0_i32_1 = arith.constant 0 : i32
    return %c0_i32, %c0_i32_0 : i32, i32
  }
  func.func @transform_7(%arg0: i32, %arg1: i32, %arg2: i32) -> i32 {
    %c0_i32 = arith.constant 0 : i32
    %c0_i32_0 = arith.constant 0 : i32
    return %c0_i32 : i32
  }
  func.func @transform_8(%arg0: i32, %arg1: i32, %arg2: i32) -> i32 {
    %c0_i32 = arith.constant 0 : i32
    %c0_i32_0 = arith.constant 0 : i32
    return %c0_i32 : i32
  }
  func.func @transform_9(%arg0: i32, %arg1: i32, %arg2: i32) -> i32 {
    %c0_i32 = arith.constant 0 : i32
    %c0_i32_0 = arith.constant 0 : i32
    return %c0_i32 : i32
  }
  func.func @transform_10(%arg0: i32, %arg1: i32, %arg2: i32) -> i32 {
    %c0_i32 = arith.constant 0 : i32
    %c0_i32_0 = arith.constant 0 : i32
    return %c0_i32 : i32
  }
  func.func @transform_11(%arg0: i32, %arg1: i32, %arg2: i32) -> (i32, i32) {
    %c0_i32 = arith.constant 0 : i32
    %c0_i32_0 = arith.constant 0 : i32
    %c0_i32_1 = arith.constant 0 : i32
    return %c0_i32, %c0_i32_0 : i32, i32
  }
  func.func @transform_12(%arg0: i32, %arg1: i32, %arg2: i32) -> (i32, i32) {
    %c0_i32 = arith.constant 0 : i32
    %c0_i32_0 = arith.constant 0 : i32
    %c0_i32_1 = arith.constant 0 : i32
    return %c0_i32, %c0_i32_0 : i32, i32
  }
}

module attributes {stable_mosaic.version = 11 : i64} {
  func.func @_apply_kernel(%arg0: i32, %arg1: i32, %arg2: memref<1x4x256xf32, #tpu.memory_space<vmem>>, %arg3: memref<4x4xf32, #tpu.memory_space<smem>>, %arg4: memref<4x4xf32, #tpu.memory_space<smem>>, %arg5: memref<4x8xf32, #tpu.memory_space<smem>>, %arg6: memref<4x8xf32, #tpu.memory_space<smem>>, %arg7: memref<4xf32, #tpu.memory_space<smem>>, %arg8: memref<4xf32, #tpu.memory_space<smem>>, %arg9: memref<8xf32, #tpu.memory_space<smem>>, %arg10: memref<8xf32, #tpu.memory_space<smem>>, %arg11: memref<1x8x256xf32, #tpu.memory_space<vmem>>) attributes {dimension_semantics = [#tpu.dimension_semantics<parallel>, #tpu.dimension_semantics<parallel>], iteration_bounds = array<i64: 2, 1>, scalar_prefetch = 0 : i64, scratch_operands = 0 : i64, tpu.core_type = #tpu.core_type<tc>, window_params = [{transform_indices = @transform_0, window_bounds = array<i64: 1, 4, 256>}, {transform_indices = @transform_1, window_bounds = array<i64: 4, 4>}, {transform_indices = @transform_2, window_bounds = array<i64: 4, 4>}, {transform_indices = @transform_3, window_bounds = array<i64: 4, 8>}, {transform_indices = @transform_4, window_bounds = array<i64: 4, 8>}, {transform_indices = @transform_5, window_bounds = array<i64: 4>}, {transform_indices = @transform_6, window_bounds = array<i64: 4>}, {transform_indices = @transform_7, window_bounds = array<i64: 8>}, {transform_indices = @transform_8, window_bounds = array<i64: 8>}, {transform_indices = @transform_9, window_bounds = array<i64: 1, 8, 256>}]} {
    %c0 = arith.constant 0 : index
    %c0_0 = arith.constant 0 : index
    %c0_1 = arith.constant 0 : index
    %0 = vector.load %arg2[%c0, %c0_0, %c0_1] : memref<1x4x256xf32, #tpu.memory_space<vmem>>, vector<1x4x256xf32>
    %1 = vector.shape_cast %0 : vector<1x4x256xf32> to vector<4x256xf32>
    %2 = vector.extract_strided_slice %1 {offsets = [0, 0], sizes = [1, 256], strides = [1, 1]} : vector<4x256xf32> to vector<1x256xf32>
    %3 = vector.extract_strided_slice %1 {offsets = [1, 0], sizes = [1, 256], strides = [1, 1]} : vector<4x256xf32> to vector<1x256xf32>
    %4 = vector.extract_strided_slice %1 {offsets = [2, 0], sizes = [1, 256], strides = [1, 1]} : vector<4x256xf32> to vector<1x256xf32>
    %5 = vector.extract_strided_slice %1 {offsets = [3, 0], sizes = [1, 256], strides = [1, 1]} : vector<4x256xf32> to vector<1x256xf32>
    %c0_2 = arith.constant 0 : index
    %c0_3 = arith.constant 0 : index
    %6 = memref.load %arg3[%c0_2, %c0_3] : memref<4x4xf32, #tpu.memory_space<smem>>
    %7 = vector.broadcast %6 : f32 to vector<1x256xf32>
    %8 = arith.mulf %7, %2 : vector<1x256xf32>
    %cst = arith.constant 0.000000e+00 : f32
    %9 = vector.broadcast %cst : f32 to vector<1x256xf32>
    %10 = arith.addf %9, %8 : vector<1x256xf32>
    %c1 = arith.constant 1 : index
    %c0_4 = arith.constant 0 : index
    %11 = memref.load %arg3[%c1, %c0_4] : memref<4x4xf32, #tpu.memory_space<smem>>
    %12 = vector.broadcast %11 : f32 to vector<1x256xf32>
    %13 = arith.mulf %12, %3 : vector<1x256xf32>
    %14 = arith.addf %10, %13 : vector<1x256xf32>
    %c2 = arith.constant 2 : index
    %c0_5 = arith.constant 0 : index
    %15 = memref.load %arg3[%c2, %c0_5] : memref<4x4xf32, #tpu.memory_space<smem>>
    %16 = vector.broadcast %15 : f32 to vector<1x256xf32>
    %17 = arith.mulf %16, %4 : vector<1x256xf32>
    %18 = arith.addf %14, %17 : vector<1x256xf32>
    %c3 = arith.constant 3 : index
    %c0_6 = arith.constant 0 : index
    %19 = memref.load %arg3[%c3, %c0_6] : memref<4x4xf32, #tpu.memory_space<smem>>
    %20 = vector.broadcast %19 : f32 to vector<1x256xf32>
    %21 = arith.mulf %20, %5 : vector<1x256xf32>
    %22 = arith.addf %18, %21 : vector<1x256xf32>
    %c0_7 = arith.constant 0 : index
    %23 = memref.load %arg7[%c0_7] : memref<4xf32, #tpu.memory_space<smem>>
    %24 = vector.broadcast %23 : f32 to vector<1x256xf32>
    %25 = arith.addf %22, %24 : vector<1x256xf32>
    %cst_8 = arith.constant 0.000000e+00 : f32
    %26 = vector.broadcast %cst_8 : f32 to vector<1x256xf32>
    %27 = arith.maximumf %25, %26 : vector<1x256xf32>
    %c0_9 = arith.constant 0 : index
    %c1_10 = arith.constant 1 : index
    %28 = memref.load %arg3[%c0_9, %c1_10] : memref<4x4xf32, #tpu.memory_space<smem>>
    %29 = vector.broadcast %28 : f32 to vector<1x256xf32>
    %30 = arith.mulf %29, %2 : vector<1x256xf32>
    %cst_11 = arith.constant 0.000000e+00 : f32
    %31 = vector.broadcast %cst_11 : f32 to vector<1x256xf32>
    %32 = arith.addf %31, %30 : vector<1x256xf32>
    %c1_12 = arith.constant 1 : index
    %c1_13 = arith.constant 1 : index
    %33 = memref.load %arg3[%c1_12, %c1_13] : memref<4x4xf32, #tpu.memory_space<smem>>
    %34 = vector.broadcast %33 : f32 to vector<1x256xf32>
    %35 = arith.mulf %34, %3 : vector<1x256xf32>
    %36 = arith.addf %32, %35 : vector<1x256xf32>
    %c2_14 = arith.constant 2 : index
    %c1_15 = arith.constant 1 : index
    %37 = memref.load %arg3[%c2_14, %c1_15] : memref<4x4xf32, #tpu.memory_space<smem>>
    %38 = vector.broadcast %37 : f32 to vector<1x256xf32>
    %39 = arith.mulf %38, %4 : vector<1x256xf32>
    %40 = arith.addf %36, %39 : vector<1x256xf32>
    %c3_16 = arith.constant 3 : index
    %c1_17 = arith.constant 1 : index
    %41 = memref.load %arg3[%c3_16, %c1_17] : memref<4x4xf32, #tpu.memory_space<smem>>
    %42 = vector.broadcast %41 : f32 to vector<1x256xf32>
    %43 = arith.mulf %42, %5 : vector<1x256xf32>
    %44 = arith.addf %40, %43 : vector<1x256xf32>
    %c1_18 = arith.constant 1 : index
    %45 = memref.load %arg7[%c1_18] : memref<4xf32, #tpu.memory_space<smem>>
    %46 = vector.broadcast %45 : f32 to vector<1x256xf32>
    %47 = arith.addf %44, %46 : vector<1x256xf32>
    %cst_19 = arith.constant 0.000000e+00 : f32
    %48 = vector.broadcast %cst_19 : f32 to vector<1x256xf32>
    %49 = arith.maximumf %47, %48 : vector<1x256xf32>
    %c0_20 = arith.constant 0 : index
    %c2_21 = arith.constant 2 : index
    %50 = memref.load %arg3[%c0_20, %c2_21] : memref<4x4xf32, #tpu.memory_space<smem>>
    %51 = vector.broadcast %50 : f32 to vector<1x256xf32>
    %52 = arith.mulf %51, %2 : vector<1x256xf32>
    %cst_22 = arith.constant 0.000000e+00 : f32
    %53 = vector.broadcast %cst_22 : f32 to vector<1x256xf32>
    %54 = arith.addf %53, %52 : vector<1x256xf32>
    %c1_23 = arith.constant 1 : index
    %c2_24 = arith.constant 2 : index
    %55 = memref.load %arg3[%c1_23, %c2_24] : memref<4x4xf32, #tpu.memory_space<smem>>
    %56 = vector.broadcast %55 : f32 to vector<1x256xf32>
    %57 = arith.mulf %56, %3 : vector<1x256xf32>
    %58 = arith.addf %54, %57 : vector<1x256xf32>
    %c2_25 = arith.constant 2 : index
    %c2_26 = arith.constant 2 : index
    %59 = memref.load %arg3[%c2_25, %c2_26] : memref<4x4xf32, #tpu.memory_space<smem>>
    %60 = vector.broadcast %59 : f32 to vector<1x256xf32>
    %61 = arith.mulf %60, %4 : vector<1x256xf32>
    %62 = arith.addf %58, %61 : vector<1x256xf32>
    %c3_27 = arith.constant 3 : index
    %c2_28 = arith.constant 2 : index
    %63 = memref.load %arg3[%c3_27, %c2_28] : memref<4x4xf32, #tpu.memory_space<smem>>
    %64 = vector.broadcast %63 : f32 to vector<1x256xf32>
    %65 = arith.mulf %64, %5 : vector<1x256xf32>
    %66 = arith.addf %62, %65 : vector<1x256xf32>
    %c2_29 = arith.constant 2 : index
    %67 = memref.load %arg7[%c2_29] : memref<4xf32, #tpu.memory_space<smem>>
    %68 = vector.broadcast %67 : f32 to vector<1x256xf32>
    %69 = arith.addf %66, %68 : vector<1x256xf32>
    %cst_30 = arith.constant 0.000000e+00 : f32
    %70 = vector.broadcast %cst_30 : f32 to vector<1x256xf32>
    %71 = arith.maximumf %69, %70 : vector<1x256xf32>
    %c0_31 = arith.constant 0 : index
    %c3_32 = arith.constant 3 : index
    %72 = memref.load %arg3[%c0_31, %c3_32] : memref<4x4xf32, #tpu.memory_space<smem>>
    %73 = vector.broadcast %72 : f32 to vector<1x256xf32>
    %74 = arith.mulf %73, %2 : vector<1x256xf32>
    %cst_33 = arith.constant 0.000000e+00 : f32
    %75 = vector.broadcast %cst_33 : f32 to vector<1x256xf32>
    %76 = arith.addf %75, %74 : vector<1x256xf32>
    %c1_34 = arith.constant 1 : index
    %c3_35 = arith.constant 3 : index
    %77 = memref.load %arg3[%c1_34, %c3_35] : memref<4x4xf32, #tpu.memory_space<smem>>
    %78 = vector.broadcast %77 : f32 to vector<1x256xf32>
    %79 = arith.mulf %78, %3 : vector<1x256xf32>
    %80 = arith.addf %76, %79 : vector<1x256xf32>
    %c2_36 = arith.constant 2 : index
    %c3_37 = arith.constant 3 : index
    %81 = memref.load %arg3[%c2_36, %c3_37] : memref<4x4xf32, #tpu.memory_space<smem>>
    %82 = vector.broadcast %81 : f32 to vector<1x256xf32>
    %83 = arith.mulf %82, %4 : vector<1x256xf32>
    %84 = arith.addf %80, %83 : vector<1x256xf32>
    %c3_38 = arith.constant 3 : index
    %c3_39 = arith.constant 3 : index
    %85 = memref.load %arg3[%c3_38, %c3_39] : memref<4x4xf32, #tpu.memory_space<smem>>
    %86 = vector.broadcast %85 : f32 to vector<1x256xf32>
    %87 = arith.mulf %86, %5 : vector<1x256xf32>
    %88 = arith.addf %84, %87 : vector<1x256xf32>
    %c3_40 = arith.constant 3 : index
    %89 = memref.load %arg7[%c3_40] : memref<4xf32, #tpu.memory_space<smem>>
    %90 = vector.broadcast %89 : f32 to vector<1x256xf32>
    %91 = arith.addf %88, %90 : vector<1x256xf32>
    %cst_41 = arith.constant 0.000000e+00 : f32
    %92 = vector.broadcast %cst_41 : f32 to vector<1x256xf32>
    %93 = arith.maximumf %91, %92 : vector<1x256xf32>
    %c0_42 = arith.constant 0 : index
    %c0_43 = arith.constant 0 : index
    %94 = memref.load %arg5[%c0_42, %c0_43] : memref<4x8xf32, #tpu.memory_space<smem>>
    %95 = vector.broadcast %94 : f32 to vector<1x256xf32>
    %96 = arith.mulf %95, %27 : vector<1x256xf32>
    %cst_44 = arith.constant 0.000000e+00 : f32
    %97 = vector.broadcast %cst_44 : f32 to vector<1x256xf32>
    %98 = arith.addf %97, %96 : vector<1x256xf32>
    %c1_45 = arith.constant 1 : index
    %c0_46 = arith.constant 0 : index
    %99 = memref.load %arg5[%c1_45, %c0_46] : memref<4x8xf32, #tpu.memory_space<smem>>
    %100 = vector.broadcast %99 : f32 to vector<1x256xf32>
    %101 = arith.mulf %100, %49 : vector<1x256xf32>
    %102 = arith.addf %98, %101 : vector<1x256xf32>
    %c2_47 = arith.constant 2 : index
    %c0_48 = arith.constant 0 : index
    %103 = memref.load %arg5[%c2_47, %c0_48] : memref<4x8xf32, #tpu.memory_space<smem>>
    %104 = vector.broadcast %103 : f32 to vector<1x256xf32>
    %105 = arith.mulf %104, %71 : vector<1x256xf32>
    %106 = arith.addf %102, %105 : vector<1x256xf32>
    %c3_49 = arith.constant 3 : index
    %c0_50 = arith.constant 0 : index
    %107 = memref.load %arg5[%c3_49, %c0_50] : memref<4x8xf32, #tpu.memory_space<smem>>
    %108 = vector.broadcast %107 : f32 to vector<1x256xf32>
    %109 = arith.mulf %108, %93 : vector<1x256xf32>
    %110 = arith.addf %106, %109 : vector<1x256xf32>
    %c0_51 = arith.constant 0 : index
    %111 = memref.load %arg9[%c0_51] : memref<8xf32, #tpu.memory_space<smem>>
    %112 = vector.broadcast %111 : f32 to vector<1x256xf32>
    %113 = arith.addf %110, %112 : vector<1x256xf32>
    %cst_52 = arith.constant 0.000000e+00 : f32
    %114 = vector.broadcast %cst_52 : f32 to vector<1x256xf32>
    %115 = arith.maximumf %113, %114 : vector<1x256xf32>
    %c0_53 = arith.constant 0 : index
    %c1_54 = arith.constant 1 : index
    %116 = memref.load %arg5[%c0_53, %c1_54] : memref<4x8xf32, #tpu.memory_space<smem>>
    %117 = vector.broadcast %116 : f32 to vector<1x256xf32>
    %118 = arith.mulf %117, %27 : vector<1x256xf32>
    %cst_55 = arith.constant 0.000000e+00 : f32
    %119 = vector.broadcast %cst_55 : f32 to vector<1x256xf32>
    %120 = arith.addf %119, %118 : vector<1x256xf32>
    %c1_56 = arith.constant 1 : index
    %c1_57 = arith.constant 1 : index
    %121 = memref.load %arg5[%c1_56, %c1_57] : memref<4x8xf32, #tpu.memory_space<smem>>
    %122 = vector.broadcast %121 : f32 to vector<1x256xf32>
    %123 = arith.mulf %122, %49 : vector<1x256xf32>
    %124 = arith.addf %120, %123 : vector<1x256xf32>
    %c2_58 = arith.constant 2 : index
    %c1_59 = arith.constant 1 : index
    %125 = memref.load %arg5[%c2_58, %c1_59] : memref<4x8xf32, #tpu.memory_space<smem>>
    %126 = vector.broadcast %125 : f32 to vector<1x256xf32>
    %127 = arith.mulf %126, %71 : vector<1x256xf32>
    %128 = arith.addf %124, %127 : vector<1x256xf32>
    %c3_60 = arith.constant 3 : index
    %c1_61 = arith.constant 1 : index
    %129 = memref.load %arg5[%c3_60, %c1_61] : memref<4x8xf32, #tpu.memory_space<smem>>
    %130 = vector.broadcast %129 : f32 to vector<1x256xf32>
    %131 = arith.mulf %130, %93 : vector<1x256xf32>
    %132 = arith.addf %128, %131 : vector<1x256xf32>
    %c1_62 = arith.constant 1 : index
    %133 = memref.load %arg9[%c1_62] : memref<8xf32, #tpu.memory_space<smem>>
    %134 = vector.broadcast %133 : f32 to vector<1x256xf32>
    %135 = arith.addf %132, %134 : vector<1x256xf32>
    %cst_63 = arith.constant 0.000000e+00 : f32
    %136 = vector.broadcast %cst_63 : f32 to vector<1x256xf32>
    %137 = arith.maximumf %135, %136 : vector<1x256xf32>
    %c0_64 = arith.constant 0 : index
    %c2_65 = arith.constant 2 : index
    %138 = memref.load %arg5[%c0_64, %c2_65] : memref<4x8xf32, #tpu.memory_space<smem>>
    %139 = vector.broadcast %138 : f32 to vector<1x256xf32>
    %140 = arith.mulf %139, %27 : vector<1x256xf32>
    %cst_66 = arith.constant 0.000000e+00 : f32
    %141 = vector.broadcast %cst_66 : f32 to vector<1x256xf32>
    %142 = arith.addf %141, %140 : vector<1x256xf32>
    %c1_67 = arith.constant 1 : index
    %c2_68 = arith.constant 2 : index
    %143 = memref.load %arg5[%c1_67, %c2_68] : memref<4x8xf32, #tpu.memory_space<smem>>
    %144 = vector.broadcast %143 : f32 to vector<1x256xf32>
    %145 = arith.mulf %144, %49 : vector<1x256xf32>
    %146 = arith.addf %142, %145 : vector<1x256xf32>
    %c2_69 = arith.constant 2 : index
    %c2_70 = arith.constant 2 : index
    %147 = memref.load %arg5[%c2_69, %c2_70] : memref<4x8xf32, #tpu.memory_space<smem>>
    %148 = vector.broadcast %147 : f32 to vector<1x256xf32>
    %149 = arith.mulf %148, %71 : vector<1x256xf32>
    %150 = arith.addf %146, %149 : vector<1x256xf32>
    %c3_71 = arith.constant 3 : index
    %c2_72 = arith.constant 2 : index
    %151 = memref.load %arg5[%c3_71, %c2_72] : memref<4x8xf32, #tpu.memory_space<smem>>
    %152 = vector.broadcast %151 : f32 to vector<1x256xf32>
    %153 = arith.mulf %152, %93 : vector<1x256xf32>
    %154 = arith.addf %150, %153 : vector<1x256xf32>
    %c2_73 = arith.constant 2 : index
    %155 = memref.load %arg9[%c2_73] : memref<8xf32, #tpu.memory_space<smem>>
    %156 = vector.broadcast %155 : f32 to vector<1x256xf32>
    %157 = arith.addf %154, %156 : vector<1x256xf32>
    %cst_74 = arith.constant 0.000000e+00 : f32
    %158 = vector.broadcast %cst_74 : f32 to vector<1x256xf32>
    %159 = arith.maximumf %157, %158 : vector<1x256xf32>
    %c0_75 = arith.constant 0 : index
    %c3_76 = arith.constant 3 : index
    %160 = memref.load %arg5[%c0_75, %c3_76] : memref<4x8xf32, #tpu.memory_space<smem>>
    %161 = vector.broadcast %160 : f32 to vector<1x256xf32>
    %162 = arith.mulf %161, %27 : vector<1x256xf32>
    %cst_77 = arith.constant 0.000000e+00 : f32
    %163 = vector.broadcast %cst_77 : f32 to vector<1x256xf32>
    %164 = arith.addf %163, %162 : vector<1x256xf32>
    %c1_78 = arith.constant 1 : index
    %c3_79 = arith.constant 3 : index
    %165 = memref.load %arg5[%c1_78, %c3_79] : memref<4x8xf32, #tpu.memory_space<smem>>
    %166 = vector.broadcast %165 : f32 to vector<1x256xf32>
    %167 = arith.mulf %166, %49 : vector<1x256xf32>
    %168 = arith.addf %164, %167 : vector<1x256xf32>
    %c2_80 = arith.constant 2 : index
    %c3_81 = arith.constant 3 : index
    %169 = memref.load %arg5[%c2_80, %c3_81] : memref<4x8xf32, #tpu.memory_space<smem>>
    %170 = vector.broadcast %169 : f32 to vector<1x256xf32>
    %171 = arith.mulf %170, %71 : vector<1x256xf32>
    %172 = arith.addf %168, %171 : vector<1x256xf32>
    %c3_82 = arith.constant 3 : index
    %c3_83 = arith.constant 3 : index
    %173 = memref.load %arg5[%c3_82, %c3_83] : memref<4x8xf32, #tpu.memory_space<smem>>
    %174 = vector.broadcast %173 : f32 to vector<1x256xf32>
    %175 = arith.mulf %174, %93 : vector<1x256xf32>
    %176 = arith.addf %172, %175 : vector<1x256xf32>
    %c3_84 = arith.constant 3 : index
    %177 = memref.load %arg9[%c3_84] : memref<8xf32, #tpu.memory_space<smem>>
    %178 = vector.broadcast %177 : f32 to vector<1x256xf32>
    %179 = arith.addf %176, %178 : vector<1x256xf32>
    %cst_85 = arith.constant 0.000000e+00 : f32
    %180 = vector.broadcast %cst_85 : f32 to vector<1x256xf32>
    %181 = arith.maximumf %179, %180 : vector<1x256xf32>
    %c0_86 = arith.constant 0 : index
    %c4 = arith.constant 4 : index
    %182 = memref.load %arg5[%c0_86, %c4] : memref<4x8xf32, #tpu.memory_space<smem>>
    %183 = vector.broadcast %182 : f32 to vector<1x256xf32>
    %184 = arith.mulf %183, %27 : vector<1x256xf32>
    %cst_87 = arith.constant 0.000000e+00 : f32
    %185 = vector.broadcast %cst_87 : f32 to vector<1x256xf32>
    %186 = arith.addf %185, %184 : vector<1x256xf32>
    %c1_88 = arith.constant 1 : index
    %c4_89 = arith.constant 4 : index
    %187 = memref.load %arg5[%c1_88, %c4_89] : memref<4x8xf32, #tpu.memory_space<smem>>
    %188 = vector.broadcast %187 : f32 to vector<1x256xf32>
    %189 = arith.mulf %188, %49 : vector<1x256xf32>
    %190 = arith.addf %186, %189 : vector<1x256xf32>
    %c2_90 = arith.constant 2 : index
    %c4_91 = arith.constant 4 : index
    %191 = memref.load %arg5[%c2_90, %c4_91] : memref<4x8xf32, #tpu.memory_space<smem>>
    %192 = vector.broadcast %191 : f32 to vector<1x256xf32>
    %193 = arith.mulf %192, %71 : vector<1x256xf32>
    %194 = arith.addf %190, %193 : vector<1x256xf32>
    %c3_92 = arith.constant 3 : index
    %c4_93 = arith.constant 4 : index
    %195 = memref.load %arg5[%c3_92, %c4_93] : memref<4x8xf32, #tpu.memory_space<smem>>
    %196 = vector.broadcast %195 : f32 to vector<1x256xf32>
    %197 = arith.mulf %196, %93 : vector<1x256xf32>
    %198 = arith.addf %194, %197 : vector<1x256xf32>
    %c4_94 = arith.constant 4 : index
    %199 = memref.load %arg9[%c4_94] : memref<8xf32, #tpu.memory_space<smem>>
    %200 = vector.broadcast %199 : f32 to vector<1x256xf32>
    %201 = arith.addf %198, %200 : vector<1x256xf32>
    %cst_95 = arith.constant 0.000000e+00 : f32
    %202 = vector.broadcast %cst_95 : f32 to vector<1x256xf32>
    %203 = arith.maximumf %201, %202 : vector<1x256xf32>
    %c0_96 = arith.constant 0 : index
    %c5 = arith.constant 5 : index
    %204 = memref.load %arg5[%c0_96, %c5] : memref<4x8xf32, #tpu.memory_space<smem>>
    %205 = vector.broadcast %204 : f32 to vector<1x256xf32>
    %206 = arith.mulf %205, %27 : vector<1x256xf32>
    %cst_97 = arith.constant 0.000000e+00 : f32
    %207 = vector.broadcast %cst_97 : f32 to vector<1x256xf32>
    %208 = arith.addf %207, %206 : vector<1x256xf32>
    %c1_98 = arith.constant 1 : index
    %c5_99 = arith.constant 5 : index
    %209 = memref.load %arg5[%c1_98, %c5_99] : memref<4x8xf32, #tpu.memory_space<smem>>
    %210 = vector.broadcast %209 : f32 to vector<1x256xf32>
    %211 = arith.mulf %210, %49 : vector<1x256xf32>
    %212 = arith.addf %208, %211 : vector<1x256xf32>
    %c2_100 = arith.constant 2 : index
    %c5_101 = arith.constant 5 : index
    %213 = memref.load %arg5[%c2_100, %c5_101] : memref<4x8xf32, #tpu.memory_space<smem>>
    %214 = vector.broadcast %213 : f32 to vector<1x256xf32>
    %215 = arith.mulf %214, %71 : vector<1x256xf32>
    %216 = arith.addf %212, %215 : vector<1x256xf32>
    %c3_102 = arith.constant 3 : index
    %c5_103 = arith.constant 5 : index
    %217 = memref.load %arg5[%c3_102, %c5_103] : memref<4x8xf32, #tpu.memory_space<smem>>
    %218 = vector.broadcast %217 : f32 to vector<1x256xf32>
    %219 = arith.mulf %218, %93 : vector<1x256xf32>
    %220 = arith.addf %216, %219 : vector<1x256xf32>
    %c5_104 = arith.constant 5 : index
    %221 = memref.load %arg9[%c5_104] : memref<8xf32, #tpu.memory_space<smem>>
    %222 = vector.broadcast %221 : f32 to vector<1x256xf32>
    %223 = arith.addf %220, %222 : vector<1x256xf32>
    %cst_105 = arith.constant 0.000000e+00 : f32
    %224 = vector.broadcast %cst_105 : f32 to vector<1x256xf32>
    %225 = arith.maximumf %223, %224 : vector<1x256xf32>
    %c0_106 = arith.constant 0 : index
    %c6 = arith.constant 6 : index
    %226 = memref.load %arg5[%c0_106, %c6] : memref<4x8xf32, #tpu.memory_space<smem>>
    %227 = vector.broadcast %226 : f32 to vector<1x256xf32>
    %228 = arith.mulf %227, %27 : vector<1x256xf32>
    %cst_107 = arith.constant 0.000000e+00 : f32
    %229 = vector.broadcast %cst_107 : f32 to vector<1x256xf32>
    %230 = arith.addf %229, %228 : vector<1x256xf32>
    %c1_108 = arith.constant 1 : index
    %c6_109 = arith.constant 6 : index
    %231 = memref.load %arg5[%c1_108, %c6_109] : memref<4x8xf32, #tpu.memory_space<smem>>
    %232 = vector.broadcast %231 : f32 to vector<1x256xf32>
    %233 = arith.mulf %232, %49 : vector<1x256xf32>
    %234 = arith.addf %230, %233 : vector<1x256xf32>
    %c2_110 = arith.constant 2 : index
    %c6_111 = arith.constant 6 : index
    %235 = memref.load %arg5[%c2_110, %c6_111] : memref<4x8xf32, #tpu.memory_space<smem>>
    %236 = vector.broadcast %235 : f32 to vector<1x256xf32>
    %237 = arith.mulf %236, %71 : vector<1x256xf32>
    %238 = arith.addf %234, %237 : vector<1x256xf32>
    %c3_112 = arith.constant 3 : index
    %c6_113 = arith.constant 6 : index
    %239 = memref.load %arg5[%c3_112, %c6_113] : memref<4x8xf32, #tpu.memory_space<smem>>
    %240 = vector.broadcast %239 : f32 to vector<1x256xf32>
    %241 = arith.mulf %240, %93 : vector<1x256xf32>
    %242 = arith.addf %238, %241 : vector<1x256xf32>
    %c6_114 = arith.constant 6 : index
    %243 = memref.load %arg9[%c6_114] : memref<8xf32, #tpu.memory_space<smem>>
    %244 = vector.broadcast %243 : f32 to vector<1x256xf32>
    %245 = arith.addf %242, %244 : vector<1x256xf32>
    %cst_115 = arith.constant 0.000000e+00 : f32
    %246 = vector.broadcast %cst_115 : f32 to vector<1x256xf32>
    %247 = arith.maximumf %245, %246 : vector<1x256xf32>
    %c0_116 = arith.constant 0 : index
    %c7 = arith.constant 7 : index
    %248 = memref.load %arg5[%c0_116, %c7] : memref<4x8xf32, #tpu.memory_space<smem>>
    %249 = vector.broadcast %248 : f32 to vector<1x256xf32>
    %250 = arith.mulf %249, %27 : vector<1x256xf32>
    %cst_117 = arith.constant 0.000000e+00 : f32
    %251 = vector.broadcast %cst_117 : f32 to vector<1x256xf32>
    %252 = arith.addf %251, %250 : vector<1x256xf32>
    %c1_118 = arith.constant 1 : index
    %c7_119 = arith.constant 7 : index
    %253 = memref.load %arg5[%c1_118, %c7_119] : memref<4x8xf32, #tpu.memory_space<smem>>
    %254 = vector.broadcast %253 : f32 to vector<1x256xf32>
    %255 = arith.mulf %254, %49 : vector<1x256xf32>
    %256 = arith.addf %252, %255 : vector<1x256xf32>
    %c2_120 = arith.constant 2 : index
    %c7_121 = arith.constant 7 : index
    %257 = memref.load %arg5[%c2_120, %c7_121] : memref<4x8xf32, #tpu.memory_space<smem>>
    %258 = vector.broadcast %257 : f32 to vector<1x256xf32>
    %259 = arith.mulf %258, %71 : vector<1x256xf32>
    %260 = arith.addf %256, %259 : vector<1x256xf32>
    %c3_122 = arith.constant 3 : index
    %c7_123 = arith.constant 7 : index
    %261 = memref.load %arg5[%c3_122, %c7_123] : memref<4x8xf32, #tpu.memory_space<smem>>
    %262 = vector.broadcast %261 : f32 to vector<1x256xf32>
    %263 = arith.mulf %262, %93 : vector<1x256xf32>
    %264 = arith.addf %260, %263 : vector<1x256xf32>
    %c7_124 = arith.constant 7 : index
    %265 = memref.load %arg9[%c7_124] : memref<8xf32, #tpu.memory_space<smem>>
    %266 = vector.broadcast %265 : f32 to vector<1x256xf32>
    %267 = arith.addf %264, %266 : vector<1x256xf32>
    %cst_125 = arith.constant 0.000000e+00 : f32
    %268 = vector.broadcast %cst_125 : f32 to vector<1x256xf32>
    %269 = arith.maximumf %267, %268 : vector<1x256xf32>
    %c0_126 = arith.constant 0 : index
    %c0_127 = arith.constant 0 : index
    %270 = memref.load %arg4[%c0_126, %c0_127] : memref<4x4xf32, #tpu.memory_space<smem>>
    %271 = vector.broadcast %270 : f32 to vector<1x256xf32>
    %272 = arith.mulf %271, %2 : vector<1x256xf32>
    %cst_128 = arith.constant 0.000000e+00 : f32
    %273 = vector.broadcast %cst_128 : f32 to vector<1x256xf32>
    %274 = arith.addf %273, %272 : vector<1x256xf32>
    %c1_129 = arith.constant 1 : index
    %c0_130 = arith.constant 0 : index
    %275 = memref.load %arg4[%c1_129, %c0_130] : memref<4x4xf32, #tpu.memory_space<smem>>
    %276 = vector.broadcast %275 : f32 to vector<1x256xf32>
    %277 = arith.mulf %276, %3 : vector<1x256xf32>
    %278 = arith.addf %274, %277 : vector<1x256xf32>
    %c2_131 = arith.constant 2 : index
    %c0_132 = arith.constant 0 : index
    %279 = memref.load %arg4[%c2_131, %c0_132] : memref<4x4xf32, #tpu.memory_space<smem>>
    %280 = vector.broadcast %279 : f32 to vector<1x256xf32>
    %281 = arith.mulf %280, %4 : vector<1x256xf32>
    %282 = arith.addf %278, %281 : vector<1x256xf32>
    %c3_133 = arith.constant 3 : index
    %c0_134 = arith.constant 0 : index
    %283 = memref.load %arg4[%c3_133, %c0_134] : memref<4x4xf32, #tpu.memory_space<smem>>
    %284 = vector.broadcast %283 : f32 to vector<1x256xf32>
    %285 = arith.mulf %284, %5 : vector<1x256xf32>
    %286 = arith.addf %282, %285 : vector<1x256xf32>
    %c0_135 = arith.constant 0 : index
    %287 = memref.load %arg8[%c0_135] : memref<4xf32, #tpu.memory_space<smem>>
    %288 = vector.broadcast %287 : f32 to vector<1x256xf32>
    %289 = arith.addf %286, %288 : vector<1x256xf32>
    %cst_136 = arith.constant 0.000000e+00 : f32
    %290 = vector.broadcast %cst_136 : f32 to vector<1x256xf32>
    %291 = arith.maximumf %289, %290 : vector<1x256xf32>
    %c0_137 = arith.constant 0 : index
    %c1_138 = arith.constant 1 : index
    %292 = memref.load %arg4[%c0_137, %c1_138] : memref<4x4xf32, #tpu.memory_space<smem>>
    %293 = vector.broadcast %292 : f32 to vector<1x256xf32>
    %294 = arith.mulf %293, %2 : vector<1x256xf32>
    %cst_139 = arith.constant 0.000000e+00 : f32
    %295 = vector.broadcast %cst_139 : f32 to vector<1x256xf32>
    %296 = arith.addf %295, %294 : vector<1x256xf32>
    %c1_140 = arith.constant 1 : index
    %c1_141 = arith.constant 1 : index
    %297 = memref.load %arg4[%c1_140, %c1_141] : memref<4x4xf32, #tpu.memory_space<smem>>
    %298 = vector.broadcast %297 : f32 to vector<1x256xf32>
    %299 = arith.mulf %298, %3 : vector<1x256xf32>
    %300 = arith.addf %296, %299 : vector<1x256xf32>
    %c2_142 = arith.constant 2 : index
    %c1_143 = arith.constant 1 : index
    %301 = memref.load %arg4[%c2_142, %c1_143] : memref<4x4xf32, #tpu.memory_space<smem>>
    %302 = vector.broadcast %301 : f32 to vector<1x256xf32>
    %303 = arith.mulf %302, %4 : vector<1x256xf32>
    %304 = arith.addf %300, %303 : vector<1x256xf32>
    %c3_144 = arith.constant 3 : index
    %c1_145 = arith.constant 1 : index
    %305 = memref.load %arg4[%c3_144, %c1_145] : memref<4x4xf32, #tpu.memory_space<smem>>
    %306 = vector.broadcast %305 : f32 to vector<1x256xf32>
    %307 = arith.mulf %306, %5 : vector<1x256xf32>
    %308 = arith.addf %304, %307 : vector<1x256xf32>
    %c1_146 = arith.constant 1 : index
    %309 = memref.load %arg8[%c1_146] : memref<4xf32, #tpu.memory_space<smem>>
    %310 = vector.broadcast %309 : f32 to vector<1x256xf32>
    %311 = arith.addf %308, %310 : vector<1x256xf32>
    %cst_147 = arith.constant 0.000000e+00 : f32
    %312 = vector.broadcast %cst_147 : f32 to vector<1x256xf32>
    %313 = arith.maximumf %311, %312 : vector<1x256xf32>
    %c0_148 = arith.constant 0 : index
    %c2_149 = arith.constant 2 : index
    %314 = memref.load %arg4[%c0_148, %c2_149] : memref<4x4xf32, #tpu.memory_space<smem>>
    %315 = vector.broadcast %314 : f32 to vector<1x256xf32>
    %316 = arith.mulf %315, %2 : vector<1x256xf32>
    %cst_150 = arith.constant 0.000000e+00 : f32
    %317 = vector.broadcast %cst_150 : f32 to vector<1x256xf32>
    %318 = arith.addf %317, %316 : vector<1x256xf32>
    %c1_151 = arith.constant 1 : index
    %c2_152 = arith.constant 2 : index
    %319 = memref.load %arg4[%c1_151, %c2_152] : memref<4x4xf32, #tpu.memory_space<smem>>
    %320 = vector.broadcast %319 : f32 to vector<1x256xf32>
    %321 = arith.mulf %320, %3 : vector<1x256xf32>
    %322 = arith.addf %318, %321 : vector<1x256xf32>
    %c2_153 = arith.constant 2 : index
    %c2_154 = arith.constant 2 : index
    %323 = memref.load %arg4[%c2_153, %c2_154] : memref<4x4xf32, #tpu.memory_space<smem>>
    %324 = vector.broadcast %323 : f32 to vector<1x256xf32>
    %325 = arith.mulf %324, %4 : vector<1x256xf32>
    %326 = arith.addf %322, %325 : vector<1x256xf32>
    %c3_155 = arith.constant 3 : index
    %c2_156 = arith.constant 2 : index
    %327 = memref.load %arg4[%c3_155, %c2_156] : memref<4x4xf32, #tpu.memory_space<smem>>
    %328 = vector.broadcast %327 : f32 to vector<1x256xf32>
    %329 = arith.mulf %328, %5 : vector<1x256xf32>
    %330 = arith.addf %326, %329 : vector<1x256xf32>
    %c2_157 = arith.constant 2 : index
    %331 = memref.load %arg8[%c2_157] : memref<4xf32, #tpu.memory_space<smem>>
    %332 = vector.broadcast %331 : f32 to vector<1x256xf32>
    %333 = arith.addf %330, %332 : vector<1x256xf32>
    %cst_158 = arith.constant 0.000000e+00 : f32
    %334 = vector.broadcast %cst_158 : f32 to vector<1x256xf32>
    %335 = arith.maximumf %333, %334 : vector<1x256xf32>
    %c0_159 = arith.constant 0 : index
    %c3_160 = arith.constant 3 : index
    %336 = memref.load %arg4[%c0_159, %c3_160] : memref<4x4xf32, #tpu.memory_space<smem>>
    %337 = vector.broadcast %336 : f32 to vector<1x256xf32>
    %338 = arith.mulf %337, %2 : vector<1x256xf32>
    %cst_161 = arith.constant 0.000000e+00 : f32
    %339 = vector.broadcast %cst_161 : f32 to vector<1x256xf32>
    %340 = arith.addf %339, %338 : vector<1x256xf32>
    %c1_162 = arith.constant 1 : index
    %c3_163 = arith.constant 3 : index
    %341 = memref.load %arg4[%c1_162, %c3_163] : memref<4x4xf32, #tpu.memory_space<smem>>
    %342 = vector.broadcast %341 : f32 to vector<1x256xf32>
    %343 = arith.mulf %342, %3 : vector<1x256xf32>
    %344 = arith.addf %340, %343 : vector<1x256xf32>
    %c2_164 = arith.constant 2 : index
    %c3_165 = arith.constant 3 : index
    %345 = memref.load %arg4[%c2_164, %c3_165] : memref<4x4xf32, #tpu.memory_space<smem>>
    %346 = vector.broadcast %345 : f32 to vector<1x256xf32>
    %347 = arith.mulf %346, %4 : vector<1x256xf32>
    %348 = arith.addf %344, %347 : vector<1x256xf32>
    %c3_166 = arith.constant 3 : index
    %c3_167 = arith.constant 3 : index
    %349 = memref.load %arg4[%c3_166, %c3_167] : memref<4x4xf32, #tpu.memory_space<smem>>
    %350 = vector.broadcast %349 : f32 to vector<1x256xf32>
    %351 = arith.mulf %350, %5 : vector<1x256xf32>
    %352 = arith.addf %348, %351 : vector<1x256xf32>
    %c3_168 = arith.constant 3 : index
    %353 = memref.load %arg8[%c3_168] : memref<4xf32, #tpu.memory_space<smem>>
    %354 = vector.broadcast %353 : f32 to vector<1x256xf32>
    %355 = arith.addf %352, %354 : vector<1x256xf32>
    %cst_169 = arith.constant 0.000000e+00 : f32
    %356 = vector.broadcast %cst_169 : f32 to vector<1x256xf32>
    %357 = arith.maximumf %355, %356 : vector<1x256xf32>
    %c0_170 = arith.constant 0 : index
    %c0_171 = arith.constant 0 : index
    %358 = memref.load %arg6[%c0_170, %c0_171] : memref<4x8xf32, #tpu.memory_space<smem>>
    %359 = vector.broadcast %358 : f32 to vector<1x256xf32>
    %360 = arith.mulf %359, %291 : vector<1x256xf32>
    %cst_172 = arith.constant 0.000000e+00 : f32
    %361 = vector.broadcast %cst_172 : f32 to vector<1x256xf32>
    %362 = arith.addf %361, %360 : vector<1x256xf32>
    %c1_173 = arith.constant 1 : index
    %c0_174 = arith.constant 0 : index
    %363 = memref.load %arg6[%c1_173, %c0_174] : memref<4x8xf32, #tpu.memory_space<smem>>
    %364 = vector.broadcast %363 : f32 to vector<1x256xf32>
    %365 = arith.mulf %364, %313 : vector<1x256xf32>
    %366 = arith.addf %362, %365 : vector<1x256xf32>
    %c2_175 = arith.constant 2 : index
    %c0_176 = arith.constant 0 : index
    %367 = memref.load %arg6[%c2_175, %c0_176] : memref<4x8xf32, #tpu.memory_space<smem>>
    %368 = vector.broadcast %367 : f32 to vector<1x256xf32>
    %369 = arith.mulf %368, %335 : vector<1x256xf32>
    %370 = arith.addf %366, %369 : vector<1x256xf32>
    %c3_177 = arith.constant 3 : index
    %c0_178 = arith.constant 0 : index
    %371 = memref.load %arg6[%c3_177, %c0_178] : memref<4x8xf32, #tpu.memory_space<smem>>
    %372 = vector.broadcast %371 : f32 to vector<1x256xf32>
    %373 = arith.mulf %372, %357 : vector<1x256xf32>
    %374 = arith.addf %370, %373 : vector<1x256xf32>
    %c0_179 = arith.constant 0 : index
    %375 = memref.load %arg10[%c0_179] : memref<8xf32, #tpu.memory_space<smem>>
    %376 = vector.broadcast %375 : f32 to vector<1x256xf32>
    %377 = arith.addf %374, %376 : vector<1x256xf32>
    %cst_180 = arith.constant 0.000000e+00 : f32
    %378 = vector.broadcast %cst_180 : f32 to vector<1x256xf32>
    %379 = arith.maximumf %377, %378 : vector<1x256xf32>
    %c0_181 = arith.constant 0 : index
    %c1_182 = arith.constant 1 : index
    %380 = memref.load %arg6[%c0_181, %c1_182] : memref<4x8xf32, #tpu.memory_space<smem>>
    %381 = vector.broadcast %380 : f32 to vector<1x256xf32>
    %382 = arith.mulf %381, %291 : vector<1x256xf32>
    %cst_183 = arith.constant 0.000000e+00 : f32
    %383 = vector.broadcast %cst_183 : f32 to vector<1x256xf32>
    %384 = arith.addf %383, %382 : vector<1x256xf32>
    %c1_184 = arith.constant 1 : index
    %c1_185 = arith.constant 1 : index
    %385 = memref.load %arg6[%c1_184, %c1_185] : memref<4x8xf32, #tpu.memory_space<smem>>
    %386 = vector.broadcast %385 : f32 to vector<1x256xf32>
    %387 = arith.mulf %386, %313 : vector<1x256xf32>
    %388 = arith.addf %384, %387 : vector<1x256xf32>
    %c2_186 = arith.constant 2 : index
    %c1_187 = arith.constant 1 : index
    %389 = memref.load %arg6[%c2_186, %c1_187] : memref<4x8xf32, #tpu.memory_space<smem>>
    %390 = vector.broadcast %389 : f32 to vector<1x256xf32>
    %391 = arith.mulf %390, %335 : vector<1x256xf32>
    %392 = arith.addf %388, %391 : vector<1x256xf32>
    %c3_188 = arith.constant 3 : index
    %c1_189 = arith.constant 1 : index
    %393 = memref.load %arg6[%c3_188, %c1_189] : memref<4x8xf32, #tpu.memory_space<smem>>
    %394 = vector.broadcast %393 : f32 to vector<1x256xf32>
    %395 = arith.mulf %394, %357 : vector<1x256xf32>
    %396 = arith.addf %392, %395 : vector<1x256xf32>
    %c1_190 = arith.constant 1 : index
    %397 = memref.load %arg10[%c1_190] : memref<8xf32, #tpu.memory_space<smem>>
    %398 = vector.broadcast %397 : f32 to vector<1x256xf32>
    %399 = arith.addf %396, %398 : vector<1x256xf32>
    %cst_191 = arith.constant 0.000000e+00 : f32
    %400 = vector.broadcast %cst_191 : f32 to vector<1x256xf32>
    %401 = arith.maximumf %399, %400 : vector<1x256xf32>
    %c0_192 = arith.constant 0 : index
    %c2_193 = arith.constant 2 : index
    %402 = memref.load %arg6[%c0_192, %c2_193] : memref<4x8xf32, #tpu.memory_space<smem>>
    %403 = vector.broadcast %402 : f32 to vector<1x256xf32>
    %404 = arith.mulf %403, %291 : vector<1x256xf32>
    %cst_194 = arith.constant 0.000000e+00 : f32
    %405 = vector.broadcast %cst_194 : f32 to vector<1x256xf32>
    %406 = arith.addf %405, %404 : vector<1x256xf32>
    %c1_195 = arith.constant 1 : index
    %c2_196 = arith.constant 2 : index
    %407 = memref.load %arg6[%c1_195, %c2_196] : memref<4x8xf32, #tpu.memory_space<smem>>
    %408 = vector.broadcast %407 : f32 to vector<1x256xf32>
    %409 = arith.mulf %408, %313 : vector<1x256xf32>
    %410 = arith.addf %406, %409 : vector<1x256xf32>
    %c2_197 = arith.constant 2 : index
    %c2_198 = arith.constant 2 : index
    %411 = memref.load %arg6[%c2_197, %c2_198] : memref<4x8xf32, #tpu.memory_space<smem>>
    %412 = vector.broadcast %411 : f32 to vector<1x256xf32>
    %413 = arith.mulf %412, %335 : vector<1x256xf32>
    %414 = arith.addf %410, %413 : vector<1x256xf32>
    %c3_199 = arith.constant 3 : index
    %c2_200 = arith.constant 2 : index
    %415 = memref.load %arg6[%c3_199, %c2_200] : memref<4x8xf32, #tpu.memory_space<smem>>
    %416 = vector.broadcast %415 : f32 to vector<1x256xf32>
    %417 = arith.mulf %416, %357 : vector<1x256xf32>
    %418 = arith.addf %414, %417 : vector<1x256xf32>
    %c2_201 = arith.constant 2 : index
    %419 = memref.load %arg10[%c2_201] : memref<8xf32, #tpu.memory_space<smem>>
    %420 = vector.broadcast %419 : f32 to vector<1x256xf32>
    %421 = arith.addf %418, %420 : vector<1x256xf32>
    %cst_202 = arith.constant 0.000000e+00 : f32
    %422 = vector.broadcast %cst_202 : f32 to vector<1x256xf32>
    %423 = arith.maximumf %421, %422 : vector<1x256xf32>
    %c0_203 = arith.constant 0 : index
    %c3_204 = arith.constant 3 : index
    %424 = memref.load %arg6[%c0_203, %c3_204] : memref<4x8xf32, #tpu.memory_space<smem>>
    %425 = vector.broadcast %424 : f32 to vector<1x256xf32>
    %426 = arith.mulf %425, %291 : vector<1x256xf32>
    %cst_205 = arith.constant 0.000000e+00 : f32
    %427 = vector.broadcast %cst_205 : f32 to vector<1x256xf32>
    %428 = arith.addf %427, %426 : vector<1x256xf32>
    %c1_206 = arith.constant 1 : index
    %c3_207 = arith.constant 3 : index
    %429 = memref.load %arg6[%c1_206, %c3_207] : memref<4x8xf32, #tpu.memory_space<smem>>
    %430 = vector.broadcast %429 : f32 to vector<1x256xf32>
    %431 = arith.mulf %430, %313 : vector<1x256xf32>
    %432 = arith.addf %428, %431 : vector<1x256xf32>
    %c2_208 = arith.constant 2 : index
    %c3_209 = arith.constant 3 : index
    %433 = memref.load %arg6[%c2_208, %c3_209] : memref<4x8xf32, #tpu.memory_space<smem>>
    %434 = vector.broadcast %433 : f32 to vector<1x256xf32>
    %435 = arith.mulf %434, %335 : vector<1x256xf32>
    %436 = arith.addf %432, %435 : vector<1x256xf32>
    %c3_210 = arith.constant 3 : index
    %c3_211 = arith.constant 3 : index
    %437 = memref.load %arg6[%c3_210, %c3_211] : memref<4x8xf32, #tpu.memory_space<smem>>
    %438 = vector.broadcast %437 : f32 to vector<1x256xf32>
    %439 = arith.mulf %438, %357 : vector<1x256xf32>
    %440 = arith.addf %436, %439 : vector<1x256xf32>
    %c3_212 = arith.constant 3 : index
    %441 = memref.load %arg10[%c3_212] : memref<8xf32, #tpu.memory_space<smem>>
    %442 = vector.broadcast %441 : f32 to vector<1x256xf32>
    %443 = arith.addf %440, %442 : vector<1x256xf32>
    %cst_213 = arith.constant 0.000000e+00 : f32
    %444 = vector.broadcast %cst_213 : f32 to vector<1x256xf32>
    %445 = arith.maximumf %443, %444 : vector<1x256xf32>
    %c0_214 = arith.constant 0 : index
    %c4_215 = arith.constant 4 : index
    %446 = memref.load %arg6[%c0_214, %c4_215] : memref<4x8xf32, #tpu.memory_space<smem>>
    %447 = vector.broadcast %446 : f32 to vector<1x256xf32>
    %448 = arith.mulf %447, %291 : vector<1x256xf32>
    %cst_216 = arith.constant 0.000000e+00 : f32
    %449 = vector.broadcast %cst_216 : f32 to vector<1x256xf32>
    %450 = arith.addf %449, %448 : vector<1x256xf32>
    %c1_217 = arith.constant 1 : index
    %c4_218 = arith.constant 4 : index
    %451 = memref.load %arg6[%c1_217, %c4_218] : memref<4x8xf32, #tpu.memory_space<smem>>
    %452 = vector.broadcast %451 : f32 to vector<1x256xf32>
    %453 = arith.mulf %452, %313 : vector<1x256xf32>
    %454 = arith.addf %450, %453 : vector<1x256xf32>
    %c2_219 = arith.constant 2 : index
    %c4_220 = arith.constant 4 : index
    %455 = memref.load %arg6[%c2_219, %c4_220] : memref<4x8xf32, #tpu.memory_space<smem>>
    %456 = vector.broadcast %455 : f32 to vector<1x256xf32>
    %457 = arith.mulf %456, %335 : vector<1x256xf32>
    %458 = arith.addf %454, %457 : vector<1x256xf32>
    %c3_221 = arith.constant 3 : index
    %c4_222 = arith.constant 4 : index
    %459 = memref.load %arg6[%c3_221, %c4_222] : memref<4x8xf32, #tpu.memory_space<smem>>
    %460 = vector.broadcast %459 : f32 to vector<1x256xf32>
    %461 = arith.mulf %460, %357 : vector<1x256xf32>
    %462 = arith.addf %458, %461 : vector<1x256xf32>
    %c4_223 = arith.constant 4 : index
    %463 = memref.load %arg10[%c4_223] : memref<8xf32, #tpu.memory_space<smem>>
    %464 = vector.broadcast %463 : f32 to vector<1x256xf32>
    %465 = arith.addf %462, %464 : vector<1x256xf32>
    %cst_224 = arith.constant 0.000000e+00 : f32
    %466 = vector.broadcast %cst_224 : f32 to vector<1x256xf32>
    %467 = arith.maximumf %465, %466 : vector<1x256xf32>
    %c0_225 = arith.constant 0 : index
    %c5_226 = arith.constant 5 : index
    %468 = memref.load %arg6[%c0_225, %c5_226] : memref<4x8xf32, #tpu.memory_space<smem>>
    %469 = vector.broadcast %468 : f32 to vector<1x256xf32>
    %470 = arith.mulf %469, %291 : vector<1x256xf32>
    %cst_227 = arith.constant 0.000000e+00 : f32
    %471 = vector.broadcast %cst_227 : f32 to vector<1x256xf32>
    %472 = arith.addf %471, %470 : vector<1x256xf32>
    %c1_228 = arith.constant 1 : index
    %c5_229 = arith.constant 5 : index
    %473 = memref.load %arg6[%c1_228, %c5_229] : memref<4x8xf32, #tpu.memory_space<smem>>
    %474 = vector.broadcast %473 : f32 to vector<1x256xf32>
    %475 = arith.mulf %474, %313 : vector<1x256xf32>
    %476 = arith.addf %472, %475 : vector<1x256xf32>
    %c2_230 = arith.constant 2 : index
    %c5_231 = arith.constant 5 : index
    %477 = memref.load %arg6[%c2_230, %c5_231] : memref<4x8xf32, #tpu.memory_space<smem>>
    %478 = vector.broadcast %477 : f32 to vector<1x256xf32>
    %479 = arith.mulf %478, %335 : vector<1x256xf32>
    %480 = arith.addf %476, %479 : vector<1x256xf32>
    %c3_232 = arith.constant 3 : index
    %c5_233 = arith.constant 5 : index
    %481 = memref.load %arg6[%c3_232, %c5_233] : memref<4x8xf32, #tpu.memory_space<smem>>
    %482 = vector.broadcast %481 : f32 to vector<1x256xf32>
    %483 = arith.mulf %482, %357 : vector<1x256xf32>
    %484 = arith.addf %480, %483 : vector<1x256xf32>
    %c5_234 = arith.constant 5 : index
    %485 = memref.load %arg10[%c5_234] : memref<8xf32, #tpu.memory_space<smem>>
    %486 = vector.broadcast %485 : f32 to vector<1x256xf32>
    %487 = arith.addf %484, %486 : vector<1x256xf32>
    %cst_235 = arith.constant 0.000000e+00 : f32
    %488 = vector.broadcast %cst_235 : f32 to vector<1x256xf32>
    %489 = arith.maximumf %487, %488 : vector<1x256xf32>
    %c0_236 = arith.constant 0 : index
    %c6_237 = arith.constant 6 : index
    %490 = memref.load %arg6[%c0_236, %c6_237] : memref<4x8xf32, #tpu.memory_space<smem>>
    %491 = vector.broadcast %490 : f32 to vector<1x256xf32>
    %492 = arith.mulf %491, %291 : vector<1x256xf32>
    %cst_238 = arith.constant 0.000000e+00 : f32
    %493 = vector.broadcast %cst_238 : f32 to vector<1x256xf32>
    %494 = arith.addf %493, %492 : vector<1x256xf32>
    %c1_239 = arith.constant 1 : index
    %c6_240 = arith.constant 6 : index
    %495 = memref.load %arg6[%c1_239, %c6_240] : memref<4x8xf32, #tpu.memory_space<smem>>
    %496 = vector.broadcast %495 : f32 to vector<1x256xf32>
    %497 = arith.mulf %496, %313 : vector<1x256xf32>
    %498 = arith.addf %494, %497 : vector<1x256xf32>
    %c2_241 = arith.constant 2 : index
    %c6_242 = arith.constant 6 : index
    %499 = memref.load %arg6[%c2_241, %c6_242] : memref<4x8xf32, #tpu.memory_space<smem>>
    %500 = vector.broadcast %499 : f32 to vector<1x256xf32>
    %501 = arith.mulf %500, %335 : vector<1x256xf32>
    %502 = arith.addf %498, %501 : vector<1x256xf32>
    %c3_243 = arith.constant 3 : index
    %c6_244 = arith.constant 6 : index
    %503 = memref.load %arg6[%c3_243, %c6_244] : memref<4x8xf32, #tpu.memory_space<smem>>
    %504 = vector.broadcast %503 : f32 to vector<1x256xf32>
    %505 = arith.mulf %504, %357 : vector<1x256xf32>
    %506 = arith.addf %502, %505 : vector<1x256xf32>
    %c6_245 = arith.constant 6 : index
    %507 = memref.load %arg10[%c6_245] : memref<8xf32, #tpu.memory_space<smem>>
    %508 = vector.broadcast %507 : f32 to vector<1x256xf32>
    %509 = arith.addf %506, %508 : vector<1x256xf32>
    %cst_246 = arith.constant 0.000000e+00 : f32
    %510 = vector.broadcast %cst_246 : f32 to vector<1x256xf32>
    %511 = arith.maximumf %509, %510 : vector<1x256xf32>
    %c0_247 = arith.constant 0 : index
    %c7_248 = arith.constant 7 : index
    %512 = memref.load %arg6[%c0_247, %c7_248] : memref<4x8xf32, #tpu.memory_space<smem>>
    %513 = vector.broadcast %512 : f32 to vector<1x256xf32>
    %514 = arith.mulf %513, %291 : vector<1x256xf32>
    %cst_249 = arith.constant 0.000000e+00 : f32
    %515 = vector.broadcast %cst_249 : f32 to vector<1x256xf32>
    %516 = arith.addf %515, %514 : vector<1x256xf32>
    %c1_250 = arith.constant 1 : index
    %c7_251 = arith.constant 7 : index
    %517 = memref.load %arg6[%c1_250, %c7_251] : memref<4x8xf32, #tpu.memory_space<smem>>
    %518 = vector.broadcast %517 : f32 to vector<1x256xf32>
    %519 = arith.mulf %518, %313 : vector<1x256xf32>
    %520 = arith.addf %516, %519 : vector<1x256xf32>
    %c2_252 = arith.constant 2 : index
    %c7_253 = arith.constant 7 : index
    %521 = memref.load %arg6[%c2_252, %c7_253] : memref<4x8xf32, #tpu.memory_space<smem>>
    %522 = vector.broadcast %521 : f32 to vector<1x256xf32>
    %523 = arith.mulf %522, %335 : vector<1x256xf32>
    %524 = arith.addf %520, %523 : vector<1x256xf32>
    %c3_254 = arith.constant 3 : index
    %c7_255 = arith.constant 7 : index
    %525 = memref.load %arg6[%c3_254, %c7_255] : memref<4x8xf32, #tpu.memory_space<smem>>
    %526 = vector.broadcast %525 : f32 to vector<1x256xf32>
    %527 = arith.mulf %526, %357 : vector<1x256xf32>
    %528 = arith.addf %524, %527 : vector<1x256xf32>
    %c7_256 = arith.constant 7 : index
    %529 = memref.load %arg10[%c7_256] : memref<8xf32, #tpu.memory_space<smem>>
    %530 = vector.broadcast %529 : f32 to vector<1x256xf32>
    %531 = arith.addf %528, %530 : vector<1x256xf32>
    %cst_257 = arith.constant 0.000000e+00 : f32
    %532 = vector.broadcast %cst_257 : f32 to vector<1x256xf32>
    %533 = arith.maximumf %531, %532 : vector<1x256xf32>
    %534 = arith.addf %115, %379 : vector<1x256xf32>
    %c0_258 = arith.constant 0 : index
    %c0_259 = arith.constant 0 : index
    %c0_260 = arith.constant 0 : index
    %535 = vector.load %arg11[%c0_258, %c0_259, %c0_260] : memref<1x8x256xf32, #tpu.memory_space<vmem>>, vector<1x1x256xf32>
    %536 = vector.shape_cast %535 : vector<1x1x256xf32> to vector<1x256xf32>
    %537 = vector.shape_cast %534 : vector<1x256xf32> to vector<1x1x256xf32>
    tpu.vector_store %arg11[%c0_258, %c0_259, %c0_260], %537 {strides = array<i32>} : memref<1x8x256xf32, #tpu.memory_space<vmem>>, vector<1x1x256xf32>,
    %538 = arith.addf %137, %401 : vector<1x256xf32>
    %c0_261 = arith.constant 0 : index
    %c1_262 = arith.constant 1 : index
    %c0_263 = arith.constant 0 : index
    %539 = vector.load %arg11[%c0_261, %c1_262, %c0_263] : memref<1x8x256xf32, #tpu.memory_space<vmem>>, vector<1x1x256xf32>
    %540 = vector.shape_cast %539 : vector<1x1x256xf32> to vector<1x256xf32>
    %541 = vector.shape_cast %538 : vector<1x256xf32> to vector<1x1x256xf32>
    tpu.vector_store %arg11[%c0_261, %c1_262, %c0_263], %541 {strides = array<i32>} : memref<1x8x256xf32, #tpu.memory_space<vmem>>, vector<1x1x256xf32>,
    %542 = arith.addf %159, %423 : vector<1x256xf32>
    %c0_264 = arith.constant 0 : index
    %c2_265 = arith.constant 2 : index
    %c0_266 = arith.constant 0 : index
    %543 = vector.load %arg11[%c0_264, %c2_265, %c0_266] : memref<1x8x256xf32, #tpu.memory_space<vmem>>, vector<1x1x256xf32>
    %544 = vector.shape_cast %543 : vector<1x1x256xf32> to vector<1x256xf32>
    %545 = vector.shape_cast %542 : vector<1x256xf32> to vector<1x1x256xf32>
    tpu.vector_store %arg11[%c0_264, %c2_265, %c0_266], %545 {strides = array<i32>} : memref<1x8x256xf32, #tpu.memory_space<vmem>>, vector<1x1x256xf32>,
    %546 = arith.addf %181, %445 : vector<1x256xf32>
    %c0_267 = arith.constant 0 : index
    %c3_268 = arith.constant 3 : index
    %c0_269 = arith.constant 0 : index
    %547 = vector.load %arg11[%c0_267, %c3_268, %c0_269] : memref<1x8x256xf32, #tpu.memory_space<vmem>>, vector<1x1x256xf32>
    %548 = vector.shape_cast %547 : vector<1x1x256xf32> to vector<1x256xf32>
    %549 = vector.shape_cast %546 : vector<1x256xf32> to vector<1x1x256xf32>
    tpu.vector_store %arg11[%c0_267, %c3_268, %c0_269], %549 {strides = array<i32>} : memref<1x8x256xf32, #tpu.memory_space<vmem>>, vector<1x1x256xf32>,
    %550 = arith.addf %203, %467 : vector<1x256xf32>
    %c0_270 = arith.constant 0 : index
    %c4_271 = arith.constant 4 : index
    %c0_272 = arith.constant 0 : index
    %551 = vector.load %arg11[%c0_270, %c4_271, %c0_272] : memref<1x8x256xf32, #tpu.memory_space<vmem>>, vector<1x1x256xf32>
    %552 = vector.shape_cast %551 : vector<1x1x256xf32> to vector<1x256xf32>
    %553 = vector.shape_cast %550 : vector<1x256xf32> to vector<1x1x256xf32>
    tpu.vector_store %arg11[%c0_270, %c4_271, %c0_272], %553 {strides = array<i32>} : memref<1x8x256xf32, #tpu.memory_space<vmem>>, vector<1x1x256xf32>,
    %554 = arith.addf %225, %489 : vector<1x256xf32>
    %c0_273 = arith.constant 0 : index
    %c5_274 = arith.constant 5 : index
    %c0_275 = arith.constant 0 : index
    %555 = vector.load %arg11[%c0_273, %c5_274, %c0_275] : memref<1x8x256xf32, #tpu.memory_space<vmem>>, vector<1x1x256xf32>
    %556 = vector.shape_cast %555 : vector<1x1x256xf32> to vector<1x256xf32>
    %557 = vector.shape_cast %554 : vector<1x256xf32> to vector<1x1x256xf32>
    tpu.vector_store %arg11[%c0_273, %c5_274, %c0_275], %557 {strides = array<i32>} : memref<1x8x256xf32, #tpu.memory_space<vmem>>, vector<1x1x256xf32>,
    %558 = arith.addf %247, %511 : vector<1x256xf32>
    %c0_276 = arith.constant 0 : index
    %c6_277 = arith.constant 6 : index
    %c0_278 = arith.constant 0 : index
    %559 = vector.load %arg11[%c0_276, %c6_277, %c0_278] : memref<1x8x256xf32, #tpu.memory_space<vmem>>, vector<1x1x256xf32>
    %560 = vector.shape_cast %559 : vector<1x1x256xf32> to vector<1x256xf32>
    %561 = vector.shape_cast %558 : vector<1x256xf32> to vector<1x1x256xf32>
    tpu.vector_store %arg11[%c0_276, %c6_277, %c0_278], %561 {strides = array<i32>} : memref<1x8x256xf32, #tpu.memory_space<vmem>>, vector<1x1x256xf32>,
    %562 = arith.addf %269, %533 : vector<1x256xf32>
    %c0_279 = arith.constant 0 : index
    %c7_280 = arith.constant 7 : index
    %c0_281 = arith.constant 0 : index
    %563 = vector.load %arg11[%c0_279, %c7_280, %c0_281] : memref<1x8x256xf32, #tpu.memory_space<vmem>>, vector<1x1x256xf32>
    %564 = vector.shape_cast %563 : vector<1x1x256xf32> to vector<1x256xf32>
    %565 = vector.shape_cast %562 : vector<1x256xf32> to vector<1x1x256xf32>
    tpu.vector_store %arg11[%c0_279, %c7_280, %c0_281], %565 {strides = array<i32>} : memref<1x8x256xf32, #tpu.memory_space<vmem>>, vector<1x1x256xf32>,
    return
  }
  func.func @transform_0(%arg0: i32, %arg1: i32) -> (i32, i32, i32) {
    %c0_i32 = arith.constant 0 : i32
    %c0_i32_0 = arith.constant 0 : i32
    return %arg0, %c0_i32, %arg1 : i32, i32, i32
  }
  func.func @transform_1(%arg0: i32, %arg1: i32) -> (i32, i32) {
    %c0_i32 = arith.constant 0 : i32
    %c0_i32_0 = arith.constant 0 : i32
    %c0_i32_1 = arith.constant 0 : i32
    return %c0_i32, %c0_i32_0 : i32, i32
  }
  func.func @transform_2(%arg0: i32, %arg1: i32) -> (i32, i32) {
    %c0_i32 = arith.constant 0 : i32
    %c0_i32_0 = arith.constant 0 : i32
    %c0_i32_1 = arith.constant 0 : i32
    return %c0_i32, %c0_i32_0 : i32, i32
  }
  func.func @transform_3(%arg0: i32, %arg1: i32) -> (i32, i32) {
    %c0_i32 = arith.constant 0 : i32
    %c0_i32_0 = arith.constant 0 : i32
    %c0_i32_1 = arith.constant 0 : i32
    return %c0_i32, %c0_i32_0 : i32, i32
  }
  func.func @transform_4(%arg0: i32, %arg1: i32) -> (i32, i32) {
    %c0_i32 = arith.constant 0 : i32
    %c0_i32_0 = arith.constant 0 : i32
    %c0_i32_1 = arith.constant 0 : i32
    return %c0_i32, %c0_i32_0 : i32, i32
  }
  func.func @transform_5(%arg0: i32, %arg1: i32) -> i32 {
    %c0_i32 = arith.constant 0 : i32
    %c0_i32_0 = arith.constant 0 : i32
    return %c0_i32 : i32
  }
  func.func @transform_6(%arg0: i32, %arg1: i32) -> i32 {
    %c0_i32 = arith.constant 0 : i32
    %c0_i32_0 = arith.constant 0 : i32
    return %c0_i32 : i32
  }
  func.func @transform_7(%arg0: i32, %arg1: i32) -> i32 {
    %c0_i32 = arith.constant 0 : i32
    %c0_i32_0 = arith.constant 0 : i32
    return %c0_i32 : i32
  }
  func.func @transform_8(%arg0: i32, %arg1: i32) -> i32 {
    %c0_i32 = arith.constant 0 : i32
    %c0_i32_0 = arith.constant 0 : i32
    return %c0_i32 : i32
  }
  func.func @transform_9(%arg0: i32, %arg1: i32) -> (i32, i32, i32) {
    %c0_i32 = arith.constant 0 : i32
    %c0_i32_0 = arith.constant 0 : i32
    return %arg0, %c0_i32, %arg1 : i32, i32, i32
  }
}

</mosaic_0001>

<bundles_post_ra>
// kernel: _forward_impl.3
= control target key start
LH: loop header
LB: loop body
LE: loop exit
PB: predicated region body
PF: predicated region fallthrough
CT: control target
= control target key end

     0   :  { %14 = vsyncpa [#allocation3], 0  ;;  %s2568_s0 = inlined_call_operand.vmem [shape: f32[2,4,256], index: 0, kind: input, shape index: {}]   ;;  %s2569_s1 = inlined_call_operand.vmem [shape: f32[4,4], index: 1, kind: input, shape index: {}]   ;;  %s2570_s2 = inlined_call_operand.vmem [shape: f32[4,4], index: 2, kind: input, shape index: {}]   ;;  %s2571_s3 = inlined_call_operand.vmem [shape: f32[4,8], index: 3, kind: input, shape index: {}]   ;;  %s2572_s4 = inlined_call_operand.vmem [shape: f32[4,8], index: 4, kind: input, shape index: {}]   ;;  %s2573_s5 = inlined_call_operand.vmem [shape: f32[4], index: 5, kind: input, shape index: {}]   ;;  %s2574_s6 = inlined_call_operand.vmem [shape: f32[4], index: 6, kind: input, shape index: {}]   ;;  %s2575_s7 = inlined_call_operand.vmem [shape: f32[8], index: 7, kind: input, shape index: {}]   ;;  %s2576_s8 = inlined_call_operand.vmem [shape: f32[8], index: 8, kind: input, shape index: {}]   ;;  %s2577_s9 = inlined_call_operand.vmem [shape: f32[2,8,256], index: 9, kind: output, shape index: {}]  }
   0x1   :  { %15 = vsyncpa [#allocation5], 0 }
   0x2   :  { %16 = vsyncpa [#allocation8], 0 }
   0x3   :  { %17 = vsyncpa [#allocation11], 0 }
   0x4   :  { %18 = vsyncpa [#allocation14], 0  ;;  %s1881_s30 = smov 0   ;;  %s1883_s10 = smov 0  }
   0x5   :  { %s1885_s11 = smov 0  }
   0x6 LB: > { %s289_s14 = sshll.u32 %s2570_s2, 4  ;;  %s1380_s15 = sadd.s32 4294967295, %s1820_s11   ;;  %s1820_s11 = sphi %s1885_s11, %s24_s11   ;;  %s1816_s10 = sphi %s1883_s10, %s2590_s10   ;;  %s1812_s30 = sphi %s1881_s30, %s2589_s30   ;;  %s290_s14 = int_to_ptr.vmem [resolvable:$true] %s289_s14 }
   0x7   : > { %p1382_p0 = scmp.ge.s32.totalorder %s1820_s11, 1  ;;  %p265_p1 = scmp.lt.s32.totalorder %s1820_s11, 3 }
   0x8   : > { %p1902_p2 = scmp.eq.s32.totalorder %s1380_s15, 0  ;;  %s311_s20 = sshll.u32 %s2572_s4, 4  ;;  %s312_s20 = int_to_ptr.vmem [resolvable:$true] %s311_s20 }
   0x9   : > { %p1906_p3 = pnand %p1382_p0, %p265_p1  ;;  %s333_s23 = sshll.u32 %s2574_s6, 4  ;;  %s1918_s23 = int_to_ptr.vmem [resolvable:$true] %s333_s23 }
   0xa   : > { %s2581_s16 = scalar_select %p1902_p2, 1, 0 }
   0xb   : > { %s2582_s17 = scalar_select %p1906_p3, 1, 0 }
   0xc   : > { %p1584_p4 = pneg %p1906_p3  ;;  %s1658_s25 = scalar_lea.vmem %s290_s14, 64 }
   0xd   : > { %p1659_p6 = scmp.ne.s32.totalorder %s290_s14, %s1658_s25  ;;  %p1666_p10 = scmp.lt.s32.totalorder %s290_s14, %s290_s14 }
   0xe   : > { %p1922_p5 = pnand %p1902_p2, %p1584_p4  ;;  %p1667_p11 = scmp.lt.s32.totalorder %s1658_s25, %s1658_s25 }
  0x10   : > { %p1928_p7 = pneg %p1922_p5  ;;  %p1668_p12 = por %p1667_p11, %p1666_p10 }
  0x12   : > { %p1661_p8 = pnand %p1928_p7, %p1659_p6 }
  0x14   : > { %p1662_p9 = pneg %p1661_p8 }
  0x16   : > { %p1669_p13 = pnand %p1668_p12, %p1662_p9 }
  0x18   : > { %1672 = shalt.err (!%p1669_p13)
}
  0x19   : > { %s1822_s27 = smov [#allocation4]   ;;  %s1673_s28 = scalar_lea.vmem %s312_s20, 64 }
  0x1a   : > { %1590 = dma.vmem_to_smem (!%p1922_p5), %s290_s14, 64, %s1822_s27, [#allocation5]  }
  0x1b   : > { %p1674_p0 = scmp.ne.s32.totalorder %s312_s20, %s1673_s28  ;;  %p1681_p2 = scmp.lt.s32.totalorder %s312_s20, %s312_s20 }
  0x1c   : > { %p1682_p3 = scmp.lt.s32.totalorder %s1673_s28, %s1673_s28 }
  0x1d   : > { %p1676_p1 = pnand %p1674_p0, %p1928_p7 }
  0x1e   : > { %p1683_p6 = por %p1682_p3, %p1681_p2 }
  0x1f   : > { %p1677_p4 = pneg %p1676_p1 }
  0x21   : > { %p1684_p8 = pnand %p1683_p6, %p1677_p4 }
  0x23   : > { %1687 = shalt.err (!%p1684_p8)
}
  0x24   : > { %s1823_s29 = smov [#allocation7]   ;;  %s1688_s12 = scalar_lea.vmem %s1918_s23, 16 }
  0x25   : > { %1596 = dma.vmem_to_smem (!%p1922_p5), %s312_s20, 64, %s1823_s29, [#allocation8]  }
  0x26   : > { %p1689_p9 = scmp.ne.s32.totalorder %s1918_s23, %s1688_s12  ;;  %p1696_p12 = scmp.lt.s32.totalorder %s1918_s23, %s1918_s23 }
  0x27   : > { %p1697_p13 = scmp.lt.s32.totalorder %s1688_s12, %s1688_s12 }
  0x28   : > { %p1691_p10 = pnand %p1689_p9, %p1928_p7 }
  0x29   : > { %p1698_p0 = por %p1697_p13, %p1696_p12 }
  0x2a   : > { %p1692_p11 = pneg %p1691_p10 }
  0x2c   : > { %p1699_p2 = pnand %p1698_p0, %p1692_p11 }
  0x2e   : > { %1702 = shalt.err (!%p1699_p2)
}
  0x2f   : > { %s1824_s13 = smov [#allocation10]   ;;  %s36_s14 = sadd.s32 1, %s1816_s10 }
  0x30   : > { %1602 = dma.vmem_to_smem (!%p1922_p5), %s1918_s23, 16, %s1824_s13, [#allocation11]  }
  0x31   : > { %s278_s19 = sshll.u32 %s2569_s1, 4  ;;  %p38_p3 = scmp.ge.s32.totalorder %s36_s14, 2  ;;  %s279_s19 = int_to_ptr.vmem [resolvable:$true] %s278_s19 }
  0x32   : > { %s300_s22 = sshll.u32 %s2571_s3, 4  ;;  %s1703_s25 = scalar_lea.vmem %s279_s19, 64  ;;  %s301_s22 = int_to_ptr.vmem [resolvable:$true] %s300_s22 }
  0x33   : > { %s2592_s14 = smov (%p38_p3, %s36_s14), 0  ;;  %p1704_p1 = scmp.ne.s32.totalorder %s279_s19, %s1703_s25 }
  0x34   : > { %p1711_p8 = scmp.lt.s32.totalorder %s279_s19, %s279_s19  ;;  %p1712_p9 = scmp.lt.s32.totalorder %s1703_s25, %s1703_s25 }
  0x35   : > { %p1706_p4 = pnand %p1704_p1, %p1928_p7 }
  0x36   : > { %p1713_p10 = por %p1712_p9, %p1711_p8 }
  0x37   : > { %p1707_p6 = pneg %p1706_p4 }
  0x39   : > { %p1714_p11 = pnand %p1713_p10, %p1707_p6 }
  0x3b   : > { %1717 = shalt.err (!%p1714_p11)
}
  0x3c   : > { %s1825_s23 = smov [#allocation2]   ;;  %s1718_s27 = scalar_lea.vmem %s301_s22, 64 }
  0x3d   : > { %1587 = dma.vmem_to_smem (!%p1922_p5), %s279_s19, 64, %s1825_s23, [#allocation3]  }
  0x3e   : > { %p1719_p12 = scmp.ne.s32.totalorder %s301_s22, %s1718_s27  ;;  %p1726_p2 = scmp.lt.s32.totalorder %s301_s22, %s301_s22 }
  0x3f   : > { %p1727_p3 = scmp.lt.s32.totalorder %s1718_s27, %s1718_s27 }
  0x40   : > { %p1721_p13 = pnand %p1719_p12, %p1928_p7 }
  0x41   : > { %p1728_p1 = por %p1727_p3, %p1726_p2 }
  0x42   : > { %p1722_p0 = pneg %p1721_p13 }
  0x44   : > { %p1729_p4 = pnand %p1728_p1, %p1722_p0 }
  0x46   : > { %1732 = shalt.err (!%p1729_p4)
}
  0x47   : > { %s1826_s28 = smov [#allocation6]   ;;  %s322_s13 = sshll.u32 %s2573_s5, 4  ;;  %s323_s13 = int_to_ptr.vmem [resolvable:$true] %s322_s13 }
  0x48   : > { %1593 = dma.vmem_to_smem (!%p1922_p5), %s301_s22, 64, %s1826_s28, [#allocation5]  }
  0x49   : > { %s344_s19 = sshll.u32 %s2575_s7, 4  ;;  %s1733_s20 = scalar_lea.vmem %s323_s13, 16  ;;  %s345_s19 = int_to_ptr.vmem [resolvable:$true] %s344_s19 }
  0x4a   : > { %p1734_p6 = scmp.ne.s32.totalorder %s323_s13, %s1733_s20  ;;  %p1741_p10 = scmp.lt.s32.totalorder %s323_s13, %s323_s13 }
  0x4b   : > { %p1742_p11 = scmp.lt.s32.totalorder %s1733_s20, %s1733_s20 }
  0x4c   : > { %p1736_p8 = pnand %p1734_p6, %p1928_p7 }
  0x4d   : > { %p1743_p12 = por %p1742_p11, %p1741_p10 }
  0x4e   : > { %p1737_p9 = pneg %p1736_p8 }
  0x50   : > { %p1744_p13 = pnand %p1743_p12, %p1737_p9 }
  0x52   : > { %1747 = shalt.err (!%p1744_p13)
}
  0x53   : > { %s1827_s21 = smov [#allocation9]   ;;  %s1748_s22 = scalar_lea.vmem %s345_s19, 16 }
  0x54   : > { %1599 = dma.vmem_to_smem (!%p1922_p5), %s323_s13, 16, %s1827_s21, [#allocation8]  }
  0x55   : > { %p1749_p0 = scmp.ne.s32.totalorder %s345_s19, %s1748_s22  ;;  %p1756_p1 = scmp.lt.s32.totalorder %s345_s19, %s345_s19 }
  0x56   : > { %p1757_p4 = scmp.lt.s32.totalorder %s1748_s22, %s1748_s22 }
  0x57   : > { %p1751_p2 = pnand %p1749_p0, %p1928_p7 }
  0x58   : > { %p1758_p6 = por %p1757_p4, %p1756_p1 }
  0x59   : > { %p1752_p3 = pneg %p1751_p2 }
  0x5b   : > { %p1759_p8 = pnand %p1758_p6, %p1752_p3 }
  0x5d   : > { %1762 = shalt.err (!%p1759_p8)
}
  0x5e   : > { %s1828_s25 = smov [#allocation12]   ;;  %s355_s28 = sshll.u32 %s2576_s8, 4  ;;  %s356_s28 = int_to_ptr.vmem [resolvable:$true] %s355_s28 }
  0x5f   : > { %1605 = dma.vmem_to_smem (!%p1922_p5), %s345_s19, 16, %s1828_s25, [#allocation11]  }
  0x60   : > { %s1763_s29 = scalar_lea.vmem %s356_s28, 16  ;;  %p1771_p12 = scmp.lt.s32.totalorder %s356_s28, %s356_s28 }
  0x61   : > { %p1764_p9 = scmp.ne.s32.totalorder %s356_s28, %s1763_s29  ;;  %p1772_p13 = scmp.lt.s32.totalorder %s1763_s29, %s1763_s29 }
  0x63   : > { %p1766_p10 = pnand %p1764_p9, %p1928_p7  ;;  %p1773_p0 = por %p1772_p13, %p1771_p12 }
  0x65   : > { %p1767_p11 = pneg %p1766_p10 }
  0x67   : > { %p1774_p2 = pnand %p1773_p0, %p1767_p11 }
  0x69   : > { %1777 = shalt.err (!%p1774_p2)
}
  0x6a   : > { %s1829_s12 = smov [#allocation13]   ;;  %p2585_p3 = scmp.ne.s32.totalorder %s2582_s17, 0 }
  0x6b   : > { %1608 = dma.vmem_to_smem (!%p1922_p5), %s356_s28, 16, %s1829_s12, [#allocation14]  }
  0x6c   : > { %381 = sbr.rel (%p2585_p3) target bundleno = 239 (0xef), region = 56  ;;  %p2586_p1 = scmp.ne.s32.totalorder (!%p2585_p3), %s2581_s16, 0 }
  0x73   : > { %1791 = dma.done.wait (%p2586_p1), [#allocation3], 64  }
  0x74   : > { %1793 = vsyncadd (%p2586_p1), [#allocation3], 4294967232 }
  0x75   : > { %1795 = dma.done.wait (%p2586_p1), [#allocation5], 128  }
  0x76   : > { %1797 = vsyncadd (%p2586_p1), [#allocation5], 4294967168 }
  0x77   : > { %1799 = dma.done.wait (%p2586_p1), [#allocation8], 80  }
  0x78   : > { %1801 = vsyncadd (%p2586_p1), [#allocation8], 4294967216 }
  0x79   : > { %1803 = dma.done.wait (%p2586_p1), [#allocation11], 32  }
  0x7a   : > { %1805 = vsyncadd (%p2586_p1), [#allocation11], 4294967264 }
  0x7b   : > { %1807 = dma.done.wait (%p2586_p1), [#allocation14], 16  }
  0x7c   : > { %1809 = vsyncadd (%p2586_p1), [#allocation14], 4294967280 }
  0x7d   : > { %415 = sfence }
  0x7e   : > { %p455_p5 = scmp.lt.s32.totalorder %s1812_s30, 1  ;;  %s475_s17 = sld [smem:[#allocation2]]  ;;  %v1830_v0 = vmov 1966171168   ;;  %v1056_v2 = vlaneseq }
  0x7f   : > { %s1405_s24 = sld [smem:[#allocation2 + $0x80]]  ;;  %v1054_v1 = vunpack.c.l.s4 %v1830_v0  ;;  %s1411_s21 = sld [smem:[#allocation2 + $0x1]] }
  0x80   : > { %s1407_s26 = sld [smem:[#allocation2 + $0x100]]  ;;  %s2594_s30 = smov (!%p455_p5, %s1812_s30), 1  ;;  %v1057_v8 = vshrl.u32 %v1056_v2, 7  ;;  %vm2493_vm0 = vcmp.lt.s32.totalorder %v1056_v2, 256 }
  0x81   : > { %s1409_s13 = sld [smem:[#allocation2 + $0x180]]  ;;  %s1550_s15 = sshll.u32 %s2594_s30, 3  ;;  %v1055_v7 = vunpack.c.0.s8 %v1054_v1 }
  0x82   : > { %s462_s16 = scalar_lea.vmem %s2568_s0, %s1550_s15  ;;  %s2017_s20 = sld [smem:[#allocation9]] }
  0x83   : > { %v2019_v3 = vld [vmem:[%s462_s16] sm:$0xff]  ;;  %s1412_s22 = sld [smem:[#allocation2 + $0x81]]  ;;  %s2029_s27 = sld [smem:[#allocation2 + $0x2]]  ;;  %v2042_v16 = vsub.s32 %v1055_v7, %v1057_v8 }
  0x84   : > { %v476_v4 = vstv %s475_s17  ;;  %s2021_s25 = sld [smem:[#allocation2 + $0x101]]  ;;  %s2031_s28 = sld [smem:[#allocation2 + $0x82]] }
  0x85   : > { %v480_v5 = vstv %s1405_s24  ;;  %s2023_s23 = sld [smem:[#allocation2 + $0x181]]  ;;  %v477_v9 = vmul.f32 %v476_v4, %v2019_v3  ;;  %s2033_s29 = sld [smem:[#allocation2 + $0x102]]  ;;  %v508_v19 = vstv %s1411_s21 }
  0x86   : > { %v488_v6 = vstv %s1407_s26  ;;  %v481_v10 = vmul.f32 %v480_v5, %v2019_v3  ;;  %s2036_s12 = sld [smem:[#allocation9 + $0x1]]  ;;  %s2038_s17 = sld [smem:[#allocation2 + $0x182]]  ;;  %v509_v21 = vmul.f32 %v508_v19, %v2019_v3 }
  0x87   : > { %v489_v11 = vmul.f32 %v488_v6, %v2019_v3  ;;  %v496_v12 = vstv %s1409_s13  ;;  %s2040_s24 = sld [smem:[#allocation2 + $0x3]]  ;;  %s2052_s15 = sld [smem:[#allocation9 + $0x2]] }
  0x88   : > { %v1406_v13 = vrot.slane %v481_v10, 9  ;;  %v497_v15 = vmul.f32 %v496_v12, %v2019_v3  ;;  %s2044_s26 = sld [smem:[#allocation2 + $0x83]]  ;;  %v504_v26 = vstv %s2017_s20  ;;  %s2061_s16 = sld [smem:[#allocation6]] }
  0x89   : > { %v1408_v14 = vrot.slane %v489_v11, 10  ;;  %v512_v20 = vstv %s1412_s22  ;;  %s2046_s13 = sld [smem:[#allocation2 + $0x103]]  ;;  %v540_v30 = vstv %s2029_s27  ;;  %s2067_s20 = sld [smem:[#allocation6 + $0x80]] }
  0x8a   : > { %v486_v17 = vadd.f32 %v1406_v13, %v477_v9  ;;  %v1410_v18 = vrot.slane %v497_v15, 11  ;;  %v513_v22 = vmul.f32 %v512_v20, %v2019_v3  ;;  %v520_v23 = vstv %s2021_s25  ;;  %s2054_s18 = sld [smem:[#allocation2 + $0x183]]  ;;  %s2069_s21 = sld [smem:[#allocation6 + $0x100]] }
  0x8b   : > { %v528_v24 = vstv %s2023_s23  ;;  %v521_v27 = vmul.f32 %v520_v23, %v2019_v3  ;;  %s2059_s19 = sld [smem:[#allocation9 + $0x3]]  ;;  %v544_v31 = vstv %s2031_s28  ;;  %v552_v32 = vstv %s2033_s29  ;;  %s2074_s22 = sld [smem:[#allocation6 + $0x180]] }
  0x8c   : > { %v494_v25 = vadd.f32 %v1408_v14, %v486_v17  ;;  %v529_v28 = vmul.f32 %v528_v24, %v2019_v3  ;;  %v1413_v29 = vrot.slane %v513_v22, 9  ;;  %v541_v36 = vmul.f32 %v540_v30, %v2019_v3  ;;  %s2076_s25 = sld [smem:[#allocation12]]  ;;  %s2081_s23 = sld [smem:[#allocation6 + $0x1]] }
  0x8d   : > { %v1415_v34 = vrot.slane %v521_v27, 10  ;;  %v545_v38 = vmul.f32 %v544_v31, %v2019_v3  ;;  %v553_v39 = vmul.f32 %v552_v32, %v2019_v3  ;;  %v560_v40 = vstv %s2038_s17  ;;  %s2083_s27 = sld [smem:[#allocation6 + $0x81]] }
  0x8e   : > { %v502_v33 = vadd.f32 %v1410_v18, %v494_v25  ;;  %v1417_v35 = vrot.slane %v529_v28, 11  ;;  %v518_v37 = vadd.f32 %v1413_v29, %v509_v21  ;;  %v536_v42 = vstv %s2036_s12  ;;  %s2086_s28 = sld [smem:[#allocation6 + $0x101]]  ;;  %s2094_s12 = sld [smem:[#allocation6 + $0x2]] }
  0x8f   : > { %v561_v43 = vmul.f32 %v560_v40, %v2019_v3  ;;  %v572_v44 = vstv %s2040_s24  ;;  %v1421_v46 = vrot.slane %v545_v38, 9  ;;  %v1423_v47 = vrot.slane %v553_v39, 10  ;;  %s2092_s29 = sld [smem:[#allocation6 + $0x181]]  ;;  %s2104_s24 = sld [smem:[#allocation6 + $0x82]] }
  0x90   : > { %v505_v41 = vadd.f32 %v504_v26, %v502_v33  ;;  %v526_v45 = vadd.f32 %v1415_v34, %v518_v37  ;;  %v573_v48 = vmul.f32 %v572_v44, %v2019_v3  ;;  %v576_v51 = vstv %s2044_s26  ;;  %s2098_s17 = sld [smem:[#allocation12 + $0x1]]  ;;  %s2106_s26 = sld [smem:[#allocation6 + $0x102]] }
  0x91   : > { %v1425_v50 = vrot.slane %v561_v43, 11  ;;  %v584_v52 = vstv %s2046_s13  ;;  %v550_v54 = vadd.f32 %v1421_v46, %v541_v36  ;;  %v577_v55 = vmul.f32 %v576_v51, %v2019_v3  ;;  %s2108_s13 = sld [smem:[#allocation6 + $0x182]] }
  0x92   : > { %v2088_v49 = vmax.f32 %v505_v41, 0.0  ;;  %v534_v53 = vadd.f32 %v1417_v35, %v526_v45  ;;  %v585_v56 = vmul.f32 %v584_v52, %v2019_v3  ;;  %v568_v57 = vstv %s2052_s15  ;;  %s2114_s15 = sld [smem:[#allocation6 + $0x3]] }
  0x93   : > { %v592_v58 = vstv %s2054_s18  ;;  %v600_v59 = vstv %s2059_s19  ;;  %v604_v60 = vstv %s2061_s16  ;;  %v558_v62 = vadd.f32 %v1423_v47, %v550_v54  ;;  %s2116_s18 = sld [smem:[#allocation6 + $0x83]] }
  0x94   : > { %v537_v61 = vadd.f32 %v536_v42, %v534_v53  ;;  %v1429_v63 = vrot.slane %v577_v55, 9  ;;  %v1431_v0 = vrot.slane %v585_v56, 10  ;;  %v593_v1 = vmul.f32 %v592_v58, %v2019_v3  ;;  %s2124_s19 = sld [smem:[#allocation6 + $0x103]] }
  0x95   : > { %v605_v4 = vmul.f32 %v604_v60, %v2088_v49  ;;  %v608_v5 = vstv %s2067_s20  ;;  %v612_v6 = vstv %s2069_s21  ;;  %v566_v8 = vadd.f32 %v1425_v50, %v558_v62  ;;  %s2126_s16 = sld [smem:[#allocation6 + $0x183]]  ;;  %s2134_s20 = sld [smem:[#allocation12 + $0x2]] }
  0x96   : > { %v2118_v7 = vmax.f32 %v537_v61, 0.0  ;;  %v582_v9 = vadd.f32 %v1429_v63, %v573_v48  ;;  %v616_v10 = vstv %s2074_s22  ;;  %v1433_v11 = vrot.slane %v593_v1, 11  ;;  %s2139_s21 = sld [smem:[#allocation6 + $0x4]] }
  0x97   : > { %v620_v12 = vstv %s2076_s25  ;;  %v624_v13 = vstv %s2081_s23  ;;  %v628_v14 = vstv %s2083_s27  ;;  %v569_v15 = vadd.f32 %v568_v57, %v566_v8  ;;  %s2144_s22 = sld [smem:[#allocation6 + $0x84]]  ;;  %s2151_s27 = sld [smem:[#allocation12 + $0x3]] }
  0x98   : > { %v590_v17 = vadd.f32 %v1431_v0, %v582_v9  ;;  %v609_v18 = vmul.f32 %v608_v5, %v2118_v7  ;;  %v625_v19 = vmul.f32 %v624_v13, %v2088_v49  ;;  %v629_v20 = vmul.f32 %v628_v14, %v2118_v7  ;;  %s2146_s23 = sld [smem:[#allocation6 + $0x104]]  ;;  %s2209_s25 = sld [smem:[#allocation6 + $0x87]] }
  0x99   : > { %v632_v21 = vstv %s2086_s28  ;;  %v636_v22 = vstv %s2092_s29  ;;  %v644_v23 = vstv %s2094_s12  ;;  %v2136_v24 = vmax.f32 %v569_v15, 0.0  ;;  %s2157_s28 = sld [smem:[#allocation6 + $0x184]]  ;;  %s2167_s12 = sld [smem:[#allocation6 + $0x5]] }
  0x9a   : > { %v598_v25 = vadd.f32 %v1433_v11, %v590_v17  ;;  %v610_v26 = vadd.f32 %v609_v18, %v605_v4  ;;  %v645_v27 = vmul.f32 %v644_v23, %v2088_v49  ;;  %v630_v28 = vadd.f32 %v629_v20, %v625_v19  ;;  %s2161_s29 = sld [smem:[#allocation12 + $0x4]] }
  0x9b   : > { %v640_v29 = vstv %s2098_s17  ;;  %v648_v30 = vstv %s2104_s24  ;;  %v652_v31 = vstv %s2106_s26  ;;  %v613_v33 = vmul.f32 %v612_v6, %v2136_v24  ;;  %s2169_s17 = sld [smem:[#allocation6 + $0x85]] }
  0x9c   : > { %v601_v32 = vadd.f32 %v600_v59, %v598_v25  ;;  %v633_v34 = vmul.f32 %v632_v21, %v2136_v24  ;;  %v649_v35 = vmul.f32 %v648_v30, %v2118_v7  ;;  %v653_v36 = vmul.f32 %v652_v31, %v2136_v24  ;;  %s2174_s24 = sld [smem:[#allocation6 + $0x105]] }
  0x9d   : > { %v656_v37 = vstv %s2108_s13  ;;  %v664_v38 = vstv %s2114_s15  ;;  %v668_v39 = vstv %s2116_s18  ;;  %v614_v41 = vadd.f32 %v613_v33, %v610_v26  ;;  %s2179_s26 = sld [smem:[#allocation6 + $0x185]]  ;;  %s2182_s13 = sld [smem:[#allocation6 + $0x6]] }
  0x9e   : > { %v2159_v40 = vmax.f32 %v601_v32, 0.0  ;;  %v634_v42 = vadd.f32 %v633_v34, %v630_v28  ;;  %v650_v43 = vadd.f32 %v649_v35, %v645_v27  ;;  %v665_v44 = vmul.f32 %v664_v38, %v2088_v49  ;;  %s2184_s15 = sld [smem:[#allocation6 + $0x86]] }
  0x9f   : > { %v669_v45 = vmul.f32 %v668_v39, %v2118_v7  ;;  %v672_v46 = vstv %s2124_s19  ;;  %v676_v47 = vstv %s2126_s16  ;;  %v660_v53 = vstv %s2134_s20  ;;  %s2189_s18 = sld [smem:[#allocation6 + $0x106]]  ;;  %s2201_s16 = sld [smem:[#allocation12 + $0x5]] }
  0xa0   : > { %v617_v48 = vmul.f32 %v616_v10, %v2159_v40  ;;  %v637_v50 = vmul.f32 %v636_v22, %v2159_v40  ;;  %v654_v51 = vadd.f32 %v653_v36, %v650_v43  ;;  %v657_v52 = vmul.f32 %v656_v37, %v2159_v40  ;;  %s2191_s19 = sld [smem:[#allocation6 + $0x186]]  ;;  %s2207_s20 = sld [smem:[#allocation6 + $0x7]] }
  0xa1   : > { %v670_v54 = vadd.f32 %v669_v45, %v665_v44  ;;  %v673_v55 = vmul.f32 %v672_v46, %v2136_v24  ;;  %v677_v56 = vmul.f32 %v676_v47, %v2159_v40  ;;  %v684_v60 = vstv %s2139_s21  ;;  %s2214_s21 = sld [smem:[#allocation12 + $0x6]] }
  0xa2   : > { %v618_v57 = vadd.f32 %v617_v48, %v614_v41  ;;  %v638_v58 = vadd.f32 %v637_v50, %v634_v42  ;;  %v658_v59 = vadd.f32 %v657_v52, %v654_v51  ;;  %v685_v62 = vmul.f32 %v684_v60, %v2088_v49 }
  0xa3   : > { %v674_v61 = vadd.f32 %v673_v55, %v670_v54  ;;  %v688_v63 = vstv %s2144_s22  ;;  %v692_v0 = vstv %s2146_s23  ;;  %v680_v5 = vstv %s2151_s27  ;;  %s2221_s22 = sld [smem:[#allocation6 + $0x107]]  ;;  %s2228_s27 = sld [smem:[#allocation4]] }
  0xa4   : > { %v2195_v1 = vadd.f32 %v620_v12, %v618_v57  ;;  %v2197_v4 = vadd.f32 %v640_v29, %v638_v58  ;;  %v689_v6 = vmul.f32 %v688_v63, %v2118_v7  ;;  %v2203_v8 = vadd.f32 %v660_v53, %v658_v59  ;;  %s2223_s23 = sld [smem:[#allocation6 + $0x187]] }
  0xa5   : > { %v678_v9 = vadd.f32 %v677_v56, %v674_v61  ;;  %v693_v10 = vmul.f32 %v692_v0, %v2136_v24  ;;  %v696_v11 = vstv %s2157_s28  ;;  %v700_v15 = vstv %s2161_s29  ;;  %s2234_s28 = sld [smem:[#allocation4 + $0x80]] }
  0xa6   : > { %v622_v12 = vmax.f32 %v2195_v1, 0.0  ;;  %v642_v13 = vmax.f32 %v2197_v4, 0.0  ;;  %v690_v14 = vadd.f32 %v689_v6, %v685_v62  ;;  %v697_v18 = vmul.f32 %v696_v11, %v2159_v40  ;;  %s2236_s29 = sld [smem:[#allocation4 + $0x100]] }
  0xa7   : > { %v2216_v17 = vadd.f32 %v680_v5, %v678_v9  ;;  %v704_v19 = vstv %s2167_s12  ;;  %v708_v20 = vstv %s2169_s17  ;;  %v712_v25 = vstv %s2174_s24  ;;  %s2240_s12 = sld [smem:[#allocation12 + $0x7]]  ;;  %s2246_s17 = sld [smem:[#allocation4 + $0x180]] }
  0xa8   : > { %v694_v21 = vadd.f32 %v693_v10, %v690_v14  ;;  %v705_v22 = vmul.f32 %v704_v19, %v2088_v49  ;;  %v709_v23 = vmul.f32 %v708_v20, %v2118_v7  ;;  %v662_v26 = vmax.f32 %v2203_v8, 0.0  ;;  %s2252_s24 = sld [smem:[#allocation4 + $0x1]] }
  0xa9   : > { %v682_v27 = vmax.f32 %v2216_v17, 0.0  ;;  %v713_v28 = vmul.f32 %v712_v25, %v2136_v24  ;;  %v716_v29 = vstv %s2179_s26  ;;  %v724_v33 = vstv %s2182_s13  ;;  %s2258_s26 = sld [smem:[#allocation10]]  ;;  %s2260_s13 = sld [smem:[#allocation4 + $0x81]] }
  0xaa   : > { %v698_v30 = vadd.f32 %v697_v18, %v694_v21  ;;  %v710_v31 = vadd.f32 %v709_v23, %v705_v22  ;;  %v717_v32 = vmul.f32 %v716_v29, %v2159_v40  ;;  %v725_v34 = vmul.f32 %v724_v33, %v2088_v49 }
  0xab   : > { %v728_v35 = vstv %s2184_s15  ;;  %v732_v36 = vstv %s2189_s18  ;;  %v736_v37 = vstv %s2191_s19  ;;  %v720_v43 = vstv %s2201_s16  ;;  %s2268_s15 = sld [smem:[#allocation4 + $0x101]]  ;;  %s2278_s16 = sld [smem:[#allocation4 + $0x2]] }
  0xac   : > { %v2248_v38 = vadd.f32 %v700_v15, %v698_v30  ;;  %v714_v39 = vadd.f32 %v713_v28, %v710_v31  ;;  %v729_v41 = vmul.f32 %v728_v35, %v2118_v7  ;;  %v733_v42 = vmul.f32 %v732_v36, %v2136_v24  ;;  %s2270_s18 = sld [smem:[#allocation4 + $0x181]] }
  0xad   : > { %v737_v44 = vmul.f32 %v736_v37, %v2159_v40  ;;  %v744_v45 = vstv %s2207_s20  ;;  %v748_v46 = vstv %s2209_s25  ;;  %v740_v50 = vstv %s2214_s21  ;;  %s2276_s19 = sld [smem:[#allocation10 + $0x1]]  ;;  %s2283_s20 = sld [smem:[#allocation4 + $0x82]] }
  0xae   : > { %v718_v47 = vadd.f32 %v717_v32, %v714_v39  ;;  %v730_v48 = vadd.f32 %v729_v41, %v725_v34  ;;  %v745_v51 = vmul.f32 %v744_v45, %v2088_v49  ;;  %v702_v52 = vmax.f32 %v2248_v38, 0.0  ;;  %s2285_s25 = sld [smem:[#allocation4 + $0x102]] }
  0xaf   : > { %v749_v53 = vmul.f32 %v748_v46, %v2118_v7  ;;  %v752_v54 = vstv %s2221_s22  ;;  %v756_v55 = vstv %s2223_s23  ;;  %v764_v7 = vstv %s2228_s27  ;;  %s2293_s21 = sld [smem:[#allocation4 + $0x182]]  ;;  %s2303_s23 = sld [smem:[#allocation4 + $0x3]] }
  0xb0   : > { %v2272_v56 = vadd.f32 %v720_v43, %v718_v47  ;;  %v734_v57 = vadd.f32 %v733_v42, %v730_v48  ;;  %v753_v58 = vmul.f32 %v752_v54, %v2136_v24  ;;  %v757_v59 = vmul.f32 %v756_v55, %v2159_v40  ;;  %s2299_s22 = sld [smem:[#allocation10 + $0x2]]  ;;  %s2305_s27 = sld [smem:[#allocation4 + $0x83]] }
  0xb1   : > { %v750_v49 = vadd.f32 %v749_v53, %v745_v51  ;;  %v768_v60 = vstv %s2234_s28  ;;  %v776_v61 = vstv %s2236_s29  ;;  %v760_v63 = vstv %s2240_s12  ;;  %s2314_s28 = sld [smem:[#allocation4 + $0x103]] }
  0xb2   : > { %v738_v62 = vadd.f32 %v737_v44, %v734_v57  ;;  %v765_v24 = vmul.f32 %v764_v7, %v2019_v3  ;;  %v769_v40 = vmul.f32 %v768_v60, %v2019_v3  ;;  %v722_v0 = vmax.f32 %v2272_v56, 0.0  ;;  %s2316_s29 = sld [smem:[#allocation4 + $0x183]] }
  0xb3   : > { %v754_v5 = vadd.f32 %v753_v58, %v750_v49  ;;  %v777_v6 = vmul.f32 %v776_v61, %v2019_v3  ;;  %v784_v9 = vstv %s2246_s17  ;;  %v796_v15 = vstv %s2252_s24  ;;  %s2320_s12 = sld [smem:[#allocation10 + $0x3]]  ;;  %s2326_s17 = sld [smem:[#allocation7]] }
  0xb4   : > { %v2295_v10 = vadd.f32 %v740_v50, %v738_v62  ;;  %v1474_v11 = vrot.slane %v769_v40, 9  ;;  %v785_v14 = vmul.f32 %v784_v9, %v2019_v3  ;;  %v792_v20 = vstv %s2258_s26  ;;  %s2328_s24 = sld [smem:[#allocation7 + $0x80]] }
  0xb5   : > { %v758_v18 = vadd.f32 %v757_v59, %v754_v5  ;;  %v1476_v19 = vrot.slane %v777_v6, 10  ;;  %v800_v21 = vstv %s2260_s13  ;;  %v797_v25 = vmul.f32 %v796_v15, %v2019_v3  ;;  %s2330_s26 = sld [smem:[#allocation7 + $0x100]] }
  0xb6   : > { %v774_v22 = vadd.f32 %v1474_v11, %v765_v24  ;;  %v1478_v23 = vrot.slane %v785_v14, 11  ;;  %v801_v28 = vmul.f32 %v800_v21, %v2019_v3  ;;  %v742_v29 = vmax.f32 %v2295_v10, 0.0  ;;  %s2336_s13 = sld [smem:[#allocation7 + $0x180]] }
  0xb7   : > { %v2310_v30 = vadd.f32 %v760_v63, %v758_v18  ;;  %v808_v31 = vstv %s2268_s15  ;;  %v816_v32 = vstv %s2270_s18  ;;  %v824_v37 = vstv %s2276_s19  ;;  %s2338_s15 = sld [smem:[#allocation13]]  ;;  %s2342_s18 = sld [smem:[#allocation7 + $0x1]] }
  0xb8   : > { %v782_v33 = vadd.f32 %v1476_v19, %v774_v22  ;;  %v1481_v34 = vrot.slane %v801_v28, 9  ;;  %v809_v35 = vmul.f32 %v808_v31, %v2019_v3  ;;  %v817_v36 = vmul.f32 %v816_v32, %v2019_v3  ;;  %s2344_s19 = sld [smem:[#allocation7 + $0x81]] }
  0xb9   : > { %v828_v39 = vstv %s2278_s16  ;;  %v832_v41 = vstv %s2283_s20  ;;  %v840_v42 = vstv %s2285_s25  ;;  %v848_v51 = vstv %s2293_s21  ;;  %s2348_s16 = sld [smem:[#allocation7 + $0x101]]  ;;  %s2360_s21 = sld [smem:[#allocation7 + $0x2]] }
  0xba   : > { %v790_v43 = vadd.f32 %v1478_v23, %v782_v33  ;;  %v806_v44 = vadd.f32 %v1481_v34, %v797_v25  ;;  %v1483_v45 = vrot.slane %v809_v35, 10  ;;  %v1485_v46 = vrot.slane %v817_v36, 11  ;;  %s2353_s20 = sld [smem:[#allocation7 + $0x181]] }
  0xbb   : > { %v829_v47 = vmul.f32 %v828_v39, %v2019_v3  ;;  %v833_v48 = vmul.f32 %v832_v41, %v2019_v3  ;;  %v841_v50 = vmul.f32 %v840_v42, %v2019_v3  ;;  %v849_v55 = vmul.f32 %v848_v51, %v2019_v3  ;;  %s2355_s25 = sld [smem:[#allocation13 + $0x1]] }
  0xbc   : > { %v793_v53 = vadd.f32 %v792_v20, %v790_v43  ;;  %v814_v54 = vadd.f32 %v1483_v45, %v806_v44  ;;  %v856_v57 = vstv %s2299_s22  ;;  %v860_v49 = vstv %s2303_s23  ;;  %s2362_s22 = sld [smem:[#allocation7 + $0x82]] }
  0xbd   : > { %v1489_v58 = vrot.slane %v833_v48, 9  ;;  %v1491_v59 = vrot.slane %v841_v50, 10  ;;  %v864_v7 = vstv %s2305_s27  ;;  %v1493_v62 = vrot.slane %v849_v55, 11  ;;  %s2367_s23 = sld [smem:[#allocation7 + $0x102]] }
  0xbe   : > { %v2350_v60 = vmax.f32 %v793_v53, 0.0  ;;  %v822_v61 = vadd.f32 %v1485_v46, %v814_v54  ;;  %v861_v63 = vmul.f32 %v860_v49, %v2019_v3  ;;  %v865_v40 = vmul.f32 %v864_v7, %v2019_v3  ;;  %s2369_s27 = sld [smem:[#allocation7 + $0x182]] }
  0xbf   : > { %v838_v24 = vadd.f32 %v1489_v58, %v829_v47  ;;  %v872_v5 = vstv %s2314_s28  ;;  %v880_v6 = vstv %s2316_s29  ;;  %v888_v15 = vstv %s2320_s12  ;;  %s2373_s28 = sld [smem:[#allocation13 + $0x2]]  ;;  %s2375_s29 = sld [smem:[#allocation7 + $0x3]] }
  0xc0   : > { %v825_v9 = vadd.f32 %v824_v37, %v822_v61  ;;  %v873_v11 = vmul.f32 %v872_v5, %v2019_v3  ;;  %v881_v14 = vmul.f32 %v880_v6, %v2019_v3  ;;  %v1497_v19 = vrot.slane %v865_v40, 9  ;;  %s2380_s12 = sld [smem:[#allocation7 + $0x83]] }
  0xc1   : > { %v846_v18 = vadd.f32 %v1491_v59, %v838_v24  ;;  %v892_v20 = vstv %s2326_s17  ;;  %v896_v21 = vstv %s2328_s24  ;;  %v900_v32 = vstv %s2330_s26  ;;  %s2388_s17 = sld [smem:[#allocation7 + $0x103]] }
  0xc2   : > { %v2377_v22 = vmax.f32 %v825_v9, 0.0  ;;  %v1499_v3 = vrot.slane %v873_v11, 10  ;;  %v1501_v23 = vrot.slane %v881_v14, 11  ;;  %v893_v25 = vmul.f32 %v892_v20, %v2350_v60  ;;  %s2390_s24 = sld [smem:[#allocation7 + $0x183]] }
  0xc3   : > { %v854_v28 = vadd.f32 %v1493_v62, %v846_v18  ;;  %v870_v31 = vadd.f32 %v1497_v19, %v861_v63  ;;  %v904_v33 = vstv %s2336_s13  ;;  %v908_v35 = vstv %s2338_s15  ;;  %s2397_s26 = sld [smem:[#allocation13 + $0x3]]  ;;  %s2402_s13 = sld [smem:[#allocation7 + $0x4]] }
  0xc4   : > { %v897_v34 = vmul.f32 %v896_v21, %v2377_v22  ;;  %v912_v36 = vstv %s2342_s18  ;;  %v916_v37 = vstv %s2344_s19  ;;  %v920_v45 = vstv %s2348_s16  ;;  %s2408_s18 = sld [smem:[#allocation7 + $0x84]]  ;;  %s2469_s15 = sld [smem:[#allocation7 + $0x107]] }
  0xc5   : > { %v857_v39 = vadd.f32 %v856_v57, %v854_v28  ;;  %v878_v41 = vadd.f32 %v1499_v3, %v870_v31  ;;  %v913_v42 = vmul.f32 %v912_v36, %v2350_v60  ;;  %v917_v43 = vmul.f32 %v916_v37, %v2377_v22  ;;  %s2410_s19 = sld [smem:[#allocation7 + $0x104]] }
  0xc6   : > { %v898_v44 = vadd.f32 %v897_v34, %v893_v25  ;;  %v924_v46 = vstv %s2353_s20  ;;  %v928_v47 = vstv %s2355_s25  ;;  %v932_v53 = vstv %s2360_s21  ;;  %s2419_s16 = sld [smem:[#allocation7 + $0x184]]  ;;  %s2429_s25 = sld [smem:[#allocation7 + $0x5]] }
  0xc7   : > { %v2399_v48 = vmax.f32 %v857_v39, 0.0  ;;  %v886_v50 = vadd.f32 %v1501_v23, %v878_v41  ;;  %v918_v51 = vadd.f32 %v917_v43, %v913_v42  ;;  %v933_v54 = vmul.f32 %v932_v53, %v2350_v60  ;;  %s2421_s20 = sld [smem:[#allocation13 + $0x4]]  ;;  %s2431_s21 = sld [smem:[#allocation7 + $0x85]] }
  0xc8   : > { %v936_v55 = vstv %s2362_s22  ;;  %v940_v57 = vstv %s2367_s23  ;;  %v944_v58 = vstv %s2369_s27  ;;  %v948_v63 = vstv %s2373_s28  ;;  %s2436_s22 = sld [smem:[#allocation7 + $0x105]]  ;;  %s2446_s28 = sld [smem:[#allocation7 + $0x6]] }
  0xc9   : > { %v889_v59 = vadd.f32 %v888_v15, %v886_v50  ;;  %v901_v49 = vmul.f32 %v900_v32, %v2399_v48  ;;  %v921_v7 = vmul.f32 %v920_v45, %v2399_v48  ;;  %v937_v61 = vmul.f32 %v936_v55, %v2377_v22  ;;  %s2441_s23 = sld [smem:[#allocation7 + $0x185]] }
  0xca   : > { %v941_v62 = vmul.f32 %v940_v57, %v2399_v48  ;;  %v952_v24 = vstv %s2375_s29  ;;  %v956_v40 = vstv %s2380_s12  ;;  %v960_v18 = vstv %s2388_s17  ;;  %s2443_s27 = sld [smem:[#allocation13 + $0x5]]  ;;  %s2448_s29 = sld [smem:[#allocation7 + $0x86]] }
  0xcb   : > { %v2423_v5 = vmax.f32 %v889_v59, 0.0  ;;  %v902_v6 = vadd.f32 %v901_v49, %v898_v44  ;;  %v922_v9 = vadd.f32 %v921_v7, %v918_v51  ;;  %v938_v11 = vadd.f32 %v937_v61, %v933_v54  ;;  %s2453_s12 = sld [smem:[#allocation7 + $0x106]] }
  0xcc   : > { %v953_v14 = vmul.f32 %v952_v24, %v2350_v60  ;;  %v957_v15 = vmul.f32 %v956_v40, %v2377_v22  ;;  %v964_v19 = vstv %s2390_s24  ;;  %v961_v28 = vmul.f32 %v960_v18, %v2399_v48  ;;  %s2455_s17 = sld [smem:[#allocation7 + $0x186]] }
  0xcd   : > { %v905_v20 = vmul.f32 %v904_v33, %v2423_v5  ;;  %v925_v21 = vmul.f32 %v924_v46, %v2423_v5  ;;  %v942_v3 = vadd.f32 %v941_v62, %v938_v11  ;;  %v945_v23 = vmul.f32 %v944_v58, %v2423_v5  ;;  %s2460_s24 = sld [smem:[#allocation13 + $0x6]] }
  0xce   : > { %v958_v25 = vadd.f32 %v957_v15, %v953_v14  ;;  %v965_v31 = vmul.f32 %v964_v19, %v2423_v5  ;;  %v968_v32 = vstv %s2397_s26  ;;  %v972_v37 = vstv %s2402_s13  ;;  %s2465_s26 = sld [smem:[#allocation7 + $0x7]] }
  0xcf   : > { %v906_v33 = vadd.f32 %v905_v20, %v902_v6  ;;  %v926_v34 = vadd.f32 %v925_v21, %v922_v9  ;;  %v946_v36 = vadd.f32 %v945_v23, %v942_v3  ;;  %v973_v41 = vmul.f32 %v972_v37, %v2350_v60  ;;  %s2467_s13 = sld [smem:[#allocation7 + $0x87]] }
  0xd0   : > { %v962_v39 = vadd.f32 %v961_v28, %v958_v25  ;;  %v976_v42 = vstv %s2408_s18  ;;  %v980_v43 = vstv %s2410_s19  ;;  %v984_v54 = vstv %s2419_s16  ;;  %s2474_s18 = sld [smem:[#allocation7 + $0x187]]  ;;  %s1551_s16 = sshll.u32 %s2594_s30, 4 }
  0xd1   : > { %v909_v44 = vadd.f32 %v908_v35, %v906_v33  ;;  %v929_v45 = vadd.f32 %v928_v47, %v926_v34  ;;  %v949_v46 = vadd.f32 %v948_v63, %v946_v36  ;;  %v977_v50 = vmul.f32 %v976_v42, %v2377_v22  ;;  %s2476_s19 = sld [smem:[#allocation13 + $0x7]] }
  0xd2   : > { %v966_v51 = vadd.f32 %v965_v31, %v962_v39  ;;  %v981_v53 = vmul.f32 %v980_v43, %v2399_v48  ;;  %v988_v55 = vstv %s2421_s20  ;;  %v985_v49 = vmul.f32 %v984_v54, %v2423_v5 }
  0xd3   : > { %v910_v57 = vmax.f32 %v909_v44, 0.0  ;;  %v930_v35 = vmax.f32 %v929_v45, 0.0  ;;  %v950_v47 = vmax.f32 %v949_v46, 0.0  ;;  %v978_v58 = vadd.f32 %v977_v50, %v973_v41 }
  0xd4   : > { %v969_v59 = vadd.f32 %v968_v32, %v966_v51  ;;  %v992_v7 = vstv %s2429_s25  ;;  %v996_v61 = vstv %s2431_s21  ;;  %v1000_v40 = vstv %s2436_s22  ;;  %s472_s25 = scalar_lea.vmem %s2577_s9, %s1551_s16 }
  0xd5   : > { %v982_v62 = vadd.f32 %v981_v53, %v978_v58  ;;  %v993_v63 = vmul.f32 %v992_v7, %v2350_v60  ;;  %v997_v24 = vmul.f32 %v996_v61, %v2377_v22  ;;  %v1001_v9 = vmul.f32 %v1000_v40, %v2399_v48 }
  0xd6   : > { %v970_v6 = vmax.f32 %v969_v59, 0.0  ;;  %v1004_v11 = vstv %s2441_s23  ;;  %v1008_v14 = vstv %s2443_s27  ;;  %v1012_v20 = vstv %s2446_s28 }
  0xd7   : > { %v986_v15 = vadd.f32 %v985_v49, %v982_v62  ;;  %v998_v18 = vadd.f32 %v997_v24, %v993_v63  ;;  %v1005_v19 = vmul.f32 %v1004_v11, %v2423_v5  ;;  %v1013_v21 = vmul.f32 %v1012_v20, %v2350_v60 }
  0xd8   : > { %v1016_v3 = vstv %s2448_s29  ;;  %v1020_v23 = vstv %s2453_s12  ;;  %v1024_v25 = vstv %s2455_s17  ;;  %v1028_v37 = vstv %s2460_s24 }
  0xd9   : > { %v989_v28 = vadd.f32 %v988_v55, %v986_v15  ;;  %v1002_v31 = vadd.f32 %v1001_v9, %v998_v18  ;;  %v1017_v32 = vmul.f32 %v1016_v3, %v2377_v22  ;;  %v1021_v33 = vmul.f32 %v1020_v23, %v2399_v48 }
  0xda   : > { %v1025_v36 = vmul.f32 %v1024_v25, %v2423_v5  ;;  %v1032_v39 = vstv %s2465_s26  ;;  %v1036_v41 = vstv %s2467_s13  ;;  %v1040_v50 = vstv %s2469_s15 }
  0xdb   : > { %v990_v42 = vmax.f32 %v989_v28, 0.0  ;;  %v1006_v43 = vadd.f32 %v1005_v19, %v1002_v31  ;;  %v1018_v44 = vadd.f32 %v1017_v32, %v1013_v21  ;;  %v1033_v45 = vmul.f32 %v1032_v39, %v2350_v60 }
  0xdc   : > { %v1037_v46 = vmul.f32 %v1036_v41, %v2377_v22  ;;  %v1044_v51 = vstv %s2474_s18  ;;  %v1048_v53 = vstv %s2476_s19  ;;  %v1041_v55 = vmul.f32 %v1040_v50, %v2399_v48 }
  0xdd   : > { %v1009_v2 = vadd.f32 %v1008_v14, %v1006_v43  ;;  %v1022_v54 = vadd.f32 %v1021_v33, %v1018_v44  ;;  %v1045_v58 = vmul.f32 %v1044_v51, %v2423_v5  ;;  %v1051_v49 = vadd.f32 %v910_v57, %v622_v12 }
  0xde   : > { %v1038_v59 = vadd.f32 %v1037_v46, %v1033_v45  ;;  %v1074_v7 = vadd.f32 %v930_v35, %v642_v13  ;;  %v1094_v60 = vadd.f32 %v950_v47, %v662_v26  ;;  %v1114_v62 = vadd.f32 %v970_v6, %v682_v27 }
  0xdf   : > { %v1010_v22 = vmax.f32 %v1009_v2, 0.0  ;;  %v1026_v61 = vadd.f32 %v1025_v36, %v1022_v54  ;;  %v1134_v48 = vadd.f32 %v990_v42, %v702_v52  ;;  %v1059_v63 = vrot.slane %v1051_v49, %v2042_v16 }
  0xe0   : > { %v1042_v5 = vadd.f32 %v1041_v55, %v1038_v59  ;;  %v1082_v1 = vrot.slane %v1074_v7, %v2042_v16  ;;  %v1102_v12 = vrot.slane %v1094_v60, %v2042_v16  ;;  %v1122_v8 = vrot.slane %v1114_v62, %v2042_v16 }
  0xe1   : > { %v1029_v4 = vadd.f32 %v1028_v37, %v1026_v61  ;;  %v1142_v13 = vrot.slane %v1134_v48, %v2042_v16  ;;  %v1154_v17 = vadd.f32 %v1010_v22, %v722_v0  ;;  %v1066_v27 = vrot.slane %v1059_v63, %v2042_v16 }
  0xe2   : > { %v1046_v26 = vadd.f32 %v1045_v58, %v1042_v5  ;;  %v1089_v38 = vrot.slane %v1082_v1, %v2042_v16  ;;  %v1109_v52 = vrot.slane %v1102_v12, %v2042_v16  ;;  %v1129_v35 = vrot.slane %v1122_v8, %v2042_v16 }
  0xe3   : > { %v1030_v57 = vmax.f32 %v1029_v4, 0.0  ;;  %v1149_v47 = vrot.slane %v1142_v13, %v2042_v16  ;;  %v1162_v24 = vrot.slane %v1154_v17, %v2042_v16  ;;  %v762_v40 = vmax.f32 %v2310_v30, 0.0  ;;  %1072 = vst.msk [vmem:[%s472_s25] ss:$8 sm:$0x3] %vm2493_vm0, %v1066_v27 }
  0xe4   : > { %v1049_v6 = vadd.f32 %v1048_v53, %v1046_v26  ;;  %1541 = vst.msk [vmem:[%s472_s25 + $0x1] ss:$8 sm:$0x3] %vm2493_vm0, %v1089_v38  ;;  %1542 = vst.msk [vmem:[%s472_s25 + $0x2] ss:$8 sm:$0x3] %vm2493_vm0, %v1109_v52 }
  0xe5   : > { %1543 = vst.msk [vmem:[%s472_s25 + $0x3] ss:$8 sm:$0x3] %vm2493_vm0, %v1129_v35  ;;  %1544 = vst.msk [vmem:[%s472_s25 + $0x4] ss:$8 sm:$0x3] %vm2493_vm0, %v1149_v47  ;;  %v1169_v56 = vrot.slane %v1162_v24, %v2042_v16  ;;  %v1174_v0 = vadd.f32 %v1030_v57, %v742_v29 }
  0xe6   : > { %v1050_v30 = vmax.f32 %v1049_v6, 0.0 }
  0xe7   : > { %1545 = vst.msk [vmem:[%s472_s25 + $0x5] ss:$8 sm:$0x3] %vm2493_vm0, %v1169_v56  ;;  %v1182_v9 = vrot.slane %v1174_v0, %v2042_v16 }
  0xe8   : > { %v1194_v11 = vadd.f32 %v1050_v30, %v762_v40 }
  0xe9   : > { %v1189_v14 = vrot.slane %v1182_v9, %v2042_v16 }
  0xea   : > { %v1202_v15 = vrot.slane %v1194_v11, %v2042_v16 }
  0xeb   : > { %1546 = vst.msk [vmem:[%s472_s25 + $0x6] ss:$8 sm:$0x3] %vm2493_vm0, %v1189_v14 }
  0xec   : > { %v1209_v18 = vrot.slane %v1202_v15, %v2042_v16 }
  0xee   : > { %1547 = vst.msk [vmem:[%s472_s25 + $0x7] ss:$8 sm:$0x3] %vm2493_vm0, %v1209_v18 }
  0xef PF: > { %s24_s11 = sadd.s32 1, %s1820_s11   ;;  %s2589_s30 = smov %s1816_s10 }
  0xf0   : > { %p21_p7 = scmp.ge.s32.totalorder %s24_s11, 4   ;;  %s2590_s10 = smov %s2592_s14 }
  0xf2   :  { %23 = sbr.rel (!%p21_p7) target bundleno = 6 (0x6), region = 126 }
  0xf9   :  { %1244 = vsyncpa [#allocation3], 1 }
  0xfa   :  { %1246 = vsyncpa [#allocation3 + $0x1], 1 }
  0xfb   :  { %1247 = vsyncpa [#allocation5], 1 }
  0xfc   :  { %1248 = vsyncpa [#allocation8], 1 }
  0xfd   :  { %1249 = vsyncpa [#allocation11], 1 }
  0xfe   :  { %1250 = vsyncpa [#allocation14], 1 }

// kernel: _forward_impl.2
= control target key start
LH: loop header
LB: loop body
LE: loop exit
PB: predicated region body
PF: predicated region fallthrough
CT: control target
= control target key end

     0   :  { %s4921_s0 = inlined_call_operand.hbm [shape: f32[1,256], index: 0, kind: input, shape index: {}, may-alias: {0,1}]   ;;  %s4922_s1 = inlined_call_operand.hbm [shape: f32[1,256], index: 1, kind: input, shape index: {}, may-alias: {0,1}]   ;;  %s4923_s2 = inlined_call_operand.vmem [shape: f32[2,4,256], index: 2, kind: input, shape index: {}]   ;;  %s4924_s3 = inlined_call_operand.vmem [shape: f32[4,4], index: 3, kind: input, shape index: {}]   ;;  %s4925_s4 = inlined_call_operand.vmem [shape: f32[4,4], index: 4, kind: input, shape index: {}]   ;;  %s4926_s5 = inlined_call_operand.hbm [shape: f32[4,8], index: 5, kind: input, shape index: {}]   ;;  %s4927_s6 = inlined_call_operand.hbm [shape: f32[4,8], index: 6, kind: input, shape index: {}]   ;;  %s4928_s7 = inlined_call_operand.hbm [shape: f32[4], index: 7, kind: input, shape index: {}]   ;;  %s4929_s8 = inlined_call_operand.hbm [shape: f32[4], index: 8, kind: input, shape index: {}]   ;;  %s4930_s9 = inlined_call_operand.hbm [shape: f32[4], index: 9, kind: input, shape index: {}]   ;;  %s4931_s10 = inlined_call_operand.hbm [shape: f32[4], index: 10, kind: input, shape index: {}]   ;;  %s4932_s11 = inlined_call_operand.vmem [shape: f32[4,4], index: 11, kind: output, shape index: {0}]   ;;  %s4933_s12 = inlined_call_operand.vmem [shape: f32[8,4], index: 12, kind: output, shape index: {1}]  }
   0x1   :  { %4980 = sst [smem:[#allocation74_spill]] %s4921_s0 }
   0x2   :  { %4981 = sst [smem:[#allocation75_spill]] %s4922_s1 }
   0x3   :  { %4982 = sst [smem:[#allocation76_spill]] %s4923_s2 }
   0x4   :  { %4983 = sst [smem:[#allocation77_spill]] %s4924_s3 }
   0x5   :  { %4984 = sst [smem:[#allocation78_spill]] %s4925_s4 }
   0x6   :  { %4985 = sst [smem:[#allocation79_spill]] %s4926_s5 }
   0x7   :  { %4986 = sst [smem:[#allocation80_spill]] %s4927_s6 }
   0x8   :  { %4987 = sst [smem:[#allocation81_spill]] %s4928_s7 }
   0x9   :  { %4988 = sst [smem:[#allocation82_spill]] %s4929_s8 }
   0xa   :  { %4989 = sst [smem:[#allocation83_spill]] %s4930_s9 }
   0xb   :  { %4990 = sst [smem:[#allocation84_spill]] %s4931_s10 }
   0xc   :  { %4991 = sst [smem:[#allocation85_spill]] %s4932_s11 }
   0xd   :  { %4992 = sst [smem:[#allocation86_spill]] %s4933_s12 }
   0xe   :  { %18 = vsyncpa [#allocation11], 0 }
   0xf   :  { %19 = vsyncpa [#allocation15], 0 }
  0x10   :  { %20 = vsyncpa [#allocation13], 0 }
  0x11   :  { %21 = vsyncpa [#allocation18], 0 }
  0x12   :  { %22 = vsyncpa [#allocation12], 0 }
  0x13   :  { %23 = vsyncpa [#allocation21], 0 }
  0x14   :  { %24 = vsyncpa [#allocation24], 0 }
  0x15   :  { %25 = vsyncpa [#allocation27], 0  ;;  %s3528_s21 = smov 0   ;;  %s3530_s22 = smov 0  }
  0x16   :  { %s3532_s23 = smov 0   ;;  %s3534_s24 = smov 0  }
  0x17   :  { %s3536_s25 = smov 0  }
  0x18 LB: > { %4993 = sst [smem:[#allocation36_spill]] %s3431_s22  ;;  %s2827_s26 = sadd.s32 4294967295, %s3443_s25   ;;  %s3443_s25 = sphi %s3536_s25, %s31_s25   ;;  %s3439_s24 = sphi %s3534_s24, %s5124_s24   ;;  %s3435_s23 = sphi %s3532_s23, %s5123_s23   ;;  %s3431_s22 = sphi %s3530_s22, %s5122_s22   ;;  %s3427_s21 = sphi %s3528_s21, %s5121_s21  }
  0x19   : > { %4994 = sst [smem:[#allocation37_spill]] %s3435_s23  ;;  %p2828_p0 = scmp.ge.s32.totalorder %s3443_s25, 1 }
  0x1a   : > { %4995 = sst [smem:[#allocation38_spill]] %s3439_s24  ;;  %p345_p1 = scmp.lt.s32.totalorder %s3443_s25, 5 }
  0x1b   : > { %4996 = sst [smem:[#allocation39_spill]] %s3443_s25  ;;  %p3556_p2 = scmp.eq.s32.totalorder %s2827_s26, 0 }
  0x1c   : > { %p3560_p3 = pnand %p2828_p0, %p345_p1  ;;  %s46_s30 = sadd.s32 1, %s3435_s23 }
  0x1d   : > { %s4997_s27 = scalar_select %p3556_p2, 1, 0 }
  0x1e   : > { %s4998_s28 = scalar_select %p3560_p3, 1, 0 }
  0x1f   : > { %p3082_p4 = pneg %p3560_p3  ;;  %s50_s13 = sadd.s32 1, %s3439_s24 }
  0x20   : > { %p3574_p6 = scmp.ge.s32.totalorder %s46_s30, 2  ;;  %s5001_s6 = sld [smem:[#allocation80_spill]] }
  0x21   : > { %p3568_p5 = pnand %p3556_p2, %p3082_p4 }
  0x23   : > { %p3586_p8 = pneg %p3568_p5 }
  0x26   : > { %s3209_s17 = scalar_lea.hbm %s5001_s6, 64 }
  0x27   : > { %p3210_p7 = scmp.ne.s32.totalorder %s5001_s6, %s3209_s17  ;;  %p3216_p11 = scmp.lt.u32.totalorder %s3209_s17, %s5001_s6 }
  0x29   : > { %p3212_p9 = pnand %p3586_p8, %p3210_p7 }
  0x2b   : > { %p3213_p10 = pneg %p3212_p9 }
  0x2d   : > { %p3218_p12 = pnand %p3216_p11, %p3213_p10 }
  0x2f   : > { %3221 = shalt.err (!%p3218_p12)
}
  0x30   : > { %s3445_s15 = smov [#allocation20]   ;;  %s5003_s8 = sld [smem:[#allocation82_spill]] }
  0x31   : > { %3100 = dma.hbm_to_smem (!%p3568_p5), %s5001_s6, 64, %s3445_s15, [#allocation21]  }
  0x36   : > { %s3222_s12 = scalar_lea.hbm %s5003_s8, 16 }
  0x37   : > { %p3223_p13 = scmp.ne.s32.totalorder %s5003_s8, %s3222_s12  ;;  %p3229_p4 = scmp.lt.u32.totalorder %s3222_s12, %s5003_s8 }
  0x39   : > { %p3225_p0 = pnand %p3223_p13, %p3586_p8 }
  0x3b   : > { %p3226_p1 = pneg %p3225_p0 }
  0x3d   : > { %p3231_p7 = pnand %p3229_p4, %p3226_p1 }
  0x3f   : > { %3234 = shalt.err (!%p3231_p7)
}
  0x40   : > { %s3446_s26 = smov [#allocation23]   ;;  %s5126_s30 = smov (%p3574_p6, %s46_s30), 0 }
  0x41   : > { %3106 = dma.hbm_to_smem (!%p3568_p5), %s5003_s8, 16, %s3446_s26, [#allocation24]  }
  0x42   : > { %5004 = sst [smem:[#allocation40_spill]] %s5126_s30  ;;  %s5128_s13 = smov (!%p3574_p6, %s50_s13), %s3439_s24 }
  0x43   : > { %p52_p9 = scmp.ge.s32.totalorder %s5128_s13, 2  ;;  %s3447_s11 = smov [#allocation10]  }
  0x44   : > { %s361_s12 = sshll.u32 %s3447_s11, 4  ;;  %s3448_s22 = smov [#allocation14]   ;;  %s362_s12 = int_to_ptr.vmem [resolvable:$true] %s361_s12 }
  0x45   : > { %s375_s25 = sshll.u32 %s3448_s22, 4  ;;  %s5130_s13 = smov (%p52_p9, %s5128_s13), 0  ;;  %s376_s25 = int_to_ptr.vmem [resolvable:$true] %s375_s25 }
  0x46   : > { %5005 = sst [smem:[#allocation41_spill]] %s5130_s13  ;;  %s5006_s0 = sld [smem:[#allocation74_spill]] }
  0x4c   : > { %s3235_s23 = scalar_lea.hbm %s5006_s0, 32 }
  0x4d   : > { %p3236_p10 = scmp.ne.s32.totalorder %s5006_s0, %s3235_s23  ;;  %p3242_p6 = scmp.lt.u32.totalorder %s3235_s23, %s5006_s0 }
  0x4f   : > { %p3238_p11 = pnand %p3236_p10, %p3586_p8 }
  0x51   : > { %p3239_p12 = pneg %p3238_p11 }
  0x53   : > { %p3244_p13 = pnand %p3242_p6, %p3239_p12 }
  0x55   : > { %3247 = shalt.err (!%p3244_p13)
}
  0x56   : > { %s3248_s16 = scalar_lea.vmem %s362_s12, 32  ;;  %p3256_p7 = scmp.lt.s32.totalorder %s362_s12, %s362_s12 }
  0x57   : > { %p3249_p0 = scmp.ne.s32.totalorder %s362_s12, %s3248_s16  ;;  %p3257_p9 = scmp.lt.s32.totalorder %s3248_s16, %s3248_s16 }
  0x59   : > { %p3251_p1 = pnand %p3249_p0, %p3586_p8  ;;  %p3258_p2 = por %p3257_p9, %p3256_p7 }
  0x5b   : > { %p3252_p4 = pneg %p3251_p1 }
  0x5d   : > { %p3259_p3 = pnand %p3258_p2, %p3252_p4 }
  0x5f   : > { %3262 = shalt.err (!%p3259_p3)
}
  0x60   : > { %3085 = dma.hbm_to_vmem [thread:$0]  (!%p3568_p5), %s5006_s0, 32, %s362_s12, [#allocation11]  }
  0x61   : > { %s5007_s3 = sld [smem:[#allocation77_spill]]  ;;  %s5008_s1 = sld [smem:[#allocation75_spill]] }
  0x67   : > { %s386_s23 = sshll.u32 %s5007_s3, 4  ;;  %s3263_s14 = scalar_lea.hbm %s5008_s1, 32  ;;  %s387_s23 = int_to_ptr.vmem [resolvable:$true] %s386_s23 }
  0x68   : > { %p3264_p2 = scmp.ne.s32.totalorder %s5008_s1, %s3263_s14  ;;  %p3270_p11 = scmp.lt.u32.totalorder %s3263_s14, %s5008_s1 }
  0x6a   : > { %p3266_p3 = pnand %p3264_p2, %p3586_p8 }
  0x6c   : > { %p3267_p10 = pneg %p3266_p3 }
  0x6e   : > { %p3272_p12 = pnand %p3270_p11, %p3267_p10 }
  0x70   : > { %3275 = shalt.err (!%p3272_p12)
}
  0x71   : > { %s3276_s12 = scalar_lea.vmem %s376_s25, 32  ;;  %p3284_p1 = scmp.lt.s32.totalorder %s376_s25, %s376_s25 }
  0x72   : > { %p3277_p6 = scmp.ne.s32.totalorder %s376_s25, %s3276_s12  ;;  %p3285_p4 = scmp.lt.s32.totalorder %s3276_s12, %s3276_s12 }
  0x74   : > { %p3279_p13 = pnand %p3277_p6, %p3586_p8  ;;  %p3286_p7 = por %p3285_p4, %p3284_p1 }
  0x76   : > { %p3280_p0 = pneg %p3279_p13 }
  0x78   : > { %p3287_p9 = pnand %p3286_p7, %p3280_p0 }
  0x7a   : > { %3290 = shalt.err (!%p3287_p9)
}
  0x7b   : > { %3088 = dma.hbm_to_vmem [thread:$0]  (!%p3568_p5), %s5008_s1, 32, %s376_s25, [#allocation15]  }
  0x7c   : > { %s3291_s6 = scalar_lea.vmem %s387_s23, 64  ;;  %p3299_p11 = scmp.lt.s32.totalorder %s387_s23, %s387_s23 }
  0x7d   : > { %p3292_p2 = scmp.ne.s32.totalorder %s387_s23, %s3291_s6  ;;  %p3300_p12 = scmp.lt.s32.totalorder %s3291_s6, %s3291_s6 }
  0x7f   : > { %p3294_p3 = pnand %p3292_p2, %p3586_p8  ;;  %p3301_p6 = por %p3300_p12, %p3299_p11 }
  0x81   : > { %p3295_p10 = pneg %p3294_p3 }
  0x83   : > { %p3302_p13 = pnand %p3301_p6, %p3295_p10 }
  0x85   : > { %3305 = shalt.err (!%p3302_p13)
}
  0x86   : > { %s3449_s19 = smov [#allocation16]   ;;  %s5009_s4 = sld [smem:[#allocation78_spill]] }
  0x87   : > { %3091 = dma.vmem_to_smem (!%p3568_p5), %s387_s23, 64, %s3449_s19, [#allocation13]  }
  0x8c   : > { %s397_s25 = sshll.u32 %s5009_s4, 4  ;;  %s398_s25 = int_to_ptr.vmem [resolvable:$true] %s397_s25 }
  0x8d   : > { %s3306_s14 = scalar_lea.vmem %s398_s25, 64  ;;  %p3314_p7 = scmp.lt.s32.totalorder %s398_s25, %s398_s25 }
  0x8e   : > { %p3307_p0 = scmp.ne.s32.totalorder %s398_s25, %s3306_s14  ;;  %p3315_p9 = scmp.lt.s32.totalorder %s3306_s14, %s3306_s14 }
  0x90   : > { %p3309_p1 = pnand %p3307_p0, %p3586_p8  ;;  %p3316_p2 = por %p3315_p9, %p3314_p7 }
  0x92   : > { %p3310_p4 = pneg %p3309_p1 }
  0x94   : > { %p3317_p3 = pnand %p3316_p2, %p3310_p4 }
  0x96   : > { %3320 = shalt.err (!%p3317_p3)
}
  0x97   : > { %s3450_s26 = smov [#allocation17]   ;;  %s5010_s5 = sld [smem:[#allocation79_spill]] }
  0x98   : > { %3094 = dma.vmem_to_smem (!%p3568_p5), %s398_s25, 64, %s3450_s26, [#allocation18]  }
  0x9d   : > { %s3321_s11 = scalar_lea.hbm %s5010_s5, 64 }
  0x9e   : > { %p3322_p10 = scmp.ne.s32.totalorder %s5010_s5, %s3321_s11  ;;  %p3328_p6 = scmp.lt.u32.totalorder %s3321_s11, %s5010_s5 }
  0xa0   : > { %p3324_p11 = pnand %p3322_p10, %p3586_p8 }
  0xa2   : > { %p3325_p12 = pneg %p3324_p11 }
  0xa4   : > { %p3330_p13 = pnand %p3328_p6, %p3325_p12 }
  0xa6   : > { %3333 = shalt.err (!%p3330_p13)
}
  0xa7   : > { %s3451_s19 = smov [#allocation19]   ;;  %s5011_s7 = sld [smem:[#allocation81_spill]] }
  0xa8   : > { %3097 = dma.hbm_to_smem (!%p3568_p5), %s5010_s5, 64, %s3451_s19, [#allocation12]  }
  0xad   : > { %s3334_s26 = scalar_lea.hbm %s5011_s7, 16 }
  0xae   : > { %p3335_p0 = scmp.ne.s32.totalorder %s5011_s7, %s3334_s26  ;;  %p3341_p7 = scmp.lt.u32.totalorder %s3334_s26, %s5011_s7 }
  0xb0   : > { %p3337_p1 = pnand %p3335_p0, %p3586_p8 }
  0xb2   : > { %p3338_p4 = pneg %p3337_p1 }
  0xb4   : > { %p3343_p9 = pnand %p3341_p7, %p3338_p4 }
  0xb6   : > { %3346 = shalt.err (!%p3343_p9)
}
  0xb7   : > { %s3452_s22 = smov [#allocation22]   ;;  %s5012_s9 = sld [smem:[#allocation83_spill]] }
  0xb8   : > { %3103 = dma.hbm_to_smem (!%p3568_p5), %s5011_s7, 16, %s3452_s22, [#allocation21]  }
  0xbd   : > { %s3347_s15 = scalar_lea.hbm %s5012_s9, 16 }
  0xbe   : > { %p3348_p2 = scmp.ne.s32.totalorder %s5012_s9, %s3347_s15  ;;  %p3354_p11 = scmp.lt.u32.totalorder %s3347_s15, %s5012_s9 }
  0xc0   : > { %p3350_p3 = pnand %p3348_p2, %p3586_p8 }
  0xc2   : > { %p3351_p10 = pneg %p3350_p3 }
  0xc4   : > { %p3356_p12 = pnand %p3354_p11, %p3351_p10 }
  0xc6   : > { %3359 = shalt.err (!%p3356_p12)
}
  0xc7   : > { %s3453_s16 = smov [#allocation25]   ;;  %s5013_s10 = sld [smem:[#allocation84_spill]] }
  0xc8   : > { %3109 = dma.hbm_to_smem (!%p3568_p5), %s5012_s9, 16, %s3453_s16, [#allocation24]  }
  0xcd   : > { %s3360_s6 = scalar_lea.hbm %s5013_s10, 16 }
  0xce   : > { %p3361_p6 = scmp.ne.s32.totalorder %s5013_s10, %s3360_s6  ;;  %p3367_p1 = scmp.lt.u32.totalorder %s3360_s6, %s5013_s10 }
  0xd0   : > { %p3363_p13 = pnand %p3361_p6, %p3586_p8 }
  0xd2   : > { %p3364_p0 = pneg %p3363_p13 }
  0xd4   : > { %p3369_p4 = pnand %p3367_p1, %p3364_p0 }
  0xd6   : > { %3372 = shalt.err (!%p3369_p4)
}
  0xd7   : > { %s3454_s14 = smov [#allocation26]   ;;  %p5014_p7 = scmp.ne.s32.totalorder %s4998_s28, 0 }
  0xd8   : > { %3112 = dma.hbm_to_smem (!%p3568_p5), %s5013_s10, 16, %s3454_s14, [#allocation27]  }
  0xd9   : > { %477 = sbr.rel (%p5014_p7) target bundleno = 1026 (0x402), region = 64  ;;  %p5015_p9 = scmp.ne.s32.totalorder (!%p5014_p7), %s4997_s27, 0 }
  0xe0   : > { %3394 = dma.done.wait (%p5015_p9), [#allocation11], 32  }
  0xe1   : > { %3396 = vsyncadd (%p5015_p9), [#allocation11], 4294967264 }
  0xe2   : > { %3398 = dma.done.wait (%p5015_p9), [#allocation15], 32  }
  0xe3   : > { %3400 = vsyncadd (%p5015_p9), [#allocation15], 4294967264 }
  0xe4   : > { %3402 = dma.done.wait (%p5015_p9), [#allocation13], 64  }
  0xe5   : > { %3404 = vsyncadd (%p5015_p9), [#allocation13], 4294967232 }
  0xe6   : > { %3406 = dma.done.wait (%p5015_p9), [#allocation18], 64  }
  0xe7   : > { %3408 = vsyncadd (%p5015_p9), [#allocation18], 4294967232 }
  0xe8   : > { %3410 = dma.done.wait (%p5015_p9), [#allocation12], 64  }
  0xe9   : > { %3412 = vsyncadd (%p5015_p9), [#allocation12], 4294967232 }
  0xea   : > { %3414 = dma.done.wait (%p5015_p9), [#allocation21], 80  }
  0xeb   : > { %3416 = vsyncadd (%p5015_p9), [#allocation21], 4294967216 }
  0xec   : > { %3418 = dma.done.wait (%p5015_p9), [#allocation24], 32  }
  0xed   : > { %3420 = vsyncadd (%p5015_p9), [#allocation24], 4294967264 }
  0xee   : > { %3422 = dma.done.wait (%p5015_p9), [#allocation27], 16  }
  0xef   : > { %3424 = vsyncadd (%p5015_p9), [#allocation27], 4294967280 }
  0xf0   : > { %519 = sfence }
  0xf1   : > { %p558_p5 = scmp.lt.s32.totalorder %s3427_s21, 1  ;;  %s5016_s2 = sld [smem:[#allocation76_spill]] }
  0xf2   : > { %s5017_s12 = sld [smem:[#allocation36_spill]] }
  0xf3   : > { %s559_s28 = scalar_select %p558_p5, %s3427_s21, 1 }
  0xf5   : > { %s3040_s29 = sshll.u32 %s559_s28, 3 }
  0xf7   : > { %s565_s11 = scalar_lea.vmem %s5016_s2, %s3040_s29 }
  0xf8   : > { %v3778_v0 = vld [vmem:[%s565_s11] sm:$0xff]  ;;  %p2853_p8 = scmp.ne.s32.totalorder %s5017_s12, 0 }
  0xf9   : > { %p572_p2 = scmp.eq.s32.totalorder (!%p2853_p8), %s3427_s21, 0 }
  0xfa   : > { %571 = sbr.rel (%p2853_p8) target bundleno = 475 (0x1db), region = 108 }
 0x101   : > { %577 = sbr.rel (!%p572_p2) target bundleno = 264 (0x108), region = 112  ;;  %vm578_vm0 = vcmask (%p572_p2), 3072   ;;  %vm583_vm1 = vcmask (%p572_p2), 7168   ;;  %v3455_v1 = vmov (%p572_p2), 0.0  }
 0x102   : > { %579 = vst.msk [vmem:[#allocation2] sm:$0xf] (%p572_p2), %vm578_vm0, %v3455_v1  ;;  %580 = vst.msk [vmem:[#allocation3] sm:$0xf] (%p572_p2), %vm578_vm0, %v3455_v1 }
 0x103   : > { %581 = vst.msk [vmem:[#allocation4] sm:$0xf] (%p572_p2), %vm578_vm0, %v3455_v1  ;;  %582 = vst.msk [vmem:[#allocation5] sm:$0xf] (%p572_p2), %vm578_vm0, %v3455_v1 }
 0x104   : > { %584 = vst.msk [vmem:[#allocation6] sm:$0xff] (%p572_p2), %vm583_vm1, %v3455_v1  ;;  %585 = vst.msk [vmem:[#allocation7] sm:$0xff] (%p572_p2), %vm583_vm1, %v3455_v1 }
 0x105   : > { %586 = vst.msk [vmem:[#allocation8] sm:$0xff] (%p572_p2), %vm583_vm1, %v3455_v1  ;;  %587 = vst.msk [vmem:[#allocation9] sm:$0xff] (%p572_p2), %vm583_vm1, %v3455_v1 }
 0x108 PF: > { %s701_s27 = sld [smem:[#allocation17]]  ;;  %v817_v2 = vlaneseq  ;;  %v3456_v3 = vmov 286326784   ;;  %v588_v6 = vld [vmem:[#allocation10] sm:$0x3]  ;;  %s3788_s25 = sld [smem:[#allocation16 + $0x1]]  ;;  %vm836_vm2 = vcmask 1040384  }
 0x109   : > { %s2882_s22 = sld [smem:[#allocation17 + $0x80]]  ;;  %v815_v4 = vunpack.c.l.s4 %v3456_v3  ;;  %s3790_s14 = sld [smem:[#allocation16 + $0x81]]  ;;  %vm843_vm3 = vcmask 0  }
 0x10a   : > { %s2884_s18 = sld [smem:[#allocation17 + $0x100]]  ;;  %v818_v5 = vshrl.u32 %v817_v2, 7  ;;  %s3794_s26 = sld [smem:[#allocation16 + $0x101]] }
 0x10b   : > { %s2886_s6 = sld [smem:[#allocation17 + $0x180]]  ;;  %v816_v7 = vunpack.c.0.s8 %v815_v4  ;;  %s3796_s23 = sld [smem:[#allocation16 + $0x181]] }
 0x10c   : > { %s589_s21 = sld [smem:[#allocation16]]  ;;  %v3792_v8 = vsub.s32 0, %v818_v5  ;;  %v3798_v12 = vsub.s32 4, %v818_v5  ;;  %s3802_s28 = sld [smem:[#allocation17 + $0x1]] }
 0x10d   : > { %s3782_s19 = sld [smem:[#allocation16 + $0x80]]  ;;  %v819_v11 = vsub.s32 %v816_v7, %v818_v5  ;;  %s3804_s29 = sld [smem:[#allocation17 + $0x81]] }
 0x10e   : > { %s3784_s17 = sld [smem:[#allocation16 + $0x100]]  ;;  %v702_v9 = vstv %s701_s27  ;;  %s3813_s20 = sld [smem:[#allocation17 + $0x101]]  ;;  %v618_v31 = vstv %s3788_s25 }
 0x10f   : > { %s3786_s15 = sld [smem:[#allocation16 + $0x180]]  ;;  %v706_v10 = vstv %s2882_s22  ;;  %v703_v13 = vmul.f32 %v702_v9, %v3778_v0  ;;  %v3808_v19 = vrot.slane %v588_v6, %v819_v11  ;;  %s3817_s16 = sld [smem:[#allocation17 + $0x181]]  ;;  %v622_v32 = vstv %s3790_s14 }
 0x110   : > { %v707_v14 = vmul.f32 %v706_v10, %v3778_v0  ;;  %v714_v15 = vstv %s2884_s18  ;;  %s3819_s11 = sld [smem:[#allocation16 + $0x2]]  ;;  %v619_v36 = vmul.f32 %v618_v31, %v3778_v0  ;;  %v623_v38 = vmul.f32 %v622_v32, %v3778_v0  ;;  %s3894_s25 = sld [smem:[#allocation16 + $0x103]] }
 0x111   : > { %v722_v16 = vstv %s2886_s6  ;;  %v715_v17 = vmul.f32 %v714_v15, %v3778_v0  ;;  %v630_v39 = vstv %s3794_s26  ;;  %v638_v40 = vstv %s3796_s23  ;;  %s3837_s12 = sld [smem:[#allocation16 + $0x82]]  ;;  %s3902_s14 = sld [smem:[#allocation16 + $0x183]] }
 0x112   : > { %v723_v18 = vmul.f32 %v722_v16, %v3778_v0  ;;  %v590_v20 = vstv %s589_s21  ;;  %v2883_v21 = vrot.slane %v707_v14, 9  ;;  %v631_v43 = vmul.f32 %v630_v39, %v3778_v0  ;;  %s3844_s27 = sld [smem:[#allocation16 + $0x102]]  ;;  %s3919_s26 = sld [smem:[#allocation17 + $0x3]] }
 0x113   : > { %v591_v22 = vmul.f32 %v590_v20, %v3778_v0  ;;  %v594_v23 = vstv %s3782_s19  ;;  %v2885_v25 = vrot.slane %v715_v17, 10  ;;  %v639_v44 = vmul.f32 %v638_v40, %v3778_v0  ;;  %s3848_s22 = sld [smem:[#allocation16 + $0x182]]  ;;  %s3922_s23 = sld [smem:[#allocation17 + $0x83]] }
 0x114   : > { %v602_v24 = vstv %s3784_s17  ;;  %v2887_v26 = vrot.slane %v723_v18, 11  ;;  %v595_v27 = vmul.f32 %v594_v23, %v3778_v0  ;;  %v712_v29 = vadd.f32 %v2883_v21, %v703_v13  ;;  %s3850_s18 = sld [smem:[#allocation17 + $0x2]]  ;;  %s3888_s17 = sld [smem:[#allocation16 + $0x3]] }
 0x115   : > { %v603_v28 = vmul.f32 %v602_v24, %v3778_v0  ;;  %v610_v30 = vstv %s3786_s15  ;;  %v2863_v46 = vrot.slane %v623_v38, 9  ;;  %v730_v47 = vstv %s3802_s28  ;;  %s3870_s6 = sld [smem:[#allocation17 + $0x82]]  ;;  %s3892_s15 = sld [smem:[#allocation16 + $0x83]] }
 0x116   : > { %v2856_v33 = vrot.slane %v595_v27, 9  ;;  %v611_v35 = vmul.f32 %v610_v30, %v3778_v0  ;;  %v720_v37 = vadd.f32 %v2885_v25, %v712_v29  ;;  %v734_v48 = vstv %s3804_s29  ;;  %s3877_s21 = sld [smem:[#allocation17 + $0x102]]  ;;  %s3924_s28 = sld [smem:[#allocation17 + $0x103]] }
 0x117   : > { %v2858_v34 = vrot.slane %v603_v28, 10  ;;  %v2865_v50 = vrot.slane %v631_v43, 10  ;;  %v2867_v51 = vrot.slane %v639_v44, 11  ;;  %v731_v52 = vmul.f32 %v730_v47, %v3778_v0  ;;  %s3882_s19 = sld [smem:[#allocation17 + $0x182]]  ;;  %s3932_s29 = sld [smem:[#allocation17 + $0x183]] }
 0x118   : > { %v600_v41 = vadd.f32 %v2856_v33, %v591_v22  ;;  %v2860_v42 = vrot.slane %v611_v35, 11  ;;  %v728_v45 = vadd.f32 %v2887_v26, %v720_v37  ;;  %v628_v54 = vadd.f32 %v2863_v46, %v619_v36 }
 0x119   : > { %v735_v55 = vmul.f32 %v734_v48, %v3778_v0  ;;  %v742_v56 = vstv %s3813_s20  ;;  %v750_v59 = vstv %s3817_s16  ;;  %v646_v60 = vstv %s3819_s11 }
 0x11a   : > { %v608_v49 = vadd.f32 %v2858_v34, %v600_v41  ;;  %v823_v53 = vmul.f32 %v3808_v19, %v728_v45  ;;  %v743_v58 = vmul.f32 %v742_v56, %v3778_v0  ;;  %v636_v1 = vadd.f32 %v2865_v50, %v628_v54 }
 0x11b   : > { %v2890_v3 = vrot.slane %v735_v55, 9  ;;  %v751_v5 = vmul.f32 %v750_v59, %v3778_v0  ;;  %v647_v27 = vmul.f32 %v646_v60, %v3778_v0  ;;  %v650_v28 = vstv %s3837_s12 }
 0x11c   : > { %v3839_v57 = vadd.f32 %v2860_v42, %v608_v49  ;;  %v870_v61 = vrot.slane %v823_v53, %v3792_v8  ;;  %v874_v62 = vrot.slane %v823_v53, %v3798_v12  ;;  %v885_v63 = vmul.f32 %v823_v53, %v728_v45 }
 0x11d   : > { %v2892_v4 = vrot.slane %v743_v58, 10  ;;  %v644_v15 = vadd.f32 %v2867_v51, %v636_v1  ;;  %v740_v18 = vadd.f32 %v2890_v3, %v731_v52  ;;  %v2894_v20 = vrot.slane %v751_v5, 11 }
 0x11e   : > { %v3854_v2 = vmul.f32 %v3808_v19, %v3839_v57  ;;  %v877_v6 = vsel %vm836_vm2, %v870_v61, 0.0  ;;  %v878_v7 = vsel %vm836_vm2, %v874_v62, 0.0  ;;  %v890_v9 = vrot.slane %v885_v63, %v3792_v8 }
 0x11f   : > { %v894_v10 = vrot.slane %v885_v63, %v3798_v12  ;;  %v879_v11 = vadd.f32 %v878_v7, %v877_v6  ;;  %v904_v24 = vmul.f32 %v3808_v19, %v644_v15  ;;  %v748_v26 = vadd.f32 %v2892_v4, %v740_v18 }
 0x120   : > { %v829_v13 = vrot.slane %v3854_v2, %v3792_v8  ;;  %v833_v14 = vrot.slane %v3854_v2, %v3798_v12  ;;  %v897_v16 = vsel %vm836_vm2, %v890_v9, 0.0  ;;  %v651_v32 = vmul.f32 %v650_v28, %v3778_v0 }
 0x121   : > { %v898_v17 = vsel %vm836_vm2, %v894_v10, 0.0  ;;  %880 = vadd.xlane.f32.xlu1 %v879_v11  ;;  %v911_v29 = vrot.slane %v904_v24, %v3792_v8  ;;  %v915_v30 = vrot.slane %v904_v24, %v3798_v12  ;;  %v926_v31 = vmul.f32 %v904_v24, %v644_v15 }
 0x122   : > { %v837_v21 = vsel %vm836_vm2, %v829_v13, 0.0  ;;  %v838_v22 = vsel %vm836_vm2, %v833_v14, 0.0  ;;  %v899_v23 = vadd.f32 %v898_v17, %v897_v16  ;;  %v756_v33 = vadd.f32 %v2894_v20, %v748_v26 }
 0x123   : > { %v839_v25 = vadd.f32 %v838_v22, %v837_v21  ;;  %v658_v34 = vstv %s3844_s27  ;;  %v666_v35 = vstv %s3848_s22  ;;  %v758_v36 = vstv %s3850_s18 }
 0x124   : > { %v918_v37 = vsel %vm836_vm2, %v911_v29, 0.0  ;;  %v919_v38 = vsel %vm836_vm2, %v915_v30, 0.0  ;;  %v931_v39 = vrot.slane %v926_v31, %v3792_v8  ;;  %v935_v40 = vrot.slane %v926_v31, %v3798_v12 }
 0x125   : > { %840 = vadd.xlane.f32.xlu0 %v839_v25  ;;  %900 = vadd.xlane.f32.xlu1 %v899_v23  ;;  %v920_v41 = vadd.f32 %v919_v38, %v918_v37  ;;  %v905_v42 = vmul.f32 %v3808_v19, %v756_v33  ;;  %v2870_v43 = vrot.slane %v651_v32, 9  ;;  %v659_v44 = vmul.f32 %v658_v34, %v3778_v0 }
 0x126   : > { %v938_v45 = vsel %vm836_vm2, %v931_v39, 0.0  ;;  %v939_v46 = vsel %vm836_vm2, %v935_v40, 0.0  ;;  %v667_v47 = vmul.f32 %v666_v35, %v3778_v0  ;;  %v759_v48 = vmul.f32 %v758_v36, %v3778_v0 }
 0x127   : > { %v940_v49 = vadd.f32 %v939_v46, %v938_v45  ;;  %v950_v50 = vrot.slane %v905_v42, %v3792_v8  ;;  %v954_v51 = vrot.slane %v905_v42, %v3798_v12  ;;  %v965_v52 = vmul.f32 %v905_v42, %v756_v33 }
 0x128   : > { %v656_v53 = vadd.f32 %v2870_v43, %v647_v27  ;;  %v2872_v54 = vrot.slane %v659_v44, 10  ;;  %v2874_v55 = vrot.slane %v667_v47, 11  ;;  %v762_v56 = vstv %s3870_s6 }
 0x129   : > { %921 = vadd.xlane.f32.xlu0 %v920_v41  ;;  %941 = vadd.xlane.f32.xlu1 %v940_v49  ;;  %v957_v58 = vsel %vm836_vm2, %v950_v50, 0.0  ;;  %v958_v59 = vsel %vm836_vm2, %v954_v51, 0.0  ;;  %v970_v60 = vrot.slane %v965_v52, %v3792_v8  ;;  %v974_v61 = vrot.slane %v965_v52, %v3798_v12 }
 0x12a   : > { %v959_v62 = vadd.f32 %v958_v59, %v957_v58  ;;  %v664_v63 = vadd.f32 %v2872_v54, %v656_v53  ;;  %v763_v1 = vmul.f32 %v762_v56, %v3778_v0  ;;  %v770_v3 = vstv %s3877_s21 }
 0x12b   : > { %v977_v4 = vsel %vm836_vm2, %v970_v60, 0.0  ;;  %v978_v5 = vsel %vm836_vm2, %v974_v61, 0.0  ;;  %v771_v6 = vmul.f32 %v770_v3, %v3778_v0  ;;  %v778_v7 = vstv %s3882_s19 }
 0x12c   : > { %v979_v9 = vadd.f32 %v978_v5, %v977_v4  ;;  %v672_v10 = vadd.f32 %v2874_v55, %v664_v63  ;;  %v2897_v11 = vrot.slane %v763_v1, 9  ;;  %v779_v13 = vmul.f32 %v778_v7, %v3778_v0 }
 0x12d   : > { %960 = vadd.xlane.f32.xlu0 %v959_v62  ;;  %v2899_v14 = vrot.slane %v771_v6, 10  ;;  %v674_v15 = vstv %s3888_s17  ;;  %v678_v16 = vstv %s3892_s15  ;;  %v686_v17 = vstv %s3894_s25 }
 0x12e   : > { %980 = vadd.xlane.f32.xlu1 %v979_v9  ;;  %v984_v18 = vmul.f32 %v3808_v19, %v672_v10  ;;  %v768_v20 = vadd.f32 %v2897_v11, %v759_v48  ;;  %v2901_v21 = vrot.slane %v779_v13, 11  ;;  %v675_v22 = vmul.f32 %v674_v15, %v3778_v0 }
 0x12f   : > { %v679_v23 = vmul.f32 %v678_v16, %v3778_v0  ;;  %v687_v24 = vmul.f32 %v686_v17, %v3778_v0  ;;  %v694_v25 = vstv %s3902_s14  ;;  %v846_v33 = vmul.f32 %v3854_v2, %v3839_v57 }
 0x130   : > { %v991_v26 = vrot.slane %v984_v18, %v3792_v8  ;;  %v995_v27 = vrot.slane %v984_v18, %v3798_v12  ;;  %v1006_v28 = vmul.f32 %v984_v18, %v672_v10  ;;  %v776_v29 = vadd.f32 %v2899_v14, %v768_v20 }
 0x131   : > { %v2877_v30 = vrot.slane %v679_v23, 9  ;;  %v2879_v31 = vrot.slane %v687_v24, 10  ;;  %v695_v32 = vmul.f32 %v694_v25, %v3778_v0  ;;  %v786_v45 = vstv %s3919_s26 }
 0x132   : > { %v998_v34 = vsel %vm836_vm2, %v991_v26, 0.0  ;;  %v999_v35 = vsel %vm836_vm2, %v995_v27, 0.0  ;;  %v1011_v36 = vrot.slane %v1006_v28, %v3792_v8  ;;  %v1015_v37 = vrot.slane %v1006_v28, %v3798_v12 }
 0x133   : > { %v1000_v38 = vadd.f32 %v999_v35, %v998_v34  ;;  %v784_v39 = vadd.f32 %v2901_v21, %v776_v29  ;;  %v684_v40 = vadd.f32 %v2877_v30, %v675_v22  ;;  %v2881_v41 = vrot.slane %v695_v32, 11 }
 0x134   : > { %v1018_v42 = vsel %vm836_vm2, %v1011_v36, 0.0  ;;  %v1019_v43 = vsel %vm836_vm2, %v1015_v37, 0.0  ;;  %v851_v46 = vrot.slane %v846_v33, %v3792_v8  ;;  %v855_v47 = vrot.slane %v846_v33, %v3798_v12 }
 0x135   : > { %1001 = vadd.xlane.f32.xlu0 %v1000_v38  ;;  %v1020_v57 = vadd.f32 %v1019_v43, %v1018_v42  ;;  %v985_v2 = vmul.f32 %v3808_v19, %v784_v39  ;;  %v692_v44 = vadd.f32 %v2879_v31, %v684_v40  ;;  %v790_v48 = vstv %s3922_s23 }
 0x136   : > { %v798_v49 = vstv %s3924_s28  ;;  %v787_v54 = vmul.f32 %v786_v45, %v3778_v0  ;;  %v791_v55 = vmul.f32 %v790_v48, %v3778_v0  ;;  %v806_v58 = vstv %s3932_s29  ;;  %v925_v48 = vld [vmem:[#allocation3 + $0x1] sm:$0x1] }
 0x137   : > { %1021 = vadd.xlane.f32.xlu1 %v1020_v57  ;;  %v1030_v50 = vrot.slane %v985_v2, %v3792_v8  ;;  %v1034_v51 = vrot.slane %v985_v2, %v3798_v12  ;;  %v1045_v52 = vmul.f32 %v985_v2, %v784_v39  ;;  %v700_v53 = vadd.f32 %v2881_v41, %v692_v44  ;;  %v865_v41 = vld [vmem:[#allocation4] sm:$0x1]  ;;  %v824_v57 = vld [vmem:[#allocation2] sm:$0x1] }
 0x138   : > { %v799_v56 = vmul.f32 %v798_v49, %v3778_v0  ;;  %v2904_v3 = vrot.slane %v791_v55, 9  ;;  %v807_v7 = vmul.f32 %v806_v58, %v3778_v0  ;;  %v858_v14 = vsel %vm836_vm2, %v851_v46, 0.0  ;;  %v906_v46 = vld [vmem:[#allocation2 + $0x1] sm:$0x1] }
 0x139   : > { %v1037_v59 = vsel %vm836_vm2, %v1030_v50, 0.0  ;;  %v1038_v60 = vsel %vm836_vm2, %v1034_v51, 0.0  ;;  %v1050_v61 = vrot.slane %v1045_v52, %v3792_v8  ;;  %v1054_v62 = vrot.slane %v1045_v52, %v3798_v12  ;;  %v945_v52 = vld [vmem:[#allocation4 + $0x1] sm:$0x1] }
 0x13a   : > { %v1039_v63 = vadd.f32 %v1038_v60, %v1037_v59  ;;  %v1064_v1 = vmul.f32 %v3808_v19, %v700_v53  ;;  %v2906_v6 = vrot.slane %v799_v56, 10  ;;  %v859_v15 = vsel %vm836_vm2, %v855_v47, 0.0  ;;  %v986_v59 = vld [vmem:[#allocation2 + $0x2] sm:$0x1] }
 0x13b   : > { %v1057_v4 = vsel %vm836_vm2, %v1050_v61, 0.0  ;;  %v1058_v5 = vsel %vm836_vm2, %v1054_v62, 0.0  ;;  %v796_v16 = vadd.f32 %v2904_v3, %v787_v54  ;;  %v2908_v17 = vrot.slane %v807_v7, 11  ;;  %v964_v54 = vld [vmem:[#allocation5 + $0x1] sm:$0x1] }
 0x13c   : > { %1040 = vadd.xlane.f32.xlu0 %v1039_v63  ;;  %v1059_v9 = vadd.f32 %v1058_v5, %v1057_v4  ;;  %v1071_v10 = vrot.slane %v1064_v1, %v3792_v8  ;;  %v1075_v11 = vrot.slane %v1064_v1, %v3798_v12  ;;  %v1086_v13 = vmul.f32 %v1064_v1, %v700_v53  ;;  %v1005_v61 = vld [vmem:[#allocation3 + $0x2] sm:$0x1]  ;;  %v1025_v3 = vld [vmem:[#allocation4 + $0x2] sm:$0x1]  ;;  %v1044_v5 = vld [vmem:[#allocation5 + $0x2] sm:$0x1] }
 0x13d   : > { %v804_v24 = vadd.f32 %v2906_v6, %v796_v16  ;;  %v860_v28 = vadd.f32 %v859_v15, %v858_v14  ;;  %v845_v16 = vld [vmem:[#allocation3] sm:$0x1] }
 0x13e   : > { %1060 = vadd.xlane.f32.xlu1 %v1059_v9  ;;  %v1078_v18 = vsel %vm836_vm2, %v1071_v10, 0.0  ;;  %v1079_v20 = vsel %vm836_vm2, %v1075_v11, 0.0  ;;  %v1091_v21 = vrot.slane %v1086_v13, %v3792_v8  ;;  %v1095_v22 = vrot.slane %v1086_v13, %v3798_v12  ;;  %v1066_v10 = vld [vmem:[#allocation2 + $0x3] sm:$0x1]  ;;  %v1085_v13 = vld [vmem:[#allocation3 + $0x3] sm:$0x1] }
 0x13f   : > { %v1080_v23 = vadd.f32 %v1079_v20, %v1078_v18  ;;  %v812_v29 = vadd.f32 %v2908_v17, %v804_v24 }
 0x140   : > { %v1098_v25 = vsel %vm836_vm2, %v1091_v21, 0.0  ;;  %v1099_v26 = vsel %vm836_vm2, %v1095_v22, 0.0  ;;  %v1105_v21 = vld [vmem:[#allocation4 + $0x3] sm:$0x1]  ;;  %v1124_v22 = vld [vmem:[#allocation5 + $0x3] sm:$0x1] }
 0x141   : > { %1081 = vadd.xlane.f32.xlu0 %v1080_v23  ;;  %v1100_v27 = vadd.f32 %v1099_v26, %v1098_v25  ;;  %v1065_v30 = vmul.f32 %v3808_v19, %v812_v29 }
 0x143   : > { %1101 = vadd.xlane.f32.xlu1 %v1100_v27  ;;  %v1125_v31 = vmul.f32 %v1065_v30, %v812_v29  ;;  %v1110_v32 = vrot.slane %v1065_v30, %v3792_v8  ;;  %v1114_v33 = vrot.slane %v1065_v30, %v3798_v12 }
 0x145   : > { %861 = vadd.xlane.f32.xlu0 %v860_v28  ;;  %v1130_v34 = vrot.slane %v1125_v31, %v3792_v8  ;;  %v1134_v35 = vrot.slane %v1125_v31, %v3798_v12  ;;  %v1117_v36 = vsel %vm836_vm2, %v1110_v32, 0.0  ;;  %v1118_v37 = vsel %vm836_vm2, %v1114_v33, 0.0  ;;  %v884_v8 = vld [vmem:[#allocation5] sm:$0x1] }
 0x146   : > { %v1119_v38 = vadd.f32 %v1118_v37, %v1117_v36 }
 0x147   : > { %v1137_v39 = vsel %vm836_vm2, %v1130_v34, 0.0  ;;  %v1138_v40 = vsel %vm836_vm2, %v1134_v35, 0.0 }
 0x148   : > { %v1139_v19 = vadd.f32 %v1138_v40, %v1137_v39 }
 0x149   : > { %1120 = vadd.xlane.f32.xlu0 %v1119_v38 }
 0x14a   : > { %1140 = vadd.xlane.f32.xlu1 %v1139_v19 }
 0x1ae   : > { %v881_v42 = vpop.xlane.xlu1 %880 }
 0x1af   : > { %v882_v43 = vadd.f32 %v881_v42, %v865_v41 }
 0x1b1   : > { %883 = vst.msk [vmem:[#allocation4] sm:$0x1] %vm843_vm3, %v882_v43 }
 0x1b2   : > { %v841_v12 = vpop.xlane.xlu0 %840  ;;  %v901_v44 = vpop.xlane.xlu1 %900 }
 0x1b3   : > { %v842_v2 = vadd.f32 %v841_v12, %v824_v57  ;;  %v902_v45 = vadd.f32 %v901_v44, %v884_v8 }
 0x1b5   : > { %844 = vst.msk [vmem:[#allocation2] sm:$0x1] %vm843_vm3, %v842_v2  ;;  %903 = vst.msk [vmem:[#allocation5] sm:$0x1] %vm843_vm3, %v902_v45 }
 0x1b6   : > { %v922_v47 = vpop.xlane.xlu0 %921  ;;  %v942_v50 = vpop.xlane.xlu1 %941 }
 0x1b7   : > { %v923_v49 = vadd.f32 %v922_v47, %v906_v46  ;;  %v943_v51 = vadd.f32 %v942_v50, %v925_v48 }
 0x1b9   : > { %924 = vst.msk [vmem:[#allocation2 + $0x1] sm:$0x1] %vm843_vm3, %v923_v49  ;;  %944 = vst.msk [vmem:[#allocation3 + $0x1] sm:$0x1] %vm843_vm3, %v943_v51 }
 0x1ba   : > { %v961_v53 = vpop.xlane.xlu0 %960 }
 0x1bb   : > { %v962_v55 = vadd.f32 %v961_v53, %v945_v52  ;;  %v981_v56 = vpop.xlane.xlu1 %980 }
 0x1bc   : > { %v982_v58 = vadd.f32 %v981_v56, %v964_v54 }
 0x1bd   : > { %963 = vst.msk [vmem:[#allocation4 + $0x1] sm:$0x1] %vm843_vm3, %v962_v55 }
 0x1be   : > { %983 = vst.msk [vmem:[#allocation5 + $0x1] sm:$0x1] %vm843_vm3, %v982_v58 }
 0x1c2   : > { %v1002_v60 = vpop.xlane.xlu0 %1001 }
 0x1c3   : > { %v1003_v62 = vadd.f32 %v1002_v60, %v986_v59 }
 0x1c4   : > { %v1022_v63 = vpop.xlane.xlu1 %1021 }
 0x1c5   : > { %1004 = vst.msk [vmem:[#allocation2 + $0x2] sm:$0x1] %vm843_vm3, %v1003_v62  ;;  %v1023_v1 = vadd.f32 %v1022_v63, %v1005_v61 }
 0x1c7   : > { %1024 = vst.msk [vmem:[#allocation3 + $0x2] sm:$0x1] %vm843_vm3, %v1023_v1 }
 0x1c9   : > { %v1041_v4 = vpop.xlane.xlu0 %1040 }
 0x1ca   : > { %v1042_v6 = vadd.f32 %v1041_v4, %v1025_v3 }
 0x1cb   : > { %v1061_v7 = vpop.xlane.xlu1 %1060 }
 0x1cc   : > { %1043 = vst.msk [vmem:[#allocation4 + $0x2] sm:$0x1] %vm843_vm3, %v1042_v6  ;;  %v1062_v9 = vadd.f32 %v1061_v7, %v1044_v5 }
 0x1ce   : > { %1063 = vst.msk [vmem:[#allocation5 + $0x2] sm:$0x1] %vm843_vm3, %v1062_v9  ;;  %v1082_v11 = vpop.xlane.xlu0 %1081 }
 0x1cf   : > { %v1083_v14 = vadd.f32 %v1082_v11, %v1066_v10 }
 0x1d0   : > { %v1102_v15 = vpop.xlane.xlu1 %1101 }
 0x1d1   : > { %1084 = vst.msk [vmem:[#allocation2 + $0x3] sm:$0x1] %vm843_vm3, %v1083_v14  ;;  %v1103_v17 = vadd.f32 %v1102_v15, %v1085_v13 }
 0x1d2   : > { %v862_v18 = vpop.xlane.xlu0 %861 }
 0x1d3   : > { %1104 = vst.msk [vmem:[#allocation3 + $0x3] sm:$0x1] %vm843_vm3, %v1103_v17  ;;  %v863_v20 = vadd.f32 %v862_v18, %v845_v16 }
 0x1d5   : > { %864 = vst.msk [vmem:[#allocation3] sm:$0x1] %vm843_vm3, %v863_v20 }
 0x1d6   : > { %v1121_v23 = vpop.xlane.xlu0 %1120 }
 0x1d7   : > { %v1122_v24 = vadd.f32 %v1121_v23, %v1105_v21  ;;  %v1141_v25 = vpop.xlane.xlu1 %1140 }
 0x1d8   : > { %v1142_v26 = vadd.f32 %v1141_v25, %v1124_v22 }
 0x1d9   : > { %1123 = vst.msk [vmem:[#allocation4 + $0x3] sm:$0x1] %vm843_vm3, %v1122_v24 }
 0x1da   : > { %1143 = vst.msk [vmem:[#allocation5 + $0x3] sm:$0x1] %vm843_vm3, %v1142_v26 }
 0x1db PF: > { %s5018_s20 = sld [smem:[#allocation36_spill]] }
 0x1e1   : > { %p2909_p3 = scmp.ne.s32.totalorder %s5018_s20, 1 }
 0x1e3   : > { %1147 = sbr.rel (%p2909_p3) target bundleno = 900 (0x384), region = 116 }
 0x1ea   : > { %v1303_v27 = vld [vmem:[#allocation2 + $0x1] sm:$0x1]  ;;  %v1305_v28 = vld [vmem:[#allocation3 + $0x1] sm:$0x1]  ;;  %v3457_v29 = vmov 0   ;;  %s4013_s16 = sld [smem:[#allocation22 + $0x1]] }
 0x1eb   : > { %3192 = vset.pattern.permute.xlu1 %v3457_v29  ;;  %3191 = vset.pattern.permute.xlu0 %v3457_v29  ;;  %v3999_v30 = vmul.f32 0.0005945303, %v1303_v27  ;;  %v1306_v31 = vmul.f32 0.0005945303, %v1305_v28  ;;  %v1261_v32 = vld [vmem:[#allocation2] sm:$0x1] }
 0x1ec   : > { %v1263_v33 = vld [vmem:[#allocation3] sm:$0x1]  ;;  %v4003_v35 = vmul.f32 0.0005945303, %v1261_v32  ;;  %v2000_v37 = vld [vmem:[#allocation4] sm:$0x1] }
 0x1ed   : > { %v1307_v34 = vmul.f32 %v3999_v30, %v3999_v30  ;;  %v1264_v36 = vmul.f32 0.0005945303, %v1263_v33  ;;  %v4005_v38 = vmul.f32 0.0005945303, %v2000_v37  ;;  %v2002_v39 = vld [vmem:[#allocation5] sm:$0x1] }
 0x1ee   : > { %v1265_v19 = vmul.f32 %v4003_v35, %v4003_v35  ;;  %v2003_v41 = vmul.f32 0.0005945303, %v2002_v39  ;;  %v2042_v42 = vld [vmem:[#allocation4 + $0x1] sm:$0x1]  ;;  %v2044_v43 = vld [vmem:[#allocation5 + $0x1] sm:$0x1] }
 0x1ef   : > { %v1308_v40 = vsub.f32 %v1306_v31, %v1307_v34  ;;  %v2004_v57 = vmul.f32 %v4005_v38, %v4005_v38  ;;  %v4011_v8 = vmul.f32 0.0005945303, %v2042_v42  ;;  %v2045_v12 = vmul.f32 0.0005945303, %v2044_v43  ;;  %v2084_v45 = vld [vmem:[#allocation4 + $0x2] sm:$0x1] }
 0x1f0   : > { %v1266_v44 = vsub.f32 %v1264_v36, %v1265_v19  ;;  %v2086_v46 = vld [vmem:[#allocation5 + $0x2] sm:$0x1]  ;;  %v4017_v49 = vmul.f32 0.0005945303, %v2084_v45  ;;  %v1345_v50 = vld [vmem:[#allocation2 + $0x2] sm:$0x1]  ;;  %v1312_v16 = vstv %s4013_s16 }
 0x1f1   : > { %v1310_v2 = vadd.f32 1e-05, %v1308_v40  ;;  %v2005_v47 = vsub.f32 %v2003_v41, %v2004_v57  ;;  %v2046_v48 = vmul.f32 %v4011_v8, %v4011_v8  ;;  %v2087_v52 = vmul.f32 0.0005945303, %v2086_v46  ;;  %s4021_s11 = sld [smem:[#allocation22]]  ;;  %s4029_s27 = sld [smem:[#allocation25 + $0x1]] }
 0x1f2   : > { %v1268_v51 = vadd.f32 1e-05, %v1266_v44  ;;  %v4019_v53 = vmul.f32 0.0005945303, %v1345_v50  ;;  %v2088_v56 = vmul.f32 %v4017_v49, %v4017_v49  ;;  %v1347_v58 = vld [vmem:[#allocation3 + $0x2] sm:$0x1] }
 0x1f3   : > { %3193 = vrsqrt.f32 %v1310_v2  ;;  %v2007_v54 = vadd.f32 1e-05, %v2005_v47  ;;  %v2047_v55 = vsub.f32 %v2045_v12, %v2046_v48  ;;  %v1348_v59 = vmul.f32 0.0005945303, %v1347_v58  ;;  %v1387_v61 = vld [vmem:[#allocation2 + $0x3] sm:$0x1] }
 0x1f4   : > { %3195 = vrsqrt.f32 %v1268_v51  ;;  %v1349_v60 = vmul.f32 %v4019_v53, %v4019_v53  ;;  %v1389_v62 = vld [vmem:[#allocation3 + $0x3] sm:$0x1]  ;;  %s4027_s12 = sld [smem:[#allocation25]]  ;;  %v2089_v1 = vsub.f32 %v2087_v52, %v2088_v56  ;;  %v4031_v4 = vmul.f32 0.0005945303, %v1387_v61  ;;  %s4037_s22 = sld [smem:[#allocation25 + $0x2]] }
 0x1f5   : > { %3197 = vrsqrt.f32 %v2007_v54  ;;  %v2049_v63 = vadd.f32 1e-05, %v2047_v55  ;;  %v1390_v5 = vmul.f32 0.0005945303, %v1389_v62  ;;  %v2126_v6 = vld [vmem:[#allocation4 + $0x3] sm:$0x1] }
 0x1f6   : > { %v1350_v3 = vsub.f32 %v1348_v59, %v1349_v60  ;;  %v2091_v7 = vadd.f32 1e-05, %v2089_v1  ;;  %v4033_v9 = vmul.f32 0.0005945303, %v2126_v6  ;;  %v2128_v10 = vld [vmem:[#allocation5 + $0x3] sm:$0x1]  ;;  %v1391_v13 = vmul.f32 %v4031_v4, %v4031_v4 }
 0x1f7   : > { %3199 = vrsqrt.f32 %v2049_v63  ;;  %v2129_v14 = vmul.f32 0.0005945303, %v2128_v10  ;;  %s4042_s18 = sld [smem:[#allocation22 + $0x2]]  ;;  %v1270_v21 = vstv %s4021_s11  ;;  %s4046_s6 = sld [smem:[#allocation22 + $0x3]]  ;;  %v2051_v29 = vstv %s4029_s27 }
 0x1f8   : > { %v1352_v11 = vadd.f32 1e-05, %v1350_v3  ;;  %3201 = vrsqrt.f32 %v2091_v7  ;;  %v2130_v15 = vmul.f32 %v4033_v9, %v4033_v9  ;;  %v1392_v17 = vsub.f32 %v1390_v5, %v1391_v13  ;;  %s4048_s21 = sld [smem:[#allocation23]]  ;;  %s4051_s19 = sld [smem:[#allocation25 + $0x3]] }
 0x1f9   : > { %s3002_s17 = sld [smem:[#allocation26 + $0x1]]  ;;  %s2940_s25 = sld [smem:[#allocation23 + $0x2]]  ;;  %vm1579_vm4 = vcmask 1040384   ;;  %vm1586_vm5 = vcmask 0  }
 0x1fa   : > { %3203 = vrsqrt.f32 %v1352_v11  ;;  %v2131_v18 = vsub.f32 %v2129_v14, %v2130_v15  ;;  %v1394_v22 = vadd.f32 1e-05, %v1392_v17  ;;  %v2009_v24 = vstv %s4027_s12  ;;  %s2938_s15 = sld [smem:[#allocation23 + $0x1]]  ;;  %s2011_s14 = sld [smem:[#allocation26]] }
 0x1fb   : > { %v2093_v33 = vstv %s4037_s22  ;;  %s3004_s26 = sld [smem:[#allocation26 + $0x2]]  ;;  %s3006_s23 = sld [smem:[#allocation26 + $0x3]]  ;;  %v1283_v14 = vlaneseq  ;;  %v3458_v17 = vmov 839922192  }
 0x1fc   : > { %v2133_v25 = vadd.f32 1e-05, %v2131_v18  ;;  %3205 = vrsqrt.f32 %v1394_v22  ;;  %s2942_s28 = sld [smem:[#allocation23 + $0x3]]  ;;  %s2917_s29 = sld [smem:[#allocation16 + $0x81]]  ;;  %v4095_v18 = vunpack.c.l.s4 %v3458_v17 }
 0x1fd   : > { %v3194_v20 = vpop.eup %3193  ;;  %v1354_v36 = vstv %s4042_s18  ;;  %v1396_v42 = vstv %s4046_s6  ;;  %s2916_s20 = sld [smem:[#allocation16 + $0x1]]  ;;  %s2910_s11 = sld [smem:[#allocation16 + $0x80]] }
 0x1fe   : > { %v1313_v23 = vmul.f32 %v3194_v20, %v1312_v16  ;;  %v3196_v26 = vpop.eup %3195  ;;  %3207 = vrsqrt.f32 %v2133_v25  ;;  %v1274_v43 = vstv %s4048_s21  ;;  %v2135_v12 = vstv %s4051_s19  ;;  %s2919_s16 = sld [smem:[#allocation16 + $0x101]]  ;;  %s4066_s27 = sld [smem:[#allocation17 + $0x80]] }
 0x1ff   : > { %v3198_v27 = vpop.eup %3197  ;;  %v1271_v28 = vmul.f32 %v3196_v26, %v1270_v21  ;;  %v2055_v47 = vstv %s3002_s17  ;;  %v1358_v54 = vstv %s2940_s25  ;;  %s2921_s12 = sld [smem:[#allocation16 + $0x181]]  ;;  %s4068_s22 = sld [smem:[#allocation16]] }
 0x200   : > { %1320 = vperm.xlu1 %3192, %v1313_v23   ;;  %v2010_v31 = vmul.f32 %v3198_v27, %v2009_v24  ;;  %v1315_v48 = vmul.f32 %v1313_v23, %v3999_v30  ;;  %v1316_v50 = vstv %s2938_s15  ;;  %v2013_v58 = vstv %s2011_s14  ;;  %s4070_s18 = sld [smem:[#allocation16 + $0x100]]  ;;  %s4083_s15 = sld [smem:[#allocation17 + $0x81]] }
 0x201   : > { %v3200_v32 = vpop.eup %3199  ;;  %1278 = vperm.xlu0 %3191, %v1271_v28   ;;  %v1273_v19 = vmul.f32 %v1271_v28, %v4003_v35  ;;  %v2097_v30 = vstv %s3004_s26  ;;  %v2139_v62 = vstv %s3006_s23  ;;  %s4073_s6 = sld [smem:[#allocation16 + $0x180]]  ;;  %s4085_s25 = sld [smem:[#allocation17 + $0x1]] }
 0x202   : > { %v2052_v34 = vmul.f32 %v3200_v32, %v2051_v29  ;;  %v3202_v37 = vpop.eup %3201  ;;  %v1317_v55 = vsub.f32 %v1316_v50, %v1315_v48  ;;  %v2012_v56 = vmul.f32 %v2010_v31, %v4005_v38  ;;  %v1400_v1 = vstv %s2942_s28  ;;  %s4075_s21 = sld [smem:[#allocation17]]  ;;  %s4087_s14 = sld [smem:[#allocation17 + $0x82]] }
 0x203   : > { %v2094_v40 = vmul.f32 %v3202_v37, %v2093_v33  ;;  %v1275_v45 = vsub.f32 %v1274_v43, %v1273_v19  ;;  %v1178_v5 = vstv %s2916_s20  ;;  %s4077_s19 = sld [smem:[#allocation17 + $0x100]]  ;;  %v1154_v7 = vstv %s2910_s11  ;;  %s4091_s26 = sld [smem:[#allocation17 + $0x101]] }
 0x204   : > { %2017 = vperm.xlu1 %3192, %v2010_v31   ;;  %v3204_v39 = vpop.eup %3203  ;;  %v2054_v46 = vmul.f32 %v2052_v34, %v4011_v8  ;;  %v2014_v60 = vsub.f32 %v2013_v58, %v2012_v56  ;;  %v1190_v6 = vstv %s2919_s16  ;;  %s4081_s17 = sld [smem:[#allocation17 + $0x180]]  ;;  %v1155_v15 = vmul.f32 %v1154_v7, %v3778_v0  ;;  %s4093_s23 = sld [smem:[#allocation16 + $0x82]] }
 0x205   : > { %2059 = vperm.xlu0 %3191, %v2052_v34   ;;  %v1355_v41 = vmul.f32 %v3204_v39, %v1354_v36  ;;  %v2096_v59 = vmul.f32 %v2094_v40, %v4017_v49  ;;  %v1182_v49 = vstv %s2917_s29  ;;  %v1191_v11 = vmul.f32 %v1190_v6, %v3778_v0  ;;  %s4102_s28 = sld [smem:[#allocation16 + $0x83]]  ;;  %s4105_s29 = sld [smem:[#allocation17 + $0x181]] }
 0x206   : > { %v3206_v57 = vpop.eup %3205  ;;  %v2056_v51 = vsub.f32 %v2055_v47, %v2054_v46  ;;  %v1198_v13 = vstv %s2921_s12  ;;  %v1893_v16 = vstv %s4066_s27  ;;  %v1150_v21 = vstv %s4068_s22  ;;  %s4107_s20 = sld [smem:[#allocation17 + $0x2]]  ;;  %s4131_s22 = sld [smem:[#allocation16 + $0x3]] }
 0x207   : > { %v1397_v44 = vmul.f32 %v3206_v57, %v1396_v42  ;;  %v1357_v52 = vmul.f32 %v1355_v41, %v4019_v53  ;;  %v2098_v63 = vsub.f32 %v2097_v30, %v2096_v59  ;;  %v4098_v20 = vmul.f32 %v1198_v13, %v3778_v0  ;;  %s4111_s16 = sld [smem:[#allocation17 + $0x102]]  ;;  %s4202_s1 = sld [smem:[#allocation19 + $0x6]] }
 0x208   : > { %2101 = vperm.xlu1 %3192, %v2094_v40   ;;  %v3208_v2 = vpop.eup %3207  ;;  %v1162_v22 = vstv %s4070_s18  ;;  %v2920_v24 = vrot.slane %v1191_v11, 10  ;;  %v1170_v25 = vstv %s4073_s6  ;;  %v1889_v26 = vstv %s4075_s21  ;;  %s4118_s11 = sld [smem:[#allocation16 + $0x2]]  ;;  %s4138_s18 = sld [smem:[#allocation16 + $0x103]] }
 0x209   : > { %1362 = vperm.xlu0 %3191, %v1355_v41   ;;  %v2136_v35 = vmul.f32 %v3208_v2, %v2135_v12  ;;  %v1359_v8 = vsub.f32 %v1358_v54, %v1357_v52  ;;  %v1399_v53 = vmul.f32 %v1397_v44, %v4031_v4  ;;  %v1183_v4 = vmul.f32 %v1182_v49, %v3778_v0  ;;  %s4120_s12 = sld [smem:[#allocation16 + $0x102]]  ;;  %s4140_s6 = sld [smem:[#allocation17 + $0x83]] }
 0x20a   : > { %v1894_v27 = vmul.f32 %v1893_v16, %v3778_v0  ;;  %v1151_v28 = vmul.f32 %v1150_v21, %v3778_v0  ;;  %v2911_v29 = vrot.slane %v1155_v15, 9  ;;  %v4115_v31 = vmul.f32 %v1162_v22, %v3778_v0  ;;  %s4129_s27 = sld [smem:[#allocation17 + $0x182]]  ;;  %s4230_s2 = sld [smem:[#allocation19 + $0x84]] }
 0x20b   : > { %v2138_v61 = vmul.f32 %v2136_v35, %v4033_v9  ;;  %v1401_v38 = vsub.f32 %v1400_v1, %v1399_v53  ;;  %v1179_v9 = vmul.f32 %v1178_v5, %v3778_v0  ;;  %v2918_v10 = vrot.slane %v1183_v4, 9  ;;  %s4147_s21 = sld [smem:[#allocation16 + $0x182]]  ;;  %s4237_s3 = sld [smem:[#allocation19 + $0x85]] }
 0x20c   : > { %1404 = vperm.xlu1 %3192, %v1397_v44   ;;  %v1901_v32 = vstv %s4077_s19  ;;  %v1282_v33 = vunpack.c.0.s8 %v4095_v18  ;;  %v4123_v34 = vshrl.u32 %v1283_v14, 7  ;;  %v2922_v36 = vrot.slane %v4098_v20, 11  ;;  %s4154_s19 = sld [smem:[#allocation16 + $0x183]]  ;;  %s4200_s0 = sld [smem:[#allocation19 + $0x82]] }
 0x20d   : > { %1291 = vperm.xlu0 %3191, %v1275_v45   ;;  %v2140_v3 = vsub.f32 %v2139_v62, %v2138_v61  ;;  %v1188_v23 = vadd.f32 %v2918_v10, %v1179_v9  ;;  %v4127_v37 = vmul.f32 %v1170_v25, %v3778_v0  ;;  %v1890_v40 = vmul.f32 %v1889_v26, %v3778_v0  ;;  %s4242_s4 = sld [smem:[#allocation19 + $0x7]]  ;;  %s4246_s5 = sld [smem:[#allocation19 + $0x86]] }
 0x20e   : > { %v1909_v19 = vstv %s4081_s17  ;;  %v1921_v41 = vstv %s4083_s15  ;;  %v2975_v42 = vrot.slane %v1894_v27, 9  ;;  %v4143_v43 = vmul.f32 %v1901_v32, %v3778_v0  ;;  %s4156_s17 = sld [smem:[#allocation17 + $0x3]]  ;;  %s4254_s7 = sld [smem:[#allocation19 + $0x180]] }
 0x20f   : > { %v4133_v39 = vadd.f32 %v2920_v24, %v1188_v23  ;;  %v1917_v57 = vstv %s4085_s25  ;;  %v1949_v12 = vstv %s4087_s14  ;;  %v4149_v2 = vadd.f32 %v2911_v29, %v1151_v28  ;;  %s4164_s15 = sld [smem:[#allocation17 + $0x103]]  ;;  %s4172_s14 = sld [smem:[#allocation19 + $0x2]] }
 0x210   : > { %2143 = vperm.xlu1 %3192, %v2136_v35   ;;  %v2913_v44 = vrot.slane %v4115_v31, 10  ;;  %v1929_v45 = vstv %s4091_s26  ;;  %v1210_v46 = vstv %s4093_s23  ;;  %v2915_v47 = vrot.slane %v4127_v37, 11  ;;  %s4166_s25 = sld [smem:[#allocation17 + $0x183]]  ;;  %s4174_s26 = sld [smem:[#allocation19]] }
 0x211   : > { %2072 = vperm.xlu0 %3191, %v2056_v51   ;;  %v4160_v48 = vmul.f32 %v1909_v19, %v3778_v0  ;;  %v1922_v35 = vmul.f32 %v1921_v41, %v3778_v0  ;;  %v1238_v50 = vstv %s4102_s28  ;;  %v1918_v51 = vmul.f32 %v1917_v57, %v3778_v0  ;;  %s4183_s23 = sld [smem:[#allocation19 + $0x3]]  ;;  %s4185_s28 = sld [smem:[#allocation19 + $0x1]] }
 0x212   : > { %v1937_v52 = vstv %s4105_s29  ;;  %v1945_v54 = vstv %s4107_s20  ;;  %v4176_v56 = vadd.f32 %v2975_v42, %v1890_v40  ;;  %v2977_v58 = vrot.slane %v4143_v43, 10  ;;  %s4191_s29 = sld [smem:[#allocation19 + $0x4]]  ;;  %s4193_s20 = sld [smem:[#allocation19 + $0x5]] }
 0x213   : > { %v1211_v59 = vmul.f32 %v1210_v46, %v3778_v0  ;;  %v1957_v30 = vstv %s4111_s16  ;;  %v1218_v61 = vstv %s4120_s12  ;;  %v1239_v62 = vmul.f32 %v1238_v50, %v3778_v0  ;;  %5024 = sst [smem:[#allocation47_spill]] %s4200_s0  ;;  %s4207_s16 = sld [smem:[#allocation19 + $0x102]] }
 0x214   : > { %1333 = vperm.xlu1 %3192, %v1317_v55   ;;  %v1950_v55 = vmul.f32 %v1949_v12, %v3778_v0  ;;  %v4196_v53 = vmul.f32 %v1937_v52, %v3778_v0  ;;  %v1946_v1 = vmul.f32 %v1945_v54, %v3778_v0  ;;  %v1965_v49 = vstv %s4129_s27  ;;  %s4214_s12 = sld [smem:[#allocation19 + $0x100]]  ;;  %s4221_s27 = sld [smem:[#allocation19 + $0x103]] }
 0x215   : > { %1375 = vperm.xlu0 %3191, %v1359_v8   ;;  %5019 = sst [smem:[#allocation42_spill]] %s4172_s14  ;;  %v4180_v8 = vmul.f32 %v1929_v45, %v3778_v0  ;;  %v1246_v4 = vstv %s4138_s18  ;;  %v1977_v5 = vstv %s4140_s6  ;;  %v1958_v6 = vmul.f32 %v1957_v30, %v3778_v0  ;;  %s4223_s18 = sld [smem:[#allocation19 + $0x81]] }
 0x216   : > { %v2925_v9 = vrot.slane %v1211_v59, 9  ;;  %v1219_v10 = vmul.f32 %v1218_v61, %v3778_v0  ;;  %v1226_v13 = vstv %s4147_s21  ;;  %v2932_v15 = vrot.slane %v1239_v62, 9  ;;  %s4228_s6 = sld [smem:[#allocation19 + $0x101]]  ;;  %5032 = sst [smem:[#allocation55_spill]] %s4230_s2 }
 0x217   : > { %5020 = sst [smem:[#allocation43_spill]] %s4183_s23  ;;  %v2984_v11 = vrot.slane %v4180_v8, 10  ;;  %v1247_v17 = vmul.f32 %v1246_v4, %v3778_v0  ;;  %v1254_v21 = vstv %s4154_s19  ;;  %v1978_v22 = vmul.f32 %v1977_v5, %v3778_v0  ;;  %s4235_s21 = sld [smem:[#allocation19 + $0x104]] }
 0x218   : > { %2030 = vperm.xlu1 %3192, %v2014_v60   ;;  %5021 = sst [smem:[#allocation44_spill]] %s4185_s28  ;;  %v1206_v60 = vstv %s4118_s11  ;;  %v1966_v24 = vmul.f32 %v1965_v49, %v3778_v0  ;;  %v1973_v25 = vstv %s4156_s17  ;;  %v1985_v26 = vstv %s4164_s15  ;;  %s4240_s19 = sld [smem:[#allocation19 + $0x105]] }
 0x219   : > { %2114 = vperm.xlu0 %3191, %v2098_v63   ;;  %5022 = sst [smem:[#allocation45_spill]] %s4191_s29  ;;  %v2982_v63 = vrot.slane %v1922_v35, 9  ;;  %s4209_s11 = sld [smem:[#allocation19 + $0x80]]  ;;  %v1207_v7 = vmul.f32 %v1206_v60, %v3778_v0  ;;  %v2991_v27 = vrot.slane %v1958_v6, 10  ;;  %v2927_v29 = vrot.slane %v1219_v10, 10 }
 0x21a   : > { %5023 = sst [smem:[#allocation46_spill]] %s4193_s20  ;;  %v1227_v32 = vmul.f32 %v1226_v13, %v3778_v0  ;;  %v1255_v19 = vmul.f32 %v1254_v21, %v3778_v0  ;;  %v1993_v41 = vstv %s4166_s25  ;;  %s4248_s17 = sld [smem:[#allocation19 + $0x106]]  ;;  %v2934_v42 = vrot.slane %v1247_v17, 10 }
 0x21b   : > { %5025 = sst [smem:[#allocation48_spill]] %s4207_s16  ;;  %v1927_v16 = vadd.f32 %v2982_v63, %v1918_v51  ;;  %v1216_v28 = vadd.f32 %v2925_v9, %v1207_v7  ;;  %v1974_v57 = vmul.f32 %v1973_v25, %v3778_v0  ;;  %v2996_v12 = vrot.slane %v1978_v22, 9  ;;  %s4252_s15 = sld [smem:[#allocation19 + $0x182]] }
 0x21c   : > { %2156 = vperm.xlu1 %3192, %v2140_v3   ;;  %v1234_v3 = vstv %s4131_s22  ;;  %5027 = sst [smem:[#allocation50_spill]] %s4214_s12  ;;  %s4216_s22 = sld [smem:[#allocation19 + $0x83]]  ;;  %v1986_v45 = vmul.f32 %v1985_v26, %v3778_v0  ;;  %v1168_v46 = vadd.f32 %v2913_v44, %v4149_v2  ;;  %v1907_v35 = vadd.f32 %v2977_v58, %v4176_v56 }
 0x21d   : > { %1417 = vperm.xlu0 %3191, %v1401_v38   ;;  %v2989_v38 = vrot.slane %v1950_v55, 9  ;;  %v1235_v14 = vmul.f32 %v1234_v3, %v3778_v0  ;;  %5029 = sst [smem:[#allocation52_spill]] %s4221_s27  ;;  %v2979_v50 = vrot.slane %v4160_v48, 11  ;;  %v2986_v51 = vrot.slane %v4196_v53, 11  ;;  %s4264_s25 = sld [smem:[#allocation19 + $0x183]] }
 0x21e   : > { %5030 = sst [smem:[#allocation53_spill]] %s4223_s18  ;;  %v1935_v52 = vadd.f32 %v2984_v11, %v1927_v16  ;;  %v2993_v55 = vrot.slane %v1966_v24, 11  ;;  %v3459_v8 = vmov 286326784   ;;  %s4268_s9 = sld [smem:[#allocation19 + $0x87]]  ;;  %v4273_v31 = vsub.s32 0, %v4123_v34 }
 0x21f   : > { %5026 = sst [smem:[#allocation49_spill]] %s4209_s11  ;;  %v1955_v23 = vadd.f32 %v2989_v38, %v1946_v1  ;;  %v1244_v40 = vadd.f32 %v2932_v15, %v1235_v14  ;;  %s4266_s8 = sld [smem:[#allocation19 + $0x181]]  ;;  %v1559_v59 = vunpack.c.l.s4 %v3459_v8  ;;  %v1224_v43 = vadd.f32 %v2927_v29, %v1216_v28  ;;  %v1148_v16 = vld [vmem:[#allocation14] sm:$0x3] }
 0x220   : > { %5031 = sst [smem:[#allocation54_spill]] %s4228_s6  ;;  %s4270_s10 = sld [smem:[#allocation19 + $0x107]]  ;;  %v2929_v2 = vrot.slane %v1227_v32, 11  ;;  %v1994_v44 = vmul.f32 %v1993_v41, %v3778_v0  ;;  %v2936_v56 = vrot.slane %v1255_v19, 11  ;;  %v1983_v58 = vadd.f32 %v2996_v12, %v1974_v57 }
 0x221   : > { %5033 = sst [smem:[#allocation56_spill]] %s4235_s21  ;;  %v1963_v54 = vadd.f32 %v2991_v27, %v1955_v23  ;;  %s4278_s30 = sld [smem:[#allocation19 + $0x185]]  ;;  %v1252_v48 = vadd.f32 %v2934_v42, %v1244_v40  ;;  %v2998_v30 = vrot.slane %v1986_v45, 10  ;;  %v4287_v60 = vsub.s32 %v1282_v33, %v4123_v34 }
 0x222   : > { %5028 = sst [smem:[#allocation51_spill]] %s4216_s22  ;;  %s4276_s13 = sld [smem:[#allocation19 + $0x184]]  ;;  %v4290_v0 = vsub.s32 4, %v4123_v34  ;;  %v4295_v61 = vadd.f32 %v2922_v36, %v4133_v39  ;;  %v4299_v62 = vadd.f32 %v2915_v47, %v1168_v46  ;;  %v4307_v33 = vadd.f32 %v2979_v50, %v1907_v35 }
 0x223   : > { %5034 = sst [smem:[#allocation57_spill]] %s4237_s3  ;;  %s4280_s24 = sld [smem:[#allocation19 + $0x186]]  ;;  %v4309_v63 = vadd.f32 %v2986_v51, %v1935_v52  ;;  %v4311_v53 = vadd.f32 %v2993_v55, %v1963_v54  ;;  %v1560_v20 = vunpack.c.0.s8 %v1559_v59  ;;  %v4317_v36 = vadd.f32 %v2929_v2, %v1224_v43 }
 0x224   : > { %5035 = sst [smem:[#allocation58_spill]] %s4242_s4  ;;  %s4313_s4 = sld [smem:[#allocation19 + $0x187]]  ;;  %v3000_v37 = vrot.slane %v1994_v44, 11  ;;  %v1462_v39 = vstv %s4172_s14  ;;  %v1466_v47 = vstv %s4200_s0  ;;  %v4327_v3 = vadd.f32 %v2936_v56, %v1252_v48 }
 0x225   : > { %5036 = sst [smem:[#allocation59_spill]] %s4246_s5  ;;  %v1991_v38 = vadd.f32 %v2998_v30, %v1983_v58  ;;  %v1470_v49 = vstv %s4207_s16  ;;  %v1474_v4 = vstv %s4252_s15  ;;  %v1430_v5 = vstv %s4174_s26  ;;  %s4339_s0 = sld [smem:[#allocation20 + $0x180]] }
 0x226   : > { %5037 = sst [smem:[#allocation60_spill]] %s4252_s15  ;;  %v1434_v6 = vstv %s4209_s11  ;;  %v1438_v7 = vstv %s4214_s12  ;;  %v1442_v9 = vstv %s4254_s7  ;;  %s4341_s14 = sld [smem:[#allocation20 + $0x83]]  ;;  %v1563_v11 = vsub.s32 %v1560_v20, %v4123_v34 }
 0x227   : > { %5038 = sst [smem:[#allocation61_spill]] %s4254_s7  ;;  %v1478_v13 = vstv %s4183_s23  ;;  %v1482_v14 = vstv %s4216_s22  ;;  %v1486_v15 = vstv %s4221_s27  ;;  %s4351_s16 = sld [smem:[#allocation20 + $0x102]]  ;;  %v1446_v21 = vstv %s4185_s28 }
 0x228   : > { %5039 = sst [smem:[#allocation62_spill]] %s4264_s25  ;;  %s4349_s15 = sld [smem:[#allocation20 + $0x181]]  ;;  %v1450_v22 = vstv %s4223_s18  ;;  %v1454_v23 = vstv %s4228_s6  ;;  %v4363_v24 = vadd.f32 %v3000_v37, %v1991_v38  ;;  %v1494_v26 = vstv %s4191_s29 }
 0x229   : > { %5040 = sst [smem:[#allocation63_spill]] %s4266_s8  ;;  %s4359_s12 = sld [smem:[#allocation20 + $0x84]]  ;;  %v1498_v27 = vstv %s4230_s2  ;;  %v1502_v28 = vstv %s4235_s21  ;;  %v1510_v32 = vstv %s4193_s20  ;;  %v1514_v40 = vstv %s4237_s3 }
 0x22a   : > { %5041 = sst [smem:[#allocation64_spill]] %s4268_s9  ;;  %s4282_s9 = sld [smem:[#allocation20 + $0x80]]  ;;  %v4380_v41 = vrot.slane %v1148_v16, %v1563_v11  ;;  %v1518_v42 = vstv %s4240_s19  ;;  %v1526_v12 = vstv %s4202_s1  ;;  %v1530_v45 = vstv %s4246_s5 }
 0x22b   : > { %5042 = sst [smem:[#allocation65_spill]] %s4270_s10  ;;  %s4303_s10 = sld [smem:[#allocation20 + $0x81]]  ;;  %v1534_v46 = vstv %s4248_s17 }
 0x22c   : > { %5043 = sst [smem:[#allocation66_spill]] %s4276_s13  ;;  %s4357_s7 = sld [smem:[#allocation20 + $0x3]]  ;;  %v2221_v11 = vstv %s4341_s14 }
 0x22d   : > { %5044 = sst [smem:[#allocation67_spill]] %s4278_s30  ;;  %s4368_s25 = sld [smem:[#allocation20 + $0x182]] }
 0x22e   : > { %5045 = sst [smem:[#allocation68_spill]] %s4280_s24  ;;  %s4370_s6 = sld [smem:[#allocation20 + $0x103]] }
 0x22f   : > { %5049 = sst [smem:[#allocation72_spill]] %s4313_s4  ;;  %s4315_s24 = sld [smem:[#allocation20 + $0x100]]  ;;  %v2237_v56 = vstv %s4359_s12 }
 0x230   : > { %5046 = sst [smem:[#allocation69_spill]] %s4282_s9  ;;  %s4301_s9 = sld [smem:[#allocation20]] }
 0x231   : > { %5048 = sst [smem:[#allocation71_spill]] %s4303_s10  ;;  %s4323_s10 = sld [smem:[#allocation20 + $0x82]] }
 0x232   : > { %s4333_s4 = sld [smem:[#allocation20 + $0x2]]  ;;  %s5052_s18 = sld [smem:[#allocation58_spill]] }
 0x233   : > { %s5053_s22 = sld [smem:[#allocation64_spill]]  ;;  %s5054_s11 = sld [smem:[#allocation65_spill]] }
 0x234   : > { %s4376_s28 = sld [smem:[#allocation20 + $0x4]]  ;;  %s5055_s23 = sld [smem:[#allocation69_spill]] }
 0x235   : > { %5050 = sst [smem:[#allocation73_spill]] %s4315_s24  ;;  %s4331_s24 = sld [smem:[#allocation20 + $0x101]] }
 0x236   : > { %5047 = sst [smem:[#allocation70_spill]] %s4301_s9  ;;  %s4321_s9 = sld [smem:[#allocation20 + $0x1]] }
 0x237   : > { %s5056_s8 = sld [smem:[#allocation71_spill]]  ;;  %s5057_s2 = sld [smem:[#allocation72_spill]]  ;;  %v2205_v20 = vstv %s4323_s10 }
 0x238   : > { %s4385_s29 = sld [smem:[#allocation20 + $0x183]]  ;;  %s5058_s21 = sld [smem:[#allocation70_spill]]  ;;  %v1542_v50 = vstv %s5052_s18 }
 0x239   : > { %s4387_s13 = sld [smem:[#allocation20 + $0x85]]  ;;  %s4393_s3 = sld [smem:[#allocation20 + $0x104]]  ;;  %v1546_v52 = vstv %s5053_s22  ;;  %v1550_v54 = vstv %s5054_s11 }
 0x23a   : > { %s5060_s20 = sld [smem:[#allocation73_spill]]  ;;  %v2173_v55 = vstv %s5055_s23  ;;  %s4399_s30 = sld [smem:[#allocation20 + $0x184]] }
 0x23b   : > { %s4401_s5 = sld [smem:[#allocation20 + $0x5]]  ;;  %s4408_s27 = sld [smem:[#allocation20 + $0x86]] }
 0x23c   : > { %s4414_s11 = sld [smem:[#allocation20 + $0x105]]  ;;  %s4416_s22 = sld [smem:[#allocation20 + $0x87]] }
 0x23d   : > { %v2189_v8 = vstv %s5056_s8  ;;  %s5087_s26 = sld [smem:[#allocation62_spill]]  ;;  %s5088_s14 = sld [smem:[#allocation63_spill]] }
 0x23e   : > { %v2169_v2 = vstv %s5058_s21  ;;  %s5089_s1 = sld [smem:[#allocation66_spill]]  ;;  %s5091_s19 = sld [smem:[#allocation68_spill]] }
 0x23f   : > { %5059 = sst [smem:[#allocation58_spill]] %s4387_s13  ;;  %s4639_s17 = sld [smem:[#allocation20 + $0x185]] }
 0x240   : > { %5061 = sst [smem:[#allocation69_spill]] %s4393_s3  ;;  %v2245_v25 = vstv %s4399_s30  ;;  %s4621_s21 = sld [smem:[#allocation20 + $0x6]] }
 0x241   : > { %5062 = sst [smem:[#allocation71_spill]] %s4399_s30  ;;  %v2269_v35 = vstv %s4408_s27 }
 0x242   : > { %5063 = sst [smem:[#allocation72_spill]] %s4401_s5 }
 0x243   : > { %5064 = sst [smem:[#allocation70_spill]] %s4408_s27 }
 0x244   : > { %5065 = sst [smem:[#allocation73_spill]] %s4416_s22 }
 0x27f   : > { %v4305_v18 = vpop.permute.xlu1 %1320 }
 0x280   : > { %v4325_v1 = vpop.permute.xlu0 %1278  ;;  %v1328_v38 = vrot.slane %v4305_v18, %v4287_v60 }
 0x281   : > { %v1286_v59 = vrot.slane %v4325_v1, %v4287_v60 }
 0x283   : > { %v4343_v10 = vpop.permute.xlu1 %2017  ;;  %v1288_v30 = vmul.f32 %v1286_v59, %v4299_v62 }
 0x284   : > { %v4361_v34 = vpop.permute.xlu0 %2059  ;;  %v2025_v44 = vrot.slane %v4343_v10, %v4287_v60 }
 0x285   : > { %v2067_v58 = vrot.slane %v4361_v34, %v4287_v60 }
 0x287   : > { %v4378_v19 = vpop.permute.xlu1 %2101  ;;  %v2069_v17 = vmul.f32 %v2067_v58, %v4309_v63 }
 0x288   : > { %v1363_v51 = vpop.permute.xlu0 %1362  ;;  %v2109_v62 = vrot.slane %v4378_v19, %v4287_v60 }
 0x289   : > { %v1370_v34 = vrot.slane %v1363_v51, %v4287_v60  ;;  %v1330_v51 = vmul.f32 %v1328_v38, %v4295_v61 }
 0x28a   : > { %v2111_v10 = vmul.f32 %v2109_v62, %v4311_v53 }
 0x28b   : > { %v1405_v48 = vpop.permute.xlu1 %1404  ;;  %v1372_v63 = vmul.f32 %v1370_v34, %v4317_v36 }
 0x28c   : > { %v1292_v16 = vpop.permute.xlu0 %1291  ;;  %v1412_v57 = vrot.slane %v1405_v48, %v4287_v60  ;;  %v2257_v48 = vstv %s4414_s11 }
 0x28d   : > { %v1299_v37 = vrot.slane %v1292_v16, %v4287_v60  ;;  %v2241_v16 = vstv %s4393_s3  ;;  %s5090_s3 = sld [smem:[#allocation67_spill]] }
 0x28f   : > { %v2144_v43 = vpop.permute.xlu1 %2143  ;;  %v1301_v59 = vadd.f32 %v1299_v37, %v1288_v30  ;;  %v2027_v30 = vmul.f32 %v2025_v44, %v4307_v33 }
 0x290   : > { %v2151_v18 = vrot.slane %v2144_v43, %v4287_v60  ;;  %v2073_v29 = vpop.permute.xlu0 %2072  ;;  %v2285_v43 = vstv %s4416_s22 }
 0x291   : > { %v1302_v1 = vmax.f32 %v1301_v59, 0.0  ;;  %v2080_v19 = vrot.slane %v2073_v29, %v4287_v60  ;;  %v1414_v59 = vmul.f32 %v1412_v57, %v4327_v3 }
 0x292   : > { %v2153_v61 = vmul.f32 %v2151_v18, %v4363_v24 }
 0x293   : > { %v1334_v37 = vpop.permute.xlu1 %1333  ;;  %v2082_v58 = vadd.f32 %v2080_v19, %v2069_v17  ;;  %v1463_v44 = vmul.f32 %v1462_v39, %v1302_v1  ;;  %v1431_v38 = vmul.f32 %v1430_v5, %v1302_v1  ;;  %v1479_v62 = vmul.f32 %v1478_v13, %v1302_v1 }
 0x294   : > { %v1341_v29 = vrot.slane %v1334_v37, %v4287_v60  ;;  %v1376_v33 = vpop.permute.xlu0 %1375  ;;  %v1447_v3 = vmul.f32 %v1446_v21, %v1302_v1  ;;  %v1495_v24 = vmul.f32 %v1494_v26, %v1302_v1  ;;  %v1511_v39 = vmul.f32 %v1510_v32, %v1302_v1 }
 0x295   : > { %v4461_v53 = vmax.f32 %v2082_v58, 0.0  ;;  %v1383_v17 = vrot.slane %v1376_v33, %v4287_v60  ;;  %v1527_v5 = vmul.f32 %v1526_v12, %v1302_v1  ;;  %v4477_v13 = vmul.f32 %v1542_v50, %v1302_v1 }
 0x296   : > { %v1343_v36 = vadd.f32 %v1341_v29, %v1330_v51 }
 0x297   : > { %v2031_v34 = vpop.permute.xlu1 %2030  ;;  %v1385_v18 = vadd.f32 %v1383_v17, %v1372_v63  ;;  %v4482_v21 = vmul.f32 %v2173_v55, %v4461_v53  ;;  %v4487_v26 = vmul.f32 %v2189_v8, %v4461_v53  ;;  %v4492_v32 = vmul.f32 %v2205_v20, %v4461_v53 }
 0x298   : > { %v1344_v57 = vmax.f32 %v1343_v36, 0.0  ;;  %v2038_v19 = vrot.slane %v2031_v34, %v4287_v60  ;;  %v2115_v51 = vpop.permute.xlu0 %2114  ;;  %v4495_v12 = vmul.f32 %v2221_v11, %v4461_v53  ;;  %v4509_v11 = vmul.f32 %v2237_v56, %v4461_v53 }
 0x299   : > { %v1386_v50 = vmax.f32 %v1385_v18, 0.0  ;;  %v2122_v37 = vrot.slane %v2115_v51, %v4287_v60 }
 0x29a   : > { %v2040_v1 = vadd.f32 %v2038_v19, %v2027_v30  ;;  %v1467_v55 = vmul.f32 %v1466_v47, %v1344_v57  ;;  %v1435_v58 = vmul.f32 %v1434_v6, %v1344_v57  ;;  %v1483_v8 = vmul.f32 %v1482_v14, %v1344_v57 }
 0x29b   : > { %v2157_v63 = vpop.permute.xlu1 %2156  ;;  %v1451_v20 = vmul.f32 %v1450_v22, %v1344_v57  ;;  %v2124_v29 = vadd.f32 %v2122_v37, %v2111_v10  ;;  %v1499_v47 = vmul.f32 %v1498_v27, %v1344_v57  ;;  %v1471_v6 = vmul.f32 %v1470_v49, %v1386_v50 }
 0x29c   : > { %v2164_v30 = vrot.slane %v2157_v63, %v4287_v60  ;;  %v1468_v33 = vadd.f32 %v1467_v55, %v1463_v44  ;;  %v4514_v36 = vmax.f32 %v2040_v1, 0.0  ;;  %v1418_v17 = vpop.permute.xlu0 %1417  ;;  %v1436_v34 = vadd.f32 %v1435_v58, %v1431_v38 }
 0x29d   : > { %v1484_v14 = vadd.f32 %v1483_v8, %v1479_v62  ;;  %v4518_v22 = vmax.f32 %v2124_v29, 0.0  ;;  %v1425_v56 = vrot.slane %v1418_v17, %v4287_v60  ;;  %v1439_v10 = vmul.f32 %v1438_v7, %v1386_v50 }
 0x29e   : > { %v1487_v44 = vmul.f32 %v1486_v15, %v1386_v50  ;;  %v4525_v27 = vadd.f32 %v2164_v30, %v2153_v61  ;;  %v1472_v18 = vadd.f32 %v1471_v6, %v1468_v33  ;;  %v1452_v49 = vadd.f32 %v1451_v20, %v1447_v3 }
 0x29f   : > { %v1455_v38 = vmul.f32 %v1454_v23, %v1386_v50  ;;  %v1427_v62 = vadd.f32 %v1425_v56, %v1414_v59  ;;  %v1440_v19 = vadd.f32 %v1439_v10, %v1436_v34  ;;  %v1500_v60 = vadd.f32 %v1499_v47, %v1495_v24 }
 0x2a0   : > { %v1488_v51 = vadd.f32 %v1487_v44, %v1484_v14  ;;  %v1503_v15 = vmul.f32 %v1502_v28, %v1386_v50  ;;  %v1515_v61 = vmul.f32 %v1514_v40, %v1344_v57  ;;  %v1519_v23 = vmul.f32 %v1518_v42, %v1386_v50 }
 0x2a1   : > { %v1456_v7 = vadd.f32 %v1455_v38, %v1452_v49  ;;  %v4535_v3 = vmax.f32 %v1427_v62, 0.0  ;;  %v1531_v59 = vmul.f32 %v1530_v45, %v1344_v57  ;;  %v1535_v1 = vmul.f32 %v1534_v46, %v1386_v50 }
 0x2a2   : > { %v1547_v24 = vmul.f32 %v1546_v52, %v1344_v57  ;;  %v1504_v37 = vadd.f32 %v1503_v15, %v1500_v60  ;;  %v1516_v55 = vadd.f32 %v1515_v61, %v1511_v39  ;;  %v4545_v63 = vmul.f32 %v1550_v54, %v1386_v50 }
 0x2a3   : > { %v4550_v28 = vmul.f32 %v2169_v2, %v4514_v36  ;;  %v1475_v40 = vmul.f32 %v1474_v4, %v4535_v3  ;;  %v1443_v42 = vmul.f32 %v1442_v9, %v4535_v3  ;;  %v5092_v45 = vstv %s5087_s26 }
 0x2a4   : > { %v1491_v46 = vmul.f32 %v5092_v45, %v4535_v3  ;;  %v5093_v52 = vstv %s5088_s14  ;;  %v5094_v54 = vstv %s5089_s1  ;;  %v1520_v50 = vadd.f32 %v1519_v23, %v1516_v55 }
 0x2a5   : > { %v1459_v39 = vmul.f32 %v5093_v52, %v4535_v3  ;;  %v1507_v57 = vmul.f32 %v5094_v54, %v4535_v3  ;;  %v5095_v2 = vstv %s5090_s3  ;;  %v1532_v8 = vadd.f32 %v1531_v59, %v1527_v5 }
 0x2a6   : > { %v1523_v58 = vmul.f32 %v5095_v2, %v4535_v3  ;;  %v1476_v20 = vadd.f32 %v1475_v40, %v1472_v18  ;;  %v4570_v29 = vadd.f32 %v1443_v42, %v1440_v19  ;;  %v4572_v4 = vadd.f32 %v1491_v46, %v1488_v51 }
 0x2a7   : > { %v1460_v9 = vadd.f32 %v1459_v39, %v1456_v7  ;;  %v4574_v30 = vadd.f32 %v1507_v57, %v1504_v37  ;;  %v1536_v47 = vadd.f32 %v1535_v1, %v1532_v8  ;;  %v5096_v17 = vstv %s5091_s19 }
 0x2a8   : > { %v4576_v33 = vadd.f32 %v1523_v58, %v1520_v50  ;;  %v1539_v6 = vmul.f32 %v5096_v17, %v4535_v3  ;;  %v1648_v34 = vmul.f32 %v4380_v41, %v1476_v20  ;;  %v4584_v14 = vmul.f32 %v4380_v41, %v4570_v29 }
 0x2a9   : > { %v1688_v5 = vmul.f32 %v4380_v41, %v4572_v4  ;;  %v1608_v56 = vmul.f32 %v4380_v41, %v1460_v9  ;;  %v1728_v10 = vmul.f32 %v4380_v41, %v4574_v30  ;;  %v1548_v49 = vadd.f32 %v1547_v24, %v4477_v13 }
 0x2aa   : > { %v4593_v44 = vmul.f32 %v4380_v41, %v4576_v33  ;;  %v4595_v18 = vadd.f32 %v1539_v6, %v1536_v47  ;;  %v1654_v38 = vrot.slane %v1648_v34, %v4273_v31  ;;  %v1658_v62 = vrot.slane %v1648_v34, %v4290_v0 }
 0x2ab   : > { %v1572_v19 = vrot.slane %v4584_v14, %v4273_v31  ;;  %v1576_v51 = vrot.slane %v4584_v14, %v4290_v0  ;;  %v1694_v60 = vrot.slane %v1688_v5, %v4273_v31  ;;  %v1698_v7 = vrot.slane %v1688_v5, %v4290_v0 }
 0x2ac   : > { %v1614_v15 = vrot.slane %v1608_v56, %v4273_v31  ;;  %v1618_v61 = vrot.slane %v1608_v56, %v4290_v0  ;;  %v1661_v13 = vsel %vm1579_vm4, %v1654_v38, 0.0  ;;  %v1662_v23 = vsel %vm1579_vm4, %v1658_v62, 0.0 }
 0x2ad   : > { %v1580_v59 = vsel %vm1579_vm4, %v1572_v19, 0.0  ;;  %v1581_v1 = vsel %vm1579_vm4, %v1576_v51, 0.0  ;;  %v1663_v24 = vadd.f32 %v1662_v23, %v1661_v13  ;;  %v1701_v55 = vsel %vm1579_vm4, %v1694_v60, 0.0 }
 0x2ae   : > { %v1582_v37 = vadd.f32 %v1581_v1, %v1580_v59  ;;  %v1702_v40 = vsel %vm1579_vm4, %v1698_v7, 0.0  ;;  %v1621_v45 = vsel %vm1579_vm4, %v1614_v15, 0.0  ;;  %v1622_v46 = vsel %vm1579_vm4, %v1618_v61, 0.0 }
 0x2af   : > { %v1703_v42 = vadd.f32 %v1702_v40, %v1701_v55  ;;  %v1734_v52 = vrot.slane %v1728_v10, %v4273_v31  ;;  %v4618_v39 = vmax.f32 %v4525_v27, 0.0  ;;  %1664 = vadd.xlane.f32.xlu1 %v1663_v24  ;;  %v1623_v54 = vadd.f32 %v1622_v46, %v1621_v45 }
 0x2b0   : > { %1583 = vadd.xlane.f32.xlu0 %v1582_v37  ;;  %v1738_v57 = vrot.slane %v1728_v10, %v4290_v0  ;;  %v1629_v50 = vmul.f32 %v1608_v56, %v1460_v9  ;;  %v1774_v58 = vrot.slane %v4593_v44, %v4273_v31  ;;  %v1778_v8 = vrot.slane %v4593_v44, %v4290_v0 }
 0x2b1   : > { %v1741_v2 = vsel %vm1579_vm4, %v1734_v52, 0.0  ;;  %v1669_v47 = vmul.f32 %v1648_v34, %v1476_v20  ;;  %v1808_v9 = vmul.f32 %v4380_v41, %v4595_v18  ;;  %v1709_v59 = vmul.f32 %v1688_v5, %v4572_v4 }
 0x2b2   : > { %v1742_v27 = vsel %vm1579_vm4, %v1738_v57, 0.0  ;;  %v1634_v17 = vrot.slane %v1629_v50, %v4273_v31  ;;  %v1638_v6 = vrot.slane %v1629_v50, %v4290_v0  ;;  %v1781_v38 = vsel %vm1579_vm4, %v1774_v58, 0.0 }
 0x2b3   : > { %v1743_v56 = vadd.f32 %v1742_v27, %v1741_v2  ;;  %v1782_v62 = vsel %vm1579_vm4, %v1778_v8, 0.0  ;;  %v1674_v19 = vrot.slane %v1669_v47, %v4273_v31  ;;  %1704 = vadd.xlane.f32.xlu1 %v1703_v42  ;;  %v1678_v60 = vrot.slane %v1669_v47, %v4290_v0 }
 0x2b4   : > { %1624 = vadd.xlane.f32.xlu0 %v1623_v54  ;;  %v1641_v20 = vsel %vm1579_vm4, %v1634_v17, 0.0  ;;  %v1642_v34 = vsel %vm1579_vm4, %v1638_v6, 0.0  ;;  %v1783_v51 = vadd.f32 %v1782_v62, %v1781_v38  ;;  %v1814_v61 = vrot.slane %v1808_v9, %v4273_v31 }
 0x2b5   : > { %v1643_v7 = vadd.f32 %v1642_v34, %v1641_v20  ;;  %v1681_v15 = vsel %vm1579_vm4, %v1674_v19, 0.0  ;;  %v1818_v13 = vrot.slane %v1808_v9, %v4290_v0  ;;  %v1682_v23 = vsel %vm1579_vm4, %v1678_v60, 0.0 }
 0x2b6   : > { %v1552_v1 = vadd.f32 %v4545_v63, %v1548_v49  ;;  %v5097_v24 = vstv %s5057_s2  ;;  %v1683_v55 = vadd.f32 %v1682_v23, %v1681_v15  ;;  %v1821_v40 = vsel %vm1579_vm4, %v1814_v61, 0.0  ;;  %s4714_s2 = sld [smem:[#allocation20 + $0x186]] }
 0x2b7   : > { %v1555_v37 = vmul.f32 %v5097_v24, %v4535_v3  ;;  %v1822_v42 = vsel %vm1579_vm4, %v1818_v13, 0.0  ;;  %v1749_v45 = vmul.f32 %v1728_v10, %v4574_v30  ;;  %1744 = vadd.xlane.f32.xlu1 %v1743_v56  ;;  %v1714_v52 = vrot.slane %v1709_v59, %v4273_v31 }
 0x2b8   : > { %1644 = vadd.xlane.f32.xlu0 %v1643_v7  ;;  %v1823_v46 = vadd.f32 %v1822_v42, %v1821_v40  ;;  %v1718_v4 = vrot.slane %v1709_v59, %v4290_v0  ;;  %v2265_v63 = vstv %s4621_s21  ;;  %v2175_v54 = vadd.f32 %v4482_v21, %v4550_v28 }
 0x2b9   : > { %v1556_v5 = vadd.f32 %v1555_v37, %v1552_v1  ;;  %v1754_v3 = vrot.slane %v1749_v45, %v4273_v31  ;;  %v1758_v49 = vrot.slane %v1749_v45, %v4290_v0  ;;  %v1721_v57 = vsel %vm1579_vm4, %v1714_v52, 0.0 }
 0x2ba   : > { %v1722_v30 = vsel %vm1579_vm4, %v1718_v4, 0.0  ;;  %v5098_v10 = vstv %s5060_s20  ;;  %v5099_v2 = vstv %s4339_s0  ;;  %v1789_v6 = vmul.f32 %v4593_v44, %v4576_v33  ;;  %s4694_s0 = sld [smem:[#allocation20 + $0x106]]  ;;  %s4780_s20 = sld [smem:[#allocation20 + $0x107]] }
 0x2bb   : > { %v2178_v50 = vmul.f32 %v5098_v10, %v4518_v22  ;;  %v2182_v58 = vmul.f32 %v5099_v2, %v4618_v39  ;;  %v1723_v8 = vadd.f32 %v1722_v30, %v1721_v57  ;;  %v1848_v47 = vmul.f32 %v4380_v41, %v1556_v5  ;;  %1784 = vadd.xlane.f32.xlu1 %v1783_v51 }
 0x2bc   : > { %v1761_v27 = vsel %vm1579_vm4, %v1754_v3, 0.0  ;;  %v1762_v21 = vsel %vm1579_vm4, %v1758_v49, 0.0  ;;  %1684 = vadd.xlane.f32.xlu0 %v1683_v55  ;;  %v2261_v56 = vstv %s4639_s17  ;;  %v5100_v19 = vstv %s4321_s9  ;;  %s5112_s9 = sld [smem:[#allocation72_spill]] }
 0x2bd   : > { %v1763_v28 = vadd.f32 %v1762_v21, %v1761_v27  ;;  %v2179_v17 = vadd.f32 %v2178_v50, %v2175_v54  ;;  %v1854_v38 = vrot.slane %v1848_v47, %v4273_v31  ;;  %v1858_v62 = vrot.slane %v1848_v47, %v4290_v0 }
 0x2be   : > { %v2186_v20 = vmul.f32 %v5100_v19, %v4514_v36  ;;  %v5101_v34 = vstv %s4331_s24  ;;  %v1794_v51 = vrot.slane %v1789_v6, %v4273_v31  ;;  %v1798_v15 = vrot.slane %v1789_v6, %v4290_v0  ;;  %s5113_s24 = sld [smem:[#allocation58_spill]] }
 0x2bf   : > { %v2194_v60 = vmul.f32 %v5101_v34, %v4518_v22  ;;  %v2183_v7 = vadd.f32 %v2182_v58, %v2179_v17  ;;  %v5102_v61 = vstv %s4349_s15  ;;  %v1861_v33 = vsel %vm1579_vm4, %v1854_v38, 0.0  ;;  %1824 = vadd.xlane.f32.xlu1 %v1823_v46 }
 0x2c0   : > { %v2198_v13 = vmul.f32 %v5102_v61, %v4618_v39  ;;  %v1862_v44 = vsel %vm1579_vm4, %v1858_v62, 0.0  ;;  %v2191_v23 = vadd.f32 %v4487_v26, %v2186_v20  ;;  %v1829_v59 = vmul.f32 %v1808_v9, %v4595_v18  ;;  %1724 = vadd.xlane.f32.xlu0 %v1723_v8 }
 0x2c1   : > { %v1863_v1 = vadd.f32 %v1862_v44, %v1861_v33  ;;  %v2296_v24 = vmul.f32 %v2183_v7, %v4380_v41  ;;  %v1801_v37 = vsel %vm1579_vm4, %v1794_v51, 0.0  ;;  %v1802_v55 = vsel %vm1579_vm4, %v1798_v15, 0.0 }
 0x2c2   : > { %v1803_v40 = vadd.f32 %v1802_v55, %v1801_v37  ;;  %v2195_v42 = vadd.f32 %v2194_v60, %v2191_v23  ;;  %v1834_v45 = vrot.slane %v1829_v59, %v4273_v31  ;;  %v1838_v26 = vrot.slane %v1829_v59, %v4290_v0 }
 0x2c3   : > { %v2302_v18 = vrot.slane %v2296_v24, %v4273_v31  ;;  %v2306_v9 = vrot.slane %v2296_v24, %v4290_v0  ;;  %v5103_v46 = vstv %s4333_s4  ;;  %v5104_v4 = vstv %s4351_s16  ;;  %1864 = vadd.xlane.f32.xlu1 %v1863_v1  ;;  %s4789_s16 = sld [smem:[#allocation20 + $0x187]] }
 0x2c4   : > { %v2202_v52 = vmul.f32 %v5103_v46, %v4514_v36  ;;  %v2210_v3 = vmul.f32 %v5104_v4, %v4518_v22  ;;  %v2199_v49 = vadd.f32 %v2198_v13, %v2195_v42  ;;  %v1841_v54 = vsel %vm1579_vm4, %v1834_v45, 0.0  ;;  %1764 = vadd.xlane.f32.xlu0 %v1763_v28 }
 0x2c5   : > { %v1842_v57 = vsel %vm1579_vm4, %v1838_v26, 0.0  ;;  %v5105_v30 = vstv %s4368_s25  ;;  %v2309_v50 = vsel %vm1579_vm4, %v2302_v18, 0.0  ;;  %v2310_v2 = vsel %vm1579_vm4, %v2306_v9, 0.0 }
 0x2c6   : > { %v2214_v10 = vmul.f32 %v5105_v30, %v4618_v39  ;;  %v1843_v58 = vadd.f32 %v1842_v57, %v1841_v54  ;;  %v2207_v8 = vadd.f32 %v4492_v32, %v2202_v52  ;;  %v2311_v27 = vadd.f32 %v2310_v2, %v2309_v50 }
 0x2c7   : > { %v2336_v21 = vmul.f32 %v2199_v49, %v4380_v41  ;;  %v1869_v17 = vmul.f32 %v1848_v47, %v1556_v5  ;;  %v5106_v6 = vstv %s4357_s7  ;;  %v5107_v28 = vstv %s4370_s6 }
 0x2c8   : > { %v2218_v38 = vmul.f32 %v5106_v6, %v4514_v36  ;;  %v2211_v62 = vadd.f32 %v2210_v3, %v2207_v8  ;;  %v2226_v19 = vmul.f32 %v5107_v28, %v4518_v22  ;;  %v5108_v20 = vstv %s4385_s29  ;;  %2312 = vadd.xlane.f32.xlu1 %v2311_v27  ;;  %1804 = vadd.xlane.f32.xlu0 %v1803_v40 }
 0x2c9   : > { %v2230_v34 = vmul.f32 %v5108_v20, %v4618_v39  ;;  %v2317_v60 = vmul.f32 %v2296_v24, %v2183_v7  ;;  %v2342_v32 = vrot.slane %v2336_v21, %v4273_v31  ;;  %v2346_v51 = vrot.slane %v2336_v21, %v4290_v0 }
 0x2ca   : > { %v1874_v15 = vrot.slane %v1869_v17, %v4273_v31  ;;  %v1878_v61 = vrot.slane %v1869_v17, %v4290_v0  ;;  %v2215_v5 = vadd.f32 %v2214_v10, %v2211_v62  ;;  %v2223_v47 = vadd.f32 %v4495_v12, %v2218_v38 }
 0x2cb   : > { %v2322_v13 = vrot.slane %v2317_v60, %v4273_v31  ;;  %v2273_v33 = vstv %s4694_s0  ;;  %v2349_v7 = vsel %vm1579_vm4, %v2342_v32, 0.0  ;;  %v2350_v44 = vsel %vm1579_vm4, %v2346_v51, 0.0 }
 0x2cc   : > { %v1881_v23 = vsel %vm1579_vm4, %v1874_v15, 0.0  ;;  %v1882_v59 = vsel %vm1579_vm4, %v1878_v61, 0.0  ;;  %v2351_v1 = vadd.f32 %v2350_v44, %v2349_v7  ;;  %v2376_v24 = vmul.f32 %v2215_v5, %v4380_v41  ;;  %1844 = vadd.xlane.f32.xlu0 %v1843_v58 }
 0x2cd   : > { %v1883_v37 = vadd.f32 %v1882_v59, %v1881_v23  ;;  %v2227_v55 = vadd.f32 %v2226_v19, %v2223_v47  ;;  %v2326_v12 = vrot.slane %v2317_v60, %v4290_v0  ;;  %v2329_v40 = vsel %vm1579_vm4, %v2322_v13, 0.0 }
 0x2ce   : > { %v5111_v42 = vstv %s4376_s28  ;;  %v2242_v26 = vmul.f32 %v2241_v16, %v4518_v22  ;;  %2352 = vadd.xlane.f32.xlu1 %v2351_v1  ;;  %v2382_v18 = vrot.slane %v2376_v24, %v4273_v31  ;;  %v2386_v9 = vrot.slane %v2376_v24, %v4290_v0  ;;  %s4767_s28 = sld [smem:[#allocation20 + $0x7]] }
 0x2cf   : > { %v2234_v45 = vmul.f32 %v5111_v42, %v4514_v36  ;;  %v2231_v46 = vadd.f32 %v2230_v34, %v2227_v55  ;;  %v2277_v52 = vstv %s4714_s2  ;;  %v2330_v4 = vsel %vm1579_vm4, %v2326_v12, 0.0 }
 0x2d0   : > { %v2246_v54 = vmul.f32 %v2245_v25, %v4618_v39  ;;  %v2357_v57 = vmul.f32 %v2336_v21, %v2199_v49  ;;  %v2389_v16 = vsel %vm1579_vm4, %v2382_v18, 0.0  ;;  %v2390_v30 = vsel %vm1579_vm4, %v2386_v9, 0.0  ;;  %1884 = vadd.xlane.f32.xlu0 %v1883_v37 }
 0x2d1   : > { %v2239_v3 = vadd.f32 %v4509_v11, %v2234_v45  ;;  %v2416_v10 = vmul.f32 %v2231_v46, %v4380_v41  ;;  %v2331_v50 = vadd.f32 %v2330_v4, %v2329_v40  ;;  %v2391_v2 = vadd.f32 %v2390_v30, %v2389_v16 }
 0x2d2   : > { %v2362_v8 = vrot.slane %v2357_v57, %v4273_v31  ;;  %v2366_v27 = vrot.slane %v2357_v57, %v4290_v0  ;;  %v5114_v49 = vstv %s5112_s9  ;;  %v5115_v17 = vstv %s5113_s24 }
 0x2d3   : > { %v2243_v58 = vadd.f32 %v2242_v26, %v2239_v3  ;;  %v2422_v11 = vrot.slane %v2416_v10, %v4273_v31  ;;  %v2426_v25 = vrot.slane %v2416_v10, %v4290_v0  ;;  %v2250_v21 = vmul.f32 %v5114_v49, %v4514_v36  ;;  %2392 = vadd.xlane.f32.xlu1 %v2391_v2 }
 0x2d4   : > { %v2254_v6 = vmul.f32 %v5115_v17, %v4461_v53  ;;  %v2369_v62 = vsel %vm1579_vm4, %v2362_v8, 0.0  ;;  %v2370_v28 = vsel %vm1579_vm4, %v2366_v27, 0.0  ;;  %v2258_v19 = vmul.f32 %v2257_v48, %v4518_v22  ;;  %2332 = vadd.xlane.f32.xlu0 %v2331_v50 }
 0x2d5   : > { %v2247_v38 = vadd.f32 %v2246_v54, %v2243_v58  ;;  %v2429_v20 = vsel %vm1579_vm4, %v2422_v11, 0.0  ;;  %v2430_v34 = vsel %vm1579_vm4, %v2426_v25, 0.0  ;;  %v2371_v60 = vadd.f32 %v2370_v28, %v2369_v62 }
 0x2d6   : > { %v2255_v32 = vadd.f32 %v2254_v6, %v2250_v21  ;;  %v2431_v51 = vadd.f32 %v2430_v34, %v2429_v20  ;;  %v2262_v61 = vmul.f32 %v2261_v56, %v4618_v39  ;;  %v2397_v47 = vmul.f32 %v2376_v24, %v2215_v5 }
 0x2d7   : > { %v2456_v15 = vmul.f32 %v2247_v38, %v4380_v41  ;;  %v2266_v48 = vmul.f32 %v2265_v63, %v4514_v36  ;;  %v2270_v7 = vmul.f32 %v2269_v35, %v4461_v53  ;;  %v2274_v44 = vmul.f32 %v2273_v33, %v4518_v22 }
 0x2d8   : > { %v2259_v13 = vadd.f32 %v2258_v19, %v2255_v32  ;;  %2432 = vadd.xlane.f32.xlu1 %v2431_v51  ;;  %v2402_v5 = vrot.slane %v2397_v47, %v4273_v31  ;;  %v2406_v59 = vrot.slane %v2397_v47, %v4290_v0  ;;  %v2278_v63 = vmul.f32 %v2277_v52, %v4618_v39 }
 0x2d9   : > { %v2462_v23 = vrot.slane %v2456_v15, %v4273_v31  ;;  %v2466_v56 = vrot.slane %v2456_v15, %v4290_v0  ;;  %v2271_v24 = vadd.f32 %v2270_v7, %v2266_v48  ;;  %v2437_v37 = vmul.f32 %v2416_v10, %v2231_v46  ;;  %2372 = vadd.xlane.f32.xlu0 %v2371_v60 }
 0x2da   : > { %v2263_v1 = vadd.f32 %v2262_v61, %v2259_v13  ;;  %v2409_v55 = vsel %vm1579_vm4, %v2402_v5, 0.0  ;;  %v2410_v12 = vsel %vm1579_vm4, %v2406_v59, 0.0  ;;  %v2281_v26 = vstv %s4767_s28 }
 0x2db   : > { %v2469_v35 = vsel %vm1579_vm4, %v2462_v23, 0.0  ;;  %v2470_v33 = vsel %vm1579_vm4, %v2466_v56, 0.0  ;;  %v2275_v45 = vadd.f32 %v2274_v44, %v2271_v24  ;;  %v2442_v18 = vrot.slane %v2437_v37, %v4273_v31 }
 0x2dc   : > { %v2471_v40 = vadd.f32 %v2470_v33, %v2469_v35  ;;  %v2496_v42 = vmul.f32 %v2263_v1, %v4380_v41  ;;  %v2446_v9 = vrot.slane %v2437_v37, %v4290_v0  ;;  %v1589_v46 = vmul.f32 %v4584_v14, %v4570_v29 }
 0x2dd   : > { %v2477_v52 = vmul.f32 %v2456_v15, %v2247_v38  ;;  %v2411_v54 = vadd.f32 %v2410_v12, %v2409_v55  ;;  %v2279_v57 = vadd.f32 %v2278_v63, %v2275_v45  ;;  %v2449_v16 = vsel %vm1579_vm4, %v2442_v18, 0.0 }
 0x2de   : > { %2472 = vadd.xlane.f32.xlu1 %v2471_v40  ;;  %v2502_v4 = vrot.slane %v2496_v42, %v4273_v31  ;;  %v2506_v3 = vrot.slane %v2496_v42, %v4290_v0  ;;  %v2450_v30 = vsel %vm1579_vm4, %v2446_v9, 0.0  ;;  %v1594_v10 = vrot.slane %v1589_v46, %v4273_v31  ;;  %v1649_v9 = vld [vmem:[#allocation6 + $0x2] sm:$0x1] }
 0x2df   : > { %v2289_v50 = vstv %s4780_s20  ;;  %2412 = vadd.xlane.f32.xlu0 %v2411_v54  ;;  %v2536_v14 = vmul.f32 %v2279_v57, %v4380_v41  ;;  %v2293_v58 = vstv %s4789_s16  ;;  %v1598_v27 = vrot.slane %v1589_v46, %v4290_v0  ;;  %v1567_v46 = vld [vmem:[#allocation6] sm:$0x1] }
 0x2e0   : > { %v2509_v2 = vsel %vm1579_vm4, %v2502_v4, 0.0  ;;  %v2510_v29 = vsel %vm1579_vm4, %v2506_v3, 0.0  ;;  %v2482_v11 = vrot.slane %v2477_v52, %v4273_v31  ;;  %v2282_v25 = vmul.f32 %v2281_v26, %v4514_v36 }
 0x2e1   : > { %v2511_v8 = vadd.f32 %v2510_v29, %v2509_v2  ;;  %v2542_v49 = vrot.slane %v2536_v14, %v4273_v31  ;;  %v2546_v21 = vrot.slane %v2536_v14, %v4290_v0  ;;  %v2451_v17 = vadd.f32 %v2450_v30, %v2449_v16  ;;  %v1628_v2 = vld [vmem:[#allocation7 + $0x1] sm:$0x1] }
 0x2e2   : > { %v2486_v6 = vrot.slane %v2477_v52, %v4290_v0  ;;  %v1601_v38 = vsel %vm1579_vm4, %v1594_v10, 0.0  ;;  %v2489_v62 = vsel %vm1579_vm4, %v2482_v11, 0.0  ;;  %v2286_v28 = vmul.f32 %v2285_v43, %v4461_v53  ;;  %v1668_v11 = vld [vmem:[#allocation7 + $0x2] sm:$0x1] }
 0x2e3   : > { %2512 = vadd.xlane.f32.xlu1 %v2511_v8  ;;  %v2290_v19 = vmul.f32 %v2289_v50, %v4518_v22  ;;  %v2549_v20 = vsel %vm1579_vm4, %v2542_v49, 0.0  ;;  %v2550_v36 = vsel %vm1579_vm4, %v2546_v21, 0.0  ;;  %2452 = vadd.xlane.f32.xlu0 %v2451_v17  ;;  %v2517_v60 = vmul.f32 %v2496_v42, %v2263_v1  ;;  %v1729_v50 = vld [vmem:[#allocation6 + $0x4] sm:$0x1] }
 0x2e4   : > { %v2490_v34 = vsel %vm1579_vm4, %v2486_v6, 0.0  ;;  %v2551_v32 = vadd.f32 %v2550_v36, %v2549_v20  ;;  %v2287_v51 = vadd.f32 %v2286_v28, %v2282_v25  ;;  %v2294_v15 = vmul.f32 %v2293_v58, %v4618_v39  ;;  %v1809_v6 = vld [vmem:[#allocation6 + $0x6] sm:$0x1]  ;;  %v1849_v36 = vld [vmem:[#allocation6 + $0x7] sm:$0x1] }
 0x2e5   : > { %v2557_v61 = vmul.f32 %v2536_v14, %v2279_v57  ;;  %v1602_v47 = vsel %vm1579_vm4, %v1598_v27, 0.0  ;;  %v2491_v13 = vadd.f32 %v2490_v34, %v2489_v62  ;;  %v2522_v43 = vrot.slane %v2517_v60, %v4273_v31  ;;  %v1689_v57 = vld [vmem:[#allocation6 + $0x3] sm:$0x1]  ;;  %v1769_v27 = vld [vmem:[#allocation6 + $0x5] sm:$0x1] }
 0x2e6   : > { %v2526_v53 = vrot.slane %v2517_v60, %v4290_v0  ;;  %v2291_v22 = vadd.f32 %v2290_v19, %v2287_v51  ;;  %v1603_v39 = vadd.f32 %v1602_v47, %v1601_v38  ;;  %v1708_v38 = vld [vmem:[#allocation7 + $0x3] sm:$0x1]  ;;  %v1748_v34 = vld [vmem:[#allocation7 + $0x4] sm:$0x1]  ;;  %v1788_v47 = vld [vmem:[#allocation7 + $0x5] sm:$0x1] }
 0x2e7   : > { %2552 = vadd.xlane.f32.xlu1 %v2551_v32  ;;  %v2562_v48 = vrot.slane %v2557_v61, %v4273_v31  ;;  %v2566_v7 = vrot.slane %v2557_v61, %v4290_v0  ;;  %2492 = vadd.xlane.f32.xlu0 %v2491_v13  ;;  %v2529_v44 = vsel %vm1579_vm4, %v2522_v43, 0.0  ;;  %v2297_v61 = vld [vmem:[#allocation8] sm:$0x1] }
 0x2e8   : > { %v2530_v23 = vsel %vm1579_vm4, %v2526_v53, 0.0  ;;  %v2295_v56 = vadd.f32 %v2294_v15, %v2291_v22 }
 0x2e9   : > { %v2531_v5 = vadd.f32 %v2530_v23, %v2529_v44  ;;  %v2569_v1 = vsel %vm1579_vm4, %v2562_v48, 0.0  ;;  %v2570_v24 = vsel %vm1579_vm4, %v2566_v7, 0.0  ;;  %v2337_v48 = vld [vmem:[#allocation8 + $0x1] sm:$0x1]  ;;  %v1828_v7 = vld [vmem:[#allocation7 + $0x6] sm:$0x1] }
 0x2ea   : > { %v2576_v59 = vmul.f32 %v2295_v56, %v4380_v41  ;;  %v2571_v33 = vadd.f32 %v2570_v24, %v2569_v1 }
 0x2eb   : > { %1604 = vadd.xlane.f32.xlu1 %v1603_v39  ;;  %2532 = vadd.xlane.f32.xlu0 %v2531_v5  ;;  %v1868_v5 = vld [vmem:[#allocation7 + $0x7] sm:$0x1] }
 0x2ec   : > { %v2582_v63 = vrot.slane %v2576_v59, %v4273_v31  ;;  %v2586_v37 = vrot.slane %v2576_v59, %v4290_v0  ;;  %v2597_v35 = vmul.f32 %v2576_v59, %v2295_v56  ;;  %v2377_v59 = vld [vmem:[#allocation8 + $0x2] sm:$0x1] }
 0x2ee   : > { %v2589_v55 = vsel %vm1579_vm4, %v2582_v63, 0.0  ;;  %v2590_v12 = vsel %vm1579_vm4, %v2586_v37, 0.0  ;;  %v2602_v40 = vrot.slane %v2597_v35, %v4273_v31  ;;  %v2606_v42 = vrot.slane %v2597_v35, %v4290_v0  ;;  %v1609_v31 = vld [vmem:[#allocation6 + $0x1] sm:$0x1]  ;;  %v2316_v35 = vld [vmem:[#allocation9] sm:$0x1] }
 0x2ef   : > { %v2591_v41 = vadd.f32 %v2590_v12, %v2589_v55  ;;  %2572 = vadd.xlane.f32.xlu0 %v2571_v33  ;;  %v2417_v33 = vld [vmem:[#allocation8 + $0x3] sm:$0x1] }
 0x2f0   : > { %v2609_v45 = vsel %vm1579_vm4, %v2602_v40, 0.0  ;;  %v2610_v26 = vsel %vm1579_vm4, %v2606_v42, 0.0 }
 0x2f1   : > { %2592 = vadd.xlane.f32.xlu1 %v2591_v41  ;;  %v2611_v18 = vadd.f32 %v2610_v26, %v2609_v45  ;;  %v2356_v41 = vld [vmem:[#allocation9 + $0x1] sm:$0x1]  ;;  %v2457_v45 = vld [vmem:[#allocation8 + $0x4] sm:$0x1] }
 0x2f3   : > { %2612 = vadd.xlane.f32.xlu0 %v2611_v18 }
 0x33c   : > { %v1665_v52 = vpop.xlane.xlu1 %1664 }
 0x33d   : > { %v1584_v4 = vpop.xlane.xlu0 %1583  ;;  %v1666_v3 = vadd.f32 %v1665_v52, %v1649_v9 }
 0x33e   : > { %v1585_v54 = vadd.f32 %v1584_v4, %v1567_v46  ;;  %v2396_v46 = vld [vmem:[#allocation9 + $0x2] sm:$0x1] }
 0x33f   : > { %1667 = vst.msk [vmem:[#allocation6 + $0x2] sm:$0x1] %vm1586_vm5, %v1666_v3  ;;  %v2497_v3 = vld [vmem:[#allocation8 + $0x5] sm:$0x1] }
 0x340   : > { %1587 = vst.msk [vmem:[#allocation6] sm:$0x1] %vm1586_vm5, %v1585_v54  ;;  %v1705_v0 = vpop.xlane.xlu1 %1704 }
 0x341   : > { %v1625_v16 = vpop.xlane.xlu0 %1624  ;;  %v1706_v30 = vadd.f32 %v1705_v0, %v1689_v57  ;;  %v2436_v57 = vld [vmem:[#allocation9 + $0x3] sm:$0x1] }
 0x342   : > { %v1626_v10 = vadd.f32 %v1625_v16, %v1609_v31 }
 0x343   : > { %1707 = vst.msk [vmem:[#allocation6 + $0x3] sm:$0x1] %vm1586_vm5, %v1706_v30  ;;  %v2537_v30 = vld [vmem:[#allocation8 + $0x6] sm:$0x1] }
 0x344   : > { %1627 = vst.msk [vmem:[#allocation6 + $0x1] sm:$0x1] %vm1586_vm5, %v1626_v10  ;;  %v1745_v29 = vpop.xlane.xlu1 %1744 }
 0x345   : > { %v1645_v14 = vpop.xlane.xlu0 %1644  ;;  %v1746_v58 = vadd.f32 %v1745_v29, %v1729_v50  ;;  %v2476_v50 = vld [vmem:[#allocation9 + $0x4] sm:$0x1] }
 0x346   : > { %v1646_v8 = vadd.f32 %v1645_v14, %v1628_v2 }
 0x347   : > { %1747 = vst.msk [vmem:[#allocation6 + $0x4] sm:$0x1] %vm1586_vm5, %v1746_v58  ;;  %v1588_v58 = vld [vmem:[#allocation7] sm:$0x1] }
 0x348   : > { %1647 = vst.msk [vmem:[#allocation7 + $0x1] sm:$0x1] %vm1586_vm5, %v1646_v8  ;;  %v1785_v25 = vpop.xlane.xlu1 %1784 }
 0x349   : > { %v1685_v49 = vpop.xlane.xlu0 %1684  ;;  %v1786_v21 = vadd.f32 %v1785_v25, %v1769_v27  ;;  %v2516_v27 = vld [vmem:[#allocation9 + $0x5] sm:$0x1] }
 0x34a   : > { %v1686_v17 = vadd.f32 %v1685_v49, %v1668_v11 }
 0x34b   : > { %1787 = vst.msk [vmem:[#allocation6 + $0x5] sm:$0x1] %vm1586_vm5, %v1786_v21 }
 0x34c   : > { %1687 = vst.msk [vmem:[#allocation7 + $0x2] sm:$0x1] %vm1586_vm5, %v1686_v17  ;;  %v1825_v62 = vpop.xlane.xlu1 %1824  ;;  %v2556_v17 = vld [vmem:[#allocation9 + $0x6] sm:$0x1] }
 0x34d   : > { %v1725_v28 = vpop.xlane.xlu0 %1724  ;;  %v1826_v19 = vadd.f32 %v1825_v62, %v1809_v6  ;;  %v2577_v6 = vld [vmem:[#allocation8 + $0x7] sm:$0x1] }
 0x34e   : > { %v1726_v20 = vadd.f32 %v1725_v28, %v1708_v38 }
 0x34f   : > { %1827 = vst.msk [vmem:[#allocation6 + $0x6] sm:$0x1] %vm1586_vm5, %v1826_v19  ;;  %v2596_v19 = vld [vmem:[#allocation9 + $0x7] sm:$0x1] }
 0x350   : > { %1727 = vst.msk [vmem:[#allocation7 + $0x3] sm:$0x1] %vm1586_vm5, %v1726_v20  ;;  %v1865_v60 = vpop.xlane.xlu1 %1864 }
 0x351   : > { %v1765_v32 = vpop.xlane.xlu0 %1764  ;;  %v1866_v51 = vadd.f32 %v1865_v60, %v1849_v36 }
 0x352   : > { %v1766_v15 = vadd.f32 %v1765_v32, %v1748_v34 }
 0x353   : > { %1867 = vst.msk [vmem:[#allocation6 + $0x7] sm:$0x1] %vm1586_vm5, %v1866_v51 }
 0x354   : > { %1767 = vst.msk [vmem:[#allocation7 + $0x4] sm:$0x1] %vm1586_vm5, %v1766_v15 }
 0x355   : > { %v2313_v13 = vpop.xlane.xlu1 %2312  ;;  %v1805_v43 = vpop.xlane.xlu0 %1804 }
 0x356   : > { %v2314_v53 = vadd.f32 %v2313_v13, %v2297_v61  ;;  %v1806_v22 = vadd.f32 %v1805_v43, %v1788_v47 }
 0x358   : > { %2315 = vst.msk [vmem:[#allocation8] sm:$0x1] %vm1586_vm5, %v2314_v53  ;;  %1807 = vst.msk [vmem:[#allocation7 + $0x5] sm:$0x1] %vm1586_vm5, %v1806_v22 }
 0x359   : > { %v1845_v23 = vpop.xlane.xlu0 %1844 }
 0x35a   : > { %v1846_v56 = vadd.f32 %v1845_v23, %v1828_v7 }
 0x35b   : > { %v2353_v44 = vpop.xlane.xlu1 %2352 }
 0x35c   : > { %v2354_v39 = vadd.f32 %v2353_v44, %v2337_v48  ;;  %1847 = vst.msk [vmem:[#allocation7 + $0x6] sm:$0x1] %vm1586_vm5, %v1846_v56 }
 0x35d   : > { %v1885_v1 = vpop.xlane.xlu0 %1884 }
 0x35e   : > { %2355 = vst.msk [vmem:[#allocation8 + $0x1] sm:$0x1] %vm1586_vm5, %v2354_v39  ;;  %v1886_v63 = vadd.f32 %v1885_v1, %v1868_v5 }
 0x360   : > { %v2393_v24 = vpop.xlane.xlu1 %2392  ;;  %1887 = vst.msk [vmem:[#allocation7 + $0x7] sm:$0x1] %vm1586_vm5, %v1886_v63 }
 0x361   : > { %v2394_v37 = vadd.f32 %v2393_v24, %v2377_v59  ;;  %v2333_v55 = vpop.xlane.xlu0 %2332 }
 0x362   : > { %v2334_v40 = vadd.f32 %v2333_v55, %v2316_v35 }
 0x363   : > { %2395 = vst.msk [vmem:[#allocation8 + $0x2] sm:$0x1] %vm1586_vm5, %v2394_v37 }
 0x364   : > { %2335 = vst.msk [vmem:[#allocation9] sm:$0x1] %vm1586_vm5, %v2334_v40 }
 0x365   : > { %v2433_v12 = vpop.xlane.xlu1 %2432 }
 0x366   : > { %v2434_v42 = vadd.f32 %v2433_v12, %v2417_v33  ;;  %v2373_v26 = vpop.xlane.xlu0 %2372 }
 0x367   : > { %v2374_v18 = vadd.f32 %v2373_v26, %v2356_v41 }
 0x368   : > { %2435 = vst.msk [vmem:[#allocation8 + $0x3] sm:$0x1] %vm1586_vm5, %v2434_v42 }
 0x369   : > { %2375 = vst.msk [vmem:[#allocation9 + $0x1] sm:$0x1] %vm1586_vm5, %v2374_v18 }
 0x36b   : > { %v2473_v9 = vpop.xlane.xlu1 %2472 }
 0x36c   : > { %v2474_v52 = vadd.f32 %v2473_v9, %v2457_v45  ;;  %v2413_v4 = vpop.xlane.xlu0 %2412 }
 0x36d   : > { %v2414_v54 = vadd.f32 %v2413_v4, %v2396_v46 }
 0x36e   : > { %2475 = vst.msk [vmem:[#allocation8 + $0x4] sm:$0x1] %vm1586_vm5, %v2474_v52 }
 0x36f   : > { %2415 = vst.msk [vmem:[#allocation9 + $0x2] sm:$0x1] %vm1586_vm5, %v2414_v54 }
 0x370   : > { %v2513_v31 = vpop.xlane.xlu1 %2512  ;;  %v2453_v16 = vpop.xlane.xlu0 %2452 }
 0x371   : > { %v2514_v0 = vadd.f32 %v2513_v31, %v2497_v3  ;;  %v2454_v10 = vadd.f32 %v2453_v16, %v2436_v57 }
 0x373   : > { %2515 = vst.msk [vmem:[#allocation8 + $0x5] sm:$0x1] %vm1586_vm5, %v2514_v0  ;;  %2455 = vst.msk [vmem:[#allocation9 + $0x3] sm:$0x1] %vm1586_vm5, %v2454_v10 }
 0x374   : > { %v2553_v2 = vpop.xlane.xlu1 %2552  ;;  %v2493_v14 = vpop.xlane.xlu0 %2492 }
 0x375   : > { %v2554_v29 = vadd.f32 %v2553_v2, %v2537_v30  ;;  %v2494_v8 = vadd.f32 %v2493_v14, %v2476_v50 }
 0x377   : > { %2555 = vst.msk [vmem:[#allocation8 + $0x6] sm:$0x1] %vm1586_vm5, %v2554_v29  ;;  %2495 = vst.msk [vmem:[#allocation9 + $0x4] sm:$0x1] %vm1586_vm5, %v2494_v8 }
 0x378   : > { %v1605_v11 = vpop.xlane.xlu1 %1604  ;;  %v2533_v49 = vpop.xlane.xlu0 %2532 }
 0x379   : > { %v1606_v25 = vadd.f32 %v1605_v11, %v1588_v58  ;;  %v2534_v21 = vadd.f32 %v2533_v49, %v2516_v27 }
 0x37b   : > { %1607 = vst.msk [vmem:[#allocation7] sm:$0x1] %vm1586_vm5, %v1606_v25  ;;  %2535 = vst.msk [vmem:[#allocation9 + $0x5] sm:$0x1] %vm1586_vm5, %v2534_v21 }
 0x37c   : > { %v2573_v38 = vpop.xlane.xlu0 %2572 }
 0x37d   : > { %v2574_v62 = vadd.f32 %v2573_v38, %v2556_v17 }
 0x37e   : > { %v2593_v28 = vpop.xlane.xlu1 %2592 }
 0x37f   : > { %v2594_v20 = vadd.f32 %v2593_v28, %v2577_v6  ;;  %2575 = vst.msk [vmem:[#allocation9 + $0x6] sm:$0x1] %vm1586_vm5, %v2574_v62 }
 0x380   : > { %v2613_v36 = vpop.xlane.xlu0 %2612 }
 0x381   : > { %2595 = vst.msk [vmem:[#allocation8 + $0x7] sm:$0x1] %vm1586_vm5, %v2594_v20  ;;  %v2614_v34 = vadd.f32 %v2613_v36, %v2596_v19 }
 0x383   : > { %2615 = vst.msk [vmem:[#allocation9 + $0x7] sm:$0x1] %vm1586_vm5, %v2614_v34 }
 0x384 PF: > { %v2626_v60 = vld [vmem:[#allocation4] sm:$0xf]  ;;  %v2619_v32 = vld [vmem:[#allocation3] sm:$0xf]  ;;  %s3460_s6 = smov 2   ;;  %s3461_s15 = smov 1  }
 0x385   : > { %2628 = vrot.lane.b32.xlu1 %v2626_v60, %s3460_s6  ;;  %2621 = vrot.lane.b32.xlu0 %v2619_v32, %s3461_s15  ;;  %vm2617_vm6 = vcmask 3072   ;;  %v2643_v15 = vld [vmem:[#allocation7] sm:$0xff]  ;;  %v2616_v61 = vld [vmem:[#allocation2] sm:$0xf]  ;;  %v2640_v47 = vld [vmem:[#allocation6] sm:$0xff]  ;;  %vm2641_vm7 = vcmask 7168  }
 0x386   : > { %s5118_s8 = sld [smem:[#allocation85_spill]]  ;;  %s5119_s13 = sld [smem:[#allocation86_spill]]  ;;  %v2633_v43 = vld [vmem:[#allocation5] sm:$0xf]  ;;  %vm2624_vm8 = vcmask 11272   ;;  %vm2631_vm9 = vcmask 19472  }
 0x387   : > { %s3462_s23 = smov 3   ;;  %vm2648_vm10 = vcmask 15368   ;;  %vm2655_vm11 = vcmask 23568   ;;  %vm2662_vm12 = vcmask 31768   ;;  %vm2638_vm13 = vcmask 27672  }
 0x388   : > { %v2650_v51 = vld [vmem:[#allocation8] sm:$0xff] }
 0x389   : > { %2652 = vrot.lane.b32.xlu1 %v2650_v51, %s3460_s6  ;;  %2645 = vrot.lane.b32.xlu0 %v2643_v15, %s3461_s15 }
 0x38a   : > { %v2657_v13 = vld [vmem:[#allocation9] sm:$0xff] }
 0x38c   : > { %2618 = vst.msk [vmem:[%s5118_s8] sm:$0xf] %vm2617_vm6, %v2616_v61 }
 0x38d   : > { %2642 = vst.msk [vmem:[%s5119_s13] sm:$0xff] %vm2641_vm7, %v2640_v47  ;;  %2659 = vrot.lane.b32.xlu1 %v2657_v13, %s3462_s23  ;;  %2635 = vrot.lane.b32.xlu0 %v2633_v43, %s3462_s23 }
 0x3f7   : > { %v2629_v53 = vpop.permute.xlu1 %2628  ;;  %v2622_v22 = vpop.permute.xlu0 %2621 }
 0x3f8   : > { %2625 = vst.msk [vmem:[%s5118_s8] sm:$0xf] %vm2624_vm8, %v2622_v22 }
 0x3f9   : > { %2632 = vst.msk [vmem:[%s5118_s8] sm:$0xf] %vm2631_vm9, %v2629_v53 }
 0x3fb   : > { %v2653_v48 = vpop.permute.xlu1 %2652  ;;  %v2646_v7 = vpop.permute.xlu0 %2645 }
 0x3fc   : > { %2649 = vst.msk [vmem:[%s5119_s13] sm:$0xff] %vm2648_vm10, %v2646_v7 }
 0x3fd   : > { %2656 = vst.msk [vmem:[%s5119_s13] sm:$0xff] %vm2655_vm11, %v2653_v48 }
 0x3ff   : > { %v2660_v44 = vpop.permute.xlu1 %2659  ;;  %v2636_v23 = vpop.permute.xlu0 %2635 }
 0x400   : > { %2663 = vst.msk [vmem:[%s5119_s13] sm:$0xff] %vm2662_vm12, %v2660_v44 }
 0x401   : > { %2639 = vst.msk [vmem:[%s5118_s8] sm:$0xf] %vm2638_vm13, %v2636_v23 }
 0x402 PF: > { %s5120_s2 = sld [smem:[#allocation39_spill]]  ;;  %s5121_s21 = sld [smem:[#allocation37_spill]] }
 0x403   : > { %s5122_s22 = sld [smem:[#allocation38_spill]]  ;;  %s5123_s23 = sld [smem:[#allocation40_spill]] }
 0x404   : > { %s5124_s24 = sld [smem:[#allocation41_spill]] }
 0x408   : > { %s31_s25 = sadd.s32 1, %s5120_s2  }
 0x409   : > { %p28_p10 = scmp.ge.s32.totalorder %s31_s25, 6  }
 0x40b   :  { %30 = sbr.rel (!%p28_p10) target bundleno = 24 (0x18), region = 155 }
 0x412   :  { %2681 = vsyncpa [#allocation11], 1 }
 0x413   :  { %2683 = vsyncpa [#allocation11 + $0x1], 1 }
 0x414   :  { %2684 = vsyncpa [#allocation15], 1 }
 0x415   :  { %2685 = vsyncpa [#allocation12], 1 }
 0x416   :  { %2687 = vsyncpa [#allocation12 + $0x1], 1 }
 0x417   :  { %2688 = vsyncpa [#allocation21], 1 }
 0x418   :  { %2689 = vsyncpa [#allocation24], 1 }
 0x419   :  { %2690 = vsyncpa [#allocation27], 1 }
 0x41a   :  { %2691 = vsyncpa [#allocation13], 1 }
 0x41b   :  { %2693 = vsyncpa [#allocation13 + $0x1], 1 }
 0x41c   :  { %2694 = vsyncpa [#allocation18], 1 }

</bundles_post_ra>
